<compile_context>
chip_gen: v5e
topology: v5e:2x2
jax: 0.10.0
libtpu: 0.0.40
codegen_flags: <defaults>
</compile_context>

<pallas_src>
import functools

import jax
import jax.numpy as jnp
from jax import lax
from jax.experimental import pallas as pl
from jax.experimental.pallas import tpu as pltpu


# conv1 produces 28 ho x 32 wo = 896 rows per image (wo >= 28 is finite
# wrap-around garbage), processed in 7 chunks of 128 rows (4 ho each).
_CONV1_ROWS = 896
_CHUNK = 128
_N_CHUNKS = _CONV1_ROWS // _CHUNK      # 7
_P1_ROWS = 232                         # 14*16 pooled rows + 8 finite pad rows
_CONV2_ROWS = 160                      # 10 ho x 16 wo (wo >= 10 is garbage)


# ------------------------------ fused kernel --------------------------------
def _fused_cnn_kernel(x_ref, w1_ref, b1_ref, w2_ref, b2_ref, w3_ref, b3_ref,
                      w4_ref, b4_ref, o_ref, hp_ref, p1_ref, h2_ref, p2_ref):
    f32 = jnp.float32
    bb = x_ref.shape[0]                # images per grid step

    # p1 pad rows: only ever read by wrap-around garbage columns; keep finite.
    p1_ref[224:232, :] = jnp.zeros((8, 32), f32)

    def per_image(b, carry):
        # ---- conv1 (5x5, 3->32) + ReLU + 2x2 max-pool, fused ----------------
        # Wrapper packed x15[r, j*3+c] = x[r+j, c], so vertical tap i over all
        # output columns of a 128-row chunk is ONE contiguous K=15 row slice.
        for c in range(_N_CHUNKS):
            r0 = c * _CHUNK
            acc = jnp.dot(x_ref[b, pl.ds(r0, _CHUNK), :], w1_ref[0],
                          preferred_element_type=f32) + b1_ref[...]
            for i in range(1, 5):
                acc = acc + jnp.dot(x_ref[b, pl.ds(r0 + i * 32, _CHUNK), :],
                                    w1_ref[i], preferred_element_type=f32)
            a = jnp.maximum(acc, 0.0)                    # (128,32): 4 ho x 32 wo
            # H pair: free sublane-group reshape.  W pair: stride-2 sublane reads.
            hp_ref[...] = jnp.max(a.reshape(2, 2, 32, 32), axis=1).reshape(64, 32)
            p1_ref[pl.ds(c * 32, 32), :] = jnp.maximum(
                hp_ref[pl.ds(0, 32, 2), :], hp_ref[pl.ds(1, 32, 2), :])

        # ---- conv2 (5x5, 32->64) + ReLU + 2x2 max-pool, fused ---------------
        acc2 = jnp.dot(p1_ref[pl.ds(0, _CONV2_ROWS), :], w2_ref[0],
                       preferred_element_type=f32) + b2_ref[...]
        for t in range(1, 25):
            i, j = divmod(t, 5)
            acc2 = acc2 + jnp.dot(p1_ref[pl.ds(i * 16 + j, _CONV2_ROWS), :],
                                  w2_ref[t], preferred_element_type=f32)
        a2 = jnp.maximum(acc2, 0.0)                      # (160,64): 10 ho x 16 wo
        h2_ref[...] = jnp.max(a2.reshape(5, 2, 16, 64), axis=1).reshape(80, 64)
        pooled2 = jnp.maximum(h2_ref[pl.ds(0, 40, 2), :],
                              h2_ref[pl.ds(1, 40, 2), :])   # (40,64): hp*8+wp
        p2_ref[pl.ds(pl.multiple_of(b * 40, 8), 40), :] = pooled2
        return carry

    lax.fori_loop(0, bb, per_image, 0)

    # ---- fc1 (64*5*5 -> 64) + ReLU, batched over the bb images (M = bb) -----
    # One (bb,64)x(64,64) MXU block per valid spatial position; fc1 weights are
    # pre-packed in the same (h, w, c) order, so no in-kernel flatten is needed.
    h = jnp.dot(p2_ref[pl.ds(0, bb, 40), :], w3_ref[0],
                preferred_element_type=jnp.float32) + b3_ref[...]
    for t in range(1, 25):
        hh, ww = divmod(t, 5)
        h = h + jnp.dot(p2_ref[pl.ds(hh * 8 + ww, bb, 40), :], w3_ref[t],
                        preferred_element_type=jnp.float32)
    h = jnp.maximum(h, 0.0)

    # ---- fc (64 -> n_classes), lane/sublane-dense (bb, 128) store -----------
    o_ref[...] = (jnp.dot(h, w4_ref[...], preferred_element_type=jnp.float32)
                  + b4_ref[...])


def _fused_forward(x15, w1, b1, w2, b2, w3, b3, w4, b4, *, block_b):
    """x15: (Bp, 1024, 15) K=15-packed flattened NHWC images.  -> (Bp, 128)."""
    bp = x15.shape[0]
    assert bp % block_b == 0
    n_flops = bp * (2 * _CONV1_ROWS * 15 * 32 * 5       # conv1
                    + 2 * _CONV2_ROWS * 32 * 64 * 25    # conv2
                    + 2 * 25 * 64 * 64                  # fc1
                    + 2 * 64 * 128)                     # fc
    n_bytes = 4 * (x15.size + w1.size + b1.size + w2.size + b2.size
                   + w3.size + b3.size + w4.size + b4.size + bp * 128)
    return pl.pallas_call(
        _fused_cnn_kernel,
        out_shape=jax.ShapeDtypeStruct((bp, 128), jnp.float32),
        grid_spec=pltpu.PrefetchScalarGridSpec(
            num_scalar_prefetch=0,
            grid=(bp // block_b,),
            in_specs=[
                pl.BlockSpec((block_b, 1024, 15), lambda g: (g, 0, 0)),  # images
                pl.BlockSpec((5, 15, 32), lambda g: (0, 0, 0)),          # conv1 w
                pl.BlockSpec((1, 32), lambda g: (0, 0)),                 # conv1 b
                pl.BlockSpec((25, 32, 64), lambda g: (0, 0, 0)),         # conv2 w
                pl.BlockSpec((1, 64), lambda g: (0, 0)),                 # conv2 b
                pl.BlockSpec((25, 64, 64), lambda g: (0, 0, 0)),         # fc1 w
                pl.BlockSpec((1, 64), lambda g: (0, 0)),                 # fc1 b
                pl.BlockSpec((64, 128), lambda g: (0, 0)),               # fc w (pad)
                pl.BlockSpec((1, 128), lambda g: (0, 0)),                # fc b (pad)
            ],
            out_specs=pl.BlockSpec((block_b, 128), lambda g: (g, 0)),
            scratch_shapes=[
                pltpu.VMEM((64, 32), jnp.float32),            # conv1 chunk H-pool
                pltpu.VMEM((_P1_ROWS, 32), jnp.float32),      # pooled conv1 (+pad)
                pltpu.VMEM((80, 64), jnp.float32),            # conv2 H-pool
                pltpu.VMEM((block_b * 40, 64), jnp.float32),  # pooled conv2, batched
            ],
        ),
        compiler_params=pltpu.CompilerParams(
            dimension_semantics=("parallel",),
            vmem_limit_bytes=32 * 1024 * 1024),
        cost_estimate=pl.CostEstimate(flops=n_flops, transcendentals=0,
                                      bytes_accessed=n_bytes),
    )(x15, w1, b1, w2, b2, w3, b3, w4, b4)


# ------------------------- params: init + packing ---------------------------
def init_params(key, n_classes=10):
    """Torch-layout parameters (same init ranges as torch defaults)."""
    ks = jax.random.split(key, 8)

    def u(k, shape, fan_in):
        bound = 1.0 / jnp.sqrt(jnp.float32(fan_in))
        return jax.random.uniform(k, shape, jnp.float32, -bound, bound)

    return {
        "conv1_w": u(ks[0], (32, 3, 5, 5), 3 * 25),
        "conv1_b": u(ks[1], (32,), 3 * 25),
        "conv2_w": u(ks[2], (64, 32, 5, 5), 32 * 25),
        "conv2_b": u(ks[3], (64,), 32 * 25),
        "fc1_w": u(ks[4], (64, 64 * 5 * 5), 64 * 5 * 5),   # torch Linear: (out, in)
        "fc1_b": u(ks[5], (64,), 64 * 5 * 5),
        "fc_w": u(ks[6], (n_classes, 64), 64),
        "fc_b": u(ks[7], (n_classes,), 64),
    }


def pack_params(p):
    """One-time repack of torch-layout params into kernel layouts (hoisted out
    of the jitted forward, so no per-step weight transposes)."""
    n_classes = p["fc_w"].shape[0]
    assert n_classes <= 128, "fc output padded to 128 lanes"
    # conv1: w1p[i, j*3+c, cout]  (matches the wrapper's K=15 input packing).
    w1p = jnp.transpose(p["conv1_w"], (2, 3, 1, 0)).reshape(5, 15, 32)
    # conv2: w2p[i*5+j, cin, cout]
    w2p = jnp.transpose(p["conv2_w"], (2, 3, 1, 0)).reshape(25, 32, 64)
    # fc1: torch flatten order is (c, h, w); re-pack rows into the kernel's
    # (h, w, c) order as (25, 64, 64) blocks: w3p[h*5+w, c, n].
    w3p = jnp.transpose(p["fc1_w"].reshape(64, 64, 5, 5), (2, 3, 1, 0)).reshape(25, 64, 64)
    w4p = jnp.zeros((64, 128), jnp.float32).at[:, :n_classes].set(p["fc_w"].T)
    b4p = jnp.zeros((1, 128), jnp.float32).at[:, :n_classes].set(p["fc_b"][None, :])
    return {
        "w1": w1p, "b1": p["conv1_b"].reshape(1, 32),
        "w2": w2p, "b2": p["conv2_b"].reshape(1, 64),
        "w3": w3p, "b3": p["fc1_b"].reshape(1, 64),
        "w4": w4p, "b4": b4p,
    }


# ------------------------------ model forward -------------------------------
@functools.partial(jax.jit, static_argnames=("n_classes", "block_b"))
def simple_cnn_forward(packed, x_nchw, n_classes=10, block_b=8):
    B, C, H, W = x_nchw.shape
    assert (C, H, W) == (3, 32, 32), "SimpleCNN geometry requires 3x32x32 input"
    bb = min(block_b, B)
    bp = ((B + bb - 1) // bb) * bb                               # pad batch
    x = jnp.transpose(x_nchw, (0, 2, 3, 1)).astype(jnp.float32)  # NCHW -> NHWC
    xf = x.reshape(B, H * W, C)
    xf = jnp.pad(xf, ((0, bp - B), (0, 4), (0, 0)))              # (bp, 1028, 3)
    # K=15 horizontal-tap packing: x15[b, r, j*3+c] = x[b, r+j, c].
    x15 = jnp.concatenate([xf[:, j:j + 1024, :] for j in range(5)], axis=-1)
    out = _fused_forward(x15, packed["w1"], packed["b1"], packed["w2"],
                         packed["b2"], packed["w3"], packed["b3"],
                         packed["w4"], packed["b4"], block_b=bb)
    return out[:B, :n_classes]


# --------------------------- pure-JAX reference -----------------------------
def _reference_forward(params, x):
    dn = ("NCHW", "OIHW", "NCHW")
    prec = jax.lax.Precision.HIGHEST
    out = jax.lax.conv_general_dilated(x, params["conv1_w"], (1, 1), "VALID",
                                       dimension_numbers=dn, precision=prec)
    out = jax.nn.relu(out + params["conv1_b"][None, :, None, None])
    out = jax.lax.reduce_window(out, -jnp.inf, jax.lax.max,
                                (1, 1, 2, 2), (1, 1, 2, 2), "VALID")
    out = jax.lax.conv_general_dilated(out, params["conv2_w"], (1, 1), "VALID",
                                       dimension_numbers=dn, precision=prec)
    out = jax.nn.relu(out + params["conv2_b"][None, :, None, None])
    out = jax.lax.reduce_window(out, -jnp.inf, jax.lax.max,
                                (1, 1, 2, 2), (1, 1, 2, 2), "VALID")
    flat = out.reshape(out.shape[0], -1)                 # (B, 1600), (C,H,W) order
    h = jax.nn.relu(jnp.dot(flat, params["fc1_w"].T, precision=prec)
                    + params["fc1_b"])
    return jnp.dot(h, params["fc_w"].T, precision=prec) + params["fc_b"]


if __name__ == "__main__":
    key = jax.random.PRNGKey(0)
    pkey, xkey, xkey2 = jax.random.split(key, 3)
    params = init_params(pkey, n_classes=10)
    packed = pack_params(params)                 # one-time, outside the jit

    # Small batch (block clamps to 2, single grid step).
    x = jax.random.normal(xkey, (2, 3, 32, 32), dtype=jnp.float32)
    logits = simple_cnn_forward(packed, x)
    jax.block_until_ready(logits)
    assert logits.shape == (2, 10), logits.shape
    ref = _reference_forward(params, x)
    err = float(jnp.max(jnp.abs(logits - ref)))
    assert err < 1e-3, f"max |kernel - reference| = {err}"

    # Larger batch: exercises the batched grid block (block_b=8), batch padding
    # to a multiple of 8, and a multi-step parallel grid.
    x2 = jax.random.normal(xkey2, (12, 3, 32, 32), dtype=jnp.float32)
    logits2 = simple_cnn_forward(packed, x2)
    jax.block_until_ready(logits2)
    assert logits2.shape == (12, 10), logits2.shape
    ref2 = _reference_forward(params, x2)
    err2 = float(jnp.max(jnp.abs(logits2 - ref2)))
    assert err2 < 1e-3, f"max |kernel - reference| = {err2}"

    print("KERNEL_OK")
</pallas_src>

<mosaic_0001>
module attributes {stable_mosaic.version = 11 : i64} {
  func.func @_fused_cnn_kernel(%arg0: i32, %arg1: memref<2x1024x15xf32, #tpu.memory_space<vmem>>, %arg2: memref<5x15x32xf32, #tpu.memory_space<vmem>>, %arg3: memref<1x32xf32, #tpu.memory_space<vmem>>, %arg4: memref<25x32x64xf32, #tpu.memory_space<vmem>>, %arg5: memref<1x64xf32, #tpu.memory_space<vmem>>, %arg6: memref<25x64x64xf32, #tpu.memory_space<vmem>>, %arg7: memref<1x64xf32, #tpu.memory_space<vmem>>, %arg8: memref<64x128xf32, #tpu.memory_space<vmem>>, %arg9: memref<1x128xf32, #tpu.memory_space<vmem>>, %arg10: memref<2x128xf32, #tpu.memory_space<vmem>>, %arg11: memref<64x32xf32, #tpu.memory_space<vmem>>, %arg12: memref<232x32xf32, #tpu.memory_space<vmem>>, %arg13: memref<80x64xf32, #tpu.memory_space<vmem>>, %arg14: memref<80x64xf32, #tpu.memory_space<vmem>>) attributes {dimension_semantics = [#tpu.dimension_semantics<parallel>], iteration_bounds = array<i64: 1>, scalar_prefetch = 0 : i64, scratch_operands = 4 : i64, tpu.core_type = #tpu.core_type<tc>, window_params = [{transform_indices = @transform_0, window_bounds = array<i64: 2, 1024, 15>}, {pipeline_mode = #tpu.pipeline_mode<synchronous>, transform_indices = @transform_1, window_bounds = array<i64: 5, 15, 32>}, {pipeline_mode = #tpu.pipeline_mode<synchronous>, transform_indices = @transform_2, window_bounds = array<i64: 1, 32>}, {pipeline_mode = #tpu.pipeline_mode<synchronous>, transform_indices = @transform_3, window_bounds = array<i64: 25, 32, 64>}, {pipeline_mode = #tpu.pipeline_mode<synchronous>, transform_indices = @transform_4, window_bounds = array<i64: 1, 64>}, {pipeline_mode = #tpu.pipeline_mode<synchronous>, transform_indices = @transform_5, window_bounds = array<i64: 25, 64, 64>}, {pipeline_mode = #tpu.pipeline_mode<synchronous>, transform_indices = @transform_6, window_bounds = array<i64: 1, 64>}, {pipeline_mode = #tpu.pipeline_mode<synchronous>, transform_indices = @transform_7, window_bounds = array<i64: 64, 128>}, {pipeline_mode = #tpu.pipeline_mode<synchronous>, transform_indices = @transform_8, window_bounds = array<i64: 1, 128>}, {transform_indices = @transform_9, window_bounds = array<i64: 2, 128>}]} {
    %cst = arith.constant 0.000000e+00 : f32
    %0 = vector.broadcast %cst : f32 to vector<8x32xf32>
    %c224 = arith.constant 224 : index
    %c0 = arith.constant 0 : index
    %1 = vector.load %arg12[%c224, %c0] : memref<232x32xf32, #tpu.memory_space<vmem>>, vector<8x32xf32>
    tpu.vector_store %arg12[%c224, %c0], %0 {strides = array<i32>} : memref<232x32xf32, #tpu.memory_space<vmem>>, vector<8x32xf32>,
    %c0_i32 = arith.constant 0 : i32
    %c2_i32 = arith.constant 2 : i32
    %2 = arith.addi %c0_i32, %c2_i32 : i32
    %c1_i32 = arith.constant 1 : i32
    scf.for %arg15 = %c0_i32 to %2 step %c1_i32  : i32 {
      %138 = arith.index_cast %arg15 : i32 to index
      %c0_128 = arith.constant 0 : index
      %c0_129 = arith.constant 0 : index
      %139 = vector.load %arg1[%138, %c0_128, %c0_129] : memref<2x1024x15xf32, #tpu.memory_space<vmem>>, vector<1x128x15xf32>
      %140 = vector.shape_cast %139 : vector<1x128x15xf32> to vector<128x15xf32>
      %c0_130 = arith.constant 0 : index
      %c0_131 = arith.constant 0 : index
      %c0_132 = arith.constant 0 : index
      %141 = vector.load %arg2[%c0_130, %c0_131, %c0_132] : memref<5x15x32xf32, #tpu.memory_space<vmem>>, vector<1x15x32xf32>
      %142 = vector.shape_cast %141 : vector<1x15x32xf32> to vector<15x32xf32>
      %cst_133 = arith.constant dense<0.000000e+00> : vector<128x32xf32>
      %143 = tpu.matmul %140, %142, %cst_133 {dimension_numbers = #tpu.dot_dimension_numbers<[1], [0], [0], [1], [0, 0, 1, 1], [], []>} : vector<128x15xf32>, vector<15x32xf32>, vector<128x32xf32> -> vector<128x32xf32>
      %c0_134 = arith.constant 0 : index
      %c0_135 = arith.constant 0 : index
      %144 = vector.load %arg3[%c0_134, %c0_135] : memref<1x32xf32, #tpu.memory_space<vmem>>, vector<1x32xf32>
      %145 = vector.broadcast %144 : vector<1x32xf32> to vector<128x32xf32>
      %146 = arith.addf %143, %145 : vector<128x32xf32>
      %147 = arith.index_cast %arg15 : i32 to index
      %c32_136 = arith.constant 32 : index
      %c0_137 = arith.constant 0 : index
      %148 = vector.load %arg1[%147, %c32_136, %c0_137] : memref<2x1024x15xf32, #tpu.memory_space<vmem>>, vector<1x128x15xf32>
      %149 = vector.shape_cast %148 : vector<1x128x15xf32> to vector<128x15xf32>
      %c1_138 = arith.constant 1 : index
      %c0_139 = arith.constant 0 : index
      %c0_140 = arith.constant 0 : index
      %150 = vector.load %arg2[%c1_138, %c0_139, %c0_140] : memref<5x15x32xf32, #tpu.memory_space<vmem>>, vector<1x15x32xf32>
      %151 = vector.shape_cast %150 : vector<1x15x32xf32> to vector<15x32xf32>
      %cst_141 = arith.constant dense<0.000000e+00> : vector<128x32xf32>
      %152 = tpu.matmul %149, %151, %cst_141 {dimension_numbers = #tpu.dot_dimension_numbers<[1], [0], [0], [1], [0, 0, 1, 1], [], []>} : vector<128x15xf32>, vector<15x32xf32>, vector<128x32xf32> -> vector<128x32xf32>
      %153 = arith.addf %146, %152 : vector<128x32xf32>
      %154 = arith.index_cast %arg15 : i32 to index
      %c64 = arith.constant 64 : index
      %c0_142 = arith.constant 0 : index
      %155 = vector.load %arg1[%154, %c64, %c0_142] : memref<2x1024x15xf32, #tpu.memory_space<vmem>>, vector<1x128x15xf32>
      %156 = vector.shape_cast %155 : vector<1x128x15xf32> to vector<128x15xf32>
      %c2_143 = arith.constant 2 : index
      %c0_144 = arith.constant 0 : index
      %c0_145 = arith.constant 0 : index
      %157 = vector.load %arg2[%c2_143, %c0_144, %c0_145] : memref<5x15x32xf32, #tpu.memory_space<vmem>>, vector<1x15x32xf32>
      %158 = vector.shape_cast %157 : vector<1x15x32xf32> to vector<15x32xf32>
      %cst_146 = arith.constant dense<0.000000e+00> : vector<128x32xf32>
      %159 = tpu.matmul %156, %158, %cst_146 {dimension_numbers = #tpu.dot_dimension_numbers<[1], [0], [0], [1], [0, 0, 1, 1], [], []>} : vector<128x15xf32>, vector<15x32xf32>, vector<128x32xf32> -> vector<128x32xf32>
      %160 = arith.addf %153, %159 : vector<128x32xf32>
      %161 = arith.index_cast %arg15 : i32 to index
      %c96 = arith.constant 96 : index
      %c0_147 = arith.constant 0 : index
      %162 = vector.load %arg1[%161, %c96, %c0_147] : memref<2x1024x15xf32, #tpu.memory_space<vmem>>, vector<1x128x15xf32>
      %163 = vector.shape_cast %162 : vector<1x128x15xf32> to vector<128x15xf32>
      %c3_148 = arith.constant 3 : index
      %c0_149 = arith.constant 0 : index
      %c0_150 = arith.constant 0 : index
      %164 = vector.load %arg2[%c3_148, %c0_149, %c0_150] : memref<5x15x32xf32, #tpu.memory_space<vmem>>, vector<1x15x32xf32>
      %165 = vector.shape_cast %164 : vector<1x15x32xf32> to vector<15x32xf32>
      %cst_151 = arith.constant dense<0.000000e+00> : vector<128x32xf32>
      %166 = tpu.matmul %163, %165, %cst_151 {dimension_numbers = #tpu.dot_dimension_numbers<[1], [0], [0], [1], [0, 0, 1, 1], [], []>} : vector<128x15xf32>, vector<15x32xf32>, vector<128x32xf32> -> vector<128x32xf32>
      %167 = arith.addf %160, %166 : vector<128x32xf32>
      %168 = arith.index_cast %arg15 : i32 to index
      %c128 = arith.constant 128 : index
      %c0_152 = arith.constant 0 : index
      %169 = vector.load %arg1[%168, %c128, %c0_152] : memref<2x1024x15xf32, #tpu.memory_space<vmem>>, vector<1x128x15xf32>
      %170 = vector.shape_cast %169 : vector<1x128x15xf32> to vector<128x15xf32>
      %c4_153 = arith.constant 4 : index
      %c0_154 = arith.constant 0 : index
      %c0_155 = arith.constant 0 : index
      %171 = vector.load %arg2[%c4_153, %c0_154, %c0_155] : memref<5x15x32xf32, #tpu.memory_space<vmem>>, vector<1x15x32xf32>
      %172 = vector.shape_cast %171 : vector<1x15x32xf32> to vector<15x32xf32>
      %cst_156 = arith.constant dense<0.000000e+00> : vector<128x32xf32>
      %173 = tpu.matmul %170, %172, %cst_156 {dimension_numbers = #tpu.dot_dimension_numbers<[1], [0], [0], [1], [0, 0, 1, 1], [], []>} : vector<128x15xf32>, vector<15x32xf32>, vector<128x32xf32> -> vector<128x32xf32>
      %174 = arith.addf %167, %173 : vector<128x32xf32>
      %cst_157 = arith.constant 0.000000e+00 : f32
      %175 = vector.broadcast %cst_157 : f32 to vector<128x32xf32>
      %176 = arith.maximumf %174, %175 : vector<128x32xf32>
      %177 = vector.shape_cast %176 : vector<128x32xf32> to vector<2x2x32x32xf32>
      %cst_158 = arith.constant dense<0xFF800000> : vector<2x32x32xf32>
      %178 = vector.multi_reduction <maximumf>, %177, %cst_158 [1] : vector<2x2x32x32xf32> to vector<2x32x32xf32>
      %179 = vector.shape_cast %178 : vector<2x32x32xf32> to vector<64x32xf32>
      %c0_159 = arith.constant 0 : index
      %c0_160 = arith.constant 0 : index
      %180 = vector.load %arg11[%c0_159, %c0_160] : memref<64x32xf32, #tpu.memory_space<vmem>>, vector<64x32xf32>
      tpu.vector_store %arg11[%c0_159, %c0_160], %179 {strides = array<i32>} : memref<64x32xf32, #tpu.memory_space<vmem>>, vector<64x32xf32>,
      %c0_161 = arith.constant 0 : index
      %c0_162 = arith.constant 0 : index
      %181 = tpu.strided_load %arg11[%c0_161, %c0_162] {strides = array<i32: 2, 1>} : memref<64x32xf32, #tpu.memory_space<vmem>>, vector<32x32xf32>
      %c1_163 = arith.constant 1 : index
      %c0_164 = arith.constant 0 : index
      %182 = tpu.strided_load %arg11[%c1_163, %c0_164] {strides = array<i32: 2, 1>} : memref<64x32xf32, #tpu.memory_space<vmem>>, vector<32x32xf32>
      %183 = arith.maximumf %181, %182 : vector<32x32xf32>
      %c0_165 = arith.constant 0 : index
      %c0_166 = arith.constant 0 : index
      %184 = vector.load %arg12[%c0_165, %c0_166] : memref<232x32xf32, #tpu.memory_space<vmem>>, vector<32x32xf32>
      tpu.vector_store %arg12[%c0_165, %c0_166], %183 {strides = array<i32>} : memref<232x32xf32, #tpu.memory_space<vmem>>, vector<32x32xf32>,
      %185 = arith.index_cast %arg15 : i32 to index
      %c128_167 = arith.constant 128 : index
      %c0_168 = arith.constant 0 : index
      %186 = vector.load %arg1[%185, %c128_167, %c0_168] : memref<2x1024x15xf32, #tpu.memory_space<vmem>>, vector<1x128x15xf32>
      %187 = vector.shape_cast %186 : vector<1x128x15xf32> to vector<128x15xf32>
      %c0_169 = arith.constant 0 : index
      %c0_170 = arith.constant 0 : index
      %c0_171 = arith.constant 0 : index
      %188 = vector.load %arg2[%c0_169, %c0_170, %c0_171] : memref<5x15x32xf32, #tpu.memory_space<vmem>>, vector<1x15x32xf32>
      %189 = vector.shape_cast %188 : vector<1x15x32xf32> to vector<15x32xf32>
      %cst_172 = arith.constant dense<0.000000e+00> : vector<128x32xf32>
      %190 = tpu.matmul %187, %189, %cst_172 {dimension_numbers = #tpu.dot_dimension_numbers<[1], [0], [0], [1], [0, 0, 1, 1], [], []>} : vector<128x15xf32>, vector<15x32xf32>, vector<128x32xf32> -> vector<128x32xf32>
      %c0_173 = arith.constant 0 : index
      %c0_174 = arith.constant 0 : index
      %191 = vector.load %arg3[%c0_173, %c0_174] : memref<1x32xf32, #tpu.memory_space<vmem>>, vector<1x32xf32>
      %192 = vector.broadcast %191 : vector<1x32xf32> to vector<128x32xf32>
      %193 = arith.addf %190, %192 : vector<128x32xf32>
      %194 = arith.index_cast %arg15 : i32 to index
      %c160 = arith.constant 160 : index
      %c0_175 = arith.constant 0 : index
      %195 = vector.load %arg1[%194, %c160, %c0_175] : memref<2x1024x15xf32, #tpu.memory_space<vmem>>, vector<1x128x15xf32>
      %196 = vector.shape_cast %195 : vector<1x128x15xf32> to vector<128x15xf32>
      %c1_176 = arith.constant 1 : index
      %c0_177 = arith.constant 0 : index
      %c0_178 = arith.constant 0 : index
      %197 = vector.load %arg2[%c1_176, %c0_177, %c0_178] : memref<5x15x32xf32, #tpu.memory_space<vmem>>, vector<1x15x32xf32>
      %198 = vector.shape_cast %197 : vector<1x15x32xf32> to vector<15x32xf32>
      %cst_179 = arith.constant dense<0.000000e+00> : vector<128x32xf32>
      %199 = tpu.matmul %196, %198, %cst_179 {dimension_numbers = #tpu.dot_dimension_numbers<[1], [0], [0], [1], [0, 0, 1, 1], [], []>} : vector<128x15xf32>, vector<15x32xf32>, vector<128x32xf32> -> vector<128x32xf32>
      %200 = arith.addf %193, %199 : vector<128x32xf32>
      %201 = arith.index_cast %arg15 : i32 to index
      %c192 = arith.constant 192 : index
      %c0_180 = arith.constant 0 : index
      %202 = vector.load %arg1[%201, %c192, %c0_180] : memref<2x1024x15xf32, #tpu.memory_space<vmem>>, vector<1x128x15xf32>
      %203 = vector.shape_cast %202 : vector<1x128x15xf32> to vector<128x15xf32>
      %c2_181 = arith.constant 2 : index
      %c0_182 = arith.constant 0 : index
      %c0_183 = arith.constant 0 : index
      %204 = vector.load %arg2[%c2_181, %c0_182, %c0_183] : memref<5x15x32xf32, #tpu.memory_space<vmem>>, vector<1x15x32xf32>
      %205 = vector.shape_cast %204 : vector<1x15x32xf32> to vector<15x32xf32>
      %cst_184 = arith.constant dense<0.000000e+00> : vector<128x32xf32>
      %206 = tpu.matmul %203, %205, %cst_184 {dimension_numbers = #tpu.dot_dimension_numbers<[1], [0], [0], [1], [0, 0, 1, 1], [], []>} : vector<128x15xf32>, vector<15x32xf32>, vector<128x32xf32> -> vector<128x32xf32>
      %207 = arith.addf %200, %206 : vector<128x32xf32>
      %208 = arith.index_cast %arg15 : i32 to index
      %c224_185 = arith.constant 224 : index
      %c0_186 = arith.constant 0 : index
      %209 = vector.load %arg1[%208, %c224_185, %c0_186] : memref<2x1024x15xf32, #tpu.memory_space<vmem>>, vector<1x128x15xf32>
      %210 = vector.shape_cast %209 : vector<1x128x15xf32> to vector<128x15xf32>
      %c3_187 = arith.constant 3 : index
      %c0_188 = arith.constant 0 : index
      %c0_189 = arith.constant 0 : index
      %211 = vector.load %arg2[%c3_187, %c0_188, %c0_189] : memref<5x15x32xf32, #tpu.memory_space<vmem>>, vector<1x15x32xf32>
      %212 = vector.shape_cast %211 : vector<1x15x32xf32> to vector<15x32xf32>
      %cst_190 = arith.constant dense<0.000000e+00> : vector<128x32xf32>
      %213 = tpu.matmul %210, %212, %cst_190 {dimension_numbers = #tpu.dot_dimension_numbers<[1], [0], [0], [1], [0, 0, 1, 1], [], []>} : vector<128x15xf32>, vector<15x32xf32>, vector<128x32xf32> -> vector<128x32xf32>
      %214 = arith.addf %207, %213 : vector<128x32xf32>
      %215 = arith.index_cast %arg15 : i32 to index
      %c256 = arith.constant 256 : index
      %c0_191 = arith.constant 0 : index
      %216 = vector.load %arg1[%215, %c256, %c0_191] : memref<2x1024x15xf32, #tpu.memory_space<vmem>>, vector<1x128x15xf32>
      %217 = vector.shape_cast %216 : vector<1x128x15xf32> to vector<128x15xf32>
      %c4_192 = arith.constant 4 : index
      %c0_193 = arith.constant 0 : index
      %c0_194 = arith.constant 0 : index
      %218 = vector.load %arg2[%c4_192, %c0_193, %c0_194] : memref<5x15x32xf32, #tpu.memory_space<vmem>>, vector<1x15x32xf32>
      %219 = vector.shape_cast %218 : vector<1x15x32xf32> to vector<15x32xf32>
      %cst_195 = arith.constant dense<0.000000e+00> : vector<128x32xf32>
      %220 = tpu.matmul %217, %219, %cst_195 {dimension_numbers = #tpu.dot_dimension_numbers<[1], [0], [0], [1], [0, 0, 1, 1], [], []>} : vector<128x15xf32>, vector<15x32xf32>, vector<128x32xf32> -> vector<128x32xf32>
      %221 = arith.addf %214, %220 : vector<128x32xf32>
      %cst_196 = arith.constant 0.000000e+00 : f32
      %222 = vector.broadcast %cst_196 : f32 to vector<128x32xf32>
      %223 = arith.maximumf %221, %222 : vector<128x32xf32>
      %224 = vector.shape_cast %223 : vector<128x32xf32> to vector<2x2x32x32xf32>
      %cst_197 = arith.constant dense<0xFF800000> : vector<2x32x32xf32>
      %225 = vector.multi_reduction <maximumf>, %224, %cst_197 [1] : vector<2x2x32x32xf32> to vector<2x32x32xf32>
      %226 = vector.shape_cast %225 : vector<2x32x32xf32> to vector<64x32xf32>
      %c0_198 = arith.constant 0 : index
      %c0_199 = arith.constant 0 : index
      %227 = vector.load %arg11[%c0_198, %c0_199] : memref<64x32xf32, #tpu.memory_space<vmem>>, vector<64x32xf32>
      tpu.vector_store %arg11[%c0_198, %c0_199], %226 {strides = array<i32>} : memref<64x32xf32, #tpu.memory_space<vmem>>, vector<64x32xf32>,
      %c0_200 = arith.constant 0 : index
      %c0_201 = arith.constant 0 : index
      %228 = tpu.strided_load %arg11[%c0_200, %c0_201] {strides = array<i32: 2, 1>} : memref<64x32xf32, #tpu.memory_space<vmem>>, vector<32x32xf32>
      %c1_202 = arith.constant 1 : index
      %c0_203 = arith.constant 0 : index
      %229 = tpu.strided_load %arg11[%c1_202, %c0_203] {strides = array<i32: 2, 1>} : memref<64x32xf32, #tpu.memory_space<vmem>>, vector<32x32xf32>
      %230 = arith.maximumf %228, %229 : vector<32x32xf32>
      %c32_204 = arith.constant 32 : index
      %c0_205 = arith.constant 0 : index
      %231 = vector.load %arg12[%c32_204, %c0_205] : memref<232x32xf32, #tpu.memory_space<vmem>>, vector<32x32xf32>
      tpu.vector_store %arg12[%c32_204, %c0_205], %230 {strides = array<i32>} : memref<232x32xf32, #tpu.memory_space<vmem>>, vector<32x32xf32>,
      %232 = arith.index_cast %arg15 : i32 to index
      %c256_206 = arith.constant 256 : index
      %c0_207 = arith.constant 0 : index
      %233 = vector.load %arg1[%232, %c256_206, %c0_207] : memref<2x1024x15xf32, #tpu.memory_space<vmem>>, vector<1x128x15xf32>
      %234 = vector.shape_cast %233 : vector<1x128x15xf32> to vector<128x15xf32>
      %c0_208 = arith.constant 0 : index
      %c0_209 = arith.constant 0 : index
      %c0_210 = arith.constant 0 : index
      %235 = vector.load %arg2[%c0_208, %c0_209, %c0_210] : memref<5x15x32xf32, #tpu.memory_space<vmem>>, vector<1x15x32xf32>
      %236 = vector.shape_cast %235 : vector<1x15x32xf32> to vector<15x32xf32>
      %cst_211 = arith.constant dense<0.000000e+00> : vector<128x32xf32>
      %237 = tpu.matmul %234, %236, %cst_211 {dimension_numbers = #tpu.dot_dimension_numbers<[1], [0], [0], [1], [0, 0, 1, 1], [], []>} : vector<128x15xf32>, vector<15x32xf32>, vector<128x32xf32> -> vector<128x32xf32>
      %c0_212 = arith.constant 0 : index
      %c0_213 = arith.constant 0 : index
      %238 = vector.load %arg3[%c0_212, %c0_213] : memref<1x32xf32, #tpu.memory_space<vmem>>, vector<1x32xf32>
      %239 = vector.broadcast %238 : vector<1x32xf32> to vector<128x32xf32>
      %240 = arith.addf %237, %239 : vector<128x32xf32>
      %241 = arith.index_cast %arg15 : i32 to index
      %c288 = arith.constant 288 : index
      %c0_214 = arith.constant 0 : index
      %242 = vector.load %arg1[%241, %c288, %c0_214] : memref<2x1024x15xf32, #tpu.memory_space<vmem>>, vector<1x128x15xf32>
      %243 = vector.shape_cast %242 : vector<1x128x15xf32> to vector<128x15xf32>
      %c1_215 = arith.constant 1 : index
      %c0_216 = arith.constant 0 : index
      %c0_217 = arith.constant 0 : index
      %244 = vector.load %arg2[%c1_215, %c0_216, %c0_217] : memref<5x15x32xf32, #tpu.memory_space<vmem>>, vector<1x15x32xf32>
      %245 = vector.shape_cast %244 : vector<1x15x32xf32> to vector<15x32xf32>
      %cst_218 = arith.constant dense<0.000000e+00> : vector<128x32xf32>
      %246 = tpu.matmul %243, %245, %cst_218 {dimension_numbers = #tpu.dot_dimension_numbers<[1], [0], [0], [1], [0, 0, 1, 1], [], []>} : vector<128x15xf32>, vector<15x32xf32>, vector<128x32xf32> -> vector<128x32xf32>
      %247 = arith.addf %240, %246 : vector<128x32xf32>
      %248 = arith.index_cast %arg15 : i32 to index
      %c320 = arith.constant 320 : index
      %c0_219 = arith.constant 0 : index
      %249 = vector.load %arg1[%248, %c320, %c0_219] : memref<2x1024x15xf32, #tpu.memory_space<vmem>>, vector<1x128x15xf32>
      %250 = vector.shape_cast %249 : vector<1x128x15xf32> to vector<128x15xf32>
      %c2_220 = arith.constant 2 : index
      %c0_221 = arith.constant 0 : index
      %c0_222 = arith.constant 0 : index
      %251 = vector.load %arg2[%c2_220, %c0_221, %c0_222] : memref<5x15x32xf32, #tpu.memory_space<vmem>>, vector<1x15x32xf32>
      %252 = vector.shape_cast %251 : vector<1x15x32xf32> to vector<15x32xf32>
      %cst_223 = arith.constant dense<0.000000e+00> : vector<128x32xf32>
      %253 = tpu.matmul %250, %252, %cst_223 {dimension_numbers = #tpu.dot_dimension_numbers<[1], [0], [0], [1], [0, 0, 1, 1], [], []>} : vector<128x15xf32>, vector<15x32xf32>, vector<128x32xf32> -> vector<128x32xf32>
      %254 = arith.addf %247, %253 : vector<128x32xf32>
      %255 = arith.index_cast %arg15 : i32 to index
      %c352 = arith.constant 352 : index
      %c0_224 = arith.constant 0 : index
      %256 = vector.load %arg1[%255, %c352, %c0_224] : memref<2x1024x15xf32, #tpu.memory_space<vmem>>, vector<1x128x15xf32>
      %257 = vector.shape_cast %256 : vector<1x128x15xf32> to vector<128x15xf32>
      %c3_225 = arith.constant 3 : index
      %c0_226 = arith.constant 0 : index
      %c0_227 = arith.constant 0 : index
      %258 = vector.load %arg2[%c3_225, %c0_226, %c0_227] : memref<5x15x32xf32, #tpu.memory_space<vmem>>, vector<1x15x32xf32>
      %259 = vector.shape_cast %258 : vector<1x15x32xf32> to vector<15x32xf32>
      %cst_228 = arith.constant dense<0.000000e+00> : vector<128x32xf32>
      %260 = tpu.matmul %257, %259, %cst_228 {dimension_numbers = #tpu.dot_dimension_numbers<[1], [0], [0], [1], [0, 0, 1, 1], [], []>} : vector<128x15xf32>, vector<15x32xf32>, vector<128x32xf32> -> vector<128x32xf32>
      %261 = arith.addf %254, %260 : vector<128x32xf32>
      %262 = arith.index_cast %arg15 : i32 to index
      %c384 = arith.constant 384 : index
      %c0_229 = arith.constant 0 : index
      %263 = vector.load %arg1[%262, %c384, %c0_229] : memref<2x1024x15xf32, #tpu.memory_space<vmem>>, vector<1x128x15xf32>
      %264 = vector.shape_cast %263 : vector<1x128x15xf32> to vector<128x15xf32>
      %c4_230 = arith.constant 4 : index
      %c0_231 = arith.constant 0 : index
      %c0_232 = arith.constant 0 : index
      %265 = vector.load %arg2[%c4_230, %c0_231, %c0_232] : memref<5x15x32xf32, #tpu.memory_space<vmem>>, vector<1x15x32xf32>
      %266 = vector.shape_cast %265 : vector<1x15x32xf32> to vector<15x32xf32>
      %cst_233 = arith.constant dense<0.000000e+00> : vector<128x32xf32>
      %267 = tpu.matmul %264, %266, %cst_233 {dimension_numbers = #tpu.dot_dimension_numbers<[1], [0], [0], [1], [0, 0, 1, 1], [], []>} : vector<128x15xf32>, vector<15x32xf32>, vector<128x32xf32> -> vector<128x32xf32>
      %268 = arith.addf %261, %267 : vector<128x32xf32>
      %cst_234 = arith.constant 0.000000e+00 : f32
      %269 = vector.broadcast %cst_234 : f32 to vector<128x32xf32>
      %270 = arith.maximumf %268, %269 : vector<128x32xf32>
      %271 = vector.shape_cast %270 : vector<128x32xf32> to vector<2x2x32x32xf32>
      %cst_235 = arith.constant dense<0xFF800000> : vector<2x32x32xf32>
      %272 = vector.multi_reduction <maximumf>, %271, %cst_235 [1] : vector<2x2x32x32xf32> to vector<2x32x32xf32>
      %273 = vector.shape_cast %272 : vector<2x32x32xf32> to vector<64x32xf32>
      %c0_236 = arith.constant 0 : index
      %c0_237 = arith.constant 0 : index
      %274 = vector.load %arg11[%c0_236, %c0_237] : memref<64x32xf32, #tpu.memory_space<vmem>>, vector<64x32xf32>
      tpu.vector_store %arg11[%c0_236, %c0_237], %273 {strides = array<i32>} : memref<64x32xf32, #tpu.memory_space<vmem>>, vector<64x32xf32>,
      %c0_238 = arith.constant 0 : index
      %c0_239 = arith.constant 0 : index
      %275 = tpu.strided_load %arg11[%c0_238, %c0_239] {strides = array<i32: 2, 1>} : memref<64x32xf32, #tpu.memory_space<vmem>>, vector<32x32xf32>
      %c1_240 = arith.constant 1 : index
      %c0_241 = arith.constant 0 : index
      %276 = tpu.strided_load %arg11[%c1_240, %c0_241] {strides = array<i32: 2, 1>} : memref<64x32xf32, #tpu.memory_space<vmem>>, vector<32x32xf32>
      %277 = arith.maximumf %275, %276 : vector<32x32xf32>
      %c64_242 = arith.constant 64 : index
      %c0_243 = arith.constant 0 : index
      %278 = vector.load %arg12[%c64_242, %c0_243] : memref<232x32xf32, #tpu.memory_space<vmem>>, vector<32x32xf32>
      tpu.vector_store %arg12[%c64_242, %c0_243], %277 {strides = array<i32>} : memref<232x32xf32, #tpu.memory_space<vmem>>, vector<32x32xf32>,
      %279 = arith.index_cast %arg15 : i32 to index
      %c384_244 = arith.constant 384 : index
      %c0_245 = arith.constant 0 : index
      %280 = vector.load %arg1[%279, %c384_244, %c0_245] : memref<2x1024x15xf32, #tpu.memory_space<vmem>>, vector<1x128x15xf32>
      %281 = vector.shape_cast %280 : vector<1x128x15xf32> to vector<128x15xf32>
      %c0_246 = arith.constant 0 : index
      %c0_247 = arith.constant 0 : index
      %c0_248 = arith.constant 0 : index
      %282 = vector.load %arg2[%c0_246, %c0_247, %c0_248] : memref<5x15x32xf32, #tpu.memory_space<vmem>>, vector<1x15x32xf32>
      %283 = vector.shape_cast %282 : vector<1x15x32xf32> to vector<15x32xf32>
      %cst_249 = arith.constant dense<0.000000e+00> : vector<128x32xf32>
      %284 = tpu.matmul %281, %283, %cst_249 {dimension_numbers = #tpu.dot_dimension_numbers<[1], [0], [0], [1], [0, 0, 1, 1], [], []>} : vector<128x15xf32>, vector<15x32xf32>, vector<128x32xf32> -> vector<128x32xf32>
      %c0_250 = arith.constant 0 : index
      %c0_251 = arith.constant 0 : index
      %285 = vector.load %arg3[%c0_250, %c0_251] : memref<1x32xf32, #tpu.memory_space<vmem>>, vector<1x32xf32>
      %286 = vector.broadcast %285 : vector<1x32xf32> to vector<128x32xf32>
      %287 = arith.addf %284, %286 : vector<128x32xf32>
      %288 = arith.index_cast %arg15 : i32 to index
      %c416 = arith.constant 416 : index
      %c0_252 = arith.constant 0 : index
      %289 = vector.load %arg1[%288, %c416, %c0_252] : memref<2x1024x15xf32, #tpu.memory_space<vmem>>, vector<1x128x15xf32>
      %290 = vector.shape_cast %289 : vector<1x128x15xf32> to vector<128x15xf32>
      %c1_253 = arith.constant 1 : index
      %c0_254 = arith.constant 0 : index
      %c0_255 = arith.constant 0 : index
      %291 = vector.load %arg2[%c1_253, %c0_254, %c0_255] : memref<5x15x32xf32, #tpu.memory_space<vmem>>, vector<1x15x32xf32>
      %292 = vector.shape_cast %291 : vector<1x15x32xf32> to vector<15x32xf32>
      %cst_256 = arith.constant dense<0.000000e+00> : vector<128x32xf32>
      %293 = tpu.matmul %290, %292, %cst_256 {dimension_numbers = #tpu.dot_dimension_numbers<[1], [0], [0], [1], [0, 0, 1, 1], [], []>} : vector<128x15xf32>, vector<15x32xf32>, vector<128x32xf32> -> vector<128x32xf32>
      %294 = arith.addf %287, %293 : vector<128x32xf32>
      %295 = arith.index_cast %arg15 : i32 to index
      %c448 = arith.constant 448 : index
      %c0_257 = arith.constant 0 : index
      %296 = vector.load %arg1[%295, %c448, %c0_257] : memref<2x1024x15xf32, #tpu.memory_space<vmem>>, vector<1x128x15xf32>
      %297 = vector.shape_cast %296 : vector<1x128x15xf32> to vector<128x15xf32>
      %c2_258 = arith.constant 2 : index
      %c0_259 = arith.constant 0 : index
      %c0_260 = arith.constant 0 : index
      %298 = vector.load %arg2[%c2_258, %c0_259, %c0_260] : memref<5x15x32xf32, #tpu.memory_space<vmem>>, vector<1x15x32xf32>
      %299 = vector.shape_cast %298 : vector<1x15x32xf32> to vector<15x32xf32>
      %cst_261 = arith.constant dense<0.000000e+00> : vector<128x32xf32>
      %300 = tpu.matmul %297, %299, %cst_261 {dimension_numbers = #tpu.dot_dimension_numbers<[1], [0], [0], [1], [0, 0, 1, 1], [], []>} : vector<128x15xf32>, vector<15x32xf32>, vector<128x32xf32> -> vector<128x32xf32>
      %301 = arith.addf %294, %300 : vector<128x32xf32>
      %302 = arith.index_cast %arg15 : i32 to index
      %c480 = arith.constant 480 : index
      %c0_262 = arith.constant 0 : index
      %303 = vector.load %arg1[%302, %c480, %c0_262] : memref<2x1024x15xf32, #tpu.memory_space<vmem>>, vector<1x128x15xf32>
      %304 = vector.shape_cast %303 : vector<1x128x15xf32> to vector<128x15xf32>
      %c3_263 = arith.constant 3 : index
      %c0_264 = arith.constant 0 : index
      %c0_265 = arith.constant 0 : index
      %305 = vector.load %arg2[%c3_263, %c0_264, %c0_265] : memref<5x15x32xf32, #tpu.memory_space<vmem>>, vector<1x15x32xf32>
      %306 = vector.shape_cast %305 : vector<1x15x32xf32> to vector<15x32xf32>
      %cst_266 = arith.constant dense<0.000000e+00> : vector<128x32xf32>
      %307 = tpu.matmul %304, %306, %cst_266 {dimension_numbers = #tpu.dot_dimension_numbers<[1], [0], [0], [1], [0, 0, 1, 1], [], []>} : vector<128x15xf32>, vector<15x32xf32>, vector<128x32xf32> -> vector<128x32xf32>
      %308 = arith.addf %301, %307 : vector<128x32xf32>
      %309 = arith.index_cast %arg15 : i32 to index
      %c512 = arith.constant 512 : index
      %c0_267 = arith.constant 0 : index
      %310 = vector.load %arg1[%309, %c512, %c0_267] : memref<2x1024x15xf32, #tpu.memory_space<vmem>>, vector<1x128x15xf32>
      %311 = vector.shape_cast %310 : vector<1x128x15xf32> to vector<128x15xf32>
      %c4_268 = arith.constant 4 : index
      %c0_269 = arith.constant 0 : index
      %c0_270 = arith.constant 0 : index
      %312 = vector.load %arg2[%c4_268, %c0_269, %c0_270] : memref<5x15x32xf32, #tpu.memory_space<vmem>>, vector<1x15x32xf32>
      %313 = vector.shape_cast %312 : vector<1x15x32xf32> to vector<15x32xf32>
      %cst_271 = arith.constant dense<0.000000e+00> : vector<128x32xf32>
      %314 = tpu.matmul %311, %313, %cst_271 {dimension_numbers = #tpu.dot_dimension_numbers<[1], [0], [0], [1], [0, 0, 1, 1], [], []>} : vector<128x15xf32>, vector<15x32xf32>, vector<128x32xf32> -> vector<128x32xf32>
      %315 = arith.addf %308, %314 : vector<128x32xf32>
      %cst_272 = arith.constant 0.000000e+00 : f32
      %316 = vector.broadcast %cst_272 : f32 to vector<128x32xf32>
      %317 = arith.maximumf %315, %316 : vector<128x32xf32>
      %318 = vector.shape_cast %317 : vector<128x32xf32> to vector<2x2x32x32xf32>
      %cst_273 = arith.constant dense<0xFF800000> : vector<2x32x32xf32>
      %319 = vector.multi_reduction <maximumf>, %318, %cst_273 [1] : vector<2x2x32x32xf32> to vector<2x32x32xf32>
      %320 = vector.shape_cast %319 : vector<2x32x32xf32> to vector<64x32xf32>
      %c0_274 = arith.constant 0 : index
      %c0_275 = arith.constant 0 : index
      %321 = vector.load %arg11[%c0_274, %c0_275] : memref<64x32xf32, #tpu.memory_space<vmem>>, vector<64x32xf32>
      tpu.vector_store %arg11[%c0_274, %c0_275], %320 {strides = array<i32>} : memref<64x32xf32, #tpu.memory_space<vmem>>, vector<64x32xf32>,
      %c0_276 = arith.constant 0 : index
      %c0_277 = arith.constant 0 : index
      %322 = tpu.strided_load %arg11[%c0_276, %c0_277] {strides = array<i32: 2, 1>} : memref<64x32xf32, #tpu.memory_space<vmem>>, vector<32x32xf32>
      %c1_278 = arith.constant 1 : index
      %c0_279 = arith.constant 0 : index
      %323 = tpu.strided_load %arg11[%c1_278, %c0_279] {strides = array<i32: 2, 1>} : memref<64x32xf32, #tpu.memory_space<vmem>>, vector<32x32xf32>
      %324 = arith.maximumf %322, %323 : vector<32x32xf32>
      %c96_280 = arith.constant 96 : index
      %c0_281 = arith.constant 0 : index
      %325 = vector.load %arg12[%c96_280, %c0_281] : memref<232x32xf32, #tpu.memory_space<vmem>>, vector<32x32xf32>
      tpu.vector_store %arg12[%c96_280, %c0_281], %324 {strides = array<i32>} : memref<232x32xf32, #tpu.memory_space<vmem>>, vector<32x32xf32>,
      %326 = arith.index_cast %arg15 : i32 to index
      %c512_282 = arith.constant 512 : index
      %c0_283 = arith.constant 0 : index
      %327 = vector.load %arg1[%326, %c512_282, %c0_283] : memref<2x1024x15xf32, #tpu.memory_space<vmem>>, vector<1x128x15xf32>
      %328 = vector.shape_cast %327 : vector<1x128x15xf32> to vector<128x15xf32>
      %c0_284 = arith.constant 0 : index
      %c0_285 = arith.constant 0 : index
      %c0_286 = arith.constant 0 : index
      %329 = vector.load %arg2[%c0_284, %c0_285, %c0_286] : memref<5x15x32xf32, #tpu.memory_space<vmem>>, vector<1x15x32xf32>
      %330 = vector.shape_cast %329 : vector<1x15x32xf32> to vector<15x32xf32>
      %cst_287 = arith.constant dense<0.000000e+00> : vector<128x32xf32>
      %331 = tpu.matmul %328, %330, %cst_287 {dimension_numbers = #tpu.dot_dimension_numbers<[1], [0], [0], [1], [0, 0, 1, 1], [], []>} : vector<128x15xf32>, vector<15x32xf32>, vector<128x32xf32> -> vector<128x32xf32>
      %c0_288 = arith.constant 0 : index
      %c0_289 = arith.constant 0 : index
      %332 = vector.load %arg3[%c0_288, %c0_289] : memref<1x32xf32, #tpu.memory_space<vmem>>, vector<1x32xf32>
      %333 = vector.broadcast %332 : vector<1x32xf32> to vector<128x32xf32>
      %334 = arith.addf %331, %333 : vector<128x32xf32>
      %335 = arith.index_cast %arg15 : i32 to index
      %c544 = arith.constant 544 : index
      %c0_290 = arith.constant 0 : index
      %336 = vector.load %arg1[%335, %c544, %c0_290] : memref<2x1024x15xf32, #tpu.memory_space<vmem>>, vector<1x128x15xf32>
      %337 = vector.shape_cast %336 : vector<1x128x15xf32> to vector<128x15xf32>
      %c1_291 = arith.constant 1 : index
      %c0_292 = arith.constant 0 : index
      %c0_293 = arith.constant 0 : index
      %338 = vector.load %arg2[%c1_291, %c0_292, %c0_293] : memref<5x15x32xf32, #tpu.memory_space<vmem>>, vector<1x15x32xf32>
      %339 = vector.shape_cast %338 : vector<1x15x32xf32> to vector<15x32xf32>
      %cst_294 = arith.constant dense<0.000000e+00> : vector<128x32xf32>
      %340 = tpu.matmul %337, %339, %cst_294 {dimension_numbers = #tpu.dot_dimension_numbers<[1], [0], [0], [1], [0, 0, 1, 1], [], []>} : vector<128x15xf32>, vector<15x32xf32>, vector<128x32xf32> -> vector<128x32xf32>
      %341 = arith.addf %334, %340 : vector<128x32xf32>
      %342 = arith.index_cast %arg15 : i32 to index
      %c576 = arith.constant 576 : index
      %c0_295 = arith.constant 0 : index
      %343 = vector.load %arg1[%342, %c576, %c0_295] : memref<2x1024x15xf32, #tpu.memory_space<vmem>>, vector<1x128x15xf32>
      %344 = vector.shape_cast %343 : vector<1x128x15xf32> to vector<128x15xf32>
      %c2_296 = arith.constant 2 : index
      %c0_297 = arith.constant 0 : index
      %c0_298 = arith.constant 0 : index
      %345 = vector.load %arg2[%c2_296, %c0_297, %c0_298] : memref<5x15x32xf32, #tpu.memory_space<vmem>>, vector<1x15x32xf32>
      %346 = vector.shape_cast %345 : vector<1x15x32xf32> to vector<15x32xf32>
      %cst_299 = arith.constant dense<0.000000e+00> : vector<128x32xf32>
      %347 = tpu.matmul %344, %346, %cst_299 {dimension_numbers = #tpu.dot_dimension_numbers<[1], [0], [0], [1], [0, 0, 1, 1], [], []>} : vector<128x15xf32>, vector<15x32xf32>, vector<128x32xf32> -> vector<128x32xf32>
      %348 = arith.addf %341, %347 : vector<128x32xf32>
      %349 = arith.index_cast %arg15 : i32 to index
      %c608 = arith.constant 608 : index
      %c0_300 = arith.constant 0 : index
      %350 = vector.load %arg1[%349, %c608, %c0_300] : memref<2x1024x15xf32, #tpu.memory_space<vmem>>, vector<1x128x15xf32>
      %351 = vector.shape_cast %350 : vector<1x128x15xf32> to vector<128x15xf32>
      %c3_301 = arith.constant 3 : index
      %c0_302 = arith.constant 0 : index
      %c0_303 = arith.constant 0 : index
      %352 = vector.load %arg2[%c3_301, %c0_302, %c0_303] : memref<5x15x32xf32, #tpu.memory_space<vmem>>, vector<1x15x32xf32>
      %353 = vector.shape_cast %352 : vector<1x15x32xf32> to vector<15x32xf32>
      %cst_304 = arith.constant dense<0.000000e+00> : vector<128x32xf32>
      %354 = tpu.matmul %351, %353, %cst_304 {dimension_numbers = #tpu.dot_dimension_numbers<[1], [0], [0], [1], [0, 0, 1, 1], [], []>} : vector<128x15xf32>, vector<15x32xf32>, vector<128x32xf32> -> vector<128x32xf32>
      %355 = arith.addf %348, %354 : vector<128x32xf32>
      %356 = arith.index_cast %arg15 : i32 to index
      %c640 = arith.constant 640 : index
      %c0_305 = arith.constant 0 : index
      %357 = vector.load %arg1[%356, %c640, %c0_305] : memref<2x1024x15xf32, #tpu.memory_space<vmem>>, vector<1x128x15xf32>
      %358 = vector.shape_cast %357 : vector<1x128x15xf32> to vector<128x15xf32>
      %c4_306 = arith.constant 4 : index
      %c0_307 = arith.constant 0 : index
      %c0_308 = arith.constant 0 : index
      %359 = vector.load %arg2[%c4_306, %c0_307, %c0_308] : memref<5x15x32xf32, #tpu.memory_space<vmem>>, vector<1x15x32xf32>
      %360 = vector.shape_cast %359 : vector<1x15x32xf32> to vector<15x32xf32>
      %cst_309 = arith.constant dense<0.000000e+00> : vector<128x32xf32>
      %361 = tpu.matmul %358, %360, %cst_309 {dimension_numbers = #tpu.dot_dimension_numbers<[1], [0], [0], [1], [0, 0, 1, 1], [], []>} : vector<128x15xf32>, vector<15x32xf32>, vector<128x32xf32> -> vector<128x32xf32>
      %362 = arith.addf %355, %361 : vector<128x32xf32>
      %cst_310 = arith.constant 0.000000e+00 : f32
      %363 = vector.broadcast %cst_310 : f32 to vector<128x32xf32>
      %364 = arith.maximumf %362, %363 : vector<128x32xf32>
      %365 = vector.shape_cast %364 : vector<128x32xf32> to vector<2x2x32x32xf32>
      %cst_311 = arith.constant dense<0xFF800000> : vector<2x32x32xf32>
      %366 = vector.multi_reduction <maximumf>, %365, %cst_311 [1] : vector<2x2x32x32xf32> to vector<2x32x32xf32>
      %367 = vector.shape_cast %366 : vector<2x32x32xf32> to vector<64x32xf32>
      %c0_312 = arith.constant 0 : index
      %c0_313 = arith.constant 0 : index
      %368 = vector.load %arg11[%c0_312, %c0_313] : memref<64x32xf32, #tpu.memory_space<vmem>>, vector<64x32xf32>
      tpu.vector_store %arg11[%c0_312, %c0_313], %367 {strides = array<i32>} : memref<64x32xf32, #tpu.memory_space<vmem>>, vector<64x32xf32>,
      %c0_314 = arith.constant 0 : index
      %c0_315 = arith.constant 0 : index
      %369 = tpu.strided_load %arg11[%c0_314, %c0_315] {strides = array<i32: 2, 1>} : memref<64x32xf32, #tpu.memory_space<vmem>>, vector<32x32xf32>
      %c1_316 = arith.constant 1 : index
      %c0_317 = arith.constant 0 : index
      %370 = tpu.strided_load %arg11[%c1_316, %c0_317] {strides = array<i32: 2, 1>} : memref<64x32xf32, #tpu.memory_space<vmem>>, vector<32x32xf32>
      %371 = arith.maximumf %369, %370 : vector<32x32xf32>
      %c128_318 = arith.constant 128 : index
      %c0_319 = arith.constant 0 : index
      %372 = vector.load %arg12[%c128_318, %c0_319] : memref<232x32xf32, #tpu.memory_space<vmem>>, vector<32x32xf32>
      tpu.vector_store %arg12[%c128_318, %c0_319], %371 {strides = array<i32>} : memref<232x32xf32, #tpu.memory_space<vmem>>, vector<32x32xf32>,
      %373 = arith.index_cast %arg15 : i32 to index
      %c640_320 = arith.constant 640 : index
      %c0_321 = arith.constant 0 : index
      %374 = vector.load %arg1[%373, %c640_320, %c0_321] : memref<2x1024x15xf32, #tpu.memory_space<vmem>>, vector<1x128x15xf32>
      %375 = vector.shape_cast %374 : vector<1x128x15xf32> to vector<128x15xf32>
      %c0_322 = arith.constant 0 : index
      %c0_323 = arith.constant 0 : index
      %c0_324 = arith.constant 0 : index
      %376 = vector.load %arg2[%c0_322, %c0_323, %c0_324] : memref<5x15x32xf32, #tpu.memory_space<vmem>>, vector<1x15x32xf32>
      %377 = vector.shape_cast %376 : vector<1x15x32xf32> to vector<15x32xf32>
      %cst_325 = arith.constant dense<0.000000e+00> : vector<128x32xf32>
      %378 = tpu.matmul %375, %377, %cst_325 {dimension_numbers = #tpu.dot_dimension_numbers<[1], [0], [0], [1], [0, 0, 1, 1], [], []>} : vector<128x15xf32>, vector<15x32xf32>, vector<128x32xf32> -> vector<128x32xf32>
      %c0_326 = arith.constant 0 : index
      %c0_327 = arith.constant 0 : index
      %379 = vector.load %arg3[%c0_326, %c0_327] : memref<1x32xf32, #tpu.memory_space<vmem>>, vector<1x32xf32>
      %380 = vector.broadcast %379 : vector<1x32xf32> to vector<128x32xf32>
      %381 = arith.addf %378, %380 : vector<128x32xf32>
      %382 = arith.index_cast %arg15 : i32 to index
      %c672 = arith.constant 672 : index
      %c0_328 = arith.constant 0 : index
      %383 = vector.load %arg1[%382, %c672, %c0_328] : memref<2x1024x15xf32, #tpu.memory_space<vmem>>, vector<1x128x15xf32>
      %384 = vector.shape_cast %383 : vector<1x128x15xf32> to vector<128x15xf32>
      %c1_329 = arith.constant 1 : index
      %c0_330 = arith.constant 0 : index
      %c0_331 = arith.constant 0 : index
      %385 = vector.load %arg2[%c1_329, %c0_330, %c0_331] : memref<5x15x32xf32, #tpu.memory_space<vmem>>, vector<1x15x32xf32>
      %386 = vector.shape_cast %385 : vector<1x15x32xf32> to vector<15x32xf32>
      %cst_332 = arith.constant dense<0.000000e+00> : vector<128x32xf32>
      %387 = tpu.matmul %384, %386, %cst_332 {dimension_numbers = #tpu.dot_dimension_numbers<[1], [0], [0], [1], [0, 0, 1, 1], [], []>} : vector<128x15xf32>, vector<15x32xf32>, vector<128x32xf32> -> vector<128x32xf32>
      %388 = arith.addf %381, %387 : vector<128x32xf32>
      %389 = arith.index_cast %arg15 : i32 to index
      %c704 = arith.constant 704 : index
      %c0_333 = arith.constant 0 : index
      %390 = vector.load %arg1[%389, %c704, %c0_333] : memref<2x1024x15xf32, #tpu.memory_space<vmem>>, vector<1x128x15xf32>
      %391 = vector.shape_cast %390 : vector<1x128x15xf32> to vector<128x15xf32>
      %c2_334 = arith.constant 2 : index
      %c0_335 = arith.constant 0 : index
      %c0_336 = arith.constant 0 : index
      %392 = vector.load %arg2[%c2_334, %c0_335, %c0_336] : memref<5x15x32xf32, #tpu.memory_space<vmem>>, vector<1x15x32xf32>
      %393 = vector.shape_cast %392 : vector<1x15x32xf32> to vector<15x32xf32>
      %cst_337 = arith.constant dense<0.000000e+00> : vector<128x32xf32>
      %394 = tpu.matmul %391, %393, %cst_337 {dimension_numbers = #tpu.dot_dimension_numbers<[1], [0], [0], [1], [0, 0, 1, 1], [], []>} : vector<128x15xf32>, vector<15x32xf32>, vector<128x32xf32> -> vector<128x32xf32>
      %395 = arith.addf %388, %394 : vector<128x32xf32>
      %396 = arith.index_cast %arg15 : i32 to index
      %c736 = arith.constant 736 : index
      %c0_338 = arith.constant 0 : index
      %397 = vector.load %arg1[%396, %c736, %c0_338] : memref<2x1024x15xf32, #tpu.memory_space<vmem>>, vector<1x128x15xf32>
      %398 = vector.shape_cast %397 : vector<1x128x15xf32> to vector<128x15xf32>
      %c3_339 = arith.constant 3 : index
      %c0_340 = arith.constant 0 : index
      %c0_341 = arith.constant 0 : index
      %399 = vector.load %arg2[%c3_339, %c0_340, %c0_341] : memref<5x15x32xf32, #tpu.memory_space<vmem>>, vector<1x15x32xf32>
      %400 = vector.shape_cast %399 : vector<1x15x32xf32> to vector<15x32xf32>
      %cst_342 = arith.constant dense<0.000000e+00> : vector<128x32xf32>
      %401 = tpu.matmul %398, %400, %cst_342 {dimension_numbers = #tpu.dot_dimension_numbers<[1], [0], [0], [1], [0, 0, 1, 1], [], []>} : vector<128x15xf32>, vector<15x32xf32>, vector<128x32xf32> -> vector<128x32xf32>
      %402 = arith.addf %395, %401 : vector<128x32xf32>
      %403 = arith.index_cast %arg15 : i32 to index
      %c768 = arith.constant 768 : index
      %c0_343 = arith.constant 0 : index
      %404 = vector.load %arg1[%403, %c768, %c0_343] : memref<2x1024x15xf32, #tpu.memory_space<vmem>>, vector<1x128x15xf32>
      %405 = vector.shape_cast %404 : vector<1x128x15xf32> to vector<128x15xf32>
      %c4_344 = arith.constant 4 : index
      %c0_345 = arith.constant 0 : index
      %c0_346 = arith.constant 0 : index
      %406 = vector.load %arg2[%c4_344, %c0_345, %c0_346] : memref<5x15x32xf32, #tpu.memory_space<vmem>>, vector<1x15x32xf32>
      %407 = vector.shape_cast %406 : vector<1x15x32xf32> to vector<15x32xf32>
      %cst_347 = arith.constant dense<0.000000e+00> : vector<128x32xf32>
      %408 = tpu.matmul %405, %407, %cst_347 {dimension_numbers = #tpu.dot_dimension_numbers<[1], [0], [0], [1], [0, 0, 1, 1], [], []>} : vector<128x15xf32>, vector<15x32xf32>, vector<128x32xf32> -> vector<128x32xf32>
      %409 = arith.addf %402, %408 : vector<128x32xf32>
      %cst_348 = arith.constant 0.000000e+00 : f32
      %410 = vector.broadcast %cst_348 : f32 to vector<128x32xf32>
      %411 = arith.maximumf %409, %410 : vector<128x32xf32>
      %412 = vector.shape_cast %411 : vector<128x32xf32> to vector<2x2x32x32xf32>
      %cst_349 = arith.constant dense<0xFF800000> : vector<2x32x32xf32>
      %413 = vector.multi_reduction <maximumf>, %412, %cst_349 [1] : vector<2x2x32x32xf32> to vector<2x32x32xf32>
      %414 = vector.shape_cast %413 : vector<2x32x32xf32> to vector<64x32xf32>
      %c0_350 = arith.constant 0 : index
      %c0_351 = arith.constant 0 : index
      %415 = vector.load %arg11[%c0_350, %c0_351] : memref<64x32xf32, #tpu.memory_space<vmem>>, vector<64x32xf32>
      tpu.vector_store %arg11[%c0_350, %c0_351], %414 {strides = array<i32>} : memref<64x32xf32, #tpu.memory_space<vmem>>, vector<64x32xf32>,
      %c0_352 = arith.constant 0 : index
      %c0_353 = arith.constant 0 : index
      %416 = tpu.strided_load %arg11[%c0_352, %c0_353] {strides = array<i32: 2, 1>} : memref<64x32xf32, #tpu.memory_space<vmem>>, vector<32x32xf32>
      %c1_354 = arith.constant 1 : index
      %c0_355 = arith.constant 0 : index
      %417 = tpu.strided_load %arg11[%c1_354, %c0_355] {strides = array<i32: 2, 1>} : memref<64x32xf32, #tpu.memory_space<vmem>>, vector<32x32xf32>
      %418 = arith.maximumf %416, %417 : vector<32x32xf32>
      %c160_356 = arith.constant 160 : index
      %c0_357 = arith.constant 0 : index
      %419 = vector.load %arg12[%c160_356, %c0_357] : memref<232x32xf32, #tpu.memory_space<vmem>>, vector<32x32xf32>
      tpu.vector_store %arg12[%c160_356, %c0_357], %418 {strides = array<i32>} : memref<232x32xf32, #tpu.memory_space<vmem>>, vector<32x32xf32>,
      %420 = arith.index_cast %arg15 : i32 to index
      %c768_358 = arith.constant 768 : index
      %c0_359 = arith.constant 0 : index
      %421 = vector.load %arg1[%420, %c768_358, %c0_359] : memref<2x1024x15xf32, #tpu.memory_space<vmem>>, vector<1x128x15xf32>
      %422 = vector.shape_cast %421 : vector<1x128x15xf32> to vector<128x15xf32>
      %c0_360 = arith.constant 0 : index
      %c0_361 = arith.constant 0 : index
      %c0_362 = arith.constant 0 : index
      %423 = vector.load %arg2[%c0_360, %c0_361, %c0_362] : memref<5x15x32xf32, #tpu.memory_space<vmem>>, vector<1x15x32xf32>
      %424 = vector.shape_cast %423 : vector<1x15x32xf32> to vector<15x32xf32>
      %cst_363 = arith.constant dense<0.000000e+00> : vector<128x32xf32>
      %425 = tpu.matmul %422, %424, %cst_363 {dimension_numbers = #tpu.dot_dimension_numbers<[1], [0], [0], [1], [0, 0, 1, 1], [], []>} : vector<128x15xf32>, vector<15x32xf32>, vector<128x32xf32> -> vector<128x32xf32>
      %c0_364 = arith.constant 0 : index
      %c0_365 = arith.constant 0 : index
      %426 = vector.load %arg3[%c0_364, %c0_365] : memref<1x32xf32, #tpu.memory_space<vmem>>, vector<1x32xf32>
      %427 = vector.broadcast %426 : vector<1x32xf32> to vector<128x32xf32>
      %428 = arith.addf %425, %427 : vector<128x32xf32>
      %429 = arith.index_cast %arg15 : i32 to index
      %c800 = arith.constant 800 : index
      %c0_366 = arith.constant 0 : index
      %430 = vector.load %arg1[%429, %c800, %c0_366] : memref<2x1024x15xf32, #tpu.memory_space<vmem>>, vector<1x128x15xf32>
      %431 = vector.shape_cast %430 : vector<1x128x15xf32> to vector<128x15xf32>
      %c1_367 = arith.constant 1 : index
      %c0_368 = arith.constant 0 : index
      %c0_369 = arith.constant 0 : index
      %432 = vector.load %arg2[%c1_367, %c0_368, %c0_369] : memref<5x15x32xf32, #tpu.memory_space<vmem>>, vector<1x15x32xf32>
      %433 = vector.shape_cast %432 : vector<1x15x32xf32> to vector<15x32xf32>
      %cst_370 = arith.constant dense<0.000000e+00> : vector<128x32xf32>
      %434 = tpu.matmul %431, %433, %cst_370 {dimension_numbers = #tpu.dot_dimension_numbers<[1], [0], [0], [1], [0, 0, 1, 1], [], []>} : vector<128x15xf32>, vector<15x32xf32>, vector<128x32xf32> -> vector<128x32xf32>
      %435 = arith.addf %428, %434 : vector<128x32xf32>
      %436 = arith.index_cast %arg15 : i32 to index
      %c832 = arith.constant 832 : index
      %c0_371 = arith.constant 0 : index
      %437 = vector.load %arg1[%436, %c832, %c0_371] : memref<2x1024x15xf32, #tpu.memory_space<vmem>>, vector<1x128x15xf32>
      %438 = vector.shape_cast %437 : vector<1x128x15xf32> to vector<128x15xf32>
      %c2_372 = arith.constant 2 : index
      %c0_373 = arith.constant 0 : index
      %c0_374 = arith.constant 0 : index
      %439 = vector.load %arg2[%c2_372, %c0_373, %c0_374] : memref<5x15x32xf32, #tpu.memory_space<vmem>>, vector<1x15x32xf32>
      %440 = vector.shape_cast %439 : vector<1x15x32xf32> to vector<15x32xf32>
      %cst_375 = arith.constant dense<0.000000e+00> : vector<128x32xf32>
      %441 = tpu.matmul %438, %440, %cst_375 {dimension_numbers = #tpu.dot_dimension_numbers<[1], [0], [0], [1], [0, 0, 1, 1], [], []>} : vector<128x15xf32>, vector<15x32xf32>, vector<128x32xf32> -> vector<128x32xf32>
      %442 = arith.addf %435, %441 : vector<128x32xf32>
      %443 = arith.index_cast %arg15 : i32 to index
      %c864 = arith.constant 864 : index
      %c0_376 = arith.constant 0 : index
      %444 = vector.load %arg1[%443, %c864, %c0_376] : memref<2x1024x15xf32, #tpu.memory_space<vmem>>, vector<1x128x15xf32>
      %445 = vector.shape_cast %444 : vector<1x128x15xf32> to vector<128x15xf32>
      %c3_377 = arith.constant 3 : index
      %c0_378 = arith.constant 0 : index
      %c0_379 = arith.constant 0 : index
      %446 = vector.load %arg2[%c3_377, %c0_378, %c0_379] : memref<5x15x32xf32, #tpu.memory_space<vmem>>, vector<1x15x32xf32>
      %447 = vector.shape_cast %446 : vector<1x15x32xf32> to vector<15x32xf32>
      %cst_380 = arith.constant dense<0.000000e+00> : vector<128x32xf32>
      %448 = tpu.matmul %445, %447, %cst_380 {dimension_numbers = #tpu.dot_dimension_numbers<[1], [0], [0], [1], [0, 0, 1, 1], [], []>} : vector<128x15xf32>, vector<15x32xf32>, vector<128x32xf32> -> vector<128x32xf32>
      %449 = arith.addf %442, %448 : vector<128x32xf32>
      %450 = arith.index_cast %arg15 : i32 to index
      %c896 = arith.constant 896 : index
      %c0_381 = arith.constant 0 : index
      %451 = vector.load %arg1[%450, %c896, %c0_381] : memref<2x1024x15xf32, #tpu.memory_space<vmem>>, vector<1x128x15xf32>
      %452 = vector.shape_cast %451 : vector<1x128x15xf32> to vector<128x15xf32>
      %c4_382 = arith.constant 4 : index
      %c0_383 = arith.constant 0 : index
      %c0_384 = arith.constant 0 : index
      %453 = vector.load %arg2[%c4_382, %c0_383, %c0_384] : memref<5x15x32xf32, #tpu.memory_space<vmem>>, vector<1x15x32xf32>
      %454 = vector.shape_cast %453 : vector<1x15x32xf32> to vector<15x32xf32>
      %cst_385 = arith.constant dense<0.000000e+00> : vector<128x32xf32>
      %455 = tpu.matmul %452, %454, %cst_385 {dimension_numbers = #tpu.dot_dimension_numbers<[1], [0], [0], [1], [0, 0, 1, 1], [], []>} : vector<128x15xf32>, vector<15x32xf32>, vector<128x32xf32> -> vector<128x32xf32>
      %456 = arith.addf %449, %455 : vector<128x32xf32>
      %cst_386 = arith.constant 0.000000e+00 : f32
      %457 = vector.broadcast %cst_386 : f32 to vector<128x32xf32>
      %458 = arith.maximumf %456, %457 : vector<128x32xf32>
      %459 = vector.shape_cast %458 : vector<128x32xf32> to vector<2x2x32x32xf32>
      %cst_387 = arith.constant dense<0xFF800000> : vector<2x32x32xf32>
      %460 = vector.multi_reduction <maximumf>, %459, %cst_387 [1] : vector<2x2x32x32xf32> to vector<2x32x32xf32>
      %461 = vector.shape_cast %460 : vector<2x32x32xf32> to vector<64x32xf32>
      %c0_388 = arith.constant 0 : index
      %c0_389 = arith.constant 0 : index
      %462 = vector.load %arg11[%c0_388, %c0_389] : memref<64x32xf32, #tpu.memory_space<vmem>>, vector<64x32xf32>
      tpu.vector_store %arg11[%c0_388, %c0_389], %461 {strides = array<i32>} : memref<64x32xf32, #tpu.memory_space<vmem>>, vector<64x32xf32>,
      %c0_390 = arith.constant 0 : index
      %c0_391 = arith.constant 0 : index
      %463 = tpu.strided_load %arg11[%c0_390, %c0_391] {strides = array<i32: 2, 1>} : memref<64x32xf32, #tpu.memory_space<vmem>>, vector<32x32xf32>
      %c1_392 = arith.constant 1 : index
      %c0_393 = arith.constant 0 : index
      %464 = tpu.strided_load %arg11[%c1_392, %c0_393] {strides = array<i32: 2, 1>} : memref<64x32xf32, #tpu.memory_space<vmem>>, vector<32x32xf32>
      %465 = arith.maximumf %463, %464 : vector<32x32xf32>
      %c192_394 = arith.constant 192 : index
      %c0_395 = arith.constant 0 : index
      %466 = vector.load %arg12[%c192_394, %c0_395] : memref<232x32xf32, #tpu.memory_space<vmem>>, vector<32x32xf32>
      tpu.vector_store %arg12[%c192_394, %c0_395], %465 {strides = array<i32>} : memref<232x32xf32, #tpu.memory_space<vmem>>, vector<32x32xf32>,
      %c0_396 = arith.constant 0 : index
      %c0_397 = arith.constant 0 : index
      %467 = vector.load %arg12[%c0_396, %c0_397] : memref<232x32xf32, #tpu.memory_space<vmem>>, vector<160x32xf32>
      %c0_398 = arith.constant 0 : index
      %c0_399 = arith.constant 0 : index
      %c0_400 = arith.constant 0 : index
      %468 = vector.load %arg4[%c0_398, %c0_399, %c0_400] : memref<25x32x64xf32, #tpu.memory_space<vmem>>, vector<1x32x64xf32>
      %469 = vector.shape_cast %468 : vector<1x32x64xf32> to vector<32x64xf32>
      %cst_401 = arith.constant dense<0.000000e+00> : vector<160x64xf32>
      %470 = tpu.matmul %467, %469, %cst_401 {dimension_numbers = #tpu.dot_dimension_numbers<[1], [0], [0], [1], [0, 0, 1, 1], [], []>} : vector<160x32xf32>, vector<32x64xf32>, vector<160x64xf32> -> vector<160x64xf32>
      %c0_402 = arith.constant 0 : index
      %c0_403 = arith.constant 0 : index
      %471 = vector.load %arg5[%c0_402, %c0_403] : memref<1x64xf32, #tpu.memory_space<vmem>>, vector<1x64xf32>
      %472 = vector.broadcast %471 : vector<1x64xf32> to vector<160x64xf32>
      %473 = arith.addf %470, %472 : vector<160x64xf32>
      %c1_404 = arith.constant 1 : index
      %c0_405 = arith.constant 0 : index
      %474 = vector.load %arg12[%c1_404, %c0_405] : memref<232x32xf32, #tpu.memory_space<vmem>>, vector<160x32xf32>
      %c1_406 = arith.constant 1 : index
      %c0_407 = arith.constant 0 : index
      %c0_408 = arith.constant 0 : index
      %475 = vector.load %arg4[%c1_406, %c0_407, %c0_408] : memref<25x32x64xf32, #tpu.memory_space<vmem>>, vector<1x32x64xf32>
      %476 = vector.shape_cast %475 : vector<1x32x64xf32> to vector<32x64xf32>
      %cst_409 = arith.constant dense<0.000000e+00> : vector<160x64xf32>
      %477 = tpu.matmul %474, %476, %cst_409 {dimension_numbers = #tpu.dot_dimension_numbers<[1], [0], [0], [1], [0, 0, 1, 1], [], []>} : vector<160x32xf32>, vector<32x64xf32>, vector<160x64xf32> -> vector<160x64xf32>
      %478 = arith.addf %473, %477 : vector<160x64xf32>
      %c2_410 = arith.constant 2 : index
      %c0_411 = arith.constant 0 : index
      %479 = vector.load %arg12[%c2_410, %c0_411] : memref<232x32xf32, #tpu.memory_space<vmem>>, vector<160x32xf32>
      %c2_412 = arith.constant 2 : index
      %c0_413 = arith.constant 0 : index
      %c0_414 = arith.constant 0 : index
      %480 = vector.load %arg4[%c2_412, %c0_413, %c0_414] : memref<25x32x64xf32, #tpu.memory_space<vmem>>, vector<1x32x64xf32>
      %481 = vector.shape_cast %480 : vector<1x32x64xf32> to vector<32x64xf32>
      %cst_415 = arith.constant dense<0.000000e+00> : vector<160x64xf32>
      %482 = tpu.matmul %479, %481, %cst_415 {dimension_numbers = #tpu.dot_dimension_numbers<[1], [0], [0], [1], [0, 0, 1, 1], [], []>} : vector<160x32xf32>, vector<32x64xf32>, vector<160x64xf32> -> vector<160x64xf32>
      %483 = arith.addf %478, %482 : vector<160x64xf32>
      %c3_416 = arith.constant 3 : index
      %c0_417 = arith.constant 0 : index
      %484 = vector.load %arg12[%c3_416, %c0_417] : memref<232x32xf32, #tpu.memory_space<vmem>>, vector<160x32xf32>
      %c3_418 = arith.constant 3 : index
      %c0_419 = arith.constant 0 : index
      %c0_420 = arith.constant 0 : index
      %485 = vector.load %arg4[%c3_418, %c0_419, %c0_420] : memref<25x32x64xf32, #tpu.memory_space<vmem>>, vector<1x32x64xf32>
      %486 = vector.shape_cast %485 : vector<1x32x64xf32> to vector<32x64xf32>
      %cst_421 = arith.constant dense<0.000000e+00> : vector<160x64xf32>
      %487 = tpu.matmul %484, %486, %cst_421 {dimension_numbers = #tpu.dot_dimension_numbers<[1], [0], [0], [1], [0, 0, 1, 1], [], []>} : vector<160x32xf32>, vector<32x64xf32>, vector<160x64xf32> -> vector<160x64xf32>
      %488 = arith.addf %483, %487 : vector<160x64xf32>
      %c4_422 = arith.constant 4 : index
      %c0_423 = arith.constant 0 : index
      %489 = vector.load %arg12[%c4_422, %c0_423] : memref<232x32xf32, #tpu.memory_space<vmem>>, vector<160x32xf32>
      %c4_424 = arith.constant 4 : index
      %c0_425 = arith.constant 0 : index
      %c0_426 = arith.constant 0 : index
      %490 = vector.load %arg4[%c4_424, %c0_425, %c0_426] : memref<25x32x64xf32, #tpu.memory_space<vmem>>, vector<1x32x64xf32>
      %491 = vector.shape_cast %490 : vector<1x32x64xf32> to vector<32x64xf32>
      %cst_427 = arith.constant dense<0.000000e+00> : vector<160x64xf32>
      %492 = tpu.matmul %489, %491, %cst_427 {dimension_numbers = #tpu.dot_dimension_numbers<[1], [0], [0], [1], [0, 0, 1, 1], [], []>} : vector<160x32xf32>, vector<32x64xf32>, vector<160x64xf32> -> vector<160x64xf32>
      %493 = arith.addf %488, %492 : vector<160x64xf32>
      %c16_428 = arith.constant 16 : index
      %c0_429 = arith.constant 0 : index
      %494 = vector.load %arg12[%c16_428, %c0_429] : memref<232x32xf32, #tpu.memory_space<vmem>>, vector<160x32xf32>
      %c5_430 = arith.constant 5 : index
      %c0_431 = arith.constant 0 : index
      %c0_432 = arith.constant 0 : index
      %495 = vector.load %arg4[%c5_430, %c0_431, %c0_432] : memref<25x32x64xf32, #tpu.memory_space<vmem>>, vector<1x32x64xf32>
      %496 = vector.shape_cast %495 : vector<1x32x64xf32> to vector<32x64xf32>
      %cst_433 = arith.constant dense<0.000000e+00> : vector<160x64xf32>
      %497 = tpu.matmul %494, %496, %cst_433 {dimension_numbers = #tpu.dot_dimension_numbers<[1], [0], [0], [1], [0, 0, 1, 1], [], []>} : vector<160x32xf32>, vector<32x64xf32>, vector<160x64xf32> -> vector<160x64xf32>
      %498 = arith.addf %493, %497 : vector<160x64xf32>
      %c17_434 = arith.constant 17 : index
      %c0_435 = arith.constant 0 : index
      %499 = vector.load %arg12[%c17_434, %c0_435] : memref<232x32xf32, #tpu.memory_space<vmem>>, vector<160x32xf32>
      %c6_436 = arith.constant 6 : index
      %c0_437 = arith.constant 0 : index
      %c0_438 = arith.constant 0 : index
      %500 = vector.load %arg4[%c6_436, %c0_437, %c0_438] : memref<25x32x64xf32, #tpu.memory_space<vmem>>, vector<1x32x64xf32>
      %501 = vector.shape_cast %500 : vector<1x32x64xf32> to vector<32x64xf32>
      %cst_439 = arith.constant dense<0.000000e+00> : vector<160x64xf32>
      %502 = tpu.matmul %499, %501, %cst_439 {dimension_numbers = #tpu.dot_dimension_numbers<[1], [0], [0], [1], [0, 0, 1, 1], [], []>} : vector<160x32xf32>, vector<32x64xf32>, vector<160x64xf32> -> vector<160x64xf32>
      %503 = arith.addf %498, %502 : vector<160x64xf32>
      %c18_440 = arith.constant 18 : index
      %c0_441 = arith.constant 0 : index
      %504 = vector.load %arg12[%c18_440, %c0_441] : memref<232x32xf32, #tpu.memory_space<vmem>>, vector<160x32xf32>
      %c7_442 = arith.constant 7 : index
      %c0_443 = arith.constant 0 : index
      %c0_444 = arith.constant 0 : index
      %505 = vector.load %arg4[%c7_442, %c0_443, %c0_444] : memref<25x32x64xf32, #tpu.memory_space<vmem>>, vector<1x32x64xf32>
      %506 = vector.shape_cast %505 : vector<1x32x64xf32> to vector<32x64xf32>
      %cst_445 = arith.constant dense<0.000000e+00> : vector<160x64xf32>
      %507 = tpu.matmul %504, %506, %cst_445 {dimension_numbers = #tpu.dot_dimension_numbers<[1], [0], [0], [1], [0, 0, 1, 1], [], []>} : vector<160x32xf32>, vector<32x64xf32>, vector<160x64xf32> -> vector<160x64xf32>
      %508 = arith.addf %503, %507 : vector<160x64xf32>
      %c19_446 = arith.constant 19 : index
      %c0_447 = arith.constant 0 : index
      %509 = vector.load %arg12[%c19_446, %c0_447] : memref<232x32xf32, #tpu.memory_space<vmem>>, vector<160x32xf32>
      %c8_448 = arith.constant 8 : index
      %c0_449 = arith.constant 0 : index
      %c0_450 = arith.constant 0 : index
      %510 = vector.load %arg4[%c8_448, %c0_449, %c0_450] : memref<25x32x64xf32, #tpu.memory_space<vmem>>, vector<1x32x64xf32>
      %511 = vector.shape_cast %510 : vector<1x32x64xf32> to vector<32x64xf32>
      %cst_451 = arith.constant dense<0.000000e+00> : vector<160x64xf32>
      %512 = tpu.matmul %509, %511, %cst_451 {dimension_numbers = #tpu.dot_dimension_numbers<[1], [0], [0], [1], [0, 0, 1, 1], [], []>} : vector<160x32xf32>, vector<32x64xf32>, vector<160x64xf32> -> vector<160x64xf32>
      %513 = arith.addf %508, %512 : vector<160x64xf32>
      %c20_452 = arith.constant 20 : index
      %c0_453 = arith.constant 0 : index
      %514 = vector.load %arg12[%c20_452, %c0_453] : memref<232x32xf32, #tpu.memory_space<vmem>>, vector<160x32xf32>
      %c9_454 = arith.constant 9 : index
      %c0_455 = arith.constant 0 : index
      %c0_456 = arith.constant 0 : index
      %515 = vector.load %arg4[%c9_454, %c0_455, %c0_456] : memref<25x32x64xf32, #tpu.memory_space<vmem>>, vector<1x32x64xf32>
      %516 = vector.shape_cast %515 : vector<1x32x64xf32> to vector<32x64xf32>
      %cst_457 = arith.constant dense<0.000000e+00> : vector<160x64xf32>
      %517 = tpu.matmul %514, %516, %cst_457 {dimension_numbers = #tpu.dot_dimension_numbers<[1], [0], [0], [1], [0, 0, 1, 1], [], []>} : vector<160x32xf32>, vector<32x64xf32>, vector<160x64xf32> -> vector<160x64xf32>
      %518 = arith.addf %513, %517 : vector<160x64xf32>
      %c32_458 = arith.constant 32 : index
      %c0_459 = arith.constant 0 : index
      %519 = vector.load %arg12[%c32_458, %c0_459] : memref<232x32xf32, #tpu.memory_space<vmem>>, vector<160x32xf32>
      %c10_460 = arith.constant 10 : index
      %c0_461 = arith.constant 0 : index
      %c0_462 = arith.constant 0 : index
      %520 = vector.load %arg4[%c10_460, %c0_461, %c0_462] : memref<25x32x64xf32, #tpu.memory_space<vmem>>, vector<1x32x64xf32>
      %521 = vector.shape_cast %520 : vector<1x32x64xf32> to vector<32x64xf32>
      %cst_463 = arith.constant dense<0.000000e+00> : vector<160x64xf32>
      %522 = tpu.matmul %519, %521, %cst_463 {dimension_numbers = #tpu.dot_dimension_numbers<[1], [0], [0], [1], [0, 0, 1, 1], [], []>} : vector<160x32xf32>, vector<32x64xf32>, vector<160x64xf32> -> vector<160x64xf32>
      %523 = arith.addf %518, %522 : vector<160x64xf32>
      %c33_464 = arith.constant 33 : index
      %c0_465 = arith.constant 0 : index
      %524 = vector.load %arg12[%c33_464, %c0_465] : memref<232x32xf32, #tpu.memory_space<vmem>>, vector<160x32xf32>
      %c11_466 = arith.constant 11 : index
      %c0_467 = arith.constant 0 : index
      %c0_468 = arith.constant 0 : index
      %525 = vector.load %arg4[%c11_466, %c0_467, %c0_468] : memref<25x32x64xf32, #tpu.memory_space<vmem>>, vector<1x32x64xf32>
      %526 = vector.shape_cast %525 : vector<1x32x64xf32> to vector<32x64xf32>
      %cst_469 = arith.constant dense<0.000000e+00> : vector<160x64xf32>
      %527 = tpu.matmul %524, %526, %cst_469 {dimension_numbers = #tpu.dot_dimension_numbers<[1], [0], [0], [1], [0, 0, 1, 1], [], []>} : vector<160x32xf32>, vector<32x64xf32>, vector<160x64xf32> -> vector<160x64xf32>
      %528 = arith.addf %523, %527 : vector<160x64xf32>
      %c34_470 = arith.constant 34 : index
      %c0_471 = arith.constant 0 : index
      %529 = vector.load %arg12[%c34_470, %c0_471] : memref<232x32xf32, #tpu.memory_space<vmem>>, vector<160x32xf32>
      %c12_472 = arith.constant 12 : index
      %c0_473 = arith.constant 0 : index
      %c0_474 = arith.constant 0 : index
      %530 = vector.load %arg4[%c12_472, %c0_473, %c0_474] : memref<25x32x64xf32, #tpu.memory_space<vmem>>, vector<1x32x64xf32>
      %531 = vector.shape_cast %530 : vector<1x32x64xf32> to vector<32x64xf32>
      %cst_475 = arith.constant dense<0.000000e+00> : vector<160x64xf32>
      %532 = tpu.matmul %529, %531, %cst_475 {dimension_numbers = #tpu.dot_dimension_numbers<[1], [0], [0], [1], [0, 0, 1, 1], [], []>} : vector<160x32xf32>, vector<32x64xf32>, vector<160x64xf32> -> vector<160x64xf32>
      %533 = arith.addf %528, %532 : vector<160x64xf32>
      %c35_476 = arith.constant 35 : index
      %c0_477 = arith.constant 0 : index
      %534 = vector.load %arg12[%c35_476, %c0_477] : memref<232x32xf32, #tpu.memory_space<vmem>>, vector<160x32xf32>
      %c13_478 = arith.constant 13 : index
      %c0_479 = arith.constant 0 : index
      %c0_480 = arith.constant 0 : index
      %535 = vector.load %arg4[%c13_478, %c0_479, %c0_480] : memref<25x32x64xf32, #tpu.memory_space<vmem>>, vector<1x32x64xf32>
      %536 = vector.shape_cast %535 : vector<1x32x64xf32> to vector<32x64xf32>
      %cst_481 = arith.constant dense<0.000000e+00> : vector<160x64xf32>
      %537 = tpu.matmul %534, %536, %cst_481 {dimension_numbers = #tpu.dot_dimension_numbers<[1], [0], [0], [1], [0, 0, 1, 1], [], []>} : vector<160x32xf32>, vector<32x64xf32>, vector<160x64xf32> -> vector<160x64xf32>
      %538 = arith.addf %533, %537 : vector<160x64xf32>
      %c36_482 = arith.constant 36 : index
      %c0_483 = arith.constant 0 : index
      %539 = vector.load %arg12[%c36_482, %c0_483] : memref<232x32xf32, #tpu.memory_space<vmem>>, vector<160x32xf32>
      %c14_484 = arith.constant 14 : index
      %c0_485 = arith.constant 0 : index
      %c0_486 = arith.constant 0 : index
      %540 = vector.load %arg4[%c14_484, %c0_485, %c0_486] : memref<25x32x64xf32, #tpu.memory_space<vmem>>, vector<1x32x64xf32>
      %541 = vector.shape_cast %540 : vector<1x32x64xf32> to vector<32x64xf32>
      %cst_487 = arith.constant dense<0.000000e+00> : vector<160x64xf32>
      %542 = tpu.matmul %539, %541, %cst_487 {dimension_numbers = #tpu.dot_dimension_numbers<[1], [0], [0], [1], [0, 0, 1, 1], [], []>} : vector<160x32xf32>, vector<32x64xf32>, vector<160x64xf32> -> vector<160x64xf32>
      %543 = arith.addf %538, %542 : vector<160x64xf32>
      %c48 = arith.constant 48 : index
      %c0_488 = arith.constant 0 : index
      %544 = vector.load %arg12[%c48, %c0_488] : memref<232x32xf32, #tpu.memory_space<vmem>>, vector<160x32xf32>
      %c15_489 = arith.constant 15 : index
      %c0_490 = arith.constant 0 : index
      %c0_491 = arith.constant 0 : index
      %545 = vector.load %arg4[%c15_489, %c0_490, %c0_491] : memref<25x32x64xf32, #tpu.memory_space<vmem>>, vector<1x32x64xf32>
      %546 = vector.shape_cast %545 : vector<1x32x64xf32> to vector<32x64xf32>
      %cst_492 = arith.constant dense<0.000000e+00> : vector<160x64xf32>
      %547 = tpu.matmul %544, %546, %cst_492 {dimension_numbers = #tpu.dot_dimension_numbers<[1], [0], [0], [1], [0, 0, 1, 1], [], []>} : vector<160x32xf32>, vector<32x64xf32>, vector<160x64xf32> -> vector<160x64xf32>
      %548 = arith.addf %543, %547 : vector<160x64xf32>
      %c49 = arith.constant 49 : index
      %c0_493 = arith.constant 0 : index
      %549 = vector.load %arg12[%c49, %c0_493] : memref<232x32xf32, #tpu.memory_space<vmem>>, vector<160x32xf32>
      %c16_494 = arith.constant 16 : index
      %c0_495 = arith.constant 0 : index
      %c0_496 = arith.constant 0 : index
      %550 = vector.load %arg4[%c16_494, %c0_495, %c0_496] : memref<25x32x64xf32, #tpu.memory_space<vmem>>, vector<1x32x64xf32>
      %551 = vector.shape_cast %550 : vector<1x32x64xf32> to vector<32x64xf32>
      %cst_497 = arith.constant dense<0.000000e+00> : vector<160x64xf32>
      %552 = tpu.matmul %549, %551, %cst_497 {dimension_numbers = #tpu.dot_dimension_numbers<[1], [0], [0], [1], [0, 0, 1, 1], [], []>} : vector<160x32xf32>, vector<32x64xf32>, vector<160x64xf32> -> vector<160x64xf32>
      %553 = arith.addf %548, %552 : vector<160x64xf32>
      %c50 = arith.constant 50 : index
      %c0_498 = arith.constant 0 : index
      %554 = vector.load %arg12[%c50, %c0_498] : memref<232x32xf32, #tpu.memory_space<vmem>>, vector<160x32xf32>
      %c17_499 = arith.constant 17 : index
      %c0_500 = arith.constant 0 : index
      %c0_501 = arith.constant 0 : index
      %555 = vector.load %arg4[%c17_499, %c0_500, %c0_501] : memref<25x32x64xf32, #tpu.memory_space<vmem>>, vector<1x32x64xf32>
      %556 = vector.shape_cast %555 : vector<1x32x64xf32> to vector<32x64xf32>
      %cst_502 = arith.constant dense<0.000000e+00> : vector<160x64xf32>
      %557 = tpu.matmul %554, %556, %cst_502 {dimension_numbers = #tpu.dot_dimension_numbers<[1], [0], [0], [1], [0, 0, 1, 1], [], []>} : vector<160x32xf32>, vector<32x64xf32>, vector<160x64xf32> -> vector<160x64xf32>
      %558 = arith.addf %553, %557 : vector<160x64xf32>
      %c51 = arith.constant 51 : index
      %c0_503 = arith.constant 0 : index
      %559 = vector.load %arg12[%c51, %c0_503] : memref<232x32xf32, #tpu.memory_space<vmem>>, vector<160x32xf32>
      %c18_504 = arith.constant 18 : index
      %c0_505 = arith.constant 0 : index
      %c0_506 = arith.constant 0 : index
      %560 = vector.load %arg4[%c18_504, %c0_505, %c0_506] : memref<25x32x64xf32, #tpu.memory_space<vmem>>, vector<1x32x64xf32>
      %561 = vector.shape_cast %560 : vector<1x32x64xf32> to vector<32x64xf32>
      %cst_507 = arith.constant dense<0.000000e+00> : vector<160x64xf32>
      %562 = tpu.matmul %559, %561, %cst_507 {dimension_numbers = #tpu.dot_dimension_numbers<[1], [0], [0], [1], [0, 0, 1, 1], [], []>} : vector<160x32xf32>, vector<32x64xf32>, vector<160x64xf32> -> vector<160x64xf32>
      %563 = arith.addf %558, %562 : vector<160x64xf32>
      %c52 = arith.constant 52 : index
      %c0_508 = arith.constant 0 : index
      %564 = vector.load %arg12[%c52, %c0_508] : memref<232x32xf32, #tpu.memory_space<vmem>>, vector<160x32xf32>
      %c19_509 = arith.constant 19 : index
      %c0_510 = arith.constant 0 : index
      %c0_511 = arith.constant 0 : index
      %565 = vector.load %arg4[%c19_509, %c0_510, %c0_511] : memref<25x32x64xf32, #tpu.memory_space<vmem>>, vector<1x32x64xf32>
      %566 = vector.shape_cast %565 : vector<1x32x64xf32> to vector<32x64xf32>
      %cst_512 = arith.constant dense<0.000000e+00> : vector<160x64xf32>
      %567 = tpu.matmul %564, %566, %cst_512 {dimension_numbers = #tpu.dot_dimension_numbers<[1], [0], [0], [1], [0, 0, 1, 1], [], []>} : vector<160x32xf32>, vector<32x64xf32>, vector<160x64xf32> -> vector<160x64xf32>
      %568 = arith.addf %563, %567 : vector<160x64xf32>
      %c64_513 = arith.constant 64 : index
      %c0_514 = arith.constant 0 : index
      %569 = vector.load %arg12[%c64_513, %c0_514] : memref<232x32xf32, #tpu.memory_space<vmem>>, vector<160x32xf32>
      %c20_515 = arith.constant 20 : index
      %c0_516 = arith.constant 0 : index
      %c0_517 = arith.constant 0 : index
      %570 = vector.load %arg4[%c20_515, %c0_516, %c0_517] : memref<25x32x64xf32, #tpu.memory_space<vmem>>, vector<1x32x64xf32>
      %571 = vector.shape_cast %570 : vector<1x32x64xf32> to vector<32x64xf32>
      %cst_518 = arith.constant dense<0.000000e+00> : vector<160x64xf32>
      %572 = tpu.matmul %569, %571, %cst_518 {dimension_numbers = #tpu.dot_dimension_numbers<[1], [0], [0], [1], [0, 0, 1, 1], [], []>} : vector<160x32xf32>, vector<32x64xf32>, vector<160x64xf32> -> vector<160x64xf32>
      %573 = arith.addf %568, %572 : vector<160x64xf32>
      %c65 = arith.constant 65 : index
      %c0_519 = arith.constant 0 : index
      %574 = vector.load %arg12[%c65, %c0_519] : memref<232x32xf32, #tpu.memory_space<vmem>>, vector<160x32xf32>
      %c21_520 = arith.constant 21 : index
      %c0_521 = arith.constant 0 : index
      %c0_522 = arith.constant 0 : index
      %575 = vector.load %arg4[%c21_520, %c0_521, %c0_522] : memref<25x32x64xf32, #tpu.memory_space<vmem>>, vector<1x32x64xf32>
      %576 = vector.shape_cast %575 : vector<1x32x64xf32> to vector<32x64xf32>
      %cst_523 = arith.constant dense<0.000000e+00> : vector<160x64xf32>
      %577 = tpu.matmul %574, %576, %cst_523 {dimension_numbers = #tpu.dot_dimension_numbers<[1], [0], [0], [1], [0, 0, 1, 1], [], []>} : vector<160x32xf32>, vector<32x64xf32>, vector<160x64xf32> -> vector<160x64xf32>
      %578 = arith.addf %573, %577 : vector<160x64xf32>
      %c66 = arith.constant 66 : index
      %c0_524 = arith.constant 0 : index
      %579 = vector.load %arg12[%c66, %c0_524] : memref<232x32xf32, #tpu.memory_space<vmem>>, vector<160x32xf32>
      %c22_525 = arith.constant 22 : index
      %c0_526 = arith.constant 0 : index
      %c0_527 = arith.constant 0 : index
      %580 = vector.load %arg4[%c22_525, %c0_526, %c0_527] : memref<25x32x64xf32, #tpu.memory_space<vmem>>, vector<1x32x64xf32>
      %581 = vector.shape_cast %580 : vector<1x32x64xf32> to vector<32x64xf32>
      %cst_528 = arith.constant dense<0.000000e+00> : vector<160x64xf32>
      %582 = tpu.matmul %579, %581, %cst_528 {dimension_numbers = #tpu.dot_dimension_numbers<[1], [0], [0], [1], [0, 0, 1, 1], [], []>} : vector<160x32xf32>, vector<32x64xf32>, vector<160x64xf32> -> vector<160x64xf32>
      %583 = arith.addf %578, %582 : vector<160x64xf32>
      %c67 = arith.constant 67 : index
      %c0_529 = arith.constant 0 : index
      %584 = vector.load %arg12[%c67, %c0_529] : memref<232x32xf32, #tpu.memory_space<vmem>>, vector<160x32xf32>
      %c23_530 = arith.constant 23 : index
      %c0_531 = arith.constant 0 : index
      %c0_532 = arith.constant 0 : index
      %585 = vector.load %arg4[%c23_530, %c0_531, %c0_532] : memref<25x32x64xf32, #tpu.memory_space<vmem>>, vector<1x32x64xf32>
      %586 = vector.shape_cast %585 : vector<1x32x64xf32> to vector<32x64xf32>
      %cst_533 = arith.constant dense<0.000000e+00> : vector<160x64xf32>
      %587 = tpu.matmul %584, %586, %cst_533 {dimension_numbers = #tpu.dot_dimension_numbers<[1], [0], [0], [1], [0, 0, 1, 1], [], []>} : vector<160x32xf32>, vector<32x64xf32>, vector<160x64xf32> -> vector<160x64xf32>
      %588 = arith.addf %583, %587 : vector<160x64xf32>
      %c68 = arith.constant 68 : index
      %c0_534 = arith.constant 0 : index
      %589 = vector.load %arg12[%c68, %c0_534] : memref<232x32xf32, #tpu.memory_space<vmem>>, vector<160x32xf32>
      %c24_535 = arith.constant 24 : index
      %c0_536 = arith.constant 0 : index
      %c0_537 = arith.constant 0 : index
      %590 = vector.load %arg4[%c24_535, %c0_536, %c0_537] : memref<25x32x64xf32, #tpu.memory_space<vmem>>, vector<1x32x64xf32>
      %591 = vector.shape_cast %590 : vector<1x32x64xf32> to vector<32x64xf32>
      %cst_538 = arith.constant dense<0.000000e+00> : vector<160x64xf32>
      %592 = tpu.matmul %589, %591, %cst_538 {dimension_numbers = #tpu.dot_dimension_numbers<[1], [0], [0], [1], [0, 0, 1, 1], [], []>} : vector<160x32xf32>, vector<32x64xf32>, vector<160x64xf32> -> vector<160x64xf32>
      %593 = arith.addf %588, %592 : vector<160x64xf32>
      %cst_539 = arith.constant 0.000000e+00 : f32
      %594 = vector.broadcast %cst_539 : f32 to vector<160x64xf32>
      %595 = arith.maximumf %593, %594 : vector<160x64xf32>
      %596 = vector.shape_cast %595 : vector<160x64xf32> to vector<5x2x16x64xf32>
      %cst_540 = arith.constant dense<0xFF800000> : vector<5x16x64xf32>
      %597 = vector.multi_reduction <maximumf>, %596, %cst_540 [1] : vector<5x2x16x64xf32> to vector<5x16x64xf32>
      %598 = vector.shape_cast %597 : vector<5x16x64xf32> to vector<80x64xf32>
      %c0_541 = arith.constant 0 : index
      %c0_542 = arith.constant 0 : index
      %599 = vector.load %arg13[%c0_541, %c0_542] : memref<80x64xf32, #tpu.memory_space<vmem>>, vector<80x64xf32>
      tpu.vector_store %arg13[%c0_541, %c0_542], %598 {strides = array<i32>} : memref<80x64xf32, #tpu.memory_space<vmem>>, vector<80x64xf32>,
      %c0_543 = arith.constant 0 : index
      %c0_544 = arith.constant 0 : index
      %600 = tpu.strided_load %arg13[%c0_543, %c0_544] {strides = array<i32: 2, 1>} : memref<80x64xf32, #tpu.memory_space<vmem>>, vector<40x64xf32>
      %c1_545 = arith.constant 1 : index
      %c0_546 = arith.constant 0 : index
      %601 = tpu.strided_load %arg13[%c1_545, %c0_546] {strides = array<i32: 2, 1>} : memref<80x64xf32, #tpu.memory_space<vmem>>, vector<40x64xf32>
      %602 = arith.maximumf %600, %601 : vector<40x64xf32>
      %c40_i32 = arith.constant 40 : i32
      %603 = arith.muli %arg15, %c40_i32 : i32
      %604 = tpu.assume_multiple %603, 8 : i32
      %605 = arith.index_cast %604 : i32 to index
      %c0_547 = arith.constant 0 : index
      %606 = vector.load %arg14[%605, %c0_547] : memref<80x64xf32, #tpu.memory_space<vmem>>, vector<40x64xf32>
      tpu.vector_store %arg14[%605, %c0_547], %602 {strides = array<i32>} : memref<80x64xf32, #tpu.memory_space<vmem>>, vector<40x64xf32>,
    }
    %c2_i32_0 = arith.constant 2 : i32
    %c0_1 = arith.constant 0 : index
    %c0_2 = arith.constant 0 : index
    %3 = tpu.strided_load %arg14[%c0_1, %c0_2] {strides = array<i32: 40, 1>} : memref<80x64xf32, #tpu.memory_space<vmem>>, vector<2x64xf32>
    %c0_3 = arith.constant 0 : index
    %c0_4 = arith.constant 0 : index
    %c0_5 = arith.constant 0 : index
    %4 = vector.load %arg6[%c0_3, %c0_4, %c0_5] : memref<25x64x64xf32, #tpu.memory_space<vmem>>, vector<1x64x64xf32>
    %5 = vector.shape_cast %4 : vector<1x64x64xf32> to vector<64x64xf32>
    %cst_6 = arith.constant dense<0.000000e+00> : vector<2x64xf32>
    %6 = tpu.matmul %3, %5, %cst_6 {dimension_numbers = #tpu.dot_dimension_numbers<[1], [0], [0], [1], [0, 0, 1, 1], [], []>} : vector<2x64xf32>, vector<64x64xf32>, vector<2x64xf32> -> vector<2x64xf32>
    %c0_7 = arith.constant 0 : index
    %c0_8 = arith.constant 0 : index
    %7 = vector.load %arg7[%c0_7, %c0_8] : memref<1x64xf32, #tpu.memory_space<vmem>>, vector<1x64xf32>
    %8 = vector.broadcast %7 : vector<1x64xf32> to vector<2x64xf32>
    %9 = arith.addf %6, %8 : vector<2x64xf32>
    %c1 = arith.constant 1 : index
    %c0_9 = arith.constant 0 : index
    %10 = tpu.strided_load %arg14[%c1, %c0_9] {strides = array<i32: 40, 1>} : memref<80x64xf32, #tpu.memory_space<vmem>>, vector<2x64xf32>
    %c1_10 = arith.constant 1 : index
    %c0_11 = arith.constant 0 : index
    %c0_12 = arith.constant 0 : index
    %11 = vector.load %arg6[%c1_10, %c0_11, %c0_12] : memref<25x64x64xf32, #tpu.memory_space<vmem>>, vector<1x64x64xf32>
    %12 = vector.shape_cast %11 : vector<1x64x64xf32> to vector<64x64xf32>
    %cst_13 = arith.constant dense<0.000000e+00> : vector<2x64xf32>
    %13 = tpu.matmul %10, %12, %cst_13 {dimension_numbers = #tpu.dot_dimension_numbers<[1], [0], [0], [1], [0, 0, 1, 1], [], []>} : vector<2x64xf32>, vector<64x64xf32>, vector<2x64xf32> -> vector<2x64xf32>
    %14 = arith.addf %9, %13 : vector<2x64xf32>
    %c2 = arith.constant 2 : index
    %c0_14 = arith.constant 0 : index
    %15 = tpu.strided_load %arg14[%c2, %c0_14] {strides = array<i32: 40, 1>} : memref<80x64xf32, #tpu.memory_space<vmem>>, vector<2x64xf32>
    %c2_15 = arith.constant 2 : index
    %c0_16 = arith.constant 0 : index
    %c0_17 = arith.constant 0 : index
    %16 = vector.load %arg6[%c2_15, %c0_16, %c0_17] : memref<25x64x64xf32, #tpu.memory_space<vmem>>, vector<1x64x64xf32>
    %17 = vector.shape_cast %16 : vector<1x64x64xf32> to vector<64x64xf32>
    %cst_18 = arith.constant dense<0.000000e+00> : vector<2x64xf32>
    %18 = tpu.matmul %15, %17, %cst_18 {dimension_numbers = #tpu.dot_dimension_numbers<[1], [0], [0], [1], [0, 0, 1, 1], [], []>} : vector<2x64xf32>, vector<64x64xf32>, vector<2x64xf32> -> vector<2x64xf32>
    %19 = arith.addf %14, %18 : vector<2x64xf32>
    %c3 = arith.constant 3 : index
    %c0_19 = arith.constant 0 : index
    %20 = tpu.strided_load %arg14[%c3, %c0_19] {strides = array<i32: 40, 1>} : memref<80x64xf32, #tpu.memory_space<vmem>>, vector<2x64xf32>
    %c3_20 = arith.constant 3 : index
    %c0_21 = arith.constant 0 : index
    %c0_22 = arith.constant 0 : index
    %21 = vector.load %arg6[%c3_20, %c0_21, %c0_22] : memref<25x64x64xf32, #tpu.memory_space<vmem>>, vector<1x64x64xf32>
    %22 = vector.shape_cast %21 : vector<1x64x64xf32> to vector<64x64xf32>
    %cst_23 = arith.constant dense<0.000000e+00> : vector<2x64xf32>
    %23 = tpu.matmul %20, %22, %cst_23 {dimension_numbers = #tpu.dot_dimension_numbers<[1], [0], [0], [1], [0, 0, 1, 1], [], []>} : vector<2x64xf32>, vector<64x64xf32>, vector<2x64xf32> -> vector<2x64xf32>
    %24 = arith.addf %19, %23 : vector<2x64xf32>
    %c4 = arith.constant 4 : index
    %c0_24 = arith.constant 0 : index
    %25 = tpu.strided_load %arg14[%c4, %c0_24] {strides = array<i32: 40, 1>} : memref<80x64xf32, #tpu.memory_space<vmem>>, vector<2x64xf32>
    %c4_25 = arith.constant 4 : index
    %c0_26 = arith.constant 0 : index
    %c0_27 = arith.constant 0 : index
    %26 = vector.load %arg6[%c4_25, %c0_26, %c0_27] : memref<25x64x64xf32, #tpu.memory_space<vmem>>, vector<1x64x64xf32>
    %27 = vector.shape_cast %26 : vector<1x64x64xf32> to vector<64x64xf32>
    %cst_28 = arith.constant dense<0.000000e+00> : vector<2x64xf32>
    %28 = tpu.matmul %25, %27, %cst_28 {dimension_numbers = #tpu.dot_dimension_numbers<[1], [0], [0], [1], [0, 0, 1, 1], [], []>} : vector<2x64xf32>, vector<64x64xf32>, vector<2x64xf32> -> vector<2x64xf32>
    %29 = arith.addf %24, %28 : vector<2x64xf32>
    %c8 = arith.constant 8 : index
    %c0_29 = arith.constant 0 : index
    %30 = tpu.strided_load %arg14[%c8, %c0_29] {strides = array<i32: 40, 1>} : memref<80x64xf32, #tpu.memory_space<vmem>>, vector<2x64xf32>
    %c5 = arith.constant 5 : index
    %c0_30 = arith.constant 0 : index
    %c0_31 = arith.constant 0 : index
    %31 = vector.load %arg6[%c5, %c0_30, %c0_31] : memref<25x64x64xf32, #tpu.memory_space<vmem>>, vector<1x64x64xf32>
    %32 = vector.shape_cast %31 : vector<1x64x64xf32> to vector<64x64xf32>
    %cst_32 = arith.constant dense<0.000000e+00> : vector<2x64xf32>
    %33 = tpu.matmul %30, %32, %cst_32 {dimension_numbers = #tpu.dot_dimension_numbers<[1], [0], [0], [1], [0, 0, 1, 1], [], []>} : vector<2x64xf32>, vector<64x64xf32>, vector<2x64xf32> -> vector<2x64xf32>
    %34 = arith.addf %29, %33 : vector<2x64xf32>
    %c9 = arith.constant 9 : index
    %c0_33 = arith.constant 0 : index
    %35 = tpu.strided_load %arg14[%c9, %c0_33] {strides = array<i32: 40, 1>} : memref<80x64xf32, #tpu.memory_space<vmem>>, vector<2x64xf32>
    %c6 = arith.constant 6 : index
    %c0_34 = arith.constant 0 : index
    %c0_35 = arith.constant 0 : index
    %36 = vector.load %arg6[%c6, %c0_34, %c0_35] : memref<25x64x64xf32, #tpu.memory_space<vmem>>, vector<1x64x64xf32>
    %37 = vector.shape_cast %36 : vector<1x64x64xf32> to vector<64x64xf32>
    %cst_36 = arith.constant dense<0.000000e+00> : vector<2x64xf32>
    %38 = tpu.matmul %35, %37, %cst_36 {dimension_numbers = #tpu.dot_dimension_numbers<[1], [0], [0], [1], [0, 0, 1, 1], [], []>} : vector<2x64xf32>, vector<64x64xf32>, vector<2x64xf32> -> vector<2x64xf32>
    %39 = arith.addf %34, %38 : vector<2x64xf32>
    %c10 = arith.constant 10 : index
    %c0_37 = arith.constant 0 : index
    %40 = tpu.strided_load %arg14[%c10, %c0_37] {strides = array<i32: 40, 1>} : memref<80x64xf32, #tpu.memory_space<vmem>>, vector<2x64xf32>
    %c7 = arith.constant 7 : index
    %c0_38 = arith.constant 0 : index
    %c0_39 = arith.constant 0 : index
    %41 = vector.load %arg6[%c7, %c0_38, %c0_39] : memref<25x64x64xf32, #tpu.memory_space<vmem>>, vector<1x64x64xf32>
    %42 = vector.shape_cast %41 : vector<1x64x64xf32> to vector<64x64xf32>
    %cst_40 = arith.constant dense<0.000000e+00> : vector<2x64xf32>
    %43 = tpu.matmul %40, %42, %cst_40 {dimension_numbers = #tpu.dot_dimension_numbers<[1], [0], [0], [1], [0, 0, 1, 1], [], []>} : vector<2x64xf32>, vector<64x64xf32>, vector<2x64xf32> -> vector<2x64xf32>
    %44 = arith.addf %39, %43 : vector<2x64xf32>
    %c11 = arith.constant 11 : index
    %c0_41 = arith.constant 0 : index
    %45 = tpu.strided_load %arg14[%c11, %c0_41] {strides = array<i32: 40, 1>} : memref<80x64xf32, #tpu.memory_space<vmem>>, vector<2x64xf32>
    %c8_42 = arith.constant 8 : index
    %c0_43 = arith.constant 0 : index
    %c0_44 = arith.constant 0 : index
    %46 = vector.load %arg6[%c8_42, %c0_43, %c0_44] : memref<25x64x64xf32, #tpu.memory_space<vmem>>, vector<1x64x64xf32>
    %47 = vector.shape_cast %46 : vector<1x64x64xf32> to vector<64x64xf32>
    %cst_45 = arith.constant dense<0.000000e+00> : vector<2x64xf32>
    %48 = tpu.matmul %45, %47, %cst_45 {dimension_numbers = #tpu.dot_dimension_numbers<[1], [0], [0], [1], [0, 0, 1, 1], [], []>} : vector<2x64xf32>, vector<64x64xf32>, vector<2x64xf32> -> vector<2x64xf32>
    %49 = arith.addf %44, %48 : vector<2x64xf32>
    %c12 = arith.constant 12 : index
    %c0_46 = arith.constant 0 : index
    %50 = tpu.strided_load %arg14[%c12, %c0_46] {strides = array<i32: 40, 1>} : memref<80x64xf32, #tpu.memory_space<vmem>>, vector<2x64xf32>
    %c9_47 = arith.constant 9 : index
    %c0_48 = arith.constant 0 : index
    %c0_49 = arith.constant 0 : index
    %51 = vector.load %arg6[%c9_47, %c0_48, %c0_49] : memref<25x64x64xf32, #tpu.memory_space<vmem>>, vector<1x64x64xf32>
    %52 = vector.shape_cast %51 : vector<1x64x64xf32> to vector<64x64xf32>
    %cst_50 = arith.constant dense<0.000000e+00> : vector<2x64xf32>
    %53 = tpu.matmul %50, %52, %cst_50 {dimension_numbers = #tpu.dot_dimension_numbers<[1], [0], [0], [1], [0, 0, 1, 1], [], []>} : vector<2x64xf32>, vector<64x64xf32>, vector<2x64xf32> -> vector<2x64xf32>
    %54 = arith.addf %49, %53 : vector<2x64xf32>
    %c16 = arith.constant 16 : index
    %c0_51 = arith.constant 0 : index
    %55 = tpu.strided_load %arg14[%c16, %c0_51] {strides = array<i32: 40, 1>} : memref<80x64xf32, #tpu.memory_space<vmem>>, vector<2x64xf32>
    %c10_52 = arith.constant 10 : index
    %c0_53 = arith.constant 0 : index
    %c0_54 = arith.constant 0 : index
    %56 = vector.load %arg6[%c10_52, %c0_53, %c0_54] : memref<25x64x64xf32, #tpu.memory_space<vmem>>, vector<1x64x64xf32>
    %57 = vector.shape_cast %56 : vector<1x64x64xf32> to vector<64x64xf32>
    %cst_55 = arith.constant dense<0.000000e+00> : vector<2x64xf32>
    %58 = tpu.matmul %55, %57, %cst_55 {dimension_numbers = #tpu.dot_dimension_numbers<[1], [0], [0], [1], [0, 0, 1, 1], [], []>} : vector<2x64xf32>, vector<64x64xf32>, vector<2x64xf32> -> vector<2x64xf32>
    %59 = arith.addf %54, %58 : vector<2x64xf32>
    %c17 = arith.constant 17 : index
    %c0_56 = arith.constant 0 : index
    %60 = tpu.strided_load %arg14[%c17, %c0_56] {strides = array<i32: 40, 1>} : memref<80x64xf32, #tpu.memory_space<vmem>>, vector<2x64xf32>
    %c11_57 = arith.constant 11 : index
    %c0_58 = arith.constant 0 : index
    %c0_59 = arith.constant 0 : index
    %61 = vector.load %arg6[%c11_57, %c0_58, %c0_59] : memref<25x64x64xf32, #tpu.memory_space<vmem>>, vector<1x64x64xf32>
    %62 = vector.shape_cast %61 : vector<1x64x64xf32> to vector<64x64xf32>
    %cst_60 = arith.constant dense<0.000000e+00> : vector<2x64xf32>
    %63 = tpu.matmul %60, %62, %cst_60 {dimension_numbers = #tpu.dot_dimension_numbers<[1], [0], [0], [1], [0, 0, 1, 1], [], []>} : vector<2x64xf32>, vector<64x64xf32>, vector<2x64xf32> -> vector<2x64xf32>
    %64 = arith.addf %59, %63 : vector<2x64xf32>
    %c18 = arith.constant 18 : index
    %c0_61 = arith.constant 0 : index
    %65 = tpu.strided_load %arg14[%c18, %c0_61] {strides = array<i32: 40, 1>} : memref<80x64xf32, #tpu.memory_space<vmem>>, vector<2x64xf32>
    %c12_62 = arith.constant 12 : index
    %c0_63 = arith.constant 0 : index
    %c0_64 = arith.constant 0 : index
    %66 = vector.load %arg6[%c12_62, %c0_63, %c0_64] : memref<25x64x64xf32, #tpu.memory_space<vmem>>, vector<1x64x64xf32>
    %67 = vector.shape_cast %66 : vector<1x64x64xf32> to vector<64x64xf32>
    %cst_65 = arith.constant dense<0.000000e+00> : vector<2x64xf32>
    %68 = tpu.matmul %65, %67, %cst_65 {dimension_numbers = #tpu.dot_dimension_numbers<[1], [0], [0], [1], [0, 0, 1, 1], [], []>} : vector<2x64xf32>, vector<64x64xf32>, vector<2x64xf32> -> vector<2x64xf32>
    %69 = arith.addf %64, %68 : vector<2x64xf32>
    %c19 = arith.constant 19 : index
    %c0_66 = arith.constant 0 : index
    %70 = tpu.strided_load %arg14[%c19, %c0_66] {strides = array<i32: 40, 1>} : memref<80x64xf32, #tpu.memory_space<vmem>>, vector<2x64xf32>
    %c13 = arith.constant 13 : index
    %c0_67 = arith.constant 0 : index
    %c0_68 = arith.constant 0 : index
    %71 = vector.load %arg6[%c13, %c0_67, %c0_68] : memref<25x64x64xf32, #tpu.memory_space<vmem>>, vector<1x64x64xf32>
    %72 = vector.shape_cast %71 : vector<1x64x64xf32> to vector<64x64xf32>
    %cst_69 = arith.constant dense<0.000000e+00> : vector<2x64xf32>
    %73 = tpu.matmul %70, %72, %cst_69 {dimension_numbers = #tpu.dot_dimension_numbers<[1], [0], [0], [1], [0, 0, 1, 1], [], []>} : vector<2x64xf32>, vector<64x64xf32>, vector<2x64xf32> -> vector<2x64xf32>
    %74 = arith.addf %69, %73 : vector<2x64xf32>
    %c20 = arith.constant 20 : index
    %c0_70 = arith.constant 0 : index
    %75 = tpu.strided_load %arg14[%c20, %c0_70] {strides = array<i32: 40, 1>} : memref<80x64xf32, #tpu.memory_space<vmem>>, vector<2x64xf32>
    %c14 = arith.constant 14 : index
    %c0_71 = arith.constant 0 : index
    %c0_72 = arith.constant 0 : index
    %76 = vector.load %arg6[%c14, %c0_71, %c0_72] : memref<25x64x64xf32, #tpu.memory_space<vmem>>, vector<1x64x64xf32>
    %77 = vector.shape_cast %76 : vector<1x64x64xf32> to vector<64x64xf32>
    %cst_73 = arith.constant dense<0.000000e+00> : vector<2x64xf32>
    %78 = tpu.matmul %75, %77, %cst_73 {dimension_numbers = #tpu.dot_dimension_numbers<[1], [0], [0], [1], [0, 0, 1, 1], [], []>} : vector<2x64xf32>, vector<64x64xf32>, vector<2x64xf32> -> vector<2x64xf32>
    %79 = arith.addf %74, %78 : vector<2x64xf32>
    %c24 = arith.constant 24 : index
    %c0_74 = arith.constant 0 : index
    %80 = tpu.strided_load %arg14[%c24, %c0_74] {strides = array<i32: 40, 1>} : memref<80x64xf32, #tpu.memory_space<vmem>>, vector<2x64xf32>
    %c15 = arith.constant 15 : index
    %c0_75 = arith.constant 0 : index
    %c0_76 = arith.constant 0 : index
    %81 = vector.load %arg6[%c15, %c0_75, %c0_76] : memref<25x64x64xf32, #tpu.memory_space<vmem>>, vector<1x64x64xf32>
    %82 = vector.shape_cast %81 : vector<1x64x64xf32> to vector<64x64xf32>
    %cst_77 = arith.constant dense<0.000000e+00> : vector<2x64xf32>
    %83 = tpu.matmul %80, %82, %cst_77 {dimension_numbers = #tpu.dot_dimension_numbers<[1], [0], [0], [1], [0, 0, 1, 1], [], []>} : vector<2x64xf32>, vector<64x64xf32>, vector<2x64xf32> -> vector<2x64xf32>
    %84 = arith.addf %79, %83 : vector<2x64xf32>
    %c25 = arith.constant 25 : index
    %c0_78 = arith.constant 0 : index
    %85 = tpu.strided_load %arg14[%c25, %c0_78] {strides = array<i32: 40, 1>} : memref<80x64xf32, #tpu.memory_space<vmem>>, vector<2x64xf32>
    %c16_79 = arith.constant 16 : index
    %c0_80 = arith.constant 0 : index
    %c0_81 = arith.constant 0 : index
    %86 = vector.load %arg6[%c16_79, %c0_80, %c0_81] : memref<25x64x64xf32, #tpu.memory_space<vmem>>, vector<1x64x64xf32>
    %87 = vector.shape_cast %86 : vector<1x64x64xf32> to vector<64x64xf32>
    %cst_82 = arith.constant dense<0.000000e+00> : vector<2x64xf32>
    %88 = tpu.matmul %85, %87, %cst_82 {dimension_numbers = #tpu.dot_dimension_numbers<[1], [0], [0], [1], [0, 0, 1, 1], [], []>} : vector<2x64xf32>, vector<64x64xf32>, vector<2x64xf32> -> vector<2x64xf32>
    %89 = arith.addf %84, %88 : vector<2x64xf32>
    %c26 = arith.constant 26 : index
    %c0_83 = arith.constant 0 : index
    %90 = tpu.strided_load %arg14[%c26, %c0_83] {strides = array<i32: 40, 1>} : memref<80x64xf32, #tpu.memory_space<vmem>>, vector<2x64xf32>
    %c17_84 = arith.constant 17 : index
    %c0_85 = arith.constant 0 : index
    %c0_86 = arith.constant 0 : index
    %91 = vector.load %arg6[%c17_84, %c0_85, %c0_86] : memref<25x64x64xf32, #tpu.memory_space<vmem>>, vector<1x64x64xf32>
    %92 = vector.shape_cast %91 : vector<1x64x64xf32> to vector<64x64xf32>
    %cst_87 = arith.constant dense<0.000000e+00> : vector<2x64xf32>
    %93 = tpu.matmul %90, %92, %cst_87 {dimension_numbers = #tpu.dot_dimension_numbers<[1], [0], [0], [1], [0, 0, 1, 1], [], []>} : vector<2x64xf32>, vector<64x64xf32>, vector<2x64xf32> -> vector<2x64xf32>
    %94 = arith.addf %89, %93 : vector<2x64xf32>
    %c27 = arith.constant 27 : index
    %c0_88 = arith.constant 0 : index
    %95 = tpu.strided_load %arg14[%c27, %c0_88] {strides = array<i32: 40, 1>} : memref<80x64xf32, #tpu.memory_space<vmem>>, vector<2x64xf32>
    %c18_89 = arith.constant 18 : index
    %c0_90 = arith.constant 0 : index
    %c0_91 = arith.constant 0 : index
    %96 = vector.load %arg6[%c18_89, %c0_90, %c0_91] : memref<25x64x64xf32, #tpu.memory_space<vmem>>, vector<1x64x64xf32>
    %97 = vector.shape_cast %96 : vector<1x64x64xf32> to vector<64x64xf32>
    %cst_92 = arith.constant dense<0.000000e+00> : vector<2x64xf32>
    %98 = tpu.matmul %95, %97, %cst_92 {dimension_numbers = #tpu.dot_dimension_numbers<[1], [0], [0], [1], [0, 0, 1, 1], [], []>} : vector<2x64xf32>, vector<64x64xf32>, vector<2x64xf32> -> vector<2x64xf32>
    %99 = arith.addf %94, %98 : vector<2x64xf32>
    %c28 = arith.constant 28 : index
    %c0_93 = arith.constant 0 : index
    %100 = tpu.strided_load %arg14[%c28, %c0_93] {strides = array<i32: 40, 1>} : memref<80x64xf32, #tpu.memory_space<vmem>>, vector<2x64xf32>
    %c19_94 = arith.constant 19 : index
    %c0_95 = arith.constant 0 : index
    %c0_96 = arith.constant 0 : index
    %101 = vector.load %arg6[%c19_94, %c0_95, %c0_96] : memref<25x64x64xf32, #tpu.memory_space<vmem>>, vector<1x64x64xf32>
    %102 = vector.shape_cast %101 : vector<1x64x64xf32> to vector<64x64xf32>
    %cst_97 = arith.constant dense<0.000000e+00> : vector<2x64xf32>
    %103 = tpu.matmul %100, %102, %cst_97 {dimension_numbers = #tpu.dot_dimension_numbers<[1], [0], [0], [1], [0, 0, 1, 1], [], []>} : vector<2x64xf32>, vector<64x64xf32>, vector<2x64xf32> -> vector<2x64xf32>
    %104 = arith.addf %99, %103 : vector<2x64xf32>
    %c32 = arith.constant 32 : index
    %c0_98 = arith.constant 0 : index
    %105 = tpu.strided_load %arg14[%c32, %c0_98] {strides = array<i32: 40, 1>} : memref<80x64xf32, #tpu.memory_space<vmem>>, vector<2x64xf32>
    %c20_99 = arith.constant 20 : index
    %c0_100 = arith.constant 0 : index
    %c0_101 = arith.constant 0 : index
    %106 = vector.load %arg6[%c20_99, %c0_100, %c0_101] : memref<25x64x64xf32, #tpu.memory_space<vmem>>, vector<1x64x64xf32>
    %107 = vector.shape_cast %106 : vector<1x64x64xf32> to vector<64x64xf32>
    %cst_102 = arith.constant dense<0.000000e+00> : vector<2x64xf32>
    %108 = tpu.matmul %105, %107, %cst_102 {dimension_numbers = #tpu.dot_dimension_numbers<[1], [0], [0], [1], [0, 0, 1, 1], [], []>} : vector<2x64xf32>, vector<64x64xf32>, vector<2x64xf32> -> vector<2x64xf32>
    %109 = arith.addf %104, %108 : vector<2x64xf32>
    %c33 = arith.constant 33 : index
    %c0_103 = arith.constant 0 : index
    %110 = tpu.strided_load %arg14[%c33, %c0_103] {strides = array<i32: 40, 1>} : memref<80x64xf32, #tpu.memory_space<vmem>>, vector<2x64xf32>
    %c21 = arith.constant 21 : index
    %c0_104 = arith.constant 0 : index
    %c0_105 = arith.constant 0 : index
    %111 = vector.load %arg6[%c21, %c0_104, %c0_105] : memref<25x64x64xf32, #tpu.memory_space<vmem>>, vector<1x64x64xf32>
    %112 = vector.shape_cast %111 : vector<1x64x64xf32> to vector<64x64xf32>
    %cst_106 = arith.constant dense<0.000000e+00> : vector<2x64xf32>
    %113 = tpu.matmul %110, %112, %cst_106 {dimension_numbers = #tpu.dot_dimension_numbers<[1], [0], [0], [1], [0, 0, 1, 1], [], []>} : vector<2x64xf32>, vector<64x64xf32>, vector<2x64xf32> -> vector<2x64xf32>
    %114 = arith.addf %109, %113 : vector<2x64xf32>
    %c34 = arith.constant 34 : index
    %c0_107 = arith.constant 0 : index
    %115 = tpu.strided_load %arg14[%c34, %c0_107] {strides = array<i32: 40, 1>} : memref<80x64xf32, #tpu.memory_space<vmem>>, vector<2x64xf32>
    %c22 = arith.constant 22 : index
    %c0_108 = arith.constant 0 : index
    %c0_109 = arith.constant 0 : index
    %116 = vector.load %arg6[%c22, %c0_108, %c0_109] : memref<25x64x64xf32, #tpu.memory_space<vmem>>, vector<1x64x64xf32>
    %117 = vector.shape_cast %116 : vector<1x64x64xf32> to vector<64x64xf32>
    %cst_110 = arith.constant dense<0.000000e+00> : vector<2x64xf32>
    %118 = tpu.matmul %115, %117, %cst_110 {dimension_numbers = #tpu.dot_dimension_numbers<[1], [0], [0], [1], [0, 0, 1, 1], [], []>} : vector<2x64xf32>, vector<64x64xf32>, vector<2x64xf32> -> vector<2x64xf32>
    %119 = arith.addf %114, %118 : vector<2x64xf32>
    %c35 = arith.constant 35 : index
    %c0_111 = arith.constant 0 : index
    %120 = tpu.strided_load %arg14[%c35, %c0_111] {strides = array<i32: 40, 1>} : memref<80x64xf32, #tpu.memory_space<vmem>>, vector<2x64xf32>
    %c23 = arith.constant 23 : index
    %c0_112 = arith.constant 0 : index
    %c0_113 = arith.constant 0 : index
    %121 = vector.load %arg6[%c23, %c0_112, %c0_113] : memref<25x64x64xf32, #tpu.memory_space<vmem>>, vector<1x64x64xf32>
    %122 = vector.shape_cast %121 : vector<1x64x64xf32> to vector<64x64xf32>
    %cst_114 = arith.constant dense<0.000000e+00> : vector<2x64xf32>
    %123 = tpu.matmul %120, %122, %cst_114 {dimension_numbers = #tpu.dot_dimension_numbers<[1], [0], [0], [1], [0, 0, 1, 1], [], []>} : vector<2x64xf32>, vector<64x64xf32>, vector<2x64xf32> -> vector<2x64xf32>
    %124 = arith.addf %119, %123 : vector<2x64xf32>
    %c36 = arith.constant 36 : index
    %c0_115 = arith.constant 0 : index
    %125 = tpu.strided_load %arg14[%c36, %c0_115] {strides = array<i32: 40, 1>} : memref<80x64xf32, #tpu.memory_space<vmem>>, vector<2x64xf32>
    %c24_116 = arith.constant 24 : index
    %c0_117 = arith.constant 0 : index
    %c0_118 = arith.constant 0 : index
    %126 = vector.load %arg6[%c24_116, %c0_117, %c0_118] : memref<25x64x64xf32, #tpu.memory_space<vmem>>, vector<1x64x64xf32>
    %127 = vector.shape_cast %126 : vector<1x64x64xf32> to vector<64x64xf32>
    %cst_119 = arith.constant dense<0.000000e+00> : vector<2x64xf32>
    %128 = tpu.matmul %125, %127, %cst_119 {dimension_numbers = #tpu.dot_dimension_numbers<[1], [0], [0], [1], [0, 0, 1, 1], [], []>} : vector<2x64xf32>, vector<64x64xf32>, vector<2x64xf32> -> vector<2x64xf32>
    %129 = arith.addf %124, %128 : vector<2x64xf32>
    %cst_120 = arith.constant 0.000000e+00 : f32
    %130 = vector.broadcast %cst_120 : f32 to vector<2x64xf32>
    %131 = arith.maximumf %129, %130 : vector<2x64xf32>
    %c0_121 = arith.constant 0 : index
    %c0_122 = arith.constant 0 : index
    %132 = vector.load %arg8[%c0_121, %c0_122] : memref<64x128xf32, #tpu.memory_space<vmem>>, vector<64x128xf32>
    %cst_123 = arith.constant dense<0.000000e+00> : vector<2x128xf32>
    %133 = tpu.matmul %131, %132, %cst_123 {dimension_numbers = #tpu.dot_dimension_numbers<[1], [0], [0], [1], [0, 0, 1, 1], [], []>} : vector<2x64xf32>, vector<64x128xf32>, vector<2x128xf32> -> vector<2x128xf32>
    %c0_124 = arith.constant 0 : index
    %c0_125 = arith.constant 0 : index
    %134 = vector.load %arg9[%c0_124, %c0_125] : memref<1x128xf32, #tpu.memory_space<vmem>>, vector<1x128xf32>
    %135 = vector.broadcast %134 : vector<1x128xf32> to vector<2x128xf32>
    %136 = arith.addf %133, %135 : vector<2x128xf32>
    %c0_126 = arith.constant 0 : index
    %c0_127 = arith.constant 0 : index
    %137 = vector.load %arg10[%c0_126, %c0_127] : memref<2x128xf32, #tpu.memory_space<vmem>>, vector<2x128xf32>
    tpu.vector_store %arg10[%c0_126, %c0_127], %136 {strides = array<i32>} : memref<2x128xf32, #tpu.memory_space<vmem>>, vector<2x128xf32>,
    return
  }
  func.func @transform_0(%arg0: i32) -> (i32, i32, i32) {
    %c0_i32 = arith.constant 0 : i32
    %c0_i32_0 = arith.constant 0 : i32
    %c0_i32_1 = arith.constant 0 : i32
    return %arg0, %c0_i32, %c0_i32_0 : i32, i32, i32
  }
  func.func @transform_1(%arg0: i32) -> (i32, i32, i32) {
    %c0_i32 = arith.constant 0 : i32
    %c0_i32_0 = arith.constant 0 : i32
    %c0_i32_1 = arith.constant 0 : i32
    %c0_i32_2 = arith.constant 0 : i32
    return %c0_i32, %c0_i32_0, %c0_i32_1 : i32, i32, i32
  }
  func.func @transform_2(%arg0: i32) -> (i32, i32) {
    %c0_i32 = arith.constant 0 : i32
    %c0_i32_0 = arith.constant 0 : i32
    %c0_i32_1 = arith.constant 0 : i32
    return %c0_i32, %c0_i32_0 : i32, i32
  }
  func.func @transform_3(%arg0: i32) -> (i32, i32, i32) {
    %c0_i32 = arith.constant 0 : i32
    %c0_i32_0 = arith.constant 0 : i32
    %c0_i32_1 = arith.constant 0 : i32
    %c0_i32_2 = arith.constant 0 : i32
    return %c0_i32, %c0_i32_0, %c0_i32_1 : i32, i32, i32
  }
  func.func @transform_4(%arg0: i32) -> (i32, i32) {
    %c0_i32 = arith.constant 0 : i32
    %c0_i32_0 = arith.constant 0 : i32
    %c0_i32_1 = arith.constant 0 : i32
    return %c0_i32, %c0_i32_0 : i32, i32
  }
  func.func @transform_5(%arg0: i32) -> (i32, i32, i32) {
    %c0_i32 = arith.constant 0 : i32
    %c0_i32_0 = arith.constant 0 : i32
    %c0_i32_1 = arith.constant 0 : i32
    %c0_i32_2 = arith.constant 0 : i32
    return %c0_i32, %c0_i32_0, %c0_i32_1 : i32, i32, i32
  }
  func.func @transform_6(%arg0: i32) -> (i32, i32) {
    %c0_i32 = arith.constant 0 : i32
    %c0_i32_0 = arith.constant 0 : i32
    %c0_i32_1 = arith.constant 0 : i32
    return %c0_i32, %c0_i32_0 : i32, i32
  }
  func.func @transform_7(%arg0: i32) -> (i32, i32) {
    %c0_i32 = arith.constant 0 : i32
    %c0_i32_0 = arith.constant 0 : i32
    %c0_i32_1 = arith.constant 0 : i32
    return %c0_i32, %c0_i32_0 : i32, i32
  }
  func.func @transform_8(%arg0: i32) -> (i32, i32) {
    %c0_i32 = arith.constant 0 : i32
    %c0_i32_0 = arith.constant 0 : i32
    %c0_i32_1 = arith.constant 0 : i32
    return %c0_i32, %c0_i32_0 : i32, i32
  }
  func.func @transform_9(%arg0: i32) -> (i32, i32) {
    %c0_i32 = arith.constant 0 : i32
    %c0_i32_0 = arith.constant 0 : i32
    return %arg0, %c0_i32 : i32, i32
  }
}

</mosaic_0001>

<bundles_post_ra>
// kernel: simple_cnn_forward.1
= control target key start
LH: loop header
LB: loop body
LE: loop exit
PB: predicated region body
PF: predicated region fallthrough
CT: control target
= control target key end

     0   :  { %14 = vsyncpa [#allocation7], 0  ;;  %vm33_vm0 = vcmask 261120   ;;  %v12760_v0 = vmov 0.0   ;;  %s12813_s30 = smov 0   ;;  %s18238_s0 = inlined_call_operand.vmem [shape: f32[2,1024,15], index: 0, kind: input, shape index: {}]   ;;  %s18239_s1 = inlined_call_operand.vmem [shape: f32[5,15,32], index: 1, kind: input, shape index: {}]   ;;  %s18240_s2 = inlined_call_operand.vmem [shape: f32[1,32], index: 2, kind: input, shape index: {}]   ;;  %s18241_s3 = inlined_call_operand.vmem [shape: f32[25,32,64], index: 3, kind: input, shape index: {}]   ;;  %s18242_s4 = inlined_call_operand.vmem [shape: f32[1,64], index: 4, kind: input, shape index: {}]   ;;  %s18243_s5 = inlined_call_operand.vmem [shape: f32[25,64,64], index: 5, kind: input, shape index: {}]   ;;  %s18244_s6 = inlined_call_operand.vmem [shape: f32[1,64], index: 6, kind: input, shape index: {}]   ;;  %s18245_s7 = inlined_call_operand.vmem [shape: f32[64,128], index: 7, kind: input, shape index: {}]   ;;  %s18246_s8 = inlined_call_operand.vmem [shape: f32[1,128], index: 8, kind: input, shape index: {}]   ;;  %s18247_s9 = inlined_call_operand.hbm [shape: f32[2,128], index: 9, kind: output, shape index: {}]  }
   0x1   :  { %34 = vst.msk [vmem:[#allocation3 + $0xe0] sm:$0xff] %vm33_vm0, %v12760_v0 }
   0x2 LB: > { %v60_v1 = vld [vmem:[%s18239_s1 + $0x8] sm:$0x7f]  ;;  %vm114_vm1 = vcmask 1046528   ;;  %v11291_v2 = vld [vmem:[%s18239_s1 + $0x38] sm:$0x7f]  ;;  %v12827_v3 = vld [vmem:[%s18239_s1] sm:$0xff]  ;;  %s12758_s30 = sphi %s12813_s30, %s40_s30  }
   0x3   : > { %11235 = vmatpush.msk.msra.mxu0 %vm114_vm1, %v60_v1  ;;  %12700 = vmatpush.msk.msra.mxu1 %vm114_vm1, %v60_v1  ;;  %v12834_v4 = vld [vmem:[%s18239_s1 + $0x30] sm:$0xff]  ;;  %s11234_s18 = sshll.u32 %s12758_s30, 10  ;;  %vm65_vm2 = vcmask 121856   ;;  %v11272_v5 = vld [vmem:[%s18239_s1 + $0x28] sm:$0x7f]  ;;  %v11271_v11 = vld [vmem:[%s18239_s1 + $0x20] sm:$0xff] }
   0x4   : > { %12701 = vmatpush.msk.msra.mxu2 %vm114_vm1, %v60_v1  ;;  %12704 = vmatpush.msk.msra.mxu3 %vm114_vm1, %v11291_v2  ;;  %s12844_s21 = scalar_lea.vmem %s18238_s0, %s11234_s18  ;;  %v11365_v9 = vld [vmem:[%s18239_s1 + $0x28] sm:$0x7f]  ;;  %v11253_v10 = vld [vmem:[%s18239_s1 + $0x18] sm:$0x7f]  ;;  %v12879_v12 = vld [vmem:[%s18239_s1 + $0x10] sm:$0xff]  ;;  %vm10223_vm3 = vcmask 523264  }
   0x5   : > { %133 = vmatpush.msra.mxu0 %v12827_v3  ;;  %12702 = vmatpush.msra.mxu1 %v12827_v3  ;;  %v43_v6 = vld [vmem:[%s12844_s21] sm:$0xff]  ;;  %v12853_v7 = vld [vmem:[%s12844_s21 + $0x70] sm:$0xff]  ;;  %v12856_v8 = vld [vmem:[%s12844_s21 + $0x78] sm:$0xff]  ;;  %s10288_s26 = smul.u32 40, %s12758_s30  ;;  %s40_s30 = sadd.s32 1, %s12758_s30  }
   0x6   : > { %12703 = vmatpush.msra.mxu2 %v12827_v3  ;;  %12705 = vmatpush.msra.mxu3 %v12834_v4  ;;  %v11346_v13 = vld [vmem:[%s18239_s1 + $0x18] sm:$0x7f]  ;;  %v44_v14 = vld [vmem:[%s12844_s21 + $0x8] sm:$0xff]  ;;  %v183_v16 = vld [vmem:[%s12844_s21 + $0x20] sm:$0xff]  ;;  %p37_p0 = scmp.ge.s32.totalorder %s40_s30, 2  }
   0x7   : > { %11236 = vmatmul.msk.f32.vlgmr.msra.gmra.mxu0 %vm65_vm2, %v43_v6  ;;  %11250 = vmatmul.msk.f32.vlgmr.msra.gmra.mxu1 %vm65_vm2, %v12853_v7  ;;  %v875_v15 = vld [vmem:[%s18239_s1 + $0x8] sm:$0x7f]  ;;  %v334_v17 = vld [vmem:[%s12844_s21 + $0x40] sm:$0xff]  ;;  %v45_v19 = vld [vmem:[%s12844_s21 + $0x10] sm:$0xff]  ;;  %s17526_s27 = scalar_lea.vmem [#allocation5], %s10288_s26  ;;  %s12761_s29 = smov (%p37_p0), [#allocation6]  }
   0x8   : > { %11251 = vmatmul.msk.f32.vlgmr.msra.gmra.mxu2 %vm65_vm2, %v12856_v8  ;;  %11296 = vmatmul.msk.f32.vlgmr.msra.gmra.mxu3 %vm65_vm2, %v12856_v8  ;;  %v12893_v18 = vld [vmem:[%s12844_s21 + $0x80] sm:$0xff]  ;;  %v184_v20 = vld [vmem:[%s12844_s21 + $0x28] sm:$0xff]  ;;  %v46_v23 = vld [vmem:[%s12844_s21 + $0x18] sm:$0xff]  ;;  %s11214_s10 = sshll.u32 (%p37_p0), %s12761_s29, 4  ;;  %s11216_s12 = sshll.u32 (%p37_p0), %s18247_s9, 4  ;;  %s11215_s10 = int_to_ptr.vmem [resolvable:$true] %s11214_s10  ;;  %s11217_s12 = int_to_ptr.hbm [resolvable:$true] %s11216_s12 }
   0x9   : > { %11273 = vmatpush.msk.msrb.mxu2 %vm114_vm1, %v11272_v5  ;;  %11292 = vmatpush.msk.msrb.mxu0 %vm114_vm1, %v11291_v2  ;;  %v335_v21 = vld [vmem:[%s12844_s21 + $0x48] sm:$0xff]  ;;  %v185_v24 = vld [vmem:[%s12844_s21 + $0x30] sm:$0xff]  ;;  %v186_v27 = vld [vmem:[%s12844_s21 + $0x38] sm:$0xff] }
   0xa   : > { %11366 = vmatpush.msk.msrb.mxu3 %vm114_vm1, %v11365_v9  ;;  %11254 = vmatpush.msk.msrb.mxu1 %vm114_vm1, %v11253_v10  ;;  %v12910_v22 = vld [vmem:[%s12844_s21 + $0x88] sm:$0xff]  ;;  %v336_v25 = vld [vmem:[%s12844_s21 + $0x50] sm:$0xff]  ;;  %v337_v28 = vld [vmem:[%s12844_s21 + $0x58] sm:$0xff] }
   0xb   : > { %419 = vmatpush.msrb.mxu2 %v11271_v11  ;;  %570 = vmatpush.msrb.mxu0 %v12834_v4  ;;  %v12921_v26 = vld [vmem:[%s12844_s21 + $0x90] sm:$0xff]  ;;  %v12931_v29 = vld [vmem:[%s12844_s21 + $0x98] sm:$0xff]  ;;  %v338_v30 = vld [vmem:[%s12844_s21 + $0x60] sm:$0xff] }
   0xc   : > { %268 = vmatpush.msrb.mxu1 %v12879_v12  ;;  %1230 = vmatpush.msrb.mxu3 %v11271_v11  ;;  %v12940_v31 = vld [vmem:[%s12844_s21 + $0xa0] sm:$0xff]  ;;  %v339_v32 = vld [vmem:[%s12844_s21 + $0x68] sm:$0xff]  ;;  %v12957_v34 = vld [vmem:[%s12844_s21 + $0xb0] sm:$0xff] }
   0xd   : > { %11347 = vmatpush.msk.msra.mxu2 %vm114_vm1, %v11346_v13  ;;  %v12949_v33 = vld [vmem:[%s12844_s21 + $0xa8] sm:$0xff]  ;;  %v12966_v35 = vld [vmem:[%s12844_s21 + $0xb8] sm:$0xff]  ;;  %v12975_v36 = vld [vmem:[%s12844_s21 + $0xc0] sm:$0xff] }
   0xe   : > { %11328 = vmatpush.msk.msra.mxu1 %vm114_vm1, %v875_v15  ;;  %v11439_v37 = vld [vmem:[%s18239_s1 + $0x18] sm:$0x7f]  ;;  %v12989_v38 = vld [vmem:[%s12844_s21 + $0xc8] sm:$0xff]  ;;  %v13002_v40 = vld [vmem:[%s12844_s21 + $0xd0] sm:$0xff] }
   0xf   : > { %1080 = vmatpush.msra.mxu2 %v12879_v12  ;;  %11237 = vmatmul.msk.f32.gmra.mxu0 %vm65_vm2, %v44_v14  ;;  %v11310_v39 = vld [vmem:[%s18239_s1 + $0x48] sm:$0x7f]  ;;  %v13012_v41 = vld [vmem:[%s12844_s21 + $0xd8] sm:$0xff]  ;;  %v13017_v42 = vld [vmem:[%s18239_s1 + $0x40] sm:$0xff] }
  0x10   : > { %11255 = vmatmul.msk.f32.vlgmr.msrb.gmra.mxu1 %vm65_vm2, %v183_v16  ;;  %11274 = vmatmul.msk.f32.vlgmr.msrb.gmra.mxu2 %vm65_vm2, %v334_v17  ;;  %v1677_v43 = vld [vmem:[%s18239_s1 + $0x8] sm:$0x7f]  ;;  %v11384_v45 = vld [vmem:[%s18239_s1 + $0x38] sm:$0x7f]  ;;  %v13082_v52 = vld [vmem:[%s12844_s21 + $0xe0] sm:$0xff] }
  0x11   : > { %11297 = vmatmul.msk.f32.gmra.mxu3 %vm65_vm2, %v12893_v18  ;;  %946 = vmatpush.msra.mxu1 %v12827_v3  ;;  %v11403_v44 = vld [vmem:[%s18239_s1 + $0x48] sm:$0x7f]  ;;  %v13114_v62 = vld [vmem:[%s12844_s21 + $0xf0] sm:$0xff] }
  0x12   : > { %11440 = vmatpush.msk.msra.mxu3 %vm114_vm1, %v11439_v37  ;;  %11311 = vmatpush.msk.msra.mxu0 %vm114_vm1, %v11310_v39  ;;  %v13099_v57 = vld [vmem:[%s12844_s21 + $0xe8] sm:$0xff] }
  0x13   : > { %11421 = vmatpush.msk.msrb.mxu2 %vm114_vm1, %v1677_v43  ;;  %11404 = vmatpush.msk.msrb.mxu1 %vm114_vm1, %v11403_v44 }
  0x14   : > { %1882 = vmatpush.msra.mxu3 %v12879_v12  ;;  %721 = vmatpush.msra.mxu0 %v13017_v42  ;;  %v13144_v12 = vld [vmem:[%s12844_s21 + $0x100] sm:$0xff] }
  0x15   : > { %1748 = vmatpush.msrb.mxu2 %v12827_v3  ;;  %1530 = vmatpush.msrb.mxu1 %v13017_v42  ;;  %v13127_v3 = vld [vmem:[%s12844_s21 + $0xf8] sm:$0xff] }
  0x17   : > { %11238 = vmatmul.msk.f32.gmra.mxu0 %vm65_vm2, %v45_v19 }
  0x18   : > { %11256 = vmatmul.msk.f32.gmra.mxu1 %vm65_vm2, %v184_v20  ;;  %11275 = vmatmul.msk.f32.gmra.mxu2 %vm65_vm2, %v335_v21 }
  0x19   : > { %11298 = vmatmul.msk.f32.gmra.mxu3 %vm65_vm2, %v12910_v22 }
  0x1f   : > { %11239 = vmatmul.msk.f32.gmra.mxu0 %vm65_vm2, %v46_v23 }
  0x20   : > { %11257 = vmatmul.msk.f32.gmra.mxu1 %vm65_vm2, %v185_v24  ;;  %11276 = vmatmul.msk.f32.gmra.mxu2 %vm65_vm2, %v336_v25 }
  0x21   : > { %11299 = vmatmul.msk.f32.gmra.mxu3 %vm65_vm2, %v12921_v26 }
  0x27   : > { %11240 = vmatmul.msk.f32.gmra.mxu0 %vm65_vm2, %v183_v16 }
  0x28   : > { %11258 = vmatmul.msk.f32.gmra.mxu1 %vm65_vm2, %v186_v27  ;;  %11277 = vmatmul.msk.f32.gmra.mxu2 %vm65_vm2, %v337_v28 }
  0x29   : > { %11300 = vmatmul.msk.f32.gmra.mxu3 %vm65_vm2, %v12931_v29 }
  0x2f   : > { %11241 = vmatmul.msk.f32.gmra.mxu0 %vm65_vm2, %v184_v20 }
  0x30   : > { %11259 = vmatmul.msk.f32.gmra.mxu1 %vm65_vm2, %v334_v17  ;;  %11278 = vmatmul.msk.f32.gmra.mxu2 %vm65_vm2, %v338_v30 }
  0x31   : > { %11301 = vmatmul.msk.f32.gmra.mxu3 %vm65_vm2, %v12940_v31 }
  0x37   : > { %11242 = vmatmul.msk.f32.gmra.mxu0 %vm65_vm2, %v185_v24 }
  0x38   : > { %11260 = vmatmul.msk.f32.gmra.mxu1 %vm65_vm2, %v335_v21  ;;  %11279 = vmatmul.msk.f32.gmra.mxu2 %vm65_vm2, %v339_v32 }
  0x39   : > { %11302 = vmatmul.msk.f32.gmra.mxu3 %vm65_vm2, %v12949_v33 }
  0x3f   : > { %11243 = vmatmul.msk.f32.gmra.mxu0 %vm65_vm2, %v186_v27 }
  0x40   : > { %11261 = vmatmul.msk.f32.gmra.mxu1 %vm65_vm2, %v336_v25  ;;  %11280 = vmatmul.msk.f32.gmra.mxu2 %vm65_vm2, %v12853_v7 }
  0x41   : > { %11303 = vmatmul.msk.f32.gmra.mxu3 %vm65_vm2, %v12957_v34 }
  0x47   : > { %11244 = vmatmul.msk.f32.gmra.mxu0 %vm65_vm2, %v334_v17 }
  0x48   : > { %11262 = vmatmul.msk.f32.gmra.mxu1 %vm65_vm2, %v337_v28  ;;  %11281 = vmatmul.msk.f32.gmra.mxu2 %vm65_vm2, %v12856_v8 }
  0x49   : > { %11304 = vmatmul.msk.f32.gmra.mxu3 %vm65_vm2, %v12966_v35 }
  0x4f   : > { %11245 = vmatmul.msk.f32.gmra.mxu0 %vm65_vm2, %v335_v21  ;;  %v13158_v21 = vld [vmem:[%s12844_s21 + $0x108] sm:$0xff] }
  0x50   : > { %11263 = vmatmul.msk.f32.gmra.mxu1 %vm65_vm2, %v338_v30  ;;  %11282 = vmatmul.msk.f32.gmra.mxu2 %vm65_vm2, %v12893_v18 }
  0x51   : > { %11305 = vmatmul.msk.f32.gmra.mxu3 %vm65_vm2, %v12975_v36 }
  0x57   : > { %11246 = vmatmul.msk.f32.gmra.mxu0 %vm65_vm2, %v336_v25 }
  0x58   : > { %11264 = vmatmul.msk.f32.gmra.mxu1 %vm65_vm2, %v339_v32  ;;  %11283 = vmatmul.msk.f32.gmra.mxu2 %vm65_vm2, %v12910_v22 }
  0x59   : > { %11306 = vmatmul.msk.f32.gmra.mxu3 %vm65_vm2, %v12989_v38 }
  0x5f   : > { %11247 = vmatmul.msk.f32.gmra.mxu0 %vm65_vm2, %v337_v28 }
  0x60   : > { %11265 = vmatmul.msk.f32.gmra.mxu1 %vm65_vm2, %v12853_v7  ;;  %11284 = vmatmul.msk.f32.gmra.mxu2 %vm65_vm2, %v12921_v26 }
  0x61   : > { %11307 = vmatmul.msk.f32.gmra.mxu3 %vm65_vm2, %v13002_v40 }
  0x67   : > { %11248 = vmatmul.msk.f32.gmra.mxu0 %vm65_vm2, %v338_v30 }
  0x68   : > { %11266 = vmatmul.msk.f32.gmra.mxu1 %vm65_vm2, %v12856_v8  ;;  %11285 = vmatmul.msk.f32.gmra.mxu2 %vm65_vm2, %v12931_v29 }
  0x69   : > { %11308 = vmatmul.msk.f32.gmra.mxu3 %vm65_vm2, %v13012_v41 }
  0x6f   : > { %11249 = vmatmul.msk.f32.gmra.mxu0 %vm65_vm2, %v339_v32 }
  0x70   : > { %11267 = vmatmul.msk.f32.gmra.mxu1 %vm65_vm2, %v12893_v18  ;;  %11286 = vmatmul.msk.f32.gmra.mxu2 %vm65_vm2, %v12940_v31 }
  0x71   : > { %11367 = vmatmul.msk.f32.vlgmr.msrb.gmra.mxu3 %vm65_vm2, %v12975_v36 }
  0x77   : > { %11293 = vmatmul.msk.f32.vlgmr.msrb.gmra.mxu0 %vm65_vm2, %v338_v30  ;;  %v13172_v30 = vld [vmem:[%s12844_s21 + $0x110] sm:$0xff] }
  0x78   : > { %11268 = vmatmul.msk.f32.gmra.mxu1 %vm65_vm2, %v12910_v22  ;;  %11287 = vmatmul.msk.f32.gmra.mxu2 %vm65_vm2, %v12949_v33 }
  0x79   : > { %11368 = vmatmul.msk.f32.gmra.mxu3 %vm65_vm2, %v12989_v38  ;;  %11385 = vmatpush.msk.msrb.mxu0 %vm114_vm1, %v11384_v45 }
  0x7b   : > { %1380 = vmatpush.msrb.mxu0 %v12834_v4  ;;  %v13132_v4 = vld [vmem:[%s18240_s2] ss:$0 sm:$0xff] }
  0x7f   : > { %11294 = vmatmul.msk.f32.gmra.mxu0 %vm65_vm2, %v339_v32 }
  0x80   : > { %11269 = vmatmul.msk.f32.gmra.mxu1 %vm65_vm2, %v12921_v26  ;;  %11288 = vmatmul.msk.f32.gmra.mxu2 %vm65_vm2, %v12957_v34 }
  0x81   : > { %11369 = vmatmul.msk.f32.gmra.mxu3 %vm65_vm2, %v13002_v40 }
  0x84   : > { %v13063_v46 = vpop.f32.mrf.mxu0  ;;  %v13065_v47 = vpop.f32.mrf.mxu1 }
  0x87   : > { %11295 = vmatmul.msk.f32.gmra.mxu0 %vm65_vm2, %v12853_v7 }
  0x88   : > { %11270 = vmatmul.msk.f32.gmra.mxu1 %vm65_vm2, %v12931_v29  ;;  %11289 = vmatmul.msk.f32.gmra.mxu2 %vm65_vm2, %v12966_v35 }
  0x89   : > { %11370 = vmatmul.msk.f32.gmra.mxu3 %vm65_vm2, %v13012_v41 }
  0x8b   : > { %v13075_v48 = vpop.f32.mrf.mxu2  ;;  %v581_v49 = vpop.f32.mrf.mxu3 }
  0x8c   : > { %v13077_v50 = vpop.f32.mrf.mxu0 }
  0x8d   : > { %v13079_v51 = vpop.f32.mrf.mxu1 }
  0x8f   : > { %11312 = vmatmul.msk.f32.vlgmr.msra.gmra.mxu0 %vm65_vm2, %v12893_v18 }
  0x90   : > { %11329 = vmatmul.msk.f32.vlgmr.msra.gmra.mxu1 %vm65_vm2, %v12893_v18  ;;  %11348 = vmatmul.msk.f32.vlgmr.msra.gmra.mxu2 %vm65_vm2, %v12940_v31 }
  0x91   : > { %11371 = vmatmul.msk.f32.gmra.mxu3 %vm65_vm2, %v13082_v52 }
  0x93   : > { %v13092_v53 = vpop.f32.mrf.mxu2 }
  0x94   : > { %v584_v54 = vpop.f32.mrf.mxu3  ;;  %v13094_v55 = vpop.f32.mrf.mxu0 }
  0x95   : > { %v13096_v56 = vpop.f32.mrf.mxu1 }
  0x97   : > { %11313 = vmatmul.msk.f32.gmra.mxu0 %vm65_vm2, %v12910_v22 }
  0x98   : > { %11330 = vmatmul.msk.f32.gmra.mxu1 %vm65_vm2, %v12910_v22  ;;  %11349 = vmatmul.msk.f32.gmra.mxu2 %vm65_vm2, %v12949_v33 }
  0x99   : > { %11372 = vmatmul.msk.f32.gmra.mxu3 %vm65_vm2, %v13099_v57 }
  0x9b   : > { %v13109_v58 = vpop.f32.mrf.mxu2 }
  0x9c   : > { %v587_v59 = vpop.f32.mrf.mxu3  ;;  %v144_v60 = vpop.f32.mrf.mxu0 }
  0x9d   : > { %v13111_v61 = vpop.f32.mrf.mxu1  ;;  %v145_v5 = vadd.f32 %v13132_v4, %v144_v60 }
  0x9f   : > { %11314 = vmatmul.msk.f32.gmra.mxu0 %vm65_vm2, %v12921_v26 }
  0xa0   : > { %11331 = vmatmul.msk.f32.gmra.mxu1 %vm65_vm2, %v12921_v26  ;;  %11350 = vmatmul.msk.f32.gmra.mxu2 %vm65_vm2, %v12957_v34 }
  0xa1   : > { %11373 = vmatmul.msk.f32.gmra.mxu3 %vm65_vm2, %v13114_v62 }
  0xa3   : > { %v13124_v63 = vpop.f32.mrf.mxu2 }
  0xa4   : > { %v590_v0 = vpop.f32.mrf.mxu3  ;;  %v147_v1 = vpop.f32.mrf.mxu0 }
  0xa5   : > { %v279_v2 = vpop.f32.mrf.mxu1  ;;  %v148_v14 = vadd.f32 %v13132_v4, %v147_v1 }
  0xa6   : > { %v321_v6 = vadd.f32 %v279_v2, %v145_v5 }
  0xa7   : > { %11315 = vmatmul.msk.f32.gmra.mxu0 %vm65_vm2, %v12931_v29 }
  0xa8   : > { %11332 = vmatmul.msk.f32.gmra.mxu1 %vm65_vm2, %v12931_v29  ;;  %11351 = vmatmul.msk.f32.gmra.mxu2 %vm65_vm2, %v12966_v35 }
  0xa9   : > { %11374 = vmatmul.msk.f32.gmra.mxu3 %vm65_vm2, %v13127_v3 }
  0xab   : > { %v430_v7 = vpop.f32.mrf.mxu2 }
  0xac   : > { %v593_v8 = vpop.f32.mrf.mxu3  ;;  %v472_v9 = vadd.f32 %v430_v7, %v321_v6  ;;  %v150_v10 = vpop.f32.mrf.mxu0  ;;  %v13200_v6 = vld [vmem:[%s12844_s21 + $0x120] sm:$0xff] }
  0xad   : > { %v282_v11 = vpop.f32.mrf.mxu1  ;;  %v151_v23 = vadd.f32 %v13132_v4, %v150_v10 }
  0xae   : > { %v13146_v13 = vadd.f32 %v581_v49, %v472_v9  ;;  %v322_v15 = vadd.f32 %v282_v11, %v148_v14  ;;  %v13186_v49 = vld [vmem:[%s12844_s21 + $0x118] sm:$0xff]  ;;  %v2479_v9 = vld [vmem:[%s18239_s1 + $0x8] sm:$0x7f] }
  0xaf   : > { %11316 = vmatmul.msk.f32.gmra.mxu0 %vm65_vm2, %v12940_v31  ;;  %11514 = vmatpush.msk.msrb.mxu3 %vm114_vm1, %v2479_v9  ;;  %v11496_v9 = vld [vmem:[%s18239_s1 + $0x48] sm:$0x7f] }
  0xb0   : > { %11333 = vmatmul.msk.f32.gmra.mxu1 %vm65_vm2, %v12940_v31  ;;  %11352 = vmatmul.msk.f32.gmra.mxu2 %vm65_vm2, %v12975_v36 }
  0xb1   : > { %11375 = vmatmul.msk.f32.gmra.mxu3 %vm65_vm2, %v13144_v12  ;;  %11497 = vmatpush.msk.msra.mxu2 %vm114_vm1, %v11496_v9 }
  0xb3   : > { %v433_v16 = vpop.f32.mrf.mxu2  ;;  %2332 = vmatpush.msra.mxu2 %v13017_v42 }
  0xb4   : > { %v596_v17 = vpop.f32.mrf.mxu3  ;;  %v473_v18 = vadd.f32 %v433_v16, %v322_v15  ;;  %v153_v19 = vpop.f32.mrf.mxu0  ;;  %v13218_v16 = vld [vmem:[%s12844_s21 + $0x128] sm:$0xff] }
  0xb5   : > { %v285_v20 = vpop.f32.mrf.mxu1  ;;  %v154_v32 = vadd.f32 %v13132_v4, %v153_v19 }
  0xb6   : > { %v13160_v22 = vadd.f32 %v584_v54, %v473_v18  ;;  %v323_v24 = vadd.f32 %v285_v20, %v151_v23 }
  0xb7   : > { %11317 = vmatmul.msk.f32.gmra.mxu0 %vm65_vm2, %v12949_v33 }
  0xb8   : > { %11334 = vmatmul.msk.f32.gmra.mxu1 %vm65_vm2, %v12949_v33  ;;  %11353 = vmatmul.msk.f32.gmra.mxu2 %vm65_vm2, %v12989_v38 }
  0xb9   : > { %11376 = vmatmul.msk.f32.gmra.mxu3 %vm65_vm2, %v13158_v21 }
  0xbb   : > { %v436_v25 = vpop.f32.mrf.mxu2 }
  0xbc   : > { %v599_v26 = vpop.f32.mrf.mxu3  ;;  %v474_v27 = vadd.f32 %v436_v25, %v323_v24  ;;  %v156_v28 = vpop.f32.mrf.mxu0 }
  0xbd   : > { %v288_v29 = vpop.f32.mrf.mxu1 }
  0xbe   : > { %v13174_v31 = vadd.f32 %v587_v59, %v474_v27  ;;  %v324_v33 = vadd.f32 %v288_v29, %v154_v32 }
  0xbf   : > { %11318 = vmatmul.msk.f32.gmra.mxu0 %vm65_vm2, %v12957_v34 }
  0xc0   : > { %11335 = vmatmul.msk.f32.gmra.mxu1 %vm65_vm2, %v12957_v34  ;;  %11354 = vmatmul.msk.f32.gmra.mxu2 %vm65_vm2, %v13002_v40  ;;  %v157_v34 = vadd.f32 %v13132_v4, %v156_v28  ;;  %v13232_v28 = vld [vmem:[%s12844_s21 + $0x130] sm:$0xff] }
  0xc1   : > { %11377 = vmatmul.msk.f32.gmra.mxu3 %vm65_vm2, %v13172_v30 }
  0xc3   : > { %v439_v37 = vpop.f32.mrf.mxu2 }
  0xc4   : > { %v602_v39 = vpop.f32.mrf.mxu3  ;;  %v475_v43 = vadd.f32 %v439_v37, %v324_v33  ;;  %v159_v44 = vpop.f32.mrf.mxu0 }
  0xc5   : > { %v291_v45 = vpop.f32.mrf.mxu1 }
  0xc6   : > { %v13188_v54 = vadd.f32 %v590_v0, %v475_v43  ;;  %v325_v59 = vadd.f32 %v291_v45, %v157_v34  ;;  %v13246_v45 = vld [vmem:[%s12844_s21 + $0x138] sm:$0xff] }
  0xc7   : > { %11319 = vmatmul.msk.f32.gmra.mxu0 %vm65_vm2, %v12966_v35 }
  0xc8   : > { %11336 = vmatmul.msk.f32.gmra.mxu1 %vm65_vm2, %v12966_v35  ;;  %11355 = vmatmul.msk.f32.gmra.mxu2 %vm65_vm2, %v13012_v41  ;;  %v160_v35 = vadd.f32 %v13132_v4, %v159_v44 }
  0xc9   : > { %11378 = vmatmul.msk.f32.gmra.mxu3 %vm65_vm2, %v13186_v49 }
  0xcb   : > { %v442_v60 = vpop.f32.mrf.mxu2 }
  0xcc   : > { %v605_v1 = vpop.f32.mrf.mxu3  ;;  %v476_v2 = vadd.f32 %v442_v60, %v325_v59  ;;  %v162_v0 = vpop.f32.mrf.mxu0 }
  0xcd   : > { %v294_v5 = vpop.f32.mrf.mxu1  ;;  %v163_v19 = vadd.f32 %v13132_v4, %v162_v0 }
  0xce   : > { %v13202_v7 = vadd.f32 %v593_v8, %v476_v2  ;;  %v326_v8 = vadd.f32 %v294_v5, %v160_v35 }
  0xcf   : > { %11320 = vmatmul.msk.f32.gmra.mxu0 %vm65_vm2, %v12975_v36 }
  0xd0   : > { %11337 = vmatmul.msk.f32.gmra.mxu1 %vm65_vm2, %v12975_v36  ;;  %11356 = vmatmul.msk.f32.gmra.mxu2 %vm65_vm2, %v13082_v52 }
  0xd1   : > { %11379 = vmatmul.msk.f32.gmra.mxu3 %vm65_vm2, %v13200_v6 }
  0xd3   : > { %v445_v10 = vpop.f32.mrf.mxu2 }
  0xd4   : > { %v608_v11 = vpop.f32.mrf.mxu3  ;;  %v477_v14 = vadd.f32 %v445_v10, %v326_v8  ;;  %v165_v36 = vpop.f32.mrf.mxu0 }
  0xd5   : > { %v297_v15 = vpop.f32.mrf.mxu1 }
  0xd6   : > { %v13220_v18 = vadd.f32 %v596_v17, %v477_v14  ;;  %v327_v20 = vadd.f32 %v297_v15, %v163_v19 }
  0xd7   : > { %11321 = vmatmul.msk.f32.gmra.mxu0 %vm65_vm2, %v12989_v38 }
  0xd8   : > { %11338 = vmatmul.msk.f32.gmra.mxu1 %vm65_vm2, %v12989_v38  ;;  %11357 = vmatmul.msk.f32.gmra.mxu2 %vm65_vm2, %v13099_v57  ;;  %v166_v38 = vadd.f32 %v13132_v4, %v165_v36 }
  0xd9   : > { %11380 = vmatmul.msk.f32.gmra.mxu3 %vm65_vm2, %v13218_v16 }
  0xdb   : > { %v448_v23 = vpop.f32.mrf.mxu2 }
  0xdc   : > { %v611_v24 = vpop.f32.mrf.mxu3  ;;  %v478_v25 = vadd.f32 %v448_v23, %v327_v20  ;;  %v168_v17 = vpop.f32.mrf.mxu0  ;;  %v11477_v20 = vld [vmem:[%s18239_s1 + $0x38] sm:$0x7f] }
  0xdd   : > { %v300_v27 = vpop.f32.mrf.mxu1  ;;  %11478 = vmatpush.msk.msra.mxu1 %vm114_vm1, %v11477_v20 }
  0xde   : > { %v13234_v29 = vadd.f32 %v599_v26, %v478_v25  ;;  %v328_v32 = vadd.f32 %v300_v27, %v166_v38 }
  0xdf   : > { %11322 = vmatmul.msk.f32.gmra.mxu0 %vm65_vm2, %v13002_v40 }
  0xe0   : > { %11339 = vmatmul.msk.f32.gmra.mxu1 %vm65_vm2, %v13002_v40  ;;  %11358 = vmatmul.msk.f32.gmra.mxu2 %vm65_vm2, %v13114_v62  ;;  %v169_v40 = vadd.f32 %v13132_v4, %v168_v17 }
  0xe1   : > { %11381 = vmatmul.msk.f32.gmra.mxu3 %vm65_vm2, %v13232_v28 }
  0xe3   : > { %v451_v33 = vpop.f32.mrf.mxu2 }
  0xe4   : > { %v614_v37 = vpop.f32.mrf.mxu3  ;;  %v479_v43 = vadd.f32 %v451_v33, %v328_v32  ;;  %v171_v26 = vpop.f32.mrf.mxu0 }
  0xe5   : > { %v303_v44 = vpop.f32.mrf.mxu1 }
  0xe6   : > { %v13248_v34 = vadd.f32 %v602_v39, %v479_v43  ;;  %v329_v59 = vadd.f32 %v303_v44, %v169_v40  ;;  %v178_v43 = vadd.f32 %v13132_v4, %v13065_v47  ;;  %v181_v47 = vadd.f32 %v13132_v4, %v13075_v48  ;;  %v13332_v48 = vld [vmem:[%s12844_s21 + $0x140] sm:$0xff] }
  0xe7   : > { %11323 = vmatmul.msk.f32.gmra.mxu0 %vm65_vm2, %v13012_v41 }
  0xe8   : > { %11340 = vmatmul.msk.f32.gmra.mxu1 %vm65_vm2, %v13012_v41  ;;  %11359 = vmatmul.msk.f32.gmra.mxu2 %vm65_vm2, %v13127_v3  ;;  %v172_v41 = vadd.f32 %v13132_v4, %v171_v26 }
  0xe9   : > { %11382 = vmatmul.msk.f32.gmra.mxu3 %vm65_vm2, %v13246_v45 }
  0xeb   : > { %v454_v60 = vpop.f32.mrf.mxu2 }
  0xec   : > { %v617_v2 = vpop.f32.mrf.mxu3  ;;  %v480_v0 = vadd.f32 %v454_v60, %v329_v59  ;;  %v174_v39 = vpop.f32.mrf.mxu0 }
  0xed   : > { %v306_v5 = vpop.f32.mrf.mxu1  ;;  %v175_v25 = vadd.f32 %v13132_v4, %v174_v39 }
  0xee   : > { %v13259_v35 = vadd.f32 %v605_v1, %v480_v0  ;;  %v11458_v1 = vld [vmem:[%s18239_s1 + $0x28] sm:$0x7f]  ;;  %v330_v8 = vadd.f32 %v306_v5, %v172_v41 }
  0xef   : > { %11324 = vmatmul.msk.f32.gmra.mxu0 %vm65_vm2, %v13082_v52 }
  0xf0   : > { %11341 = vmatmul.msk.f32.gmra.mxu1 %vm65_vm2, %v13082_v52  ;;  %11360 = vmatmul.msk.f32.gmra.mxu2 %vm65_vm2, %v13144_v12 }
  0xf1   : > { %11441 = vmatmul.msk.f32.vlgmr.msra.gmra.mxu3 %vm65_vm2, %v13200_v6  ;;  %11459 = vmatpush.msk.msra.mxu0 %vm114_vm1, %v11458_v1  ;;  %v13329_v1 = vld [vmem:[%s18240_s2] ss:$0 sm:$0xff] }
  0xf3   : > { %v457_v10 = vpop.f32.mrf.mxu2 }
  0xf4   : > { %v1232_v14 = vpop.f32.mrf.mxu3  ;;  %v481_v36 = vadd.f32 %v457_v10, %v330_v8  ;;  %v13278_v19 = vpop.f32.mrf.mxu0 }
  0xf5   : > { %v309_v15 = vpop.f32.mrf.mxu1 }
  0xf6   : > { %v13285_v23 = vadd.f32 %v608_v11, %v481_v36  ;;  %v331_v17 = vadd.f32 %v309_v15, %v175_v25 }
  0xf7   : > { %11325 = vmatmul.msk.f32.gmra.mxu0 %vm65_vm2, %v13099_v57 }
  0xf8   : > { %11342 = vmatmul.msk.f32.gmra.mxu1 %vm65_vm2, %v13099_v57  ;;  %11361 = vmatmul.msk.f32.gmra.mxu2 %vm65_vm2, %v13158_v21 }
  0xf9   : > { %11442 = vmatmul.msk.f32.gmra.mxu3 %vm65_vm2, %v13218_v16 }
  0xfb   : > { %v460_v42 = vpop.f32.mrf.mxu2 }
  0xfc   : > { %v1235_v27 = vpop.f32.mrf.mxu3  ;;  %v482_v38 = vadd.f32 %v460_v42, %v331_v17  ;;  %v13296_v32 = vpop.f32.mrf.mxu0  ;;  %v13351_v42 = vld [vmem:[%s12844_s21 + $0x148] sm:$0xff] }
  0xfd   : > { %v312_v11 = vpop.f32.mrf.mxu1 }
  0xfe   : > { %v13298_v33 = vadd.f32 %v611_v24, %v482_v38  ;;  %v332_v26 = vadd.f32 %v312_v11, %v178_v43 }
  0xff   : > { %11326 = vmatmul.msk.f32.gmra.mxu0 %vm65_vm2, %v13114_v62 }
 0x100   : > { %11343 = vmatmul.msk.f32.gmra.mxu1 %vm65_vm2, %v13114_v62  ;;  %11362 = vmatmul.msk.f32.gmra.mxu2 %vm65_vm2, %v13172_v30 }
 0x101   : > { %11443 = vmatmul.msk.f32.gmra.mxu3 %vm65_vm2, %v13232_v28 }
 0x103   : > { %v463_v44 = vpop.f32.mrf.mxu2 }
 0x104   : > { %v1238_v40 = vpop.f32.mrf.mxu3  ;;  %v483_v24 = vadd.f32 %v463_v44, %v332_v26  ;;  %v13310_v60 = vpop.f32.mrf.mxu0 }
 0x105   : > { %v315_v59 = vpop.f32.mrf.mxu1 }
 0x106   : > { %v13312_v0 = vadd.f32 %v614_v37, %v483_v24  ;;  %v333_v39 = vadd.f32 %v315_v59, %v181_v47 }
 0x107   : > { %11327 = vmatmul.msk.f32.gmra.mxu0 %vm65_vm2, %v13127_v3 }
 0x108   : > { %11344 = vmatmul.msk.f32.gmra.mxu1 %vm65_vm2, %v13127_v3  ;;  %11363 = vmatmul.msk.f32.gmra.mxu2 %vm65_vm2, %v13186_v49 }
 0x109   : > { %11444 = vmatmul.msk.f32.gmra.mxu3 %vm65_vm2, %v13246_v45 }
 0x10b   : > { %v466_v5 = vpop.f32.mrf.mxu2 }
 0x10c   : > { %v13324_v41 = vpop.f32.mrf.mxu3  ;;  %v484_v37 = vadd.f32 %v466_v5, %v333_v39  ;;  %v723_v9 = vpop.f32.mrf.mxu0  ;;  %v136_v39 = vadd.f32 %v13132_v4, %v13063_v46 }
 0x10d   : > { %v948_v8 = vpop.f32.mrf.mxu1 }
 0x10e   : > { %v13334_v10 = vadd.f32 %v617_v2, %v484_v37  ;;  %v949_v36 = vadd.f32 %v13329_v1, %v948_v8 }
 0x10f   : > { %11386 = vmatmul.msk.f32.vlgmr.msrb.gmra.mxu0 %vm65_vm2, %v13082_v52  ;;  %v2478_v52 = vld [vmem:[%s18239_s1] sm:$0xff] }
 0x110   : > { %11405 = vmatmul.msk.f32.vlgmr.msrb.gmra.mxu1 %vm65_vm2, %v13144_v12  ;;  %11422 = vmatmul.msk.f32.vlgmr.msrb.gmra.mxu2 %vm65_vm2, %v13144_v12 }
 0x111   : > { %11445 = vmatmul.msk.f32.gmra.mxu3 %vm65_vm2, %v13332_v48 }
 0x112   : > { %2550 = vmatpush.msrb.mxu3 %v2478_v52 }
 0x113   : > { %v1082_v15 = vpop.f32.mrf.mxu2 }
 0x114   : > { %v13345_v20 = vpop.f32.mrf.mxu3  ;;  %v1130_v25 = vadd.f32 %v1082_v15, %v949_v36  ;;  %v726_v2 = vpop.f32.mrf.mxu0 }
 0x115   : > { %v951_v17 = vpop.f32.mrf.mxu1 }
 0x116   : > { %v13353_v38 = vadd.f32 %v1232_v14, %v1130_v25  ;;  %v952_v11 = vadd.f32 %v13329_v1, %v951_v17  ;;  %v13391_v25 = vld [vmem:[%s12844_s21 + $0x158] sm:$0xff] }
 0x117   : > { %11387 = vmatmul.msk.f32.gmra.mxu0 %vm65_vm2, %v13099_v57  ;;  %v13369_v57 = vld [vmem:[%s12844_s21 + $0x150] sm:$0xff] }
 0x118   : > { %11406 = vmatmul.msk.f32.gmra.mxu1 %vm65_vm2, %v13158_v21  ;;  %11423 = vmatmul.msk.f32.gmra.mxu2 %vm65_vm2, %v13158_v21 }
 0x119   : > { %11446 = vmatmul.msk.f32.gmra.mxu3 %vm65_vm2, %v13351_v42 }
 0x11b   : > { %v1085_v43 = vpop.f32.mrf.mxu2 }
 0x11c   : > { %v13364_v26 = vpop.f32.mrf.mxu3  ;;  %v1131_v44 = vadd.f32 %v1085_v43, %v952_v11  ;;  %v13366_v14 = vpop.f32.mrf.mxu0 }
 0x11d   : > { %v954_v24 = vpop.f32.mrf.mxu1 }
 0x11e   : > { %v13371_v59 = vadd.f32 %v1235_v27, %v1131_v44  ;;  %v955_v47 = vadd.f32 %v13329_v1, %v954_v24  ;;  %v318_v27 = vadd.f32 %v13079_v51, %v136_v39  ;;  %v139_v51 = vadd.f32 %v13132_v4, %v13077_v50 }
 0x11f   : > { %11388 = vmatmul.msk.f32.gmra.mxu0 %vm65_vm2, %v13114_v62 }
 0x120   : > { %11407 = vmatmul.msk.f32.gmra.mxu1 %vm65_vm2, %v13172_v30  ;;  %11424 = vmatmul.msk.f32.gmra.mxu2 %vm65_vm2, %v13172_v30  ;;  %v469_v15 = vadd.f32 %v13092_v53, %v318_v27  ;;  %v13413_v27 = vld [vmem:[%s12844_s21 + $0x160] sm:$0xff] }
 0x121   : > { %11447 = vmatmul.msk.f32.gmra.mxu3 %vm65_vm2, %v13369_v57 }
 0x122   : > { %v620_v52 = vadd.f32 %v13278_v19, %v469_v15  ;;  %v319_v19 = vadd.f32 %v13096_v56, %v139_v51 }
 0x123   : > { %v1088_v5 = vpop.f32.mrf.mxu2 }
 0x124   : > { %v13385_v37 = vpop.f32.mrf.mxu3  ;;  %v1132_v62 = vadd.f32 %v1088_v5, %v955_v47  ;;  %v13387_v8 = vpop.f32.mrf.mxu0  ;;  %v771_v53 = vadd.f32 %v723_v9, %v620_v52  ;;  %v470_v24 = vadd.f32 %v13109_v58, %v319_v19  ;;  %v142_v58 = vadd.f32 %v13132_v4, %v13094_v55  ;;  %v13438_v52 = vld [vmem:[%s18239_s1 + $0x20] sm:$0xff]  ;;  %v13450_v19 = vld [vmem:[%s12844_s21 + $0x168] sm:$0xff] }
 0x125   : > { %v957_v36 = vpop.f32.mrf.mxu1  ;;  %2032 = vmatpush.msra.mxu0 %v13438_v52 }
 0x126   : > { %v13393_v17 = vadd.f32 %v1238_v40, %v1132_v62  ;;  %v958_v46 = vadd.f32 %v13329_v1, %v957_v36  ;;  %v787_v47 = vmax.f32 %v771_v53, 0.0  ;;  %v621_v50 = vadd.f32 %v13296_v32, %v470_v24 }
 0x127   : > { %11389 = vmatmul.msk.f32.gmra.mxu0 %vm65_vm2, %v13127_v3  ;;  %v320_v62 = vadd.f32 %v13111_v61, %v142_v58  ;;  %v13474_v58 = vld [vmem:[%s12844_s21 + $0x170] sm:$0xff] }
 0x128   : > { %11408 = vmatmul.msk.f32.gmra.mxu1 %vm65_vm2, %v13186_v49  ;;  %11425 = vmatmul.msk.f32.gmra.mxu2 %vm65_vm2, %v13186_v49  ;;  %v772_v32 = vadd.f32 %v726_v2, %v621_v50  ;;  %v13445_v2 = vld [vmem:[%s18239_s1 + $0x30] sm:$0xff] }
 0x129   : > { %11448 = vmatmul.msk.f32.gmra.mxu3 %vm65_vm2, %v13391_v25  ;;  %v471_v61 = vadd.f32 %v13124_v63, %v320_v62  ;;  %2182 = vmatpush.msra.mxu1 %v13445_v2 }
 0x12a   : > { %v788_v51 = vmax.f32 %v772_v32, 0.0 }
 0x12b   : > { %v1091_v40 = vpop.f32.mrf.mxu2 }
 0x12c   : > { %v13408_v3 = vpop.f32.mrf.mxu3  ;;  %v1133_v11 = vadd.f32 %v1091_v40, %v958_v46  ;;  %v735_v43 = vpop.f32.mrf.mxu0 }
 0x12d   : > { %v960_v44 = vpop.f32.mrf.mxu1  ;;  %v775_v39 = vadd.f32 %v735_v43, %v13160_v22  ;;  %v803_v22 = vsel %vm33_vm0, %v787_v47, -inf }
 0x12e   : > { %v13416_v5 = vadd.f32 %v13324_v41, %v1133_v11  ;;  %v961_v56 = vadd.f32 %v13329_v1, %v960_v44  ;;  %v622_v11 = vadd.f32 %v13310_v60, %v471_v61 }
 0x12f   : > { %v791_v9 = vmax.f32 %v775_v39, 0.0  ;;  %11390 = vmatmul.msk.f32.gmra.mxu0 %vm65_vm2, %v13144_v12 }
 0x130   : > { %11409 = vmatmul.msk.f32.gmra.mxu1 %vm65_vm2, %v13200_v6  ;;  %11426 = vmatmul.msk.f32.gmra.mxu2 %vm65_vm2, %v13200_v6  ;;  %v773_v60 = vadd.f32 %v13366_v14, %v622_v11 }
 0x131   : > { %11449 = vmatmul.msk.f32.gmra.mxu3 %vm65_vm2, %v13413_v27  ;;  %v804_v12 = vsel %vm33_vm0, %v791_v9, -inf }
 0x132   : > { %v805_v41 = vmax.f32 %v803_v22, %v804_v12  ;;  %v789_v9 = vmax.f32 %v773_v60, 0.0 }
 0x133   : > { %v1094_v36 = vpop.f32.mrf.mxu2 }
 0x134   : > { %v13433_v15 = vpop.f32.mrf.mxu3  ;;  %827 = vst.msk [vmem:[#allocation2] sm:$0xff] %vm33_vm0, %v805_v41  ;;  %v1134_v55 = vadd.f32 %v1094_v36, %v961_v56  ;;  %v738_v4 = vpop.f32.mrf.mxu0 }
 0x135   : > { %v963_v46 = vpop.f32.mrf.mxu1  ;;  %v776_v53 = vadd.f32 %v738_v4, %v13174_v31  ;;  %v806_v31 = vsel %vm33_vm0, %v788_v51, -inf }
 0x136   : > { %v13454_v40 = vadd.f32 %v13345_v20, %v1134_v55  ;;  %v964_v63 = vadd.f32 %v13329_v1, %v963_v46 }
 0x137   : > { %v792_v43 = vmax.f32 %v776_v53, 0.0  ;;  %11391 = vmatmul.msk.f32.gmra.mxu0 %vm65_vm2, %v13158_v21 }
 0x138   : > { %11410 = vmatmul.msk.f32.gmra.mxu1 %vm65_vm2, %v13218_v16  ;;  %11427 = vmatmul.msk.f32.gmra.mxu2 %vm65_vm2, %v13218_v16 }
 0x139   : > { %11450 = vmatmul.msk.f32.gmra.mxu3 %vm65_vm2, %v13450_v19  ;;  %v807_v20 = vsel %vm33_vm0, %v792_v43, -inf  ;;  %v13497_v43 = vld [vmem:[%s12844_s21 + $0x178] sm:$0xff] }
 0x13a   : > { %v808_v44 = vmax.f32 %v806_v31, %v807_v20 }
 0x13b   : > { %v1097_v21 = vpop.f32.mrf.mxu2 }
 0x13c   : > { %v13469_v24 = vpop.f32.mrf.mxu3  ;;  %828 = vst.msk [vmem:[#allocation2 + $0x8] sm:$0xff] %vm33_vm0, %v808_v44  ;;  %v1135_v47 = vadd.f32 %v1097_v21, %v964_v63  ;;  %v741_v39 = vpop.f32.mrf.mxu0 }
 0x13d   : > { %v966_v50 = vpop.f32.mrf.mxu1  ;;  %v777_v56 = vadd.f32 %v741_v39, %v13188_v54  ;;  %v809_v54 = vsel %vm33_vm0, %v789_v9, -inf }
 0x13e   : > { %v13477_v22 = vadd.f32 %v13364_v26, %v1135_v47  ;;  %v967_v32 = vadd.f32 %v13329_v1, %v966_v50  ;;  %v774_v26 = vadd.f32 %v13387_v8, %v13146_v13  ;;  %v13516_v47 = vld [vmem:[%s12844_s21 + $0x180] sm:$0xff] }
 0x13f   : > { %v793_v14 = vmax.f32 %v777_v56, 0.0  ;;  %11392 = vmatmul.msk.f32.gmra.mxu0 %vm65_vm2, %v13172_v30 }
 0x140   : > { %11411 = vmatmul.msk.f32.gmra.mxu1 %vm65_vm2, %v13232_v28  ;;  %11428 = vmatmul.msk.f32.gmra.mxu2 %vm65_vm2, %v13232_v28  ;;  %v790_v53 = vmax.f32 %v774_v26, 0.0 }
 0x141   : > { %11451 = vmatmul.msk.f32.gmra.mxu3 %vm65_vm2, %v13474_v58  ;;  %v810_v12 = vsel %vm33_vm0, %v793_v14, -inf }
 0x142   : > { %v811_v30 = vmax.f32 %v809_v54, %v810_v12 }
 0x143   : > { %v835_v41 = vld [vmem:[#allocation2] ss:$2 sm:$0xff]  ;;  %v843_v62 = vld [vmem:[#allocation2 + $0x1] ss:$2 sm:$0xff]  ;;  %v1100_v36 = vpop.f32.mrf.mxu2 }
 0x144   : > { %v13492_v55 = vpop.f32.mrf.mxu3  ;;  %829 = vst.msk [vmem:[#allocation2 + $0x10] sm:$0xff] %vm33_vm0, %v811_v30  ;;  %v1136_v4 = vadd.f32 %v1100_v36, %v967_v32  ;;  %v744_v46 = vpop.f32.mrf.mxu0  ;;  %v850_v51 = vmax.f32 %v835_v41, %v843_v62  ;;  %v13536_v30 = vld [vmem:[%s12844_s21 + $0x188] sm:$0xff] }
 0x145   : > { %v969_v61 = vpop.f32.mrf.mxu1  ;;  %v778_v11 = vadd.f32 %v744_v46, %v13202_v7  ;;  %v812_v7 = vsel %vm33_vm0, %v790_v53, -inf }
 0x146   : > { %v13500_v13 = vadd.f32 %v13385_v37, %v1136_v4  ;;  %854 = vst.msk [vmem:[#allocation3] sm:$0xff] %vm33_vm0, %v850_v51  ;;  %v970_v63 = vadd.f32 %v13329_v1, %v969_v61 }
 0x147   : > { %v794_v8 = vmax.f32 %v778_v11, 0.0  ;;  %11393 = vmatmul.msk.f32.gmra.mxu0 %vm65_vm2, %v13186_v49 }
 0x148   : > { %11412 = vmatmul.msk.f32.gmra.mxu1 %vm65_vm2, %v13246_v45  ;;  %11429 = vmatmul.msk.f32.gmra.mxu2 %vm65_vm2, %v13246_v45 }
 0x149   : > { %11452 = vmatmul.msk.f32.gmra.mxu3 %vm65_vm2, %v13497_v43  ;;  %v813_v37 = vsel %vm33_vm0, %v794_v8, -inf }
 0x14a   : > { %v814_v31 = vmax.f32 %v812_v7, %v813_v37  ;;  %v13576_v37 = vld [vmem:[%s12844_s21 + $0x198] sm:$0xff] }
 0x14b   : > { %v1103_v60 = vpop.f32.mrf.mxu2 }
 0x14c   : > { %v1265_v20 = vpop.f32.mrf.mxu3  ;;  %830 = vst.msk [vmem:[#allocation2 + $0x18] sm:$0xff] %vm33_vm0, %v814_v31  ;;  %v1137_v49 = vadd.f32 %v1103_v60, %v970_v63  ;;  %v747_v44 = vpop.f32.mrf.mxu0 }
 0x14d   : > { %v972_v21 = vpop.f32.mrf.mxu1  ;;  %v779_v60 = vadd.f32 %v747_v44, %v13220_v18 }
 0x14e   : > { %v13519_v39 = vadd.f32 %v13408_v3, %v1137_v49  ;;  %v973_v50 = vadd.f32 %v13329_v1, %v972_v21 }
 0x14f   : > { %11394 = vmatmul.msk.f32.gmra.mxu0 %vm65_vm2, %v13200_v6  ;;  %v11589_v6 = vld [vmem:[%s18239_s1 + $0x48] sm:$0x7f] }
 0x150   : > { %11413 = vmatmul.msk.f32.gmra.mxu1 %vm65_vm2, %v13332_v48  ;;  %11430 = vmatmul.msk.f32.gmra.mxu2 %vm65_vm2, %v13332_v48 }
 0x151   : > { %11453 = vmatmul.msk.f32.gmra.mxu3 %vm65_vm2, %v13516_v47 }
 0x152   : > { %11590 = vmatpush.msk.msra.mxu3 %vm114_vm1, %v11589_v6 }
 0x153   : > { %v837_v9 = vld [vmem:[#allocation2 + $0x10] ss:$2 sm:$0xff]  ;;  %v845_v56 = vld [vmem:[#allocation2 + $0x11] ss:$2 sm:$0xff]  ;;  %v1106_v14 = vpop.f32.mrf.mxu2 }
 0x154   : > { %v13530_v32 = vpop.f32.mrf.mxu3  ;;  %v1138_v3 = vadd.f32 %v1106_v14, %v973_v50  ;;  %v750_v54 = vpop.f32.mrf.mxu0  ;;  %v851_v12 = vmax.f32 %v837_v9, %v845_v56 }
 0x155   : > { %v975_v26 = vpop.f32.mrf.mxu1 }
 0x156   : > { %v13540_v41 = vadd.f32 %v13433_v15, %v1138_v3  ;;  %855 = vst.msk [vmem:[#allocation3 + $0x8] sm:$0xff] %vm33_vm0, %v851_v12  ;;  %v976_v62 = vadd.f32 %v13329_v1, %v975_v26 }
 0x157   : > { %11395 = vmatmul.msk.f32.gmra.mxu0 %vm65_vm2, %v13218_v16  ;;  %v13557_v16 = vld [vmem:[%s12844_s21 + $0x190] sm:$0xff] }
 0x158   : > { %11414 = vmatmul.msk.f32.gmra.mxu1 %vm65_vm2, %v13351_v42  ;;  %11431 = vmatmul.msk.f32.gmra.mxu2 %vm65_vm2, %v13351_v42 }
 0x159   : > { %11454 = vmatmul.msk.f32.gmra.mxu3 %vm65_vm2, %v13536_v30 }
 0x15b   : > { %v1109_v36 = vpop.f32.mrf.mxu2 }
 0x15c   : > { %v13552_v4 = vpop.f32.mrf.mxu3  ;;  %v1139_v15 = vadd.f32 %v1109_v36, %v976_v62  ;;  %v13554_v46 = vpop.f32.mrf.mxu0  ;;  %v11570_v62 = vld [vmem:[%s18239_s1 + $0x38] sm:$0x7f] }
 0x15d   : > { %v978_v61 = vpop.f32.mrf.mxu1  ;;  %v11532_v36 = vld [vmem:[%s18239_s1 + $0x18] sm:$0x7f]  ;;  %11571 = vmatpush.msk.msrb.mxu2 %vm114_vm1, %v11570_v62 }
 0x15e   : > { %v13560_v51 = vadd.f32 %v13469_v24, %v1139_v15  ;;  %v979_v53 = vadd.f32 %v13329_v1, %v978_v61  ;;  %11533 = vmatpush.msk.msrb.mxu0 %vm114_vm1, %v11532_v36 }
 0x15f   : > { %11396 = vmatmul.msk.f32.gmra.mxu0 %vm65_vm2, %v13232_v28  ;;  %2984 = vmatpush.msrb.mxu2 %v13445_v2  ;;  %v781_v2 = vadd.f32 %v13554_v46, %v13248_v34 }
 0x160   : > { %11415 = vmatmul.msk.f32.gmra.mxu1 %vm65_vm2, %v13369_v57  ;;  %11432 = vmatmul.msk.f32.gmra.mxu2 %vm65_vm2, %v13369_v57 }
 0x161   : > { %11455 = vmatmul.msk.f32.gmra.mxu3 %vm65_vm2, %v13557_v16 }
 0x163   : > { %v1112_v11 = vpop.f32.mrf.mxu2 }
 0x164   : > { %v13571_v8 = vpop.f32.mrf.mxu3  ;;  %v1140_v63 = vadd.f32 %v1112_v11, %v979_v53  ;;  %v13573_v24 = vpop.f32.mrf.mxu0 }
 0x165   : > { %v981_v7 = vpop.f32.mrf.mxu1 }
 0x166   : > { %v13579_v28 = vadd.f32 %v13492_v55, %v1140_v63  ;;  %v982_v31 = vadd.f32 %v13329_v1, %v981_v7 }
 0x167   : > { %11397 = vmatmul.msk.f32.gmra.mxu0 %vm65_vm2, %v13246_v45  ;;  %v795_v45 = vmax.f32 %v779_v60, 0.0 }
 0x168   : > { %11416 = vmatmul.msk.f32.gmra.mxu1 %vm65_vm2, %v13391_v25  ;;  %11433 = vmatmul.msk.f32.gmra.mxu2 %vm65_vm2, %v13391_v25 }
 0x169   : > { %11456 = vmatmul.msk.f32.gmra.mxu3 %vm65_vm2, %v13576_v37  ;;  %v815_v44 = vsel %vm33_vm0, %v795_v45, -inf }
 0x16b   : > { %v1115_v49 = vpop.f32.mrf.mxu2 }
 0x16c   : > { %v13591_v21 = vpop.f32.mrf.mxu3  ;;  %v1141_v55 = vadd.f32 %v1115_v49, %v982_v31  ;;  %v759_v50 = vpop.f32.mrf.mxu0 }
 0x16d   : > { %v984_v9 = vpop.f32.mrf.mxu1  ;;  %v783_v56 = vadd.f32 %v759_v50, %v13285_v23  ;;  %v780_v23 = vadd.f32 %v750_v54, %v13234_v29  ;;  %v11551_v29 = vld [vmem:[%s18239_s1 + $0x28] sm:$0x7f] }
 0x16e   : > { %v13594_v14 = vadd.f32 %v1265_v20, %v1141_v55  ;;  %v985_v18 = vadd.f32 %v13329_v1, %v984_v9  ;;  %11552 = vmatpush.msk.msrb.mxu1 %vm114_vm1, %v11551_v29 }
 0x16f   : > { %v799_v3 = vmax.f32 %v783_v56, 0.0  ;;  %11398 = vmatmul.msk.f32.gmra.mxu0 %vm65_vm2, %v13332_v48  ;;  %v796_v54 = vmax.f32 %v780_v23, 0.0  ;;  %v797_v56 = vmax.f32 %v781_v2, 0.0 }
 0x170   : > { %11417 = vmatmul.msk.f32.gmra.mxu1 %vm65_vm2, %v13413_v27  ;;  %11434 = vmatmul.msk.f32.gmra.mxu2 %vm65_vm2, %v13413_v27 }
 0x171   : > { %11515 = vmatmul.msk.f32.vlgmr.msrb.gmra.mxu3 %vm65_vm2, %v13516_v47  ;;  %v816_v20 = vsel %vm33_vm0, %v799_v3, -inf  ;;  %2834 = vmatpush.msrb.mxu1 %v13438_v52 }
 0x172   : > { %v817_v26 = vmax.f32 %v815_v44, %v816_v20 }
 0x173   : > { %v1118_v6 = vpop.f32.mrf.mxu2 }
 0x174   : > { %v13608_v12 = vpop.f32.mrf.mxu3  ;;  %831 = vst.msk [vmem:[#allocation2 + $0x20] sm:$0xff] %vm33_vm0, %v817_v26  ;;  %v1142_v15 = vadd.f32 %v1118_v6, %v985_v18  ;;  %v762_v61 = vpop.f32.mrf.mxu0 }
 0x175   : > { %v987_v53 = vpop.f32.mrf.mxu1  ;;  %v784_v11 = vadd.f32 %v762_v61, %v13298_v33  ;;  %v818_v33 = vsel %vm33_vm0, %v796_v54, -inf }
 0x176   : > { %v13626_v63 = vadd.f32 %v13530_v32, %v1142_v15  ;;  %v988_v31 = vadd.f32 %v13329_v1, %v987_v53 }
 0x177   : > { %v800_v7 = vmax.f32 %v784_v11, 0.0  ;;  %11399 = vmatmul.msk.f32.gmra.mxu0 %vm65_vm2, %v13351_v42 }
 0x178   : > { %11418 = vmatmul.msk.f32.gmra.mxu1 %vm65_vm2, %v13450_v19  ;;  %11435 = vmatmul.msk.f32.gmra.mxu2 %vm65_vm2, %v13450_v19 }
 0x179   : > { %11516 = vmatmul.msk.f32.gmra.mxu3 %vm65_vm2, %v13536_v30  ;;  %v819_v32 = vsel %vm33_vm0, %v800_v7, -inf }
 0x17a   : > { %v820_v60 = vmax.f32 %v818_v33, %v819_v32 }
 0x17b   : > { %v1121_v49 = vpop.f32.mrf.mxu2 }
 0x17c   : > { %v13642_v55 = vpop.f32.mrf.mxu3  ;;  %832 = vst.msk [vmem:[#allocation2 + $0x28] sm:$0xff] %vm33_vm0, %v820_v60  ;;  %v1143_v50 = vadd.f32 %v1121_v49, %v988_v31  ;;  %v765_v9 = vpop.f32.mrf.mxu0  ;;  %v13699_v49 = vld [vmem:[%s18240_s2] ss:$0 sm:$0xff] }
 0x17d   : > { %v990_v45 = vpop.f32.mrf.mxu1  ;;  %v785_v3 = vadd.f32 %v765_v9, %v13312_v0  ;;  %v821_v0 = vsel %vm33_vm0, %v797_v56, -inf }
 0x17e   : > { %v13647_v18 = vadd.f32 %v13552_v4, %v1143_v50  ;;  %v991_v52 = vadd.f32 %v13329_v1, %v990_v45  ;;  %v782_v4 = vadd.f32 %v13573_v24, %v13259_v35 }
 0x17f   : > { %v801_v34 = vmax.f32 %v785_v3, 0.0  ;;  %11400 = vmatmul.msk.f32.gmra.mxu0 %vm65_vm2, %v13369_v57 }
 0x180   : > { %11419 = vmatmul.msk.f32.gmra.mxu1 %vm65_vm2, %v13474_v58  ;;  %11436 = vmatmul.msk.f32.gmra.mxu2 %vm65_vm2, %v13474_v58  ;;  %v798_v53 = vmax.f32 %v782_v4, 0.0 }
 0x181   : > { %11517 = vmatmul.msk.f32.gmra.mxu3 %vm65_vm2, %v13557_v16  ;;  %v822_v46 = vsel %vm33_vm0, %v801_v34, -inf }
 0x182   : > { %v823_v44 = vmax.f32 %v821_v0, %v822_v46  ;;  %v11588_v0 = vld [vmem:[%s18239_s1 + $0x40] sm:$0xff] }
 0x183   : > { %v839_v23 = vld [vmem:[#allocation2 + $0x20] ss:$2 sm:$0xff]  ;;  %v847_v20 = vld [vmem:[#allocation2 + $0x21] ss:$2 sm:$0xff]  ;;  %v1124_v26 = vpop.f32.mrf.mxu2  ;;  %3134 = vmatpush.msra.mxu3 %v11588_v0 }
 0x184   : > { %v13662_v6 = vpop.f32.mrf.mxu3  ;;  %833 = vst.msk [vmem:[#allocation2 + $0x30] sm:$0xff] %vm33_vm0, %v823_v44  ;;  %v1144_v62 = vadd.f32 %v1124_v26, %v991_v52  ;;  %v768_v36 = vpop.f32.mrf.mxu0  ;;  %v852_v61 = vmax.f32 %v839_v23, %v847_v20  ;;  %v13705_v52 = vld [vmem:[%s12844_s21 + $0x1a8] sm:$0xff]  ;;  %v13726_v26 = vld [vmem:[%s12844_s21 + $0x1b0] sm:$0xff] }
 0x185   : > { %v993_v15 = vpop.f32.mrf.mxu1  ;;  %v786_v29 = vadd.f32 %v768_v36, %v13334_v10  ;;  %v824_v10 = vsel %vm33_vm0, %v798_v53, -inf }
 0x186   : > { %v13667_v54 = vadd.f32 %v13571_v8, %v1144_v62  ;;  %856 = vst.msk [vmem:[#allocation3 + $0x10] sm:$0xff] %vm33_vm0, %v852_v61  ;;  %v994_v24 = vadd.f32 %v13329_v1, %v993_v15  ;;  %v13683_v1 = vld [vmem:[%s12844_s21 + $0x1a0] sm:$0xff] }
 0x187   : > { %v802_v35 = vmax.f32 %v786_v29, 0.0  ;;  %11401 = vmatmul.msk.f32.gmra.mxu0 %vm65_vm2, %v13391_v25 }
 0x188   : > { %11420 = vmatmul.msk.f32.gmra.mxu1 %vm65_vm2, %v13497_v43  ;;  %11437 = vmatmul.msk.f32.gmra.mxu2 %vm65_vm2, %v13497_v43 }
 0x189   : > { %11518 = vmatmul.msk.f32.gmra.mxu3 %vm65_vm2, %v13576_v37  ;;  %v825_v8 = vsel %vm33_vm0, %v802_v35, -inf }
 0x18a   : > { %v826_v11 = vmax.f32 %v824_v10, %v825_v8 }
 0x18b   : > { %v1127_v7 = vpop.f32.mrf.mxu2 }
 0x18c   : > { %v1893_v31 = vpop.f32.mrf.mxu3  ;;  %834 = vst.msk [vmem:[#allocation2 + $0x38] sm:$0xff] %vm33_vm0, %v826_v11  ;;  %v1145_v33 = vadd.f32 %v1127_v7, %v994_v24  ;;  %v1382_v2 = vpop.f32.mrf.mxu0 }
 0x18d   : > { %v1532_v32 = vpop.f32.mrf.mxu1  ;;  %v1430_v29 = vadd.f32 %v1382_v2, %v13353_v38 }
 0x18e   : > { %v13686_v60 = vadd.f32 %v13591_v21, %v1145_v33 }
 0x18f   : > { %11460 = vmatmul.msk.f32.vlgmr.msra.gmra.mxu0 %vm65_vm2, %v13332_v48  ;;  %v1580_v35 = vadd.f32 %v1532_v32, %v1430_v29 }
 0x190   : > { %11479 = vmatmul.msk.f32.vlgmr.msra.gmra.mxu1 %vm65_vm2, %v13413_v27  ;;  %11498 = vmatmul.msk.f32.vlgmr.msra.gmra.mxu2 %vm65_vm2, %v13516_v47 }
 0x191   : > { %11519 = vmatmul.msk.f32.gmra.mxu3 %vm65_vm2, %v13683_v1  ;;  %v1596_v33 = vmax.f32 %v1580_v35, 0.0 }
 0x193   : > { %v841_v50 = vld [vmem:[#allocation2 + $0x30] ss:$2 sm:$0xff]  ;;  %v849_v21 = vld [vmem:[#allocation2 + $0x31] ss:$2 sm:$0xff]  ;;  %v1750_v9 = vpop.f32.mrf.mxu2 }
 0x194   : > { %v13701_v45 = vpop.f32.mrf.mxu3  ;;  %v1751_v48 = vadd.f32 %v13699_v49, %v1750_v9  ;;  %v1385_v56 = vpop.f32.mrf.mxu0  ;;  %v853_v34 = vmax.f32 %v841_v50, %v849_v21 }
 0x195   : > { %v1535_v3 = vpop.f32.mrf.mxu1  ;;  %v1431_v2 = vadd.f32 %v1385_v56, %v13371_v59 }
 0x196   : > { %v13711_v4 = vadd.f32 %v13608_v12, %v1751_v48  ;;  %857 = vst.msk [vmem:[#allocation3 + $0x18] sm:$0xff] %vm33_vm0, %v853_v34 }
 0x197   : > { %11461 = vmatmul.msk.f32.gmra.mxu0 %vm65_vm2, %v13351_v42  ;;  %v1581_v32 = vadd.f32 %v1535_v3, %v1431_v2 }
 0x198   : > { %11480 = vmatmul.msk.f32.gmra.mxu1 %vm65_vm2, %v13450_v19  ;;  %11499 = vmatmul.msk.f32.gmra.mxu2 %vm65_vm2, %v13536_v30 }
 0x199   : > { %11520 = vmatmul.msk.f32.gmra.mxu3 %vm65_vm2, %v13705_v52 }
 0x19b   : > { %v1753_v46 = vpop.f32.mrf.mxu2 }
 0x19c   : > { %v13722_v44 = vpop.f32.mrf.mxu3  ;;  %v1754_v12 = vadd.f32 %v13699_v49, %v1753_v46  ;;  %v1388_v23 = vpop.f32.mrf.mxu0  ;;  %v13786_v46 = vld [vmem:[%s12844_s21 + $0x1c8] sm:$0xff] }
 0x19d   : > { %v1538_v20 = vpop.f32.mrf.mxu1 }
 0x19e   : > { %v13729_v42 = vadd.f32 %v13642_v55, %v1754_v12  ;;  %v13791_v12 = vld [vmem:[%s18239_s1 + $0x10] sm:$0xff] }
 0x19f   : > { %11462 = vmatmul.msk.f32.gmra.mxu0 %vm65_vm2, %v13369_v57  ;;  %v13747_v57 = vld [vmem:[%s12844_s21 + $0x1b8] sm:$0xff] }
 0x1a0   : > { %11481 = vmatmul.msk.f32.gmra.mxu1 %vm65_vm2, %v13474_v58  ;;  %11500 = vmatmul.msk.f32.gmra.mxu2 %vm65_vm2, %v13557_v16 }
 0x1a1   : > { %11521 = vmatmul.msk.f32.gmra.mxu3 %vm65_vm2, %v13726_v26  ;;  %2684 = vmatpush.msrb.mxu0 %v13791_v12 }
 0x1a3   : > { %v1756_v62 = vpop.f32.mrf.mxu2 }
 0x1a4   : > { %v13739_v36 = vpop.f32.mrf.mxu3  ;;  %v1757_v15 = vadd.f32 %v13699_v49, %v1756_v62  ;;  %v13742_v61 = vpop.f32.mrf.mxu0  ;;  %v1597_v62 = vmax.f32 %v1581_v32, 0.0 }
 0x1a5   : > { %v13744_v55 = vpop.f32.mrf.mxu1 }
 0x1a6   : > { %v13750_v53 = vadd.f32 %v13662_v6, %v1757_v15  ;;  %v1432_v15 = vadd.f32 %v1388_v23, %v13393_v17 }
 0x1a7   : > { %11463 = vmatmul.msk.f32.gmra.mxu0 %vm65_vm2, %v13391_v25  ;;  %v13766_v25 = vld [vmem:[%s12844_s21 + $0x1c0] sm:$0xff] }
 0x1a8   : > { %11482 = vmatmul.msk.f32.gmra.mxu1 %vm65_vm2, %v13497_v43  ;;  %11501 = vmatmul.msk.f32.gmra.mxu2 %vm65_vm2, %v13576_v37  ;;  %v1582_v35 = vadd.f32 %v1538_v20, %v1432_v15 }
 0x1a9   : > { %11522 = vmatmul.msk.f32.gmra.mxu3 %vm65_vm2, %v13747_v57 }
 0x1aa   : > { %v1598_v20 = vmax.f32 %v1582_v35, 0.0 }
 0x1ab   : > { %v1759_v24 = vpop.f32.mrf.mxu2 }
 0x1ac   : > { %v13761_v10 = vpop.f32.mrf.mxu3  ;;  %v1760_v6 = vadd.f32 %v13699_v49, %v1759_v24  ;;  %v1394_v8 = vpop.f32.mrf.mxu0 }
 0x1ad   : > { %v1544_v38 = vpop.f32.mrf.mxu1  ;;  %v1434_v11 = vadd.f32 %v1394_v8, %v13454_v40 }
 0x1ae   : > { %v13768_v7 = vadd.f32 %v1893_v31, %v1760_v6  ;;  %v1612_v31 = vsel %vm33_vm0, %v1596_v33, -inf  ;;  %v13814_v33 = vld [vmem:[%s12844_s21 + $0x1d0] sm:$0xff] }
 0x1af   : > { %v1584_v50 = vadd.f32 %v1544_v38, %v1434_v11  ;;  %11464 = vmatmul.msk.f32.gmra.mxu0 %vm65_vm2, %v13413_v27 }
 0x1b0   : > { %11483 = vmatmul.msk.f32.gmra.mxu1 %vm65_vm2, %v13516_v47  ;;  %11502 = vmatmul.msk.f32.gmra.mxu2 %vm65_vm2, %v13683_v1 }
 0x1b1   : > { %11523 = vmatmul.msk.f32.gmra.mxu3 %vm65_vm2, %v13766_v25  ;;  %v1600_v40 = vmax.f32 %v1584_v50, 0.0  ;;  %v1433_v50 = vadd.f32 %v13742_v61, %v13416_v5 }
 0x1b3   : > { %v1613_v59 = vsel %vm33_vm0, %v1600_v40, -inf  ;;  %v1762_v21 = vpop.f32.mrf.mxu2 }
 0x1b4   : > { %v13781_v9 = vpop.f32.mrf.mxu3  ;;  %v1614_v48 = vmax.f32 %v1612_v31, %v1613_v59  ;;  %v1763_v27 = vadd.f32 %v13699_v49, %v1762_v21  ;;  %v1397_v56 = vpop.f32.mrf.mxu0  ;;  %v1583_v31 = vadd.f32 %v13744_v55, %v1433_v50 }
 0x1b5   : > { %v1547_v34 = vpop.f32.mrf.mxu1  ;;  %v1435_v0 = vadd.f32 %v1397_v56, %v13477_v22 }
 0x1b6   : > { %1636 = vst.msk [vmem:[#allocation2] sm:$0xff] %vm33_vm0, %v1614_v48  ;;  %v13796_v3 = vadd.f32 %v13701_v45, %v1763_v27  ;;  %v1615_v45 = vsel %vm33_vm0, %v1597_v62, -inf  ;;  %v1599_v15 = vmax.f32 %v1583_v31, 0.0 }
 0x1b7   : > { %v1585_v29 = vadd.f32 %v1547_v34, %v1435_v0  ;;  %11465 = vmatmul.msk.f32.gmra.mxu0 %vm65_vm2, %v13450_v19  ;;  %v13838_v0 = vld [vmem:[%s12844_s21 + $0x1d8] sm:$0xff] }
 0x1b8   : > { %11484 = vmatmul.msk.f32.gmra.mxu1 %vm65_vm2, %v13536_v30  ;;  %11503 = vmatmul.msk.f32.gmra.mxu2 %vm65_vm2, %v13705_v52 }
 0x1b9   : > { %11524 = vmatmul.msk.f32.gmra.mxu3 %vm65_vm2, %v13786_v46  ;;  %v1601_v22 = vmax.f32 %v1585_v29, 0.0 }
 0x1bb   : > { %v1616_v17 = vsel %vm33_vm0, %v1601_v22, -inf  ;;  %v1765_v23 = vpop.f32.mrf.mxu2 }
 0x1bc   : > { %v13809_v24 = vpop.f32.mrf.mxu3  ;;  %v1617_v6 = vmax.f32 %v1615_v45, %v1616_v17  ;;  %v1766_v19 = vadd.f32 %v13699_v49, %v1765_v23  ;;  %v1400_v8 = vpop.f32.mrf.mxu0 }
 0x1bd   : > { %v1550_v38 = vpop.f32.mrf.mxu1  ;;  %v1436_v11 = vadd.f32 %v1400_v8, %v13500_v13 }
 0x1be   : > { %1637 = vst.msk [vmem:[#allocation2 + $0x8] sm:$0xff] %vm33_vm0, %v1617_v6  ;;  %v13818_v2 = vadd.f32 %v13722_v44, %v1766_v19  ;;  %v1618_v44 = vsel %vm33_vm0, %v1598_v20, -inf  ;;  %v13857_v19 = vld [vmem:[%s12844_s21 + $0x1e0] sm:$0xff] }
 0x1bf   : > { %v1586_v40 = vadd.f32 %v1550_v38, %v1436_v11  ;;  %11466 = vmatmul.msk.f32.gmra.mxu0 %vm65_vm2, %v13474_v58 }
 0x1c0   : > { %11485 = vmatmul.msk.f32.gmra.mxu1 %vm65_vm2, %v13557_v16  ;;  %11504 = vmatmul.msk.f32.gmra.mxu2 %vm65_vm2, %v13726_v26 }
 0x1c1   : > { %11525 = vmatmul.msk.f32.gmra.mxu3 %vm65_vm2, %v13814_v33  ;;  %v1602_v13 = vmax.f32 %v1586_v40, 0.0 }
 0x1c3   : > { %v1619_v5 = vsel %vm33_vm0, %v1602_v13, -inf  ;;  %v1768_v61 = vpop.f32.mrf.mxu2 }
 0x1c4   : > { %v13833_v32 = vpop.f32.mrf.mxu3  ;;  %v1620_v58 = vmax.f32 %v1618_v44, %v1619_v5  ;;  %v1769_v59 = vadd.f32 %v13699_v49, %v1768_v61  ;;  %v1403_v21 = vpop.f32.mrf.mxu0  ;;  %v11663_v44 = vld [vmem:[%s18239_s1 + $0x38] sm:$0x7f] }
 0x1c5   : > { %v1553_v48 = vpop.f32.mrf.mxu1  ;;  %v1644_v27 = vld [vmem:[#allocation2] ss:$2 sm:$0xff]  ;;  %v1648_v56 = vld [vmem:[#allocation2 + $0x1] ss:$2 sm:$0xff]  ;;  %v1437_v34 = vadd.f32 %v1403_v21, %v13519_v39  ;;  %11664 = vmatpush.msk.msrb.mxu3 %vm114_vm1, %v11663_v44  ;;  %v13899_v21 = vld [vmem:[%s12844_s21 + $0x1f0] sm:$0xff] }
 0x1c6   : > { %1638 = vst.msk [vmem:[#allocation2 + $0x10] sm:$0xff] %vm33_vm0, %v1620_v58  ;;  %v13842_v55 = vadd.f32 %v13739_v36, %v1769_v59  ;;  %v1652_v62 = vmax.f32 %v1644_v27, %v1648_v56  ;;  %v1621_v36 = vsel %vm33_vm0, %v1599_v15, -inf }
 0x1c7   : > { %v1587_v29 = vadd.f32 %v1553_v48, %v1437_v34  ;;  %11467 = vmatmul.msk.f32.gmra.mxu0 %vm65_vm2, %v13497_v43 }
 0x1c8   : > { %11486 = vmatmul.msk.f32.gmra.mxu1 %vm65_vm2, %v13576_v37  ;;  %11505 = vmatmul.msk.f32.gmra.mxu2 %vm65_vm2, %v13747_v57  ;;  %1656 = vst.msk [vmem:[#allocation3 + $0x20] sm:$0xff] %vm33_vm0, %v1652_v62 }
 0x1c9   : > { %11526 = vmatmul.msk.f32.gmra.mxu3 %vm65_vm2, %v13838_v0  ;;  %v1603_v39 = vmax.f32 %v1587_v29, 0.0 }
 0x1cb   : > { %v1622_v22 = vsel %vm33_vm0, %v1603_v39, -inf  ;;  %v1771_v45 = vpop.f32.mrf.mxu2 }
 0x1cc   : > { %v1917_v35 = vpop.f32.mrf.mxu3  ;;  %v1623_v17 = vmax.f32 %v1621_v36, %v1622_v22  ;;  %v1772_v43 = vadd.f32 %v13699_v49, %v1771_v45  ;;  %v1406_v23 = vpop.f32.mrf.mxu0 }
 0x1cd   : > { %v1556_v6 = vpop.f32.mrf.mxu1  ;;  %v1438_v29 = vadd.f32 %v1406_v23, %v13540_v41 }
 0x1ce   : > { %1639 = vst.msk [vmem:[#allocation2 + $0x18] sm:$0xff] %vm33_vm0, %v1623_v17  ;;  %v13861_v8 = vadd.f32 %v13761_v10, %v1772_v43 }
 0x1cf   : > { %11468 = vmatmul.msk.f32.gmra.mxu0 %vm65_vm2, %v13516_v47  ;;  %v13875_v47 = vld [vmem:[%s12844_s21 + $0x1e8] sm:$0xff]  ;;  %v1588_v39 = vadd.f32 %v1556_v6, %v1438_v29 }
 0x1d0   : > { %11487 = vmatmul.msk.f32.gmra.mxu1 %vm65_vm2, %v13683_v1  ;;  %11506 = vmatmul.msk.f32.gmra.mxu2 %vm65_vm2, %v13766_v25 }
 0x1d1   : > { %11527 = vmatmul.msk.f32.gmra.mxu3 %vm65_vm2, %v13857_v19  ;;  %v1604_v23 = vmax.f32 %v1588_v39, 0.0 }
 0x1d3   : > { %v1774_v38 = vpop.f32.mrf.mxu2 }
 0x1d4   : > { %v13871_v11 = vpop.f32.mrf.mxu3  ;;  %v1775_v20 = vadd.f32 %v13699_v49, %v1774_v38  ;;  %v1409_v50 = vpop.f32.mrf.mxu0 }
 0x1d5   : > { %v1559_v10 = vpop.f32.mrf.mxu1  ;;  %v1645_v40 = vld [vmem:[#allocation2 + $0x10] ss:$2 sm:$0xff]  ;;  %v1649_v13 = vld [vmem:[#allocation2 + $0x11] ss:$2 sm:$0xff]  ;;  %v1439_v38 = vadd.f32 %v1409_v50, %v13560_v51 }
 0x1d6   : > { %v13881_v31 = vadd.f32 %v13781_v9, %v1775_v20  ;;  %v1653_v5 = vmax.f32 %v1645_v40, %v1649_v13 }
 0x1d7   : > { %11469 = vmatmul.msk.f32.gmra.mxu0 %vm65_vm2, %v13536_v30  ;;  %v1589_v6 = vadd.f32 %v1559_v10, %v1439_v38  ;;  %v3281_v10 = vld [vmem:[%s18239_s1 + $0x8] sm:$0x7f] }
 0x1d8   : > { %11488 = vmatmul.msk.f32.gmra.mxu1 %vm65_vm2, %v13705_v52  ;;  %11507 = vmatmul.msk.f32.gmra.mxu2 %vm65_vm2, %v13786_v46  ;;  %1657 = vst.msk [vmem:[#allocation3 + $0x28] sm:$0xff] %vm33_vm0, %v1653_v5 }
 0x1d9   : > { %11528 = vmatmul.msk.f32.gmra.mxu3 %vm65_vm2, %v13875_v47  ;;  %11607 = vmatpush.msk.msra.mxu0 %vm114_vm1, %v3281_v10 }
 0x1db   : > { %v1777_v61 = vpop.f32.mrf.mxu2 }
 0x1dc   : > { %v13893_v9 = vpop.f32.mrf.mxu3  ;;  %v1778_v58 = vadd.f32 %v13699_v49, %v1777_v61  ;;  %v1412_v30 = vpop.f32.mrf.mxu0 }
 0x1dd   : > { %v13896_v59 = vpop.f32.mrf.mxu1  ;;  %v1440_v39 = vadd.f32 %v1412_v30, %v13579_v28 }
 0x1de   : > { %v13902_v48 = vadd.f32 %v13809_v24, %v1778_v58 }
 0x1df   : > { %11470 = vmatmul.msk.f32.gmra.mxu0 %vm65_vm2, %v13557_v16  ;;  %v13920_v16 = vld [vmem:[%s12844_s21 + $0x1f8] sm:$0xff]  ;;  %v1590_v30 = vadd.f32 %v13896_v59, %v1440_v39 }
 0x1e0   : > { %11489 = vmatmul.msk.f32.gmra.mxu1 %vm65_vm2, %v13726_v26  ;;  %11508 = vmatmul.msk.f32.gmra.mxu2 %vm65_vm2, %v13814_v33 }
 0x1e1   : > { %11529 = vmatmul.msk.f32.gmra.mxu3 %vm65_vm2, %v13899_v21 }
 0x1e3   : > { %v1780_v27 = vpop.f32.mrf.mxu2 }
 0x1e4   : > { %v13912_v56 = vpop.f32.mrf.mxu3  ;;  %v1781_v34 = vadd.f32 %v13699_v49, %v1780_v27  ;;  %v13915_v62 = vpop.f32.mrf.mxu0  ;;  %v13959_v27 = vld [vmem:[%s12844_s21 + $0x208] sm:$0xff] }
 0x1e5   : > { %v13917_v24 = vpop.f32.mrf.mxu1 }
 0x1e6   : > { %v13923_v15 = vadd.f32 %v13833_v32, %v1781_v34  ;;  %v11644_v34 = vld [vmem:[%s18239_s1 + $0x28] sm:$0x7f] }
 0x1e7   : > { %11471 = vmatmul.msk.f32.gmra.mxu0 %vm65_vm2, %v13576_v37  ;;  %v13939_v37 = vld [vmem:[%s12844_s21 + $0x200] sm:$0xff]  ;;  %11645 = vmatpush.msk.msra.mxu2 %vm114_vm1, %v11644_v34 }
 0x1e8   : > { %11490 = vmatmul.msk.f32.gmra.mxu1 %vm65_vm2, %v13747_v57  ;;  %11509 = vmatmul.msk.f32.gmra.mxu2 %vm65_vm2, %v13838_v0 }
 0x1e9   : > { %11530 = vmatmul.msk.f32.gmra.mxu3 %vm65_vm2, %v13920_v16 }
 0x1eb   : > { %v1783_v36 = vpop.f32.mrf.mxu2 }
 0x1ec   : > { %v13934_v22 = vpop.f32.mrf.mxu3  ;;  %v1784_v32 = vadd.f32 %v13699_v49, %v1783_v36  ;;  %v1418_v45 = vpop.f32.mrf.mxu0 }
 0x1ed   : > { %v1568_v41 = vpop.f32.mrf.mxu1  ;;  %v1442_v17 = vadd.f32 %v1418_v45, %v13626_v63 }
 0x1ee   : > { %v13941_v43 = vadd.f32 %v1917_v35, %v1784_v32  ;;  %v1624_v35 = vsel %vm33_vm0, %v1604_v23, -inf }
 0x1ef   : > { %v1592_v20 = vadd.f32 %v1568_v41, %v1442_v17  ;;  %11472 = vmatmul.msk.f32.gmra.mxu0 %vm65_vm2, %v13683_v1 }
 0x1f0   : > { %11491 = vmatmul.msk.f32.gmra.mxu1 %vm65_vm2, %v13766_v25  ;;  %11510 = vmatmul.msk.f32.gmra.mxu2 %vm65_vm2, %v13857_v19 }
 0x1f1   : > { %11591 = vmatmul.msk.f32.vlgmr.msra.gmra.mxu3 %vm65_vm2, %v13939_v37  ;;  %v1608_v63 = vmax.f32 %v1592_v20, 0.0 }
 0x1f3   : > { %v1625_v51 = vsel %vm33_vm0, %v1608_v63, -inf  ;;  %v1786_v50 = vpop.f32.mrf.mxu2 }
 0x1f4   : > { %v13954_v40 = vpop.f32.mrf.mxu3  ;;  %v1626_v13 = vmax.f32 %v1624_v35, %v1625_v51  ;;  %v1787_v44 = vadd.f32 %v13699_v49, %v1786_v50  ;;  %v1421_v5 = vpop.f32.mrf.mxu0  ;;  %v1606_v51 = vmax.f32 %v1590_v30, 0.0  ;;  %v1441_v50 = vadd.f32 %v13915_v62, %v13594_v14 }
 0x1f5   : > { %v1571_v61 = vpop.f32.mrf.mxu1  ;;  %v1443_v58 = vadd.f32 %v1421_v5, %v13647_v18  ;;  %v1605_v18 = vmax.f32 %v1589_v6, 0.0  ;;  %v13995_v6 = vld [vmem:[%s12844_s21 + $0x210] sm:$0xff] }
 0x1f6   : > { %1640 = vst.msk [vmem:[#allocation2 + $0x20] sm:$0xff] %vm33_vm0, %v1626_v13  ;;  %v13971_v29 = vadd.f32 %v13871_v11, %v1787_v44  ;;  %v11625_v11 = vld [vmem:[%s18239_s1 + $0x18] sm:$0x7f] }
 0x1f7   : > { %v1593_v36 = vadd.f32 %v1571_v61, %v1443_v58  ;;  %11473 = vmatmul.msk.f32.gmra.mxu0 %vm65_vm2, %v13705_v52  ;;  %11626 = vmatpush.msk.msra.mxu1 %vm114_vm1, %v11625_v11  ;;  %v1627_v28 = vsel %vm33_vm0, %v1605_v18, -inf }
 0x1f8   : > { %11492 = vmatmul.msk.f32.gmra.mxu1 %vm65_vm2, %v13786_v46  ;;  %11511 = vmatmul.msk.f32.gmra.mxu2 %vm65_vm2, %v13875_v47 }
 0x1f9   : > { %11592 = vmatmul.msk.f32.gmra.mxu3 %vm65_vm2, %v13959_v27  ;;  %v1609_v32 = vmax.f32 %v1593_v36, 0.0  ;;  %3486 = vmatpush.msra.mxu1 %v13791_v12  ;;  %v1630_v12 = vsel %vm33_vm0, %v1606_v51, -inf  ;;  %v14019_v36 = vld [vmem:[%s12844_s21 + $0x218] sm:$0xff] }
 0x1fb   : > { %v1628_v45 = vsel %vm33_vm0, %v1609_v32, -inf  ;;  %v1789_v41 = vpop.f32.mrf.mxu2 }
 0x1fc   : > { %v13989_v17 = vpop.f32.mrf.mxu3  ;;  %v1629_v23 = vmax.f32 %v1627_v28, %v1628_v45  ;;  %v1790_v38 = vadd.f32 %v13699_v49, %v1789_v41  ;;  %v1424_v20 = vpop.f32.mrf.mxu0 }
 0x1fd   : > { %v1574_v63 = vpop.f32.mrf.mxu1  ;;  %v1444_v35 = vadd.f32 %v1424_v20, %v13667_v54 }
 0x1fe   : > { %1641 = vst.msk [vmem:[#allocation2 + $0x28] sm:$0xff] %vm33_vm0, %v1629_v23  ;;  %v13999_v59 = vadd.f32 %v13893_v9, %v1790_v38  ;;  %v1591_v9 = vadd.f32 %v13917_v24, %v1441_v50 }
 0x1ff   : > { %v1594_v13 = vadd.f32 %v1574_v63, %v1444_v35  ;;  %11474 = vmatmul.msk.f32.gmra.mxu0 %vm65_vm2, %v13726_v26  ;;  %v14040_v35 = vld [vmem:[%s12844_s21 + $0x220] sm:$0xff] }
 0x200   : > { %11493 = vmatmul.msk.f32.gmra.mxu1 %vm65_vm2, %v13814_v33  ;;  %11512 = vmatmul.msk.f32.gmra.mxu2 %vm65_vm2, %v13899_v21  ;;  %v1607_v32 = vmax.f32 %v1591_v9, 0.0  ;;  %v14060_v9 = vld [vmem:[%s12844_s21 + $0x228] sm:$0xff] }
 0x201   : > { %11593 = vmatmul.msk.f32.gmra.mxu3 %vm65_vm2, %v13995_v6  ;;  %v1610_v54 = vmax.f32 %v1594_v13, 0.0 }
 0x203   : > { %v1631_v14 = vsel %vm33_vm0, %v1610_v54, -inf  ;;  %v1792_v62 = vpop.f32.mrf.mxu2 }
 0x204   : > { %v14014_v44 = vpop.f32.mrf.mxu3  ;;  %v1632_v5 = vmax.f32 %v1630_v12, %v1631_v14  ;;  %v1793_v61 = vadd.f32 %v13699_v49, %v1792_v62  ;;  %v1427_v58 = vpop.f32.mrf.mxu0 }
 0x205   : > { %v1577_v34 = vpop.f32.mrf.mxu1  ;;  %v1646_v10 = vld [vmem:[#allocation2 + $0x20] ss:$2 sm:$0xff]  ;;  %v1650_v18 = vld [vmem:[#allocation2 + $0x21] ss:$2 sm:$0xff]  ;;  %v1445_v39 = vadd.f32 %v1427_v58, %v13686_v60 }
 0x206   : > { %1642 = vst.msk [vmem:[#allocation2 + $0x30] sm:$0xff] %vm33_vm0, %v1632_v5  ;;  %v14023_v24 = vadd.f32 %v13912_v56, %v1793_v61  ;;  %v1654_v11 = vmax.f32 %v1646_v10, %v1650_v18  ;;  %v1633_v56 = vsel %vm33_vm0, %v1607_v32, -inf }
 0x207   : > { %v1595_v28 = vadd.f32 %v1577_v34, %v1445_v39  ;;  %11475 = vmatmul.msk.f32.gmra.mxu0 %vm65_vm2, %v13747_v57  ;;  %v14074_v34 = vld [vmem:[%s12844_s21 + $0x230] sm:$0xff] }
 0x208   : > { %11494 = vmatmul.msk.f32.gmra.mxu1 %vm65_vm2, %v13838_v0  ;;  %11513 = vmatmul.msk.f32.gmra.mxu2 %vm65_vm2, %v13920_v16  ;;  %1658 = vst.msk [vmem:[#allocation3 + $0x30] sm:$0xff] %vm33_vm0, %v1654_v11  ;;  %v14091_v11 = vld [vmem:[%s12844_s21 + $0x238] sm:$0xff] }
 0x209   : > { %11594 = vmatmul.msk.f32.gmra.mxu3 %vm65_vm2, %v14019_v36  ;;  %v1611_v60 = vmax.f32 %v1595_v28, 0.0 }
 0x20b   : > { %v1634_v30 = vsel %vm33_vm0, %v1611_v60, -inf  ;;  %v1795_v45 = vpop.f32.mrf.mxu2 }
 0x20c   : > { %v14036_v41 = vpop.f32.mrf.mxu3  ;;  %v1635_v23 = vmax.f32 %v1633_v56, %v1634_v30  ;;  %v1796_v38 = vadd.f32 %v13699_v49, %v1795_v45  ;;  %v2034_v20 = vpop.f32.mrf.mxu0  ;;  %v11662_v49 = vld [vmem:[%s18239_s1 + $0x30] sm:$0xff]  ;;  %v14107_v30 = vld [vmem:[%s12844_s21 + $0x240] sm:$0xff] }
 0x20d   : > { %v2184_v63 = vpop.f32.mrf.mxu1  ;;  %3786 = vmatpush.msrb.mxu3 %v11662_v49 }
 0x20e   : > { %1643 = vst.msk [vmem:[#allocation2 + $0x38] sm:$0xff] %vm33_vm0, %v1635_v23  ;;  %v14044_v51 = vadd.f32 %v13934_v22, %v1796_v38 }
 0x20f   : > { %11534 = vmatmul.msk.f32.vlgmr.msrb.gmra.mxu0 %vm65_vm2, %v13683_v1 }
 0x210   : > { %11553 = vmatmul.msk.f32.vlgmr.msrb.gmra.mxu1 %vm65_vm2, %v13766_v25  ;;  %11572 = vmatmul.msk.f32.vlgmr.msrb.gmra.mxu2 %vm65_vm2, %v13857_v19 }
 0x211   : > { %11595 = vmatmul.msk.f32.gmra.mxu3 %vm65_vm2, %v14040_v35 }
 0x213   : > { %v2334_v50 = vpop.f32.mrf.mxu2 }
 0x214   : > { %v14057_v22 = vpop.f32.mrf.mxu3  ;;  %v2037_v13 = vpop.f32.mrf.mxu0 }
 0x215   : > { %v2187_v1 = vpop.f32.mrf.mxu1  ;;  %v1647_v54 = vld [vmem:[#allocation2 + $0x30] ss:$2 sm:$0xff]  ;;  %v1651_v12 = vld [vmem:[#allocation2 + $0x31] ss:$2 sm:$0xff] }
 0x216   : > { %v1655_v14 = vmax.f32 %v1647_v54, %v1651_v12  ;;  %v14122_v12 = vld [vmem:[%s12844_s21 + $0x248] sm:$0xff] }
 0x217   : > { %11535 = vmatmul.msk.f32.gmra.mxu0 %vm65_vm2, %v13705_v52 }
 0x218   : > { %11554 = vmatmul.msk.f32.gmra.mxu1 %vm65_vm2, %v13786_v46  ;;  %11573 = vmatmul.msk.f32.gmra.mxu2 %vm65_vm2, %v13875_v47  ;;  %1659 = vst.msk [vmem:[#allocation3 + $0x38] sm:$0xff] %vm33_vm0, %v1655_v14 }
 0x219   : > { %11596 = vmatmul.msk.f32.gmra.mxu3 %vm65_vm2, %v14060_v9 }
 0x21b   : > { %v2337_v62 = vpop.f32.mrf.mxu2 }
 0x21c   : > { %v14071_v5 = vpop.f32.mrf.mxu3  ;;  %v2040_v61 = vpop.f32.mrf.mxu0 }
 0x21d   : > { %v2190_v58 = vpop.f32.mrf.mxu1 }
 0x21f   : > { %11536 = vmatmul.msk.f32.gmra.mxu0 %vm65_vm2, %v13726_v26  ;;  %v2082_v26 = vadd.f32 %v2034_v20, %v13711_v4  ;;  %v2083_v4 = vadd.f32 %v2037_v13, %v13729_v42 }
 0x220   : > { %11555 = vmatmul.msk.f32.gmra.mxu1 %vm65_vm2, %v13814_v33  ;;  %11574 = vmatmul.msk.f32.gmra.mxu2 %vm65_vm2, %v13899_v21 }
 0x221   : > { %11597 = vmatmul.msk.f32.gmra.mxu3 %vm65_vm2, %v14074_v34  ;;  %v2233_v14 = vadd.f32 %v2187_v1, %v2083_v4 }
 0x223   : > { %v2340_v52 = vpop.f32.mrf.mxu2  ;;  %v2383_v13 = vadd.f32 %v2337_v62, %v2233_v14  ;;  %v14144_v62 = vld [vmem:[%s18239_s1] sm:$0xff] }
 0x224   : > { %v14084_v10 = vpop.f32.mrf.mxu3  ;;  %v14086_v18 = vpop.f32.mrf.mxu0  ;;  %3352 = vmatpush.msra.mxu0 %v14144_v62 }
 0x225   : > { %v14088_v39 = vpop.f32.mrf.mxu1 }
 0x227   : > { %11537 = vmatmul.msk.f32.gmra.mxu0 %vm65_vm2, %v13747_v57  ;;  %v2232_v57 = vadd.f32 %v2184_v63, %v2082_v26 }
 0x228   : > { %11556 = vmatmul.msk.f32.gmra.mxu1 %vm65_vm2, %v13838_v0  ;;  %11575 = vmatmul.msk.f32.gmra.mxu2 %vm65_vm2, %v13920_v16 }
 0x229   : > { %11598 = vmatmul.msk.f32.gmra.mxu3 %vm65_vm2, %v14091_v11  ;;  %v2382_v23 = vadd.f32 %v2334_v50, %v2232_v57 }
 0x22b   : > { %v14102_v32 = vpop.f32.mrf.mxu2 }
 0x22c   : > { %v14104_v28 = vpop.f32.mrf.mxu3  ;;  %v2046_v60 = vpop.f32.mrf.mxu0 }
 0x22d   : > { %v2196_v56 = vpop.f32.mrf.mxu1  ;;  %v2086_v45 = vadd.f32 %v2046_v60, %v13796_v3  ;;  %v2398_v3 = vmax.f32 %v2382_v23, 0.0 }
 0x22f   : > { %11538 = vmatmul.msk.f32.gmra.mxu0 %vm65_vm2, %v13766_v25  ;;  %v2236_v38 = vadd.f32 %v2196_v56, %v2086_v45  ;;  %v2414_v42 = vsel %vm33_vm0, %v2398_v3, -inf }
 0x230   : > { %11557 = vmatmul.msk.f32.gmra.mxu1 %vm65_vm2, %v13857_v19  ;;  %11576 = vmatmul.msk.f32.gmra.mxu2 %vm65_vm2, %v13939_v37 }
 0x231   : > { %11599 = vmatmul.msk.f32.gmra.mxu3 %vm65_vm2, %v14107_v30 }
 0x233   : > { %v2346_v20 = vpop.f32.mrf.mxu2 }
 0x234   : > { %v14119_v63 = vpop.f32.mrf.mxu3  ;;  %v2386_v49 = vadd.f32 %v2346_v20, %v2236_v38  ;;  %v2049_v54 = vpop.f32.mrf.mxu0  ;;  %v14152_v38 = vld [vmem:[%s12844_s21 + $0x250] sm:$0xff] }
 0x235   : > { %v2199_v25 = vpop.f32.mrf.mxu1  ;;  %v2087_v26 = vadd.f32 %v2049_v54, %v13818_v2  ;;  %v2084_v2 = vadd.f32 %v2040_v61, %v13750_v53  ;;  %v2399_v53 = vmax.f32 %v2383_v13, 0.0 }
 0x236   : > { %v2402_v50 = vmax.f32 %v2386_v49, 0.0 }
 0x237   : > { %11539 = vmatmul.msk.f32.gmra.mxu0 %vm65_vm2, %v13786_v46  ;;  %v2237_v56 = vadd.f32 %v2199_v25, %v2087_v26  ;;  %v14139_v46 = vld [vmem:[%s18239_s1 + $0x20] sm:$0xff]  ;;  %v2234_v20 = vadd.f32 %v2190_v58, %v2084_v2  ;;  %v2417_v54 = vsel %vm33_vm0, %v2399_v53, -inf }
 0x238   : > { %11558 = vmatmul.msk.f32.gmra.mxu1 %vm65_vm2, %v13875_v47  ;;  %v2415_v60 = vsel %vm33_vm0, %v2402_v50, -inf  ;;  %11577 = vmatmul.msk.f32.gmra.mxu2 %vm65_vm2, %v13959_v27 }
 0x239   : > { %11600 = vmatmul.msk.f32.gmra.mxu3 %vm65_vm2, %v14122_v12  ;;  %v2416_v1 = vmax.f32 %v2414_v42, %v2415_v60  ;;  %3636 = vmatpush.msra.mxu2 %v14139_v46  ;;  %v2384_v25 = vadd.f32 %v2340_v52, %v2234_v20 }
 0x23b   : > { %2438 = vst.msk [vmem:[#allocation2] sm:$0xff] %vm33_vm0, %v2416_v1  ;;  %v2349_v57 = vpop.f32.mrf.mxu2  ;;  %v2400_v42 = vmax.f32 %v2384_v25, 0.0  ;;  %v14171_v1 = vld [vmem:[%s12844_s21 + $0x258] sm:$0xff]  ;;  %v14190_v25 = vld [vmem:[%s12844_s21 + $0x260] sm:$0xff] }
 0x23c   : > { %v14147_v45 = vpop.f32.mrf.mxu3  ;;  %v2387_v61 = vadd.f32 %v2349_v57, %v2237_v56  ;;  %v2052_v23 = vpop.f32.mrf.mxu0 }
 0x23d   : > { %v2202_v4 = vpop.f32.mrf.mxu1  ;;  %v2088_v49 = vadd.f32 %v2052_v23, %v13842_v55  ;;  %v2085_v55 = vadd.f32 %v14086_v18, %v13768_v7  ;;  %v2420_v7 = vsel %vm33_vm0, %v2400_v42, -inf }
 0x23e   : > { %v2403_v3 = vmax.f32 %v2387_v61, 0.0 }
 0x23f   : > { %11540 = vmatmul.msk.f32.gmra.mxu0 %vm65_vm2, %v13814_v33  ;;  %v2238_v33 = vadd.f32 %v2202_v4, %v2088_v49  ;;  %v2235_v2 = vadd.f32 %v14088_v39, %v2085_v55 }
 0x240   : > { %11559 = vmatmul.msk.f32.gmra.mxu1 %vm65_vm2, %v13899_v21  ;;  %v2418_v14 = vsel %vm33_vm0, %v2403_v3, -inf  ;;  %11578 = vmatmul.msk.f32.gmra.mxu2 %vm65_vm2, %v13995_v6 }
 0x241   : > { %11601 = vmatmul.msk.f32.gmra.mxu3 %vm65_vm2, %v14152_v38  ;;  %v2419_v58 = vmax.f32 %v2417_v54, %v2418_v14  ;;  %v2385_v18 = vadd.f32 %v14102_v32, %v2235_v2 }
 0x243   : > { %2439 = vst.msk [vmem:[#allocation2 + $0x8] sm:$0xff] %vm33_vm0, %v2419_v58  ;;  %v2352_v50 = vpop.f32.mrf.mxu2  ;;  %v2401_v32 = vmax.f32 %v2385_v18, 0.0 }
 0x244   : > { %v14168_v26 = vpop.f32.mrf.mxu3  ;;  %v2388_v52 = vadd.f32 %v2352_v50, %v2238_v33  ;;  %v2055_v13 = vpop.f32.mrf.mxu0  ;;  %v11737_v33 = vld [vmem:[%s18239_s1 + $0x28] sm:$0x7f] }
 0x245   : > { %v2205_v60 = vpop.f32.mrf.mxu1  ;;  %v2089_v57 = vadd.f32 %v2055_v13, %v13861_v8  ;;  %v2423_v58 = vsel %vm33_vm0, %v2401_v32, -inf  ;;  %11738 = vmatpush.msk.msra.mxu3 %vm114_vm1, %v11737_v33 }
 0x246   : > { %v2404_v56 = vmax.f32 %v2388_v52, 0.0 }
 0x247   : > { %11541 = vmatmul.msk.f32.gmra.mxu0 %vm65_vm2, %v13838_v0  ;;  %v2239_v0 = vadd.f32 %v2205_v60, %v2089_v57  ;;  %4438 = vmatpush.msra.mxu3 %v14139_v46  ;;  %v14212_v60 = vld [vmem:[%s12844_s21 + $0x268] sm:$0xff] }
 0x248   : > { %11560 = vmatmul.msk.f32.gmra.mxu1 %vm65_vm2, %v13920_v16  ;;  %v2421_v53 = vsel %vm33_vm0, %v2404_v56, -inf  ;;  %11579 = vmatmul.msk.f32.gmra.mxu2 %vm65_vm2, %v14019_v36 }
 0x249   : > { %11602 = vmatmul.msk.f32.gmra.mxu3 %vm65_vm2, %v14171_v1  ;;  %v2422_v8 = vmax.f32 %v2420_v7, %v2421_v53 }
 0x24a   : > { %v2446_v39 = vld [vmem:[#allocation2] ss:$2 sm:$0xff]  ;;  %v2450_v61 = vld [vmem:[#allocation2 + $0x1] ss:$2 sm:$0xff] }
 0x24b   : > { %2440 = vst.msk [vmem:[#allocation2 + $0x10] sm:$0xff] %vm33_vm0, %v2422_v8  ;;  %v2355_v23 = vpop.f32.mrf.mxu2  ;;  %v2454_v20 = vmax.f32 %v2446_v39, %v2450_v61  ;;  %v14225_v8 = vld [vmem:[%s12844_s21 + $0x270] sm:$0xff] }
 0x24c   : > { %v14187_v4 = vpop.f32.mrf.mxu3  ;;  %v2389_v3 = vadd.f32 %v2355_v23, %v2239_v0  ;;  %v2058_v49 = vpop.f32.mrf.mxu0  ;;  %v14243_v23 = vld [vmem:[%s12844_s21 + $0x278] sm:$0xff] }
 0x24d   : > { %v2208_v54 = vpop.f32.mrf.mxu1  ;;  %2458 = vst.msk [vmem:[#allocation3 + $0x40] sm:$0xff] %vm33_vm0, %v2454_v20 }
 0x24e   : > { %v2405_v14 = vmax.f32 %v2389_v3, 0.0 }
 0x24f   : > { %11542 = vmatmul.msk.f32.gmra.mxu0 %vm65_vm2, %v13857_v19 }
 0x250   : > { %11561 = vmatmul.msk.f32.gmra.mxu1 %vm65_vm2, %v13939_v37  ;;  %v2424_v55 = vsel %vm33_vm0, %v2405_v14, -inf  ;;  %11580 = vmatmul.msk.f32.gmra.mxu2 %vm65_vm2, %v14040_v35 }
 0x251   : > { %11603 = vmatmul.msk.f32.gmra.mxu3 %vm65_vm2, %v14190_v25  ;;  %v2425_v50 = vmax.f32 %v2423_v58, %v2424_v55 }
 0x253   : > { %2441 = vst.msk [vmem:[#allocation2 + $0x18] sm:$0xff] %vm33_vm0, %v2425_v50  ;;  %v2358_v19 = vpop.f32.mrf.mxu2 }
 0x254   : > { %v14208_v42 = vpop.f32.mrf.mxu3  ;;  %v2061_v52 = vpop.f32.mrf.mxu0 }
 0x255   : > { %v2211_v13 = vpop.f32.mrf.mxu1 }
 0x257   : > { %11543 = vmatmul.msk.f32.gmra.mxu0 %vm65_vm2, %v13875_v47 }
 0x258   : > { %11562 = vmatmul.msk.f32.gmra.mxu1 %vm65_vm2, %v13959_v27  ;;  %11581 = vmatmul.msk.f32.gmra.mxu2 %vm65_vm2, %v14060_v9 }
 0x259   : > { %11604 = vmatmul.msk.f32.gmra.mxu3 %vm65_vm2, %v14212_v60 }
 0x25a   : > { %v2447_v2 = vld [vmem:[#allocation2 + $0x10] ss:$2 sm:$0xff]  ;;  %v2451_v56 = vld [vmem:[#allocation2 + $0x11] ss:$2 sm:$0xff] }
 0x25b   : > { %v2361_v46 = vpop.f32.mrf.mxu2  ;;  %v2455_v7 = vmax.f32 %v2447_v2, %v2451_v56 }
 0x25c   : > { %v14222_v57 = vpop.f32.mrf.mxu3  ;;  %v2064_v18 = vpop.f32.mrf.mxu0 }
 0x25d   : > { %v2214_v53 = vpop.f32.mrf.mxu1  ;;  %2459 = vst.msk [vmem:[#allocation3 + $0x48] sm:$0xff] %vm33_vm0, %v2455_v7 }
 0x25f   : > { %11544 = vmatmul.msk.f32.gmra.mxu0 %vm65_vm2, %v13899_v21  ;;  %v2090_v21 = vadd.f32 %v2058_v49, %v13881_v31  ;;  %v2091_v31 = vadd.f32 %v2061_v52, %v13902_v48 }
 0x260   : > { %11563 = vmatmul.msk.f32.gmra.mxu1 %vm65_vm2, %v13995_v6  ;;  %11582 = vmatmul.msk.f32.gmra.mxu2 %vm65_vm2, %v14074_v34 }
 0x261   : > { %11605 = vmatmul.msk.f32.gmra.mxu3 %vm65_vm2, %v14225_v8  ;;  %v2240_v58 = vadd.f32 %v2208_v54, %v2090_v21  ;;  %v2241_v7 = vadd.f32 %v2211_v13, %v2091_v31 }
 0x263   : > { %v2364_v47 = vpop.f32.mrf.mxu2  ;;  %v2390_v55 = vadd.f32 %v2358_v19, %v2240_v58  ;;  %v2391_v52 = vadd.f32 %v2361_v46, %v2241_v7  ;;  %v11718_v58 = vld [vmem:[%s18239_s1 + $0x18] sm:$0x7f]  ;;  %v11682_v46 = vld [vmem:[%s18239_s1 + $0x48] sm:$0x7f] }
 0x264   : > { %v14236_v39 = vpop.f32.mrf.mxu3  ;;  %v14238_v61 = vpop.f32.mrf.mxu0  ;;  %11719 = vmatpush.msk.msrb.mxu2 %vm114_vm1, %v11718_v58  ;;  %11683 = vmatpush.msk.msrb.mxu0 %vm114_vm1, %v11682_v46 }
 0x265   : > { %v14240_v0 = vpop.f32.mrf.mxu1 }
 0x267   : > { %11545 = vmatmul.msk.f32.gmra.mxu0 %vm65_vm2, %v13920_v16 }
 0x268   : > { %11564 = vmatmul.msk.f32.gmra.mxu1 %vm65_vm2, %v14019_v36  ;;  %11583 = vmatmul.msk.f32.gmra.mxu2 %vm65_vm2, %v14091_v11 }
 0x269   : > { %11606 = vmatmul.msk.f32.gmra.mxu3 %vm65_vm2, %v14243_v23 }
 0x26b   : > { %v14254_v20 = vpop.f32.mrf.mxu2 }
 0x26c   : > { %v14256_v32 = vpop.f32.mrf.mxu3  ;;  %v2070_v3 = vpop.f32.mrf.mxu0 }
 0x26d   : > { %v2220_v14 = vpop.f32.mrf.mxu1  ;;  %v2094_v16 = vadd.f32 %v2070_v3, %v13971_v29  ;;  %v2406_v29 = vmax.f32 %v2390_v55, 0.0 }
 0x26f   : > { %11546 = vmatmul.msk.f32.gmra.mxu0 %vm65_vm2, %v13939_v37  ;;  %v2244_v49 = vadd.f32 %v2220_v14, %v2094_v16  ;;  %v2426_v48 = vsel %vm33_vm0, %v2406_v29, -inf  ;;  %v4083_v16 = vld [vmem:[%s18239_s1 + $0x8] sm:$0x7f] }
 0x270   : > { %11565 = vmatmul.msk.f32.gmra.mxu1 %vm65_vm2, %v14040_v35  ;;  %11584 = vmatmul.msk.f32.gmra.mxu2 %vm65_vm2, %v14107_v30 }
 0x271   : > { %11665 = vmatmul.msk.f32.vlgmr.msrb.gmra.mxu3 %vm65_vm2, %v14190_v25  ;;  %11700 = vmatpush.msk.msrb.mxu1 %vm114_vm1, %v4083_v16 }
 0x273   : > { %v2370_v33 = vpop.f32.mrf.mxu2  ;;  %4154 = vmatpush.msrb.mxu1 %v14144_v62  ;;  %v2093_v62 = vadd.f32 %v14238_v61, %v13941_v43  ;;  %v14323_v43 = vld [vmem:[%s18240_s2] ss:$0 sm:$0xff] }
 0x274   : > { %v14268_v54 = vpop.f32.mrf.mxu3  ;;  %v2394_v50 = vadd.f32 %v2370_v33, %v2244_v49  ;;  %v2073_v2 = vpop.f32.mrf.mxu0 }
 0x275   : > { %v2223_v56 = vpop.f32.mrf.mxu1  ;;  %v2095_v19 = vadd.f32 %v2073_v2, %v13999_v59  ;;  %v2092_v59 = vadd.f32 %v2064_v18, %v13923_v15  ;;  %v2407_v15 = vmax.f32 %v2391_v52, 0.0 }
 0x276   : > { %v2410_v21 = vmax.f32 %v2394_v50, 0.0 }
 0x277   : > { %11547 = vmatmul.msk.f32.gmra.mxu0 %vm65_vm2, %v13959_v27  ;;  %v2245_v14 = vadd.f32 %v2223_v56, %v2095_v19  ;;  %v2242_v29 = vadd.f32 %v2214_v53, %v2092_v59  ;;  %v2429_v56 = vsel %vm33_vm0, %v2407_v15, -inf  ;;  %v2243_v59 = vadd.f32 %v14240_v0, %v2093_v62 }
 0x278   : > { %11566 = vmatmul.msk.f32.gmra.mxu1 %vm65_vm2, %v14060_v9  ;;  %v2427_v3 = vsel %vm33_vm0, %v2410_v21, -inf  ;;  %11585 = vmatmul.msk.f32.gmra.mxu2 %vm65_vm2, %v14122_v12 }
 0x279   : > { %11666 = vmatmul.msk.f32.gmra.mxu3 %vm65_vm2, %v14212_v60  ;;  %v2428_v13 = vmax.f32 %v2426_v48, %v2427_v3  ;;  %v2392_v7 = vadd.f32 %v2364_v47, %v2242_v29  ;;  %v2393_v46 = vadd.f32 %v14254_v20, %v2243_v59  ;;  %v2553_v20 = vadd.f32 %v14323_v43, %v13954_v40 }
 0x27b   : > { %2442 = vst.msk [vmem:[#allocation2 + $0x20] sm:$0xff] %vm33_vm0, %v2428_v13  ;;  %v2373_v55 = vpop.f32.mrf.mxu2  ;;  %v2408_v52 = vmax.f32 %v2392_v7, 0.0  ;;  %v2409_v29 = vmax.f32 %v2393_v46, 0.0  ;;  %v14338_v7 = vld [vmem:[%s12844_s21 + $0x280] sm:$0xff] }
 0x27c   : > { %v14292_v31 = vpop.f32.mrf.mxu3  ;;  %v2395_v18 = vadd.f32 %v2373_v55, %v2245_v14  ;;  %v2076_v49 = vpop.f32.mrf.mxu0 }
 0x27d   : > { %v2226_v33 = vpop.f32.mrf.mxu1  ;;  %v2096_v2 = vadd.f32 %v2076_v49, %v14023_v24  ;;  %v2432_v61 = vsel %vm33_vm0, %v2408_v52, -inf  ;;  %v2435_v62 = vsel %vm33_vm0, %v2409_v29, -inf }
 0x27e   : > { %v2411_v50 = vmax.f32 %v2395_v18, 0.0 }
 0x27f   : > { %11548 = vmatmul.msk.f32.gmra.mxu0 %vm65_vm2, %v13995_v6  ;;  %v2246_v53 = vadd.f32 %v2226_v33, %v2096_v2 }
 0x280   : > { %11567 = vmatmul.msk.f32.gmra.mxu1 %vm65_vm2, %v14074_v34  ;;  %v2430_v21 = vsel %vm33_vm0, %v2411_v50, -inf  ;;  %11586 = vmatmul.msk.f32.gmra.mxu2 %vm65_vm2, %v14152_v38 }
 0x281   : > { %11667 = vmatmul.msk.f32.gmra.mxu3 %vm65_vm2, %v14225_v8  ;;  %v2431_v24 = vmax.f32 %v2429_v56, %v2430_v21 }
 0x283   : > { %2443 = vst.msk [vmem:[#allocation2 + $0x28] sm:$0xff] %vm33_vm0, %v2431_v24  ;;  %v2376_v19 = vpop.f32.mrf.mxu2 }
 0x284   : > { %v14312_v48 = vpop.f32.mrf.mxu3  ;;  %v2396_v47 = vadd.f32 %v2376_v19, %v2246_v53  ;;  %v2079_v3 = vpop.f32.mrf.mxu0 }
 0x285   : > { %v2229_v13 = vpop.f32.mrf.mxu1  ;;  %v2097_v58 = vadd.f32 %v2079_v3, %v14044_v51 }
 0x286   : > { %v2412_v14 = vmax.f32 %v2396_v47, 0.0 }
 0x287   : > { %11549 = vmatmul.msk.f32.gmra.mxu0 %vm65_vm2, %v14019_v36  ;;  %v2247_v15 = vadd.f32 %v2229_v13, %v2097_v58 }
 0x288   : > { %11568 = vmatmul.msk.f32.gmra.mxu1 %vm65_vm2, %v14091_v11  ;;  %v2433_v0 = vsel %vm33_vm0, %v2412_v14, -inf  ;;  %11587 = vmatmul.msk.f32.gmra.mxu2 %vm65_vm2, %v14171_v1  ;;  %v14357_v14 = vld [vmem:[%s12844_s21 + $0x288] sm:$0xff] }
 0x289   : > { %11668 = vmatmul.msk.f32.gmra.mxu3 %vm65_vm2, %v14243_v23  ;;  %v2434_v51 = vmax.f32 %v2432_v61, %v2433_v0 }
 0x28a   : > { %v2448_v16 = vld [vmem:[#allocation2 + $0x20] ss:$2 sm:$0xff]  ;;  %v2452_v55 = vld [vmem:[#allocation2 + $0x21] ss:$2 sm:$0xff] }
 0x28b   : > { %2444 = vst.msk [vmem:[#allocation2 + $0x30] sm:$0xff] %vm33_vm0, %v2434_v51  ;;  %v2379_v18 = vpop.f32.mrf.mxu2  ;;  %v2456_v33 = vmax.f32 %v2448_v16, %v2452_v55  ;;  %v2559_v55 = vadd.f32 %v14323_v43, %v14014_v44 }
 0x28c   : > { %v14333_v49 = vpop.f32.mrf.mxu3  ;;  %v2397_v50 = vadd.f32 %v2379_v18, %v2247_v15  ;;  %v2686_v2 = vpop.f32.mrf.mxu0 }
 0x28d   : > { %v2836_v56 = vpop.f32.mrf.mxu1  ;;  %2460 = vst.msk [vmem:[#allocation3 + $0x50] sm:$0xff] %vm33_vm0, %v2456_v33  ;;  %v2734_v24 = vadd.f32 %v2686_v2, %v2553_v20  ;;  %v14375_v33 = vld [vmem:[%s12844_s21 + $0x290] sm:$0xff] }
 0x28e   : > { %v2413_v21 = vmax.f32 %v2397_v50, 0.0 }
 0x28f   : > { %11608 = vmatmul.msk.f32.vlgmr.msra.gmra.mxu0 %vm65_vm2, %v13939_v37  ;;  %v2884_v19 = vadd.f32 %v2836_v56, %v2734_v24  ;;  %v2556_v37 = vadd.f32 %v14323_v43, %v13989_v17  ;;  %v14394_v24 = vld [vmem:[%s12844_s21 + $0x298] sm:$0xff] }
 0x290   : > { %11627 = vmatmul.msk.f32.vlgmr.msra.gmra.mxu1 %vm65_vm2, %v14040_v35  ;;  %v2436_v40 = vsel %vm33_vm0, %v2413_v21, -inf  ;;  %11646 = vmatmul.msk.f32.vlgmr.msra.gmra.mxu2 %vm65_vm2, %v14107_v30 }
 0x291   : > { %11669 = vmatmul.msk.f32.gmra.mxu3 %vm65_vm2, %v14338_v7  ;;  %v2437_v53 = vmax.f32 %v2435_v62, %v2436_v40 }
 0x293   : > { %2445 = vst.msk [vmem:[#allocation2 + $0x38] sm:$0xff] %vm33_vm0, %v2437_v53  ;;  %v2986_v52 = vpop.f32.mrf.mxu2 }
 0x294   : > { %v14352_v47 = vpop.f32.mrf.mxu3  ;;  %v3034_v3 = vadd.f32 %v2986_v52, %v2884_v19  ;;  %v2689_v13 = vpop.f32.mrf.mxu0 }
 0x295   : > { %v2839_v59 = vpop.f32.mrf.mxu1  ;;  %v2735_v61 = vadd.f32 %v2689_v13, %v2556_v37 }
 0x296   : > { %v14360_v58 = vadd.f32 %v14268_v54, %v3034_v3  ;;  %v14412_v3 = vld [vmem:[%s12844_s21 + $0x2a0] sm:$0xff] }
 0x297   : > { %11609 = vmatmul.msk.f32.gmra.mxu0 %vm65_vm2, %v13959_v27  ;;  %v2885_v0 = vadd.f32 %v2839_v59, %v2735_v61 }
 0x298   : > { %11628 = vmatmul.msk.f32.gmra.mxu1 %vm65_vm2, %v14060_v9  ;;  %11647 = vmatmul.msk.f32.gmra.mxu2 %vm65_vm2, %v14122_v12 }
 0x299   : > { %11670 = vmatmul.msk.f32.gmra.mxu3 %vm65_vm2, %v14357_v14 }
 0x29a   : > { %v2449_v17 = vld [vmem:[#allocation2 + $0x30] ss:$2 sm:$0xff]  ;;  %v2453_v46 = vld [vmem:[#allocation2 + $0x31] ss:$2 sm:$0xff] }
 0x29b   : > { %v2989_v51 = vpop.f32.mrf.mxu2  ;;  %v2457_v16 = vmax.f32 %v2449_v17, %v2453_v46 }
 0x29c   : > { %v14370_v54 = vpop.f32.mrf.mxu3  ;;  %v3035_v27 = vadd.f32 %v2989_v51, %v2885_v0  ;;  %v2692_v15 = vpop.f32.mrf.mxu0 }
 0x29d   : > { %v2842_v18 = vpop.f32.mrf.mxu1  ;;  %2461 = vst.msk [vmem:[#allocation3 + $0x58] sm:$0xff] %vm33_vm0, %v2457_v16  ;;  %v2736_v29 = vadd.f32 %v2692_v15, %v2559_v55  ;;  %v14435_v16 = vld [vmem:[%s18239_s1 + $0x10] sm:$0xff]  ;;  %v14440_v55 = vld [vmem:[%s18239_s1 + $0x40] sm:$0xff] }
 0x29e   : > { %v14379_v20 = vadd.f32 %v14292_v31, %v3035_v27  ;;  %v2562_v31 = vadd.f32 %v14323_v43, %v14036_v41  ;;  %v3200_v27 = vmax.f32 %v14360_v58, 0.0  ;;  %4288 = vmatpush.msrb.mxu2 %v14435_v16  ;;  %3936 = vmatpush.msrb.mxu0 %v14440_v55 }
 0x29f   : > { %11610 = vmatmul.msk.f32.gmra.mxu0 %vm65_vm2, %v13995_v6  ;;  %v2886_v44 = vadd.f32 %v2842_v18, %v2736_v29 }
 0x2a0   : > { %11629 = vmatmul.msk.f32.gmra.mxu1 %vm65_vm2, %v14074_v34  ;;  %11648 = vmatmul.msk.f32.gmra.mxu2 %vm65_vm2, %v14152_v38 }
 0x2a1   : > { %11671 = vmatmul.msk.f32.gmra.mxu3 %vm65_vm2, %v14375_v33 }
 0x2a3   : > { %v2992_v50 = vpop.f32.mrf.mxu2 }
 0x2a4   : > { %v14389_v2 = vpop.f32.mrf.mxu3  ;;  %v3036_v56 = vadd.f32 %v2992_v50, %v2886_v44  ;;  %v2695_v21 = vpop.f32.mrf.mxu0 }
 0x2a5   : > { %v2845_v6 = vpop.f32.mrf.mxu1  ;;  %v2737_v40 = vadd.f32 %v2695_v21, %v2562_v31 }
 0x2a6   : > { %v14397_v62 = vadd.f32 %v14312_v48, %v3036_v56  ;;  %v2565_v48 = vadd.f32 %v14323_v43, %v14057_v22 }
 0x2a7   : > { %11611 = vmatmul.msk.f32.gmra.mxu0 %vm65_vm2, %v14019_v36  ;;  %v2887_v41 = vadd.f32 %v2845_v6, %v2737_v40  ;;  %v14462_v40 = vld [vmem:[%s12844_s21 + $0x2b0] sm:$0xff] }
 0x2a8   : > { %11630 = vmatmul.msk.f32.gmra.mxu1 %vm65_vm2, %v14091_v11  ;;  %11649 = vmatmul.msk.f32.gmra.mxu2 %vm65_vm2, %v14171_v1 }
 0x2a9   : > { %11672 = vmatmul.msk.f32.gmra.mxu3 %vm65_vm2, %v14394_v24 }
 0x2ab   : > { %v2995_v53 = vpop.f32.mrf.mxu2 }
 0x2ac   : > { %v14407_v19 = vpop.f32.mrf.mxu3  ;;  %v3037_v52 = vadd.f32 %v2995_v53, %v2887_v41  ;;  %v2698_v37 = vpop.f32.mrf.mxu0  ;;  %v3201_v41 = vmax.f32 %v14379_v20, 0.0 }
 0x2ad   : > { %v2848_v36 = vpop.f32.mrf.mxu1  ;;  %v2738_v59 = vadd.f32 %v2698_v37, %v2565_v48 }
 0x2ae   : > { %v14415_v13 = vadd.f32 %v14333_v49, %v3037_v52  ;;  %v2568_v49 = vadd.f32 %v14323_v43, %v14071_v5  ;;  %v3219_v52 = vsel %vm33_vm0, %v3201_v41, -inf }
 0x2af   : > { %11612 = vmatmul.msk.f32.gmra.mxu0 %vm65_vm2, %v14040_v35  ;;  %v2888_v22 = vadd.f32 %v2848_v36, %v2738_v59  ;;  %v14430_v35 = vld [vmem:[%s12844_s21 + $0x2a8] sm:$0xff] }
 0x2b0   : > { %11631 = vmatmul.msk.f32.gmra.mxu1 %vm65_vm2, %v14107_v30  ;;  %11650 = vmatmul.msk.f32.gmra.mxu2 %vm65_vm2, %v14190_v25 }
 0x2b1   : > { %11673 = vmatmul.msk.f32.gmra.mxu3 %vm65_vm2, %v14412_v3 }
 0x2b3   : > { %v2998_v61 = vpop.f32.mrf.mxu2 }
 0x2b4   : > { %v14425_v17 = vpop.f32.mrf.mxu3  ;;  %v3038_v46 = vadd.f32 %v2998_v61, %v2888_v22  ;;  %v2701_v0 = vpop.f32.mrf.mxu0 }
 0x2b5   : > { %v2851_v51 = vpop.f32.mrf.mxu1  ;;  %v2739_v5 = vadd.f32 %v2701_v0, %v2568_v49  ;;  %v3202_v0 = vmax.f32 %v14397_v62, 0.0 }
 0x2b6   : > { %v3188_v15 = vadd.f32 %v14352_v47, %v3038_v46  ;;  %v3216_v47 = vsel %vm33_vm0, %v3200_v27, -inf  ;;  %v14482_v46 = vld [vmem:[%s12844_s21 + $0x2b8] sm:$0xff] }
 0x2b7   : > { %11613 = vmatmul.msk.f32.gmra.mxu0 %vm65_vm2, %v14060_v9  ;;  %v2889_v29 = vadd.f32 %v2851_v51, %v2739_v5  ;;  %v2571_v9 = vadd.f32 %v14323_v43, %v14084_v10 }
 0x2b8   : > { %11632 = vmatmul.msk.f32.gmra.mxu1 %vm65_vm2, %v14122_v12  ;;  %v3204_v18 = vmax.f32 %v3188_v15, 0.0  ;;  %11651 = vmatmul.msk.f32.gmra.mxu2 %vm65_vm2, %v14212_v60 }
 0x2b9   : > { %11674 = vmatmul.msk.f32.gmra.mxu3 %vm65_vm2, %v14430_v35 }
 0x2ba   : > { %v3217_v58 = vsel %vm33_vm0, %v3204_v18, -inf }
 0x2bb   : > { %v3218_v44 = vmax.f32 %v3216_v47, %v3217_v58  ;;  %v3001_v50 = vpop.f32.mrf.mxu2 }
 0x2bc   : > { %v14456_v31 = vpop.f32.mrf.mxu3  ;;  %v3039_v56 = vadd.f32 %v3001_v50, %v2889_v29  ;;  %v2704_v21 = vpop.f32.mrf.mxu0 }
 0x2bd   : > { %v2854_v6 = vpop.f32.mrf.mxu1  ;;  %3240 = vst.msk [vmem:[#allocation2] sm:$0xff] %vm33_vm0, %v3218_v44  ;;  %v2740_v48 = vadd.f32 %v2704_v21, %v2571_v9 }
 0x2be   : > { %v3189_v53 = vadd.f32 %v14370_v54, %v3039_v56  ;;  %v14502_v56 = vld [vmem:[%s12844_s21 + $0x2c0] sm:$0xff] }
 0x2bf   : > { %11614 = vmatmul.msk.f32.gmra.mxu0 %vm65_vm2, %v14074_v34  ;;  %v2890_v54 = vadd.f32 %v2854_v6, %v2740_v48  ;;  %v2574_v34 = vadd.f32 %v14323_v43, %v14104_v28  ;;  %v3222_v28 = vsel %vm33_vm0, %v3202_v0, -inf  ;;  %v3203_v6 = vmax.f32 %v14415_v13, 0.0 }
 0x2c0   : > { %11633 = vmatmul.msk.f32.gmra.mxu1 %vm65_vm2, %v14152_v38  ;;  %v3205_v10 = vmax.f32 %v3189_v53, 0.0  ;;  %11652 = vmatmul.msk.f32.gmra.mxu2 %vm65_vm2, %v14225_v8 }
 0x2c1   : > { %11675 = vmatmul.msk.f32.gmra.mxu3 %vm65_vm2, %v14462_v40  ;;  %v3225_v13 = vsel %vm33_vm0, %v3203_v6, -inf }
 0x2c2   : > { %v3220_v20 = vsel %vm33_vm0, %v3205_v10, -inf }
 0x2c3   : > { %v3221_v37 = vmax.f32 %v3219_v52, %v3220_v20  ;;  %v3004_v36 = vpop.f32.mrf.mxu2 }
 0x2c4   : > { %v14476_v59 = vpop.f32.mrf.mxu3  ;;  %v3040_v22 = vadd.f32 %v3004_v36, %v2890_v54  ;;  %v2707_v61 = vpop.f32.mrf.mxu0  ;;  %v2580_v54 = vadd.f32 %v14323_v43, %v14147_v45 }
 0x2c5   : > { %v2857_v49 = vpop.f32.mrf.mxu1  ;;  %3241 = vst.msk [vmem:[#allocation2 + $0x8] sm:$0xff] %vm33_vm0, %v3221_v37  ;;  %v2741_v27 = vadd.f32 %v2707_v61, %v2574_v34 }
 0x2c6   : > { %v3190_v51 = vadd.f32 %v14389_v2, %v3040_v22  ;;  %v14527_v22 = vld [vmem:[%s12844_s21 + $0x2c8] sm:$0xff] }
 0x2c7   : > { %11615 = vmatmul.msk.f32.gmra.mxu0 %vm65_vm2, %v14091_v11  ;;  %v2891_v2 = vadd.f32 %v2857_v49, %v2741_v27  ;;  %v2577_v11 = vadd.f32 %v14323_v43, %v14119_v63 }
 0x2c8   : > { %11634 = vmatmul.msk.f32.gmra.mxu1 %vm65_vm2, %v14171_v1  ;;  %v3206_v15 = vmax.f32 %v3190_v51, 0.0  ;;  %11653 = vmatmul.msk.f32.gmra.mxu2 %vm65_vm2, %v14243_v23 }
 0x2c9   : > { %11676 = vmatmul.msk.f32.gmra.mxu3 %vm65_vm2, %v14482_v46 }
 0x2ca   : > { %v3223_v62 = vsel %vm33_vm0, %v3206_v15, -inf }
 0x2cb   : > { %v3224_v5 = vmax.f32 %v3222_v28, %v3223_v62  ;;  %v3007_v18 = vpop.f32.mrf.mxu2  ;;  %v14546_v62 = vld [vmem:[%s12844_s21 + $0x2d0] sm:$0xff] }
 0x2cc   : > { %v14496_v47 = vpop.f32.mrf.mxu3  ;;  %v3041_v58 = vadd.f32 %v3007_v18, %v2891_v2  ;;  %v2710_v29 = vpop.f32.mrf.mxu0  ;;  %v3248_v50 = vld [vmem:[#allocation2] ss:$2 sm:$0xff]  ;;  %v3252_v9 = vld [vmem:[#allocation2 + $0x1] ss:$2 sm:$0xff] }
 0x2cd   : > { %v2860_v44 = vpop.f32.mrf.mxu1  ;;  %3242 = vst.msk [vmem:[#allocation2 + $0x10] sm:$0xff] %vm33_vm0, %v3224_v5  ;;  %v3256_v21 = vmax.f32 %v3248_v50, %v3252_v9  ;;  %v2742_v53 = vadd.f32 %v2710_v29, %v2577_v11  ;;  %v14565_v50 = vld [vmem:[%s12844_s21 + $0x2d8] sm:$0xff] }
 0x2ce   : > { %v3191_v41 = vadd.f32 %v14407_v19, %v3041_v58 }
 0x2cf   : > { %11616 = vmatmul.msk.f32.gmra.mxu0 %vm65_vm2, %v14107_v30  ;;  %3260 = vst.msk [vmem:[#allocation3 + $0x60] sm:$0xff] %vm33_vm0, %v3256_v21  ;;  %v2892_v48 = vadd.f32 %v2860_v44, %v2742_v53  ;;  %v11811_v30 = vld [vmem:[%s18239_s1 + $0x18] sm:$0x7f] }
 0x2d0   : > { %11635 = vmatmul.msk.f32.gmra.mxu1 %vm65_vm2, %v14190_v25  ;;  %v3207_v63 = vmax.f32 %v3191_v41, 0.0  ;;  %11654 = vmatmul.msk.f32.gmra.mxu2 %vm65_vm2, %v14338_v7 }
 0x2d1   : > { %11677 = vmatmul.msk.f32.gmra.mxu3 %vm65_vm2, %v14502_v56 }
 0x2d2   : > { %v3226_v19 = vsel %vm33_vm0, %v3207_v63, -inf  ;;  %11812 = vmatpush.msk.msrb.mxu3 %vm114_vm1, %v11811_v30 }
 0x2d3   : > { %v3227_v10 = vmax.f32 %v3225_v13, %v3226_v19  ;;  %v3010_v52 = vpop.f32.mrf.mxu2 }
 0x2d4   : > { %v14520_v20 = vpop.f32.mrf.mxu3  ;;  %v3042_v37 = vadd.f32 %v3010_v52, %v2892_v48  ;;  %v2713_v36 = vpop.f32.mrf.mxu0  ;;  %5090 = vmatpush.msrb.mxu3 %v14435_v16 }
 0x2d5   : > { %v2863_v34 = vpop.f32.mrf.mxu1  ;;  %3243 = vst.msk [vmem:[#allocation2 + $0x18] sm:$0xff] %vm33_vm0, %v3227_v10  ;;  %v2743_v49 = vadd.f32 %v2713_v36, %v2580_v54 }
 0x2d6   : > { %v14531_v61 = vadd.f32 %v14425_v17, %v3042_v37  ;;  %v2583_v17 = vadd.f32 %v14323_v43, %v14168_v26  ;;  %v11756_v37 = vld [vmem:[%s18239_s1 + $0x38] sm:$0x7f] }
 0x2d7   : > { %11617 = vmatmul.msk.f32.gmra.mxu0 %vm65_vm2, %v14122_v12  ;;  %v2893_v45 = vadd.f32 %v2863_v34, %v2743_v49 }
 0x2d8   : > { %11636 = vmatmul.msk.f32.gmra.mxu1 %vm65_vm2, %v14212_v60  ;;  %11655 = vmatmul.msk.f32.gmra.mxu2 %vm65_vm2, %v14357_v14  ;;  %v3208_v36 = vmax.f32 %v14531_v61, 0.0 }
 0x2d9   : > { %11678 = vmatmul.msk.f32.gmra.mxu3 %vm65_vm2, %v14527_v22  ;;  %11757 = vmatpush.msk.msra.mxu0 %vm114_vm1, %v11756_v37 }
 0x2db   : > { %v3013_v0 = vpop.f32.mrf.mxu2 }
 0x2dc   : > { %v14541_v16 = vpop.f32.mrf.mxu3  ;;  %v3043_v51 = vadd.f32 %v3013_v0, %v2893_v45  ;;  %v2716_v27 = vpop.f32.mrf.mxu0  ;;  %v3249_v12 = vld [vmem:[#allocation2 + $0x10] ss:$2 sm:$0xff]  ;;  %v3253_v28 = vld [vmem:[#allocation2 + $0x11] ss:$2 sm:$0xff] }
 0x2dd   : > { %v2866_v15 = vpop.f32.mrf.mxu1  ;;  %v3257_v2 = vmax.f32 %v3249_v12, %v3253_v28  ;;  %v2744_v18 = vadd.f32 %v2716_v27, %v2583_v17  ;;  %v2595_v27 = vadd.f32 %v14323_v43, %v14236_v39 }
 0x2de   : > { %v14549_v5 = vadd.f32 %v14456_v31, %v3043_v51  ;;  %v2586_v31 = vadd.f32 %v14323_v43, %v14187_v4 }
 0x2df   : > { %11618 = vmatmul.msk.f32.gmra.mxu0 %vm65_vm2, %v14152_v38  ;;  %3261 = vst.msk [vmem:[#allocation3 + $0x68] sm:$0xff] %vm33_vm0, %v3257_v2  ;;  %v2894_v26 = vadd.f32 %v2866_v15, %v2744_v18 }
 0x2e0   : > { %11637 = vmatmul.msk.f32.gmra.mxu1 %vm65_vm2, %v14225_v8  ;;  %11656 = vmatmul.msk.f32.gmra.mxu2 %vm65_vm2, %v14375_v33  ;;  %v3209_v2 = vmax.f32 %v14549_v5, 0.0 }
 0x2e1   : > { %11679 = vmatmul.msk.f32.gmra.mxu3 %vm65_vm2, %v14546_v62 }
 0x2e2   : > { %v3231_v39 = vsel %vm33_vm0, %v3209_v2, -inf }
 0x2e3   : > { %v3016_v11 = vpop.f32.mrf.mxu2 }
 0x2e4   : > { %v14560_v58 = vpop.f32.mrf.mxu3  ;;  %v3044_v29 = vadd.f32 %v3016_v11, %v2894_v26  ;;  %v2719_v38 = vpop.f32.mrf.mxu0 }
 0x2e5   : > { %v2869_v44 = vpop.f32.mrf.mxu1  ;;  %v2745_v21 = vadd.f32 %v2719_v38, %v2586_v31 }
 0x2e6   : > { %v14568_v9 = vadd.f32 %v14476_v59, %v3044_v29  ;;  %v2589_v59 = vadd.f32 %v14323_v43, %v14208_v42 }
 0x2e7   : > { %11619 = vmatmul.msk.f32.gmra.mxu0 %vm65_vm2, %v14171_v1  ;;  %v2895_v4 = vadd.f32 %v2869_v44, %v2745_v21 }
 0x2e8   : > { %11638 = vmatmul.msk.f32.gmra.mxu1 %vm65_vm2, %v14243_v23  ;;  %11657 = vmatmul.msk.f32.gmra.mxu2 %vm65_vm2, %v14394_v24 }
 0x2e9   : > { %11680 = vmatmul.msk.f32.gmra.mxu3 %vm65_vm2, %v14565_v50 }
 0x2eb   : > { %v3019_v6 = vpop.f32.mrf.mxu2 }
 0x2ec   : > { %v14578_v41 = vpop.f32.mrf.mxu3  ;;  %v3045_v53 = vadd.f32 %v3019_v6, %v2895_v4  ;;  %v2722_v63 = vpop.f32.mrf.mxu0  ;;  %v3210_v4 = vmax.f32 %v14568_v9, 0.0 }
 0x2ed   : > { %v2872_v13 = vpop.f32.mrf.mxu1  ;;  %v2746_v19 = vadd.f32 %v2722_v63, %v2589_v59 }
 0x2ee   : > { %v14583_v1 = vadd.f32 %v14496_v47, %v3045_v53  ;;  %v2592_v47 = vadd.f32 %v14323_v43, %v14222_v57  ;;  %v11775_v57 = vld [vmem:[%s18239_s1 + $0x48] sm:$0x7f] }
 0x2ef   : > { %11620 = vmatmul.msk.f32.gmra.mxu0 %vm65_vm2, %v14190_v25  ;;  %v2896_v42 = vadd.f32 %v2872_v13, %v2746_v19  ;;  %v4885_v25 = vld [vmem:[%s18239_s1 + $0x8] sm:$0x7f]  ;;  %11776 = vmatpush.msk.msra.mxu1 %vm114_vm1, %v11775_v57 }
 0x2f0   : > { %11639 = vmatmul.msk.f32.gmra.mxu1 %vm65_vm2, %v14338_v7  ;;  %11658 = vmatmul.msk.f32.gmra.mxu2 %vm65_vm2, %v14412_v3  ;;  %v3211_v37 = vmax.f32 %v14583_v1, 0.0 }
 0x2f1   : > { %11739 = vmatmul.msk.f32.vlgmr.msra.gmra.mxu3 %vm65_vm2, %v14502_v56  ;;  %11793 = vmatpush.msk.msra.mxu2 %vm114_vm1, %v4885_v25 }
 0x2f2   : > { %4738 = vmatpush.msra.mxu1 %v14440_v55  ;;  %v3237_v1 = vsel %vm33_vm0, %v3211_v37, -inf }
 0x2f3   : > { %v3022_v48 = vpop.f32.mrf.mxu2 }
 0x2f4   : > { %v14593_v30 = vpop.f32.mrf.mxu3  ;;  %v3046_v10 = vadd.f32 %v3022_v48, %v2896_v42  ;;  %v2725_v52 = vpop.f32.mrf.mxu0 }
 0x2f5   : > { %v2875_v54 = vpop.f32.mrf.mxu1  ;;  %v2747_v49 = vadd.f32 %v2725_v52, %v2592_v47 }
 0x2f6   : > { %v3196_v34 = vadd.f32 %v14520_v20, %v3046_v10  ;;  %v3228_v20 = vsel %vm33_vm0, %v3208_v36, -inf }
 0x2f7   : > { %11621 = vmatmul.msk.f32.gmra.mxu0 %vm65_vm2, %v14212_v60  ;;  %v2897_v0 = vadd.f32 %v2875_v54, %v2747_v49  ;;  %v14666_v54 = vld [vmem:[%s12844_s21 + $0x2e0] sm:$0xff] }
 0x2f8   : > { %11640 = vmatmul.msk.f32.gmra.mxu1 %vm65_vm2, %v14357_v14  ;;  %v3212_v45 = vmax.f32 %v3196_v34, 0.0  ;;  %11659 = vmatmul.msk.f32.gmra.mxu2 %vm65_vm2, %v14430_v35 }
 0x2f9   : > { %11740 = vmatmul.msk.f32.gmra.mxu3 %vm65_vm2, %v14527_v22 }
 0x2fa   : > { %v3229_v61 = vsel %vm33_vm0, %v3212_v45, -inf }
 0x2fb   : > { %v3230_v17 = vmax.f32 %v3228_v20, %v3229_v61  ;;  %v3025_v51 = vpop.f32.mrf.mxu2 }
 0x2fc   : > { %v14621_v60 = vpop.f32.mrf.mxu3  ;;  %v3047_v15 = vadd.f32 %v3025_v51, %v2897_v0  ;;  %v2728_v12 = vpop.f32.mrf.mxu0  ;;  %v14686_v51 = vld [vmem:[%s12844_s21 + $0x2e8] sm:$0xff] }
 0x2fd   : > { %v2878_v28 = vpop.f32.mrf.mxu1  ;;  %3244 = vst.msk [vmem:[#allocation2 + $0x20] sm:$0xff] %vm33_vm0, %v3230_v17  ;;  %v2748_v26 = vadd.f32 %v2728_v12, %v2595_v27 }
 0x2fe   : > { %v3197_v18 = vadd.f32 %v14541_v16, %v3047_v15 }
 0x2ff   : > { %11622 = vmatmul.msk.f32.gmra.mxu0 %vm65_vm2, %v14225_v8  ;;  %v2898_v11 = vadd.f32 %v2878_v28, %v2748_v26  ;;  %v2598_v8 = vadd.f32 %v14323_v43, %v14256_v32  ;;  %v14657_v32 = vld [vmem:[%s18240_s2] ss:$0 sm:$0xff]  ;;  %v3234_v43 = vsel %vm33_vm0, %v3210_v4, -inf  ;;  %v14719_v4 = vld [vmem:[%s12844_s21 + $0x2f8] sm:$0xff] }
 0x300   : > { %11641 = vmatmul.msk.f32.gmra.mxu1 %vm65_vm2, %v14375_v33  ;;  %v3213_v55 = vmax.f32 %v3197_v18, 0.0  ;;  %11660 = vmatmul.msk.f32.gmra.mxu2 %vm65_vm2, %v14462_v40 }
 0x301   : > { %11741 = vmatmul.msk.f32.gmra.mxu3 %vm65_vm2, %v14546_v62 }
 0x302   : > { %v3232_v5 = vsel %vm33_vm0, %v3213_v55, -inf }
 0x303   : > { %v3233_v16 = vmax.f32 %v3231_v39, %v3232_v5  ;;  %v3028_v31 = vpop.f32.mrf.mxu2  ;;  %v14703_v5 = vld [vmem:[%s12844_s21 + $0x2f0] sm:$0xff] }
 0x304   : > { %v14639_v29 = vpop.f32.mrf.mxu3  ;;  %v3048_v38 = vadd.f32 %v3028_v31, %v2898_v11  ;;  %v2731_v44 = vpop.f32.mrf.mxu0 }
 0x305   : > { %v2881_v21 = vpop.f32.mrf.mxu1  ;;  %3245 = vst.msk [vmem:[#allocation2 + $0x28] sm:$0xff] %vm33_vm0, %v3233_v16  ;;  %v2749_v59 = vadd.f32 %v2731_v44, %v2598_v8 }
 0x306   : > { %v3198_v6 = vadd.f32 %v14560_v58, %v3048_v38 }
 0x307   : > { %11623 = vmatmul.msk.f32.gmra.mxu0 %vm65_vm2, %v14243_v23  ;;  %v2899_v58 = vadd.f32 %v2881_v21, %v2749_v59 }
 0x308   : > { %11642 = vmatmul.msk.f32.gmra.mxu1 %vm65_vm2, %v14394_v24  ;;  %v3214_v53 = vmax.f32 %v3198_v6, 0.0  ;;  %11661 = vmatmul.msk.f32.gmra.mxu2 %vm65_vm2, %v14482_v46 }
 0x309   : > { %11742 = vmatmul.msk.f32.gmra.mxu3 %vm65_vm2, %v14565_v50 }
 0x30a   : > { %v3235_v23 = vsel %vm33_vm0, %v3214_v53, -inf }
 0x30b   : > { %v3236_v9 = vmax.f32 %v3234_v43, %v3235_v23  ;;  %v3031_v63 = vpop.f32.mrf.mxu2 }
 0x30c   : > { %v14661_v13 = vpop.f32.mrf.mxu3  ;;  %v3049_v19 = vadd.f32 %v3031_v63, %v2899_v58  ;;  %v3354_v42 = vpop.f32.mrf.mxu0  ;;  %v3250_v47 = vld [vmem:[#allocation2 + $0x20] ss:$2 sm:$0xff]  ;;  %v3254_v10 = vld [vmem:[#allocation2 + $0x21] ss:$2 sm:$0xff] }
 0x30d   : > { %v3488_v48 = vpop.f32.mrf.mxu1  ;;  %3246 = vst.msk [vmem:[#allocation2 + $0x30] sm:$0xff] %vm33_vm0, %v3236_v9  ;;  %v3355_v52 = vadd.f32 %v14657_v32, %v3354_v42  ;;  %v3258_v25 = vmax.f32 %v3250_v47, %v3254_v10  ;;  %v14734_v9 = vld [vmem:[%s12844_s21 + $0x300] sm:$0xff] }
 0x30e   : > { %v3199_v36 = vadd.f32 %v14578_v41, %v3049_v19  ;;  %v4884_v19 = vld [vmem:[%s18239_s1] sm:$0xff] }
 0x30f   : > { %11684 = vmatmul.msk.f32.vlgmr.msrb.gmra.mxu0 %vm65_vm2, %v14338_v7  ;;  %3262 = vst.msk [vmem:[#allocation3 + $0x70] sm:$0xff] %vm33_vm0, %v3258_v25  ;;  %v3536_v49 = vadd.f32 %v3488_v48, %v3355_v52  ;;  %4956 = vmatpush.msra.mxu2 %v4884_v19  ;;  %v14758_v25 = vld [vmem:[%s12844_s21 + $0x308] sm:$0xff] }
 0x310   : > { %11701 = vmatmul.msk.f32.vlgmr.msrb.gmra.mxu1 %vm65_vm2, %v14338_v7  ;;  %v3215_v34 = vmax.f32 %v3199_v36, 0.0  ;;  %11720 = vmatmul.msk.f32.vlgmr.msrb.gmra.mxu2 %vm65_vm2, %v14412_v3 }
 0x311   : > { %11743 = vmatmul.msk.f32.gmra.mxu3 %vm65_vm2, %v14666_v54 }
 0x312   : > { %v3238_v41 = vsel %vm33_vm0, %v3215_v34, -inf }
 0x313   : > { %v3239_v57 = vmax.f32 %v3237_v1, %v3238_v41  ;;  %v3638_v45 = vpop.f32.mrf.mxu2 }
 0x314   : > { %v14681_v20 = vpop.f32.mrf.mxu3  ;;  %v3686_v7 = vadd.f32 %v3638_v45, %v3536_v49  ;;  %v3357_v61 = vpop.f32.mrf.mxu0 }
 0x315   : > { %v3491_v0 = vpop.f32.mrf.mxu1  ;;  %3247 = vst.msk [vmem:[#allocation2 + $0x38] sm:$0xff] %vm33_vm0, %v3239_v57  ;;  %v3358_v17 = vadd.f32 %v14657_v32, %v3357_v61 }
 0x316   : > { %v14689_v27 = vadd.f32 %v14593_v30, %v3686_v7 }
 0x317   : > { %11685 = vmatmul.msk.f32.gmra.mxu0 %vm65_vm2, %v14357_v14  ;;  %v3537_v15 = vadd.f32 %v3491_v0, %v3358_v17 }
 0x318   : > { %11702 = vmatmul.msk.f32.gmra.mxu1 %vm65_vm2, %v14357_v14  ;;  %11721 = vmatmul.msk.f32.gmra.mxu2 %vm65_vm2, %v14430_v35 }
 0x319   : > { %11744 = vmatmul.msk.f32.gmra.mxu3 %vm65_vm2, %v14686_v51 }
 0x31b   : > { %v3641_v12 = vpop.f32.mrf.mxu2 }
 0x31c   : > { %v14699_v28 = vpop.f32.mrf.mxu3  ;;  %v3687_v2 = vadd.f32 %v3641_v12, %v3537_v15  ;;  %v3360_v18 = vpop.f32.mrf.mxu0  ;;  %v3251_v26 = vld [vmem:[#allocation2 + $0x30] ss:$2 sm:$0xff]  ;;  %v3255_v55 = vld [vmem:[#allocation2 + $0x31] ss:$2 sm:$0xff] }
 0x31d   : > { %v3494_v30 = vpop.f32.mrf.mxu1  ;;  %v3361_v39 = vadd.f32 %v14657_v32, %v3360_v18  ;;  %v3259_v14 = vmax.f32 %v3251_v26, %v3255_v55 }
 0x31e   : > { %v14706_v11 = vadd.f32 %v14621_v60, %v3687_v2  ;;  %v14788_v2 = vld [vmem:[%s12844_s21 + $0x318] sm:$0xff] }
 0x31f   : > { %11686 = vmatmul.msk.f32.gmra.mxu0 %vm65_vm2, %v14375_v33  ;;  %3263 = vst.msk [vmem:[#allocation3 + $0x78] sm:$0xff] %vm33_vm0, %v3259_v14  ;;  %v3538_v16 = vadd.f32 %v3494_v30, %v3361_v39 }
 0x320   : > { %11703 = vmatmul.msk.f32.gmra.mxu1 %vm65_vm2, %v14375_v33  ;;  %11722 = vmatmul.msk.f32.gmra.mxu2 %vm65_vm2, %v14462_v40 }
 0x321   : > { %11745 = vmatmul.msk.f32.gmra.mxu3 %vm65_vm2, %v14703_v5 }
 0x323   : > { %v3644_v31 = vpop.f32.mrf.mxu2 }
 0x324   : > { %v3806_v8 = vpop.f32.mrf.mxu3  ;;  %v3688_v38 = vadd.f32 %v3644_v31, %v3538_v16  ;;  %v3363_v60 = vpop.f32.mrf.mxu0  ;;  %v14802_v31 = vld [vmem:[%s12844_s21 + $0x320] sm:$0xff] }
 0x325   : > { %v3497_v44 = vpop.f32.mrf.mxu1  ;;  %v3364_v21 = vadd.f32 %v14657_v32, %v3363_v60 }
 0x326   : > { %v14722_v33 = vadd.f32 %v14639_v29, %v3688_v38  ;;  %v5693_v38 = vld [vmem:[%s18241_s3 + $0x18] sm:$0xff] }
 0x327   : > { %11687 = vmatmul.msk.f32.gmra.mxu0 %vm65_vm2, %v14394_v24  ;;  %v3539_v6 = vadd.f32 %v3497_v44, %v3364_v21  ;;  %5770 = vmatpush.msra.mxu3 %v5693_v38 }
 0x328   : > { %11704 = vmatmul.msk.f32.gmra.mxu1 %vm65_vm2, %v14394_v24  ;;  %11723 = vmatmul.msk.f32.gmra.mxu2 %vm65_vm2, %v14482_v46 }
 0x329   : > { %11746 = vmatmul.msk.f32.gmra.mxu3 %vm65_vm2, %v14719_v4 }
 0x32b   : > { %v3647_v59 = vpop.f32.mrf.mxu2 }
 0x32c   : > { %v3809_v53 = vpop.f32.mrf.mxu3  ;;  %v3689_v43 = vadd.f32 %v3647_v59, %v3539_v6  ;;  %v3366_v23 = vpop.f32.mrf.mxu0 }
 0x32d   : > { %v3500_v58 = vpop.f32.mrf.mxu1  ;;  %v3367_v29 = vadd.f32 %v14657_v32, %v3366_v23 }
 0x32e   : > { %v14737_v63 = vadd.f32 %v14661_v13, %v3689_v43  ;;  %v14753_v13 = vld [vmem:[%s18239_s1 + $0x30] sm:$0xff] }
 0x32f   : > { %11688 = vmatmul.msk.f32.gmra.mxu0 %vm65_vm2, %v14412_v3  ;;  %v3540_v24 = vadd.f32 %v3500_v58, %v3367_v29 }
 0x330   : > { %11705 = vmatmul.msk.f32.gmra.mxu1 %vm65_vm2, %v14412_v3  ;;  %11724 = vmatmul.msk.f32.gmra.mxu2 %vm65_vm2, %v14502_v56 }
 0x331   : > { %11747 = vmatmul.msk.f32.gmra.mxu3 %vm65_vm2, %v14734_v9  ;;  %4588 = vmatpush.msra.mxu0 %v14753_v13 }
 0x333   : > { %v3650_v3 = vpop.f32.mrf.mxu2 }
 0x334   : > { %v3812_v42 = vpop.f32.mrf.mxu3  ;;  %v3690_v48 = vadd.f32 %v3650_v3, %v3540_v24  ;;  %v3369_v47 = vpop.f32.mrf.mxu0 }
 0x335   : > { %v3503_v10 = vpop.f32.mrf.mxu1  ;;  %v3370_v52 = vadd.f32 %v14657_v32, %v3369_v47 }
 0x336   : > { %v14761_v37 = vadd.f32 %v14681_v20, %v3690_v48  ;;  %v14773_v20 = vld [vmem:[%s12844_s21 + $0x310] sm:$0xff] }
 0x337   : > { %11689 = vmatmul.msk.f32.gmra.mxu0 %vm65_vm2, %v14430_v35  ;;  %v3541_v36 = vadd.f32 %v3503_v10, %v3370_v52  ;;  %v14837_v48 = vld [vmem:[%s12844_s21 + $0x330] sm:$0xff] }
 0x338   : > { %11706 = vmatmul.msk.f32.gmra.mxu1 %vm65_vm2, %v14430_v35  ;;  %11725 = vmatmul.msk.f32.gmra.mxu2 %vm65_vm2, %v14527_v22 }
 0x339   : > { %11748 = vmatmul.msk.f32.gmra.mxu3 %vm65_vm2, %v14758_v25 }
 0x33b   : > { %v3653_v34 = vpop.f32.mrf.mxu2 }
 0x33c   : > { %v3815_v49 = vpop.f32.mrf.mxu3  ;;  %v3691_v1 = vadd.f32 %v3653_v34, %v3541_v36  ;;  %v3372_v41 = vpop.f32.mrf.mxu0 }
 0x33d   : > { %v3506_v57 = vpop.f32.mrf.mxu1  ;;  %v3373_v45 = vadd.f32 %v14657_v32, %v3372_v41  ;;  %v14853_v41 = vld [vmem:[%s12844_s21 + $0x338] sm:$0xff] }
 0x33e   : > { %v14776_v7 = vadd.f32 %v14699_v28, %v3691_v1 }
 0x33f   : > { %11690 = vmatmul.msk.f32.gmra.mxu0 %vm65_vm2, %v14462_v40  ;;  %v3542_v35 = vadd.f32 %v3506_v57, %v3373_v45 }
 0x340   : > { %11707 = vmatmul.msk.f32.gmra.mxu1 %vm65_vm2, %v14462_v40  ;;  %11726 = vmatmul.msk.f32.gmra.mxu2 %vm65_vm2, %v14546_v62 }
 0x341   : > { %11749 = vmatmul.msk.f32.gmra.mxu3 %vm65_vm2, %v14773_v20 }
 0x343   : > { %v3656_v61 = vpop.f32.mrf.mxu2 }
 0x344   : > { %v3818_v0 = vpop.f32.mrf.mxu3  ;;  %v3692_v17 = vadd.f32 %v3656_v61, %v3542_v35  ;;  %v3375_v15 = vpop.f32.mrf.mxu0 }
 0x345   : > { %v3509_v12 = vpop.f32.mrf.mxu1  ;;  %v3376_v28 = vadd.f32 %v14657_v32, %v3375_v15 }
 0x346   : > { %v14790_v18 = vadd.f32 %v3806_v8, %v3692_v17 }
 0x347   : > { %11691 = vmatmul.msk.f32.gmra.mxu0 %vm65_vm2, %v14482_v46  ;;  %v3543_v40 = vadd.f32 %v3509_v12, %v3376_v28  ;;  %v11868_v28 = vld [vmem:[%s18239_s1 + $0x48] sm:$0x7f] }
 0x348   : > { %11708 = vmatmul.msk.f32.gmra.mxu1 %vm65_vm2, %v14482_v46  ;;  %11727 = vmatmul.msk.f32.gmra.mxu2 %vm65_vm2, %v14565_v50 }
 0x349   : > { %11750 = vmatmul.msk.f32.gmra.mxu3 %vm65_vm2, %v14788_v2  ;;  %11869 = vmatpush.msk.msrb.mxu2 %vm114_vm1, %v11868_v28 }
 0x34b   : > { %v3659_v30 = vpop.f32.mrf.mxu2 }
 0x34c   : > { %v3821_v26 = vpop.f32.mrf.mxu3  ;;  %v3693_v55 = vadd.f32 %v3659_v30, %v3543_v40  ;;  %v3378_v39 = vpop.f32.mrf.mxu0  ;;  %v11830_v40 = vld [vmem:[%s18239_s1 + $0x28] sm:$0x7f]  ;;  %v5692_v30 = vld [vmem:[%s18241_s3 + $0x10] sm:$0xff] }
 0x34d   : > { %v3512_v14 = vpop.f32.mrf.mxu1  ;;  %v3379_v16 = vadd.f32 %v14657_v32, %v3378_v39  ;;  %11831 = vmatpush.msk.msrb.mxu0 %vm114_vm1, %v11830_v40  ;;  %5771 = vmatpush.msra.mxu3 %v5692_v30  ;;  %v14956_v30 = vld [vmem:[%s12844_s21 + $0x348] sm:$0xff] }
 0x34e   : > { %v14804_v8 = vadd.f32 %v3809_v53, %v3693_v55  ;;  %v14821_v53 = vld [vmem:[%s12844_s21 + $0x328] sm:$0xff] }
 0x34f   : > { %11692 = vmatmul.msk.f32.gmra.mxu0 %vm65_vm2, %v14502_v56  ;;  %v3544_v46 = vadd.f32 %v3512_v14, %v3379_v16 }
 0x350   : > { %11709 = vmatmul.msk.f32.gmra.mxu1 %vm65_vm2, %v14502_v56  ;;  %11728 = vmatmul.msk.f32.gmra.mxu2 %vm65_vm2, %v14666_v54 }
 0x351   : > { %11751 = vmatmul.msk.f32.gmra.mxu3 %vm65_vm2, %v14802_v31 }
 0x353   : > { %v3662_v60 = vpop.f32.mrf.mxu2 }
 0x354   : > { %v14817_v44 = vpop.f32.mrf.mxu3  ;;  %v3694_v21 = vadd.f32 %v3662_v60, %v3544_v46  ;;  %v3381_v6 = vpop.f32.mrf.mxu0  ;;  %v11849_v46 = vld [vmem:[%s18239_s1 + $0x38] sm:$0x7f] }
 0x355   : > { %v3515_v59 = vpop.f32.mrf.mxu1  ;;  %v3382_v56 = vadd.f32 %v14657_v32, %v3381_v6  ;;  %11850 = vmatpush.msk.msrb.mxu1 %vm114_vm1, %v11849_v46 }
 0x356   : > { %v14823_v43 = vadd.f32 %v3812_v42, %v3694_v21 }
 0x357   : > { %11693 = vmatmul.msk.f32.gmra.mxu0 %vm65_vm2, %v14527_v22  ;;  %v3545_v23 = vadd.f32 %v3515_v59, %v3382_v56  ;;  %5390 = vmatpush.msrb.mxu1 %v14753_v13 }
 0x358   : > { %11710 = vmatmul.msk.f32.gmra.mxu1 %vm65_vm2, %v14527_v22  ;;  %11729 = vmatmul.msk.f32.gmra.mxu2 %vm65_vm2, %v14686_v51 }
 0x359   : > { %11752 = vmatmul.msk.f32.gmra.mxu3 %vm65_vm2, %v14821_v53 }
 0x35b   : > { %v3665_v58 = vpop.f32.mrf.mxu2 }
 0x35c   : > { %v14833_v29 = vpop.f32.mrf.mxu3  ;;  %v3695_v24 = vadd.f32 %v3665_v58, %v3545_v23  ;;  %v3384_v19 = vpop.f32.mrf.mxu0 }
 0x35d   : > { %v3518_v3 = vpop.f32.mrf.mxu1  ;;  %v3385_v42 = vadd.f32 %v14657_v32, %v3384_v19 }
 0x35e   : > { %v14839_v47 = vadd.f32 %v3815_v49, %v3695_v24 }
 0x35f   : > { %11694 = vmatmul.msk.f32.gmra.mxu0 %vm65_vm2, %v14546_v62  ;;  %v3546_v22 = vadd.f32 %v3518_v3, %v3385_v42 }
 0x360   : > { %11711 = vmatmul.msk.f32.gmra.mxu1 %vm65_vm2, %v14546_v62  ;;  %11730 = vmatmul.msk.f32.gmra.mxu2 %vm65_vm2, %v14703_v5 }
 0x361   : > { %11753 = vmatmul.msk.f32.gmra.mxu3 %vm65_vm2, %v14837_v48 }
 0x363   : > { %v3668_v10 = vpop.f32.mrf.mxu2 }
 0x364   : > { %v14849_v52 = vpop.f32.mrf.mxu3  ;;  %v3696_v36 = vadd.f32 %v3668_v10, %v3546_v22  ;;  %v3387_v34 = vpop.f32.mrf.mxu0 }
 0x365   : > { %v3521_v49 = vpop.f32.mrf.mxu1  ;;  %v3388_v1 = vadd.f32 %v14657_v32, %v3387_v34 }
 0x366   : > { %v14855_v57 = vadd.f32 %v3818_v0, %v3696_v36 }
 0x367   : > { %11695 = vmatmul.msk.f32.gmra.mxu0 %vm65_vm2, %v14565_v50  ;;  %v3547_v62 = vadd.f32 %v3521_v49, %v3388_v1 }
 0x368   : > { %11712 = vmatmul.msk.f32.gmra.mxu1 %vm65_vm2, %v14565_v50  ;;  %11731 = vmatmul.msk.f32.gmra.mxu2 %vm65_vm2, %v14719_v4 }
 0x369   : > { %11754 = vmatmul.msk.f32.gmra.mxu3 %vm65_vm2, %v14853_v41 }
 0x36b   : > { %v3671_v45 = vpop.f32.mrf.mxu2 }
 0x36c   : > { %v14865_v35 = vpop.f32.mrf.mxu3  ;;  %v3697_v61 = vadd.f32 %v3671_v45, %v3547_v62  ;;  %v3390_v17 = vpop.f32.mrf.mxu0 }
 0x36d   : > { %v3524_v0 = vpop.f32.mrf.mxu1  ;;  %v3391_v15 = vadd.f32 %v14657_v32, %v3390_v17 }
 0x36e   : > { %v14868_v12 = vadd.f32 %v3821_v26, %v3697_v61  ;;  %v14936_v61 = vld [vmem:[%s12844_s21 + $0x340] sm:$0xff] }
 0x36f   : > { %11696 = vmatmul.msk.f32.gmra.mxu0 %vm65_vm2, %v14666_v54  ;;  %v3548_v50 = vadd.f32 %v3524_v0, %v3391_v15  ;;  %v5691_v15 = vld [vmem:[%s18241_s3 + $0x8] sm:$0xff] }
 0x370   : > { %11713 = vmatmul.msk.f32.gmra.mxu1 %vm65_vm2, %v14666_v54  ;;  %11732 = vmatmul.msk.f32.gmra.mxu2 %vm65_vm2, %v14734_v9 }
 0x371   : > { %11813 = vmatmul.msk.f32.vlgmr.msrb.gmra.mxu3 %vm65_vm2, %v14802_v31 }
 0x372   : > { %5772 = vmatpush.msra.mxu3 %v5691_v15  ;;  %v11829_v15 = vld [vmem:[%s18239_s1 + $0x20] sm:$0xff] }
 0x373   : > { %v3674_v26 = vpop.f32.mrf.mxu2  ;;  %5240 = vmatpush.msrb.mxu0 %v11829_v15 }
 0x374   : > { %v4440_v55 = vpop.f32.mrf.mxu3  ;;  %v3698_v39 = vadd.f32 %v3674_v26, %v3548_v50  ;;  %v3393_v14 = vpop.f32.mrf.mxu0 }
 0x375   : > { %v3527_v16 = vpop.f32.mrf.mxu1  ;;  %v3394_v38 = vadd.f32 %v14657_v32, %v3393_v14 }
 0x376   : > { %v14895_v60 = vadd.f32 %v14817_v44, %v3698_v39 }
 0x377   : > { %11697 = vmatmul.msk.f32.gmra.mxu0 %vm65_vm2, %v14686_v51  ;;  %v3549_v21 = vadd.f32 %v3527_v16, %v3394_v38 }
 0x378   : > { %11714 = vmatmul.msk.f32.gmra.mxu1 %vm65_vm2, %v14686_v51  ;;  %11733 = vmatmul.msk.f32.gmra.mxu2 %vm65_vm2, %v14758_v25 }
 0x379   : > { %11814 = vmatmul.msk.f32.gmra.mxu3 %vm65_vm2, %v14821_v53 }
 0x37b   : > { %v3677_v6 = vpop.f32.mrf.mxu2 }
 0x37c   : > { %v4443_v59 = vpop.f32.mrf.mxu3  ;;  %v3699_v56 = vadd.f32 %v3677_v6, %v3549_v21  ;;  %v3396_v44 = vpop.f32.mrf.mxu0 }
 0x37d   : > { %v3530_v23 = vpop.f32.mrf.mxu1  ;;  %v3397_v58 = vadd.f32 %v14657_v32, %v3396_v44 }
 0x37e   : > { %v14908_v24 = vadd.f32 %v14833_v29, %v3699_v56 }
 0x37f   : > { %11698 = vmatmul.msk.f32.gmra.mxu0 %vm65_vm2, %v14703_v5  ;;  %v3550_v19 = vadd.f32 %v3530_v23, %v3397_v58 }
 0x380   : > { %11715 = vmatmul.msk.f32.gmra.mxu1 %vm65_vm2, %v14703_v5  ;;  %11734 = vmatmul.msk.f32.gmra.mxu2 %vm65_vm2, %v14773_v20 }
 0x381   : > { %11815 = vmatmul.msk.f32.gmra.mxu3 %vm65_vm2, %v14837_v48 }
 0x383   : > { %v3680_v13 = vpop.f32.mrf.mxu2 }
 0x384   : > { %v4446_v3 = vpop.f32.mrf.mxu3  ;;  %v3700_v42 = vadd.f32 %v3680_v13, %v3550_v19  ;;  %v3399_v22 = vpop.f32.mrf.mxu0 }
 0x385   : > { %v3533_v29 = vpop.f32.mrf.mxu1  ;;  %v3400_v10 = vadd.f32 %v14657_v32, %v3399_v22 }
 0x386   : > { %v14920_v36 = vadd.f32 %v14849_v52, %v3700_v42  ;;  %v14933_v52 = vld [vmem:[%s18240_s2] ss:$0 sm:$0xff] }
 0x387   : > { %11699 = vmatmul.msk.f32.gmra.mxu0 %vm65_vm2, %v14719_v4  ;;  %v3551_v34 = vadd.f32 %v3533_v29, %v3400_v10 }
 0x388   : > { %11716 = vmatmul.msk.f32.gmra.mxu1 %vm65_vm2, %v14719_v4  ;;  %11735 = vmatmul.msk.f32.gmra.mxu2 %vm65_vm2, %v14788_v2 }
 0x389   : > { %11816 = vmatmul.msk.f32.gmra.mxu3 %vm65_vm2, %v14853_v41 }
 0x38b   : > { %v3683_v49 = vpop.f32.mrf.mxu2 }
 0x38c   : > { %v4449_v1 = vpop.f32.mrf.mxu3  ;;  %v3701_v62 = vadd.f32 %v3683_v49, %v3551_v34  ;;  %v3938_v32 = vpop.f32.mrf.mxu0 }
 0x38d   : > { %v4156_v45 = vpop.f32.mrf.mxu1  ;;  %v3986_v42 = vadd.f32 %v3938_v32, %v14689_v27 }
 0x38e   : > { %v14939_v17 = vadd.f32 %v14865_v35, %v3701_v62  ;;  %v4157_v0 = vadd.f32 %v14933_v52, %v4156_v45  ;;  %v15010_v62 = vld [vmem:[%s12844_s21 + $0x360] sm:$0xff] }
 0x38f   : > { %11758 = vmatmul.msk.f32.vlgmr.msra.gmra.mxu0 %vm65_vm2, %v14666_v54 }
 0x390   : > { %11777 = vmatmul.msk.f32.vlgmr.msra.gmra.mxu1 %vm65_vm2, %v14734_v9  ;;  %11794 = vmatmul.msk.f32.vlgmr.msra.gmra.mxu2 %vm65_vm2, %v14734_v9 }
 0x391   : > { %11817 = vmatmul.msk.f32.gmra.mxu3 %vm65_vm2, %v14936_v61 }
 0x393   : > { %v4290_v35 = vpop.f32.mrf.mxu2 }
 0x394   : > { %v14953_v50 = vpop.f32.mrf.mxu3  ;;  %v4338_v54 = vadd.f32 %v4290_v35, %v4157_v0  ;;  %v3941_v28 = vpop.f32.mrf.mxu0  ;;  %v5690_v35 = vld [vmem:[%s18241_s3] sm:$0xff] }
 0x395   : > { %v4159_v40 = vpop.f32.mrf.mxu1  ;;  %5773 = vmatpush.msra.mxu3 %v5690_v35 }
 0x396   : > { %v14958_v26 = vadd.f32 %v4440_v55, %v4338_v54  ;;  %v4160_v39 = vadd.f32 %v14933_v52, %v4159_v40 }
 0x397   : > { %11759 = vmatmul.msk.f32.gmra.mxu0 %vm65_vm2, %v14686_v51  ;;  %v14974_v51 = vld [vmem:[%s12844_s21 + $0x350] sm:$0xff] }
 0x398   : > { %11778 = vmatmul.msk.f32.gmra.mxu1 %vm65_vm2, %v14758_v25  ;;  %11795 = vmatmul.msk.f32.gmra.mxu2 %vm65_vm2, %v14758_v25 }
 0x399   : > { %11818 = vmatmul.msk.f32.gmra.mxu3 %vm65_vm2, %v14956_v30 }
 0x39b   : > { %v4293_v14 = vpop.f32.mrf.mxu2 }
 0x39c   : > { %v14969_v16 = vpop.f32.mrf.mxu3  ;;  %v4339_v55 = vadd.f32 %v4293_v14, %v4160_v39  ;;  %v14971_v46 = vpop.f32.mrf.mxu0 }
 0x39d   : > { %v4162_v38 = vpop.f32.mrf.mxu1 }
 0x39e   : > { %v14976_v21 = vadd.f32 %v4443_v59, %v4339_v55  ;;  %v4163_v6 = vadd.f32 %v14933_v52, %v4162_v38 }
 0x39f   : > { %11760 = vmatmul.msk.f32.gmra.mxu0 %vm65_vm2, %v14703_v5  ;;  %v14992_v5 = vld [vmem:[%s12844_s21 + $0x358] sm:$0xff] }
 0x3a0   : > { %11779 = vmatmul.msk.f32.gmra.mxu1 %vm65_vm2, %v14773_v20  ;;  %11796 = vmatmul.msk.f32.gmra.mxu2 %vm65_vm2, %v14773_v20 }
 0x3a1   : > { %11819 = vmatmul.msk.f32.gmra.mxu3 %vm65_vm2, %v14974_v51 }
 0x3a3   : > { %v4296_v56 = vpop.f32.mrf.mxu2 }
 0x3a4   : > { %v14987_v44 = vpop.f32.mrf.mxu3  ;;  %v4340_v23 = vadd.f32 %v4296_v56, %v4163_v6  ;;  %v14989_v59 = vpop.f32.mrf.mxu0  ;;  %v15040_v6 = vld [vmem:[%s12844_s21 + $0x368] sm:$0xff] }
 0x3a5   : > { %v4165_v58 = vpop.f32.mrf.mxu1 }
 0x3a6   : > { %v14994_v19 = vadd.f32 %v4446_v3, %v4340_v23  ;;  %v4166_v13 = vadd.f32 %v14933_v52, %v4165_v58 }
 0x3a7   : > { %11761 = vmatmul.msk.f32.gmra.mxu0 %vm65_vm2, %v14719_v4  ;;  %v4002_v4 = vmax.f32 %v3986_v42, 0.0 }
 0x3a8   : > { %11780 = vmatmul.msk.f32.gmra.mxu1 %vm65_vm2, %v14788_v2  ;;  %11797 = vmatmul.msk.f32.gmra.mxu2 %vm65_vm2, %v14788_v2 }
 0x3a9   : > { %11820 = vmatmul.msk.f32.gmra.mxu3 %vm65_vm2, %v14992_v5 }
 0x3ab   : > { %v4299_v22 = vpop.f32.mrf.mxu2 }
 0x3ac   : > { %v15006_v29 = vpop.f32.mrf.mxu3  ;;  %v4341_v3 = vadd.f32 %v4299_v22, %v4166_v13  ;;  %v3950_v10 = vpop.f32.mrf.mxu0 }
 0x3ad   : > { %v4168_v34 = vpop.f32.mrf.mxu1  ;;  %v3990_v49 = vadd.f32 %v3950_v10, %v14761_v37  ;;  %v4018_v37 = vsel %vm33_vm0, %v4002_v4, -inf }
 0x3ae   : > { %v15012_v45 = vadd.f32 %v4449_v1, %v4341_v3  ;;  %v4169_v27 = vadd.f32 %v14933_v52, %v4168_v34  ;;  %v3987_v1 = vadd.f32 %v3941_v28, %v14706_v11 }
 0x3af   : > { %v4006_v0 = vmax.f32 %v3990_v49, 0.0  ;;  %11762 = vmatmul.msk.f32.gmra.mxu0 %vm65_vm2, %v14734_v9  ;;  %v11867_v9 = vld [vmem:[%s18239_s1 + $0x40] sm:$0xff] }
 0x3b0   : > { %11781 = vmatmul.msk.f32.gmra.mxu1 %vm65_vm2, %v14802_v31  ;;  %11798 = vmatmul.msk.f32.gmra.mxu2 %vm65_vm2, %v14802_v31  ;;  %v4003_v55 = vmax.f32 %v3987_v1, 0.0 }
 0x3b1   : > { %11821 = vmatmul.msk.f32.gmra.mxu3 %vm65_vm2, %v15010_v62  ;;  %v4019_v32 = vsel %vm33_vm0, %v4006_v0, -inf  ;;  %5540 = vmatpush.msrb.mxu2 %v11867_v9  ;;  %v15063_v0 = vld [vmem:[%s12844_s21 + $0x370] sm:$0xff] }
 0x3b2   : > { %v4020_v54 = vmax.f32 %v4018_v37, %v4019_v32 }
 0x3b3   : > { %v4302_v40 = vpop.f32.mrf.mxu2 }
 0x3b4   : > { %v15035_v11 = vpop.f32.mrf.mxu3  ;;  %v4342_v28 = vadd.f32 %v4302_v40, %v4169_v27  ;;  %v3953_v39 = vpop.f32.mrf.mxu0  ;;  %4042 = vst.msk [vmem:[#allocation2] sm:$0xff] %vm33_vm0, %v4020_v54 }
 0x3b5   : > { %v4171_v14 = vpop.f32.mrf.mxu1  ;;  %v3991_v38 = vadd.f32 %v3953_v39, %v14776_v7  ;;  %v4021_v7 = vsel %vm33_vm0, %v4003_v55, -inf  ;;  %v15086_v55 = vld [vmem:[%s12844_s21 + $0x378] sm:$0xff] }
 0x3b6   : > { %v15043_v56 = vadd.f32 %v14953_v50, %v4342_v28  ;;  %v4172_v58 = vadd.f32 %v14933_v52, %v4171_v14  ;;  %v3988_v50 = vadd.f32 %v14971_v46, %v14722_v33 }
 0x3b7   : > { %v4007_v23 = vmax.f32 %v3991_v38, 0.0  ;;  %11763 = vmatmul.msk.f32.gmra.mxu0 %vm65_vm2, %v14758_v25 }
 0x3b8   : > { %11782 = vmatmul.msk.f32.gmra.mxu1 %vm65_vm2, %v14821_v53  ;;  %11799 = vmatmul.msk.f32.gmra.mxu2 %vm65_vm2, %v14821_v53  ;;  %v4004_v4 = vmax.f32 %v3988_v50, 0.0 }
 0x3b9   : > { %11822 = vmatmul.msk.f32.gmra.mxu3 %vm65_vm2, %v15040_v6  ;;  %v4022_v13 = vsel %vm33_vm0, %v4007_v23, -inf }
 0x3ba   : > { %v4023_v25 = vmax.f32 %v4021_v7, %v4022_v13 }
 0x3bb   : > { %v4305_v42 = vpop.f32.mrf.mxu2 }
 0x3bc   : > { %v15058_v22 = vpop.f32.mrf.mxu3  ;;  %v4343_v3 = vadd.f32 %v4305_v42, %v4172_v58  ;;  %v3956_v10 = vpop.f32.mrf.mxu0  ;;  %4043 = vst.msk [vmem:[#allocation2 + $0x8] sm:$0xff] %vm33_vm0, %v4023_v25  ;;  %v15105_v25 = vld [vmem:[%s12844_s21 + $0x380] sm:$0xff] }
 0x3bd   : > { %v4174_v34 = vpop.f32.mrf.mxu1  ;;  %v3992_v49 = vadd.f32 %v3956_v10, %v14790_v18  ;;  %v4024_v18 = vsel %vm33_vm0, %v4004_v4, -inf }
 0x3be   : > { %v15066_v27 = vadd.f32 %v14969_v16, %v4343_v3  ;;  %v4175_v46 = vadd.f32 %v14933_v52, %v4174_v34  ;;  %v3989_v16 = vadd.f32 %v14989_v59, %v14737_v63 }
 0x3bf   : > { %v4008_v33 = vmax.f32 %v3992_v49, 0.0  ;;  %11764 = vmatmul.msk.f32.gmra.mxu0 %vm65_vm2, %v14773_v20 }
 0x3c0   : > { %11783 = vmatmul.msk.f32.gmra.mxu1 %vm65_vm2, %v14837_v48  ;;  %11800 = vmatmul.msk.f32.gmra.mxu2 %vm65_vm2, %v14837_v48  ;;  %v4005_v39 = vmax.f32 %v3989_v16, 0.0  ;;  %v15125_v16 = vld [vmem:[%s12844_s21 + $0x388] sm:$0xff] }
 0x3c1   : > { %11823 = vmatmul.msk.f32.gmra.mxu3 %vm65_vm2, %v15063_v0  ;;  %v4025_v37 = vsel %vm33_vm0, %v4008_v33, -inf }
 0x3c2   : > { %v4026_v20 = vmax.f32 %v4024_v18, %v4025_v37 }
 0x3c3   : > { %v4308_v1 = vpop.f32.mrf.mxu2  ;;  %v4050_v9 = vld [vmem:[#allocation2] ss:$2 sm:$0xff]  ;;  %v4054_v15 = vld [vmem:[#allocation2 + $0x1] ss:$2 sm:$0xff] }
 0x3c4   : > { %v15081_v32 = vpop.f32.mrf.mxu3  ;;  %v4344_v35 = vadd.f32 %v4308_v1, %v4175_v46  ;;  %v3959_v54 = vpop.f32.mrf.mxu0  ;;  %4044 = vst.msk [vmem:[#allocation2 + $0x10] sm:$0xff] %vm33_vm0, %v4026_v20  ;;  %v4058_v28 = vmax.f32 %v4050_v9, %v4054_v15 }
 0x3c5   : > { %v4177_v40 = vpop.f32.mrf.mxu1  ;;  %v3993_v14 = vadd.f32 %v3959_v54, %v14804_v8  ;;  %v4027_v8 = vsel %vm33_vm0, %v4005_v39, -inf }
 0x3c6   : > { %v15089_v63 = vadd.f32 %v14987_v44, %v4344_v35  ;;  %4062 = vst.msk [vmem:[#allocation3 + $0x80] sm:$0xff] %vm33_vm0, %v4058_v28  ;;  %v4178_v38 = vadd.f32 %v14933_v52, %v4177_v40 }
 0x3c7   : > { %v4009_v59 = vmax.f32 %v3993_v14, 0.0  ;;  %11765 = vmatmul.msk.f32.gmra.mxu0 %vm65_vm2, %v14788_v2 }
 0x3c8   : > { %11784 = vmatmul.msk.f32.gmra.mxu1 %vm65_vm2, %v14853_v41  ;;  %11801 = vmatmul.msk.f32.gmra.mxu2 %vm65_vm2, %v14853_v41 }
 0x3c9   : > { %11824 = vmatmul.msk.f32.gmra.mxu3 %vm65_vm2, %v15086_v55  ;;  %v4028_v44 = vsel %vm33_vm0, %v4009_v59, -inf }
 0x3ca   : > { %v4029_v23 = vmax.f32 %v4027_v8, %v4028_v44 }
 0x3cb   : > { %v4311_v58 = vpop.f32.mrf.mxu2 }
 0x3cc   : > { %v4473_v7 = vpop.f32.mrf.mxu3  ;;  %v4345_v50 = vadd.f32 %v4311_v58, %v4178_v38  ;;  %v3962_v2 = vpop.f32.mrf.mxu0  ;;  %4045 = vst.msk [vmem:[#allocation2 + $0x18] sm:$0xff] %vm33_vm0, %v4029_v23  ;;  %v15164_v38 = vld [vmem:[%s12844_s21 + $0x398] sm:$0xff] }
 0x3cd   : > { %v4180_v13 = vpop.f32.mrf.mxu1  ;;  %v3994_v44 = vadd.f32 %v3962_v2, %v14823_v43 }
 0x3ce   : > { %v15108_v42 = vadd.f32 %v15006_v29, %v4345_v50  ;;  %v4181_v3 = vadd.f32 %v14933_v52, %v4180_v13  ;;  %v11981_v29 = vld [vmem:[%s18241_s3 + $0x98] sm:$0xff] }
 0x3cf   : > { %11766 = vmatmul.msk.f32.gmra.mxu0 %vm65_vm2, %v14802_v31  ;;  %6478 = vmatpush.msrb.mxu3 %v11981_v29 }
 0x3d0   : > { %11785 = vmatmul.msk.f32.gmra.mxu1 %vm65_vm2, %v14936_v61  ;;  %11802 = vmatmul.msk.f32.gmra.mxu2 %vm65_vm2, %v14936_v61 }
 0x3d1   : > { %11825 = vmatmul.msk.f32.gmra.mxu3 %vm65_vm2, %v15105_v25 }
 0x3d3   : > { %v4314_v10 = vpop.f32.mrf.mxu2  ;;  %v4051_v31 = vld [vmem:[#allocation2 + $0x10] ss:$2 sm:$0xff]  ;;  %v4055_v4 = vld [vmem:[#allocation2 + $0x11] ss:$2 sm:$0xff] }
 0x3d4   : > { %v15122_v34 = vpop.f32.mrf.mxu3  ;;  %v4346_v49 = vadd.f32 %v4314_v10, %v4181_v3  ;;  %v3965_v33 = vpop.f32.mrf.mxu0  ;;  %v4059_v18 = vmax.f32 %v4051_v31, %v4055_v4  ;;  %v5670_v31 = vld [vmem:[#allocation3] sm:$0xff] }
 0x3d5   : > { %v4183_v46 = vpop.f32.mrf.mxu1 }
 0x3d6   : > { %v15128_v37 = vadd.f32 %v15035_v11, %v4346_v49  ;;  %4063 = vst.msk [vmem:[#allocation3 + $0x88] sm:$0xff] %vm33_vm0, %v4059_v18  ;;  %v4184_v20 = vadd.f32 %v14933_v52, %v4183_v46  ;;  %v11957_v18 = vld [vmem:[%s18241_s3 + $0x78] sm:$0xff] }
 0x3d7   : > { %11767 = vmatmul.msk.f32.gmra.mxu0 %vm65_vm2, %v14821_v53  ;;  %v15145_v53 = vld [vmem:[%s12844_s21 + $0x390] sm:$0xff]  ;;  %6296 = vmatpush.msra.mxu2 %v11957_v18 }
 0x3d8   : > { %11786 = vmatmul.msk.f32.gmra.mxu1 %vm65_vm2, %v14956_v30  ;;  %11803 = vmatmul.msk.f32.gmra.mxu2 %vm65_vm2, %v14956_v30 }
 0x3d9   : > { %11826 = vmatmul.msk.f32.gmra.mxu3 %vm65_vm2, %v15125_v16 }
 0x3db   : > { %v4317_v1 = vpop.f32.mrf.mxu2 }
 0x3dc   : > { %v15140_v9 = vpop.f32.mrf.mxu3  ;;  %v4347_v11 = vadd.f32 %v4317_v1, %v4184_v20  ;;  %v15142_v15 = vpop.f32.mrf.mxu0  ;;  %v11909_v20 = vld [vmem:[%s18241_s3 + $0x38] sm:$0xff] }
 0x3dd   : > { %v4186_v35 = vpop.f32.mrf.mxu1  ;;  %5932 = vmatpush.msra.mxu0 %v11909_v20 }
 0x3de   : > { %v15148_v54 = vadd.f32 %v15058_v22, %v4347_v11  ;;  %v4187_v40 = vadd.f32 %v14933_v52, %v4186_v35 }
 0x3df   : > { %11768 = vmatmul.msk.f32.gmra.mxu0 %vm65_vm2, %v14837_v48 }
 0x3e0   : > { %11787 = vmatmul.msk.f32.gmra.mxu1 %vm65_vm2, %v14974_v51  ;;  %11804 = vmatmul.msk.f32.gmra.mxu2 %vm65_vm2, %v14974_v51 }
 0x3e1   : > { %11827 = vmatmul.msk.f32.gmra.mxu3 %vm65_vm2, %v15145_v53 }
 0x3e3   : > { %v4320_v28 = vpop.f32.mrf.mxu2 }
 0x3e4   : > { %v15159_v39 = vpop.f32.mrf.mxu3  ;;  %v4348_v14 = vadd.f32 %v4320_v28, %v4187_v40  ;;  %v15161_v22 = vpop.f32.mrf.mxu0 }
 0x3e5   : > { %v4189_v59 = vpop.f32.mrf.mxu1 }
 0x3e6   : > { %v15167_v48 = vadd.f32 %v15081_v32, %v4348_v14  ;;  %v4190_v8 = vadd.f32 %v14933_v52, %v4189_v59  ;;  %v5671_v59 = vld [vmem:[#allocation3 + $0x8] sm:$0xff] }
 0x3e7   : > { %11769 = vmatmul.msk.f32.gmra.mxu0 %vm65_vm2, %v14853_v41  ;;  %v4010_v41 = vmax.f32 %v3994_v44, 0.0 }
 0x3e8   : > { %11788 = vmatmul.msk.f32.gmra.mxu1 %vm65_vm2, %v14992_v5  ;;  %11805 = vmatmul.msk.f32.gmra.mxu2 %vm65_vm2, %v14992_v5 }
 0x3e9   : > { %11828 = vmatmul.msk.f32.gmra.mxu3 %vm65_vm2, %v15164_v38  ;;  %v4030_v2 = vsel %vm33_vm0, %v4010_v41, -inf }
 0x3eb   : > { %v4323_v23 = vpop.f32.mrf.mxu2 }
 0x3ec   : > { %v15179_v58 = vpop.f32.mrf.mxu3  ;;  %v4349_v32 = vadd.f32 %v4323_v23, %v4190_v8  ;;  %v3974_v50 = vpop.f32.mrf.mxu0 }
 0x3ed   : > { %v4192_v13 = vpop.f32.mrf.mxu1  ;;  %v3998_v3 = vadd.f32 %v3974_v50, %v14895_v60  ;;  %v3995_v60 = vadd.f32 %v3965_v33, %v14839_v47  ;;  %v11933_v47 = vld [vmem:[%s18241_s3 + $0x58] sm:$0xff] }
 0x3ee   : > { %v15182_v29 = vadd.f32 %v4473_v7, %v4349_v32  ;;  %v4193_v43 = vadd.f32 %v14933_v52, %v4192_v13  ;;  %6114 = vmatpush.msra.mxu1 %v11933_v47  ;;  %v11980_v13 = vld [vmem:[%s18241_s3 + $0x90] sm:$0xff] }
 0x3ef   : > { %v4014_v10 = vmax.f32 %v3998_v3, 0.0  ;;  %11770 = vmatmul.msk.f32.gmra.mxu0 %vm65_vm2, %v14936_v61  ;;  %v4011_v33 = vmax.f32 %v3995_v60, 0.0  ;;  %6479 = vmatpush.msrb.mxu3 %v11980_v13 }
 0x3f0   : > { %11789 = vmatmul.msk.f32.gmra.mxu1 %vm65_vm2, %v15010_v62  ;;  %11806 = vmatmul.msk.f32.gmra.mxu2 %vm65_vm2, %v15010_v62 }
 0x3f1   : > { %11886 = vmatmul.msk.f32.vlgmr.msra.gmra.mxu3 %vm33_vm0, %v5670_v31  ;;  %v4031_v7 = vsel %vm33_vm0, %v4014_v10, -inf }
 0x3f2   : > { %v4032_v4 = vmax.f32 %v4030_v2, %v4031_v7  ;;  %v5672_v2 = vld [vmem:[#allocation3 + $0x10] sm:$0xff] }
 0x3f3   : > { %v4326_v49 = vpop.f32.mrf.mxu2 }
 0x3f4   : > { %v15195_v46 = vpop.f32.mrf.mxu3  ;;  %v4350_v1 = vadd.f32 %v4326_v49, %v4193_v43  ;;  %v3977_v11 = vpop.f32.mrf.mxu0  ;;  %4046 = vst.msk [vmem:[#allocation2 + $0x20] sm:$0xff] %vm33_vm0, %v4032_v4 }
 0x3f5   : > { %v4195_v35 = vpop.f32.mrf.mxu1  ;;  %v3999_v40 = vadd.f32 %v3977_v11, %v14908_v24  ;;  %v4033_v24 = vsel %vm33_vm0, %v4011_v33, -inf }
 0x3f6   : > { %v15209_v28 = vadd.f32 %v15122_v34, %v4350_v1  ;;  %v4196_v8 = vadd.f32 %v14933_v52, %v4195_v35  ;;  %v3996_v34 = vadd.f32 %v15142_v15, %v14855_v57 }
 0x3f7   : > { %v4015_v14 = vmax.f32 %v3999_v40, 0.0  ;;  %11771 = vmatmul.msk.f32.gmra.mxu0 %vm65_vm2, %v14956_v30 }
 0x3f8   : > { %11790 = vmatmul.msk.f32.gmra.mxu1 %vm65_vm2, %v15040_v6  ;;  %11807 = vmatmul.msk.f32.gmra.mxu2 %vm65_vm2, %v15040_v6  ;;  %v4012_v31 = vmax.f32 %v3996_v34, 0.0 }
 0x3f9   : > { %11887 = vmatmul.msk.f32.gmra.mxu3 %vm33_vm0, %v5671_v59  ;;  %v4034_v44 = vsel %vm33_vm0, %v4015_v14, -inf }
 0x3fa   : > { %v4035_v23 = vmax.f32 %v4033_v24, %v4034_v44 }
 0x3fb   : > { %v4329_v32 = vpop.f32.mrf.mxu2 }
 0x3fc   : > { %v15223_v50 = vpop.f32.mrf.mxu3  ;;  %v4351_v41 = vadd.f32 %v4329_v32, %v4196_v8  ;;  %v3980_v3 = vpop.f32.mrf.mxu0  ;;  %4047 = vst.msk [vmem:[#allocation2 + $0x28] sm:$0xff] %vm33_vm0, %v4035_v23 }
 0x3fd   : > { %v4198_v10 = vpop.f32.mrf.mxu1  ;;  %v4000_v43 = vadd.f32 %v3980_v3, %v14920_v36  ;;  %v4036_v36 = vsel %vm33_vm0, %v4012_v31, -inf  ;;  %v15279_v3 = vld [vmem:[%s18240_s2] ss:$0 sm:$0xff] }
 0x3fe   : > { %v15231_v57 = vadd.f32 %v15140_v9, %v4351_v41  ;;  %v4199_v60 = vadd.f32 %v14933_v52, %v4198_v10  ;;  %v3997_v9 = vadd.f32 %v15161_v22, %v14868_v12  ;;  %v5673_v22 = vld [vmem:[#allocation3 + $0x18] sm:$0xff]  ;;  %v5674_v41 = vld [vmem:[#allocation3 + $0x20] sm:$0xff] }
 0x3ff   : > { %v4016_v15 = vmax.f32 %v4000_v43, 0.0  ;;  %11772 = vmatmul.msk.f32.gmra.mxu0 %vm65_vm2, %v14974_v51 }
 0x400   : > { %11791 = vmatmul.msk.f32.gmra.mxu1 %vm65_vm2, %v15063_v0  ;;  %11808 = vmatmul.msk.f32.gmra.mxu2 %vm65_vm2, %v15063_v0  ;;  %v4013_v40 = vmax.f32 %v3997_v9, 0.0  ;;  %v11932_v9 = vld [vmem:[%s18241_s3 + $0x50] sm:$0xff] }
 0x401   : > { %11888 = vmatmul.msk.f32.gmra.mxu3 %vm33_vm0, %v5672_v2  ;;  %v4037_v7 = vsel %vm33_vm0, %v4016_v15, -inf  ;;  %6115 = vmatpush.msra.mxu1 %v11932_v9 }
 0x402   : > { %v4038_v4 = vmax.f32 %v4036_v36, %v4037_v7  ;;  %v11908_v36 = vld [vmem:[%s18241_s3 + $0x30] sm:$0xff] }
 0x403   : > { %v4332_v49 = vpop.f32.mrf.mxu2  ;;  %v4052_v20 = vld [vmem:[#allocation2 + $0x20] ss:$2 sm:$0xff]  ;;  %v4056_v1 = vld [vmem:[#allocation2 + $0x21] ss:$2 sm:$0xff]  ;;  %5933 = vmatpush.msra.mxu0 %v11908_v36 }
 0x404   : > { %v15245_v18 = vpop.f32.mrf.mxu3  ;;  %v4352_v11 = vadd.f32 %v4332_v49, %v4199_v60  ;;  %v3983_v35 = vpop.f32.mrf.mxu0  ;;  %4048 = vst.msk [vmem:[#allocation2 + $0x30] sm:$0xff] %vm33_vm0, %v4038_v4  ;;  %v4060_v33 = vmax.f32 %v4052_v20, %v4056_v1  ;;  %v11956_v60 = vld [vmem:[%s18241_s3 + $0x70] sm:$0xff]  ;;  %v5675_v49 = vld [vmem:[#allocation3 + $0x28] sm:$0xff] }
 0x405   : > { %v4201_v47 = vpop.f32.mrf.mxu1  ;;  %v4001_v14 = vadd.f32 %v3983_v35, %v14939_v17  ;;  %v4039_v17 = vsel %vm33_vm0, %v4013_v40, -inf  ;;  %6297 = vmatpush.msra.mxu2 %v11956_v60  ;;  %v11907_v36 = vld [vmem:[%s18241_s3 + $0x28] sm:$0xff] }
 0x406   : > { %v15250_v59 = vadd.f32 %v15159_v39, %v4352_v11  ;;  %4064 = vst.msk [vmem:[#allocation3 + $0x90] sm:$0xff] %vm33_vm0, %v4060_v33  ;;  %v4202_v8 = vadd.f32 %v14933_v52, %v4201_v47  ;;  %5934 = vmatpush.msra.mxu0 %v11907_v36 }
 0x407   : > { %v4017_v12 = vmax.f32 %v4001_v14, 0.0  ;;  %11773 = vmatmul.msk.f32.gmra.mxu0 %vm65_vm2, %v14992_v5 }
 0x408   : > { %11792 = vmatmul.msk.f32.gmra.mxu1 %vm65_vm2, %v15086_v55  ;;  %11809 = vmatmul.msk.f32.gmra.mxu2 %vm65_vm2, %v15086_v55 }
 0x409   : > { %11889 = vmatmul.msk.f32.gmra.mxu3 %vm33_vm0, %v5673_v22  ;;  %v4040_v39 = vsel %vm33_vm0, %v4017_v12, -inf }
 0x40a   : > { %v4041_v24 = vmax.f32 %v4039_v17, %v4040_v39  ;;  %v5677_v17 = vld [vmem:[#allocation3 + $0x38] sm:$0xff] }
 0x40b   : > { %v4335_v34 = vpop.f32.mrf.mxu2 }
 0x40c   : > { %v15263_v44 = vpop.f32.mrf.mxu3  ;;  %v4353_v23 = vadd.f32 %v4335_v34, %v4202_v8  ;;  %v4590_v32 = vpop.f32.mrf.mxu0  ;;  %4049 = vst.msk [vmem:[#allocation2 + $0x38] sm:$0xff] %vm33_vm0, %v4041_v24 }
 0x40d   : > { %v4740_v13 = vpop.f32.mrf.mxu1  ;;  %v4638_v8 = vadd.f32 %v4590_v32, %v14958_v26 }
 0x40e   : > { %v15267_v52 = vadd.f32 %v15179_v58, %v4353_v23 }
 0x40f   : > { %11832 = vmatmul.msk.f32.vlgmr.msrb.gmra.mxu0 %vm65_vm2, %v14936_v61  ;;  %v4788_v39 = vadd.f32 %v4740_v13, %v4638_v8  ;;  %v5678_v13 = vld [vmem:[#allocation3 + $0x40] sm:$0xff] }
 0x410   : > { %11851 = vmatmul.msk.f32.vlgmr.msrb.gmra.mxu1 %vm65_vm2, %v15010_v62  ;;  %11870 = vmatmul.msk.f32.vlgmr.msrb.gmra.mxu2 %vm65_vm2, %v15105_v25 }
 0x411   : > { %11890 = vmatmul.msk.f32.gmra.mxu3 %vm33_vm0, %v5674_v41 }
 0x413   : > { %v4958_v10 = vpop.f32.mrf.mxu2  ;;  %v4053_v31 = vld [vmem:[#allocation2 + $0x30] ss:$2 sm:$0xff]  ;;  %v4057_v43 = vld [vmem:[#allocation2 + $0x31] ss:$2 sm:$0xff] }
 0x414   : > { %v15281_v58 = vpop.f32.mrf.mxu3  ;;  %v4959_v61 = vadd.f32 %v15279_v3, %v4958_v10  ;;  %v4593_v15 = vpop.f32.mrf.mxu0  ;;  %v4061_v7 = vmax.f32 %v4053_v31, %v4057_v43  ;;  %v4804_v10 = vmax.f32 %v4788_v39, 0.0 }
 0x415   : > { %v4743_v2 = vpop.f32.mrf.mxu1  ;;  %v4639_v31 = vadd.f32 %v4593_v15, %v14976_v21 }
 0x416   : > { %4065 = vst.msk [vmem:[#allocation3 + $0x98] sm:$0xff] %vm33_vm0, %v4061_v7  ;;  %v15295_v4 = vadd.f32 %v15195_v46, %v4959_v61 }
 0x417   : > { %11833 = vmatmul.msk.f32.gmra.mxu0 %vm65_vm2, %v14956_v30  ;;  %v5676_v30 = vld [vmem:[#allocation3 + $0x30] sm:$0xff]  ;;  %v4789_v61 = vadd.f32 %v4743_v2, %v4639_v31  ;;  %v11931_v2 = vld [vmem:[%s18241_s3 + $0x48] sm:$0xff] }
 0x418   : > { %11852 = vmatmul.msk.f32.gmra.mxu1 %vm65_vm2, %v15040_v6  ;;  %11871 = vmatmul.msk.f32.gmra.mxu2 %vm65_vm2, %v15125_v16 }
 0x419   : > { %11891 = vmatmul.msk.f32.gmra.mxu3 %vm33_vm0, %v5675_v49  ;;  %6116 = vmatpush.msra.mxu1 %v11931_v2 }
 0x41b   : > { %v4961_v20 = vpop.f32.mrf.mxu2 }
 0x41c   : > { %v15304_v1 = vpop.f32.mrf.mxu3  ;;  %v4962_v11 = vadd.f32 %v15279_v3, %v4961_v20  ;;  %v4596_v35 = vpop.f32.mrf.mxu0 }
 0x41d   : > { %v15307_v46 = vpop.f32.mrf.mxu1 }
 0x41e   : > { %v15310_v47 = vadd.f32 %v15223_v50, %v4962_v11 }
 0x41f   : > { %11834 = vmatmul.msk.f32.gmra.mxu0 %vm65_vm2, %v14974_v51  ;;  %v11979_v51 = vld [vmem:[%s18241_s3 + $0x88] sm:$0xff] }
 0x420   : > { %11853 = vmatmul.msk.f32.gmra.mxu1 %vm65_vm2, %v15063_v0  ;;  %11872 = vmatmul.msk.f32.gmra.mxu2 %vm65_vm2, %v15145_v53 }
 0x421   : > { %11892 = vmatmul.msk.f32.gmra.mxu3 %vm33_vm0, %v5676_v30  ;;  %v15374_v30 = vld [vmem:[%s12844_s21 + $0x3a8] sm:$0xff] }
 0x422   : > { %6480 = vmatpush.msrb.mxu3 %v11979_v51  ;;  %v4640_v51 = vadd.f32 %v4596_v35, %v14994_v19 }
 0x423   : > { %v4964_v33 = vpop.f32.mrf.mxu2 }
 0x424   : > { %v15319_v40 = vpop.f32.mrf.mxu3  ;;  %v4965_v14 = vadd.f32 %v15279_v3, %v4964_v33  ;;  %v15322_v12 = vpop.f32.mrf.mxu0  ;;  %v4790_v39 = vadd.f32 %v15307_v46, %v4640_v51 }
 0x425   : > { %v15324_v50 = vpop.f32.mrf.mxu1 }
 0x426   : > { %v15330_v22 = vadd.f32 %v15245_v18, %v4965_v14  ;;  %v4805_v14 = vmax.f32 %v4789_v61, 0.0  ;;  %v4806_v46 = vmax.f32 %v4790_v39, 0.0 }
 0x427   : > { %11835 = vmatmul.msk.f32.gmra.mxu0 %vm65_vm2, %v14992_v5  ;;  %v15345_v5 = vld [vmem:[%s12844_s21 + $0x3a0] sm:$0xff] }
 0x428   : > { %11854 = vmatmul.msk.f32.gmra.mxu1 %vm65_vm2, %v15086_v55  ;;  %11873 = vmatmul.msk.f32.gmra.mxu2 %vm65_vm2, %v15164_v38 }
 0x429   : > { %11893 = vmatmul.msk.f32.gmra.mxu3 %vm33_vm0, %v5677_v17 }
 0x42b   : > { %v4967_v24 = vpop.f32.mrf.mxu2 }
 0x42c   : > { %v15340_v34 = vpop.f32.mrf.mxu3  ;;  %v4968_v18 = vadd.f32 %v15279_v3, %v4967_v24  ;;  %v4602_v23 = vpop.f32.mrf.mxu0 }
 0x42d   : > { %v4752_v26 = vpop.f32.mrf.mxu1  ;;  %v4642_v32 = vadd.f32 %v4602_v23, %v15043_v56 }
 0x42e   : > { %v15348_v41 = vadd.f32 %v15263_v44, %v4968_v18  ;;  %v4820_v44 = vsel %vm33_vm0, %v4804_v10, -inf  ;;  %v15396_v10 = vld [vmem:[%s12844_s21 + $0x3b0] sm:$0xff] }
 0x42f   : > { %v4792_v43 = vadd.f32 %v4752_v26, %v4642_v32  ;;  %11836 = vmatmul.msk.f32.gmra.mxu0 %vm65_vm2, %v15010_v62  ;;  %v11955_v62 = vld [vmem:[%s18241_s3 + $0x68] sm:$0xff] }
 0x430   : > { %11855 = vmatmul.msk.f32.gmra.mxu1 %vm65_vm2, %v15105_v25  ;;  %11874 = vmatmul.msk.f32.gmra.mxu2 %vm65_vm2, %v15345_v5 }
 0x431   : > { %11894 = vmatmul.msk.f32.gmra.mxu3 %vm33_vm0, %v5678_v13  ;;  %v4808_v56 = vmax.f32 %v4792_v43, 0.0  ;;  %6298 = vmatpush.msra.mxu2 %v11955_v62  ;;  %v4641_v43 = vadd.f32 %v15322_v12, %v15012_v45 }
 0x433   : > { %v4821_v21 = vsel %vm33_vm0, %v4808_v56, -inf  ;;  %v4970_v15 = vpop.f32.mrf.mxu2  ;;  %v4826_v56 = vsel %vm33_vm0, %v4806_v46, -inf }
 0x434   : > { %v15360_v60 = vpop.f32.mrf.mxu3  ;;  %v4822_v9 = vmax.f32 %v4820_v44, %v4821_v21  ;;  %v4971_v7 = vadd.f32 %v15279_v3, %v4970_v15  ;;  %v4605_v49 = vpop.f32.mrf.mxu0  ;;  %v4791_v44 = vadd.f32 %v15324_v50, %v4641_v43  ;;  %v11906_v43 = vld [vmem:[%s18241_s3 + $0x20] sm:$0xff] }
 0x435   : > { %v4755_v20 = vpop.f32.mrf.mxu1  ;;  %v4643_v11 = vadd.f32 %v4605_v49, %v15066_v27  ;;  %v5679_v27 = vld [vmem:[#allocation3 + $0x48] sm:$0xff]  ;;  %5935 = vmatpush.msra.mxu0 %v11906_v43 }
 0x436   : > { %4844 = vst.msk [vmem:[#allocation2] sm:$0xff] %vm33_vm0, %v4822_v9  ;;  %v15378_v33 = vadd.f32 %v15281_v58, %v4971_v7  ;;  %v4823_v58 = vsel %vm33_vm0, %v4805_v14, -inf  ;;  %v15419_v9 = vld [vmem:[%s12844_s21 + $0x3b8] sm:$0xff]  ;;  %v4807_v2 = vmax.f32 %v4791_v44, 0.0 }
 0x437   : > { %v4793_v8 = vadd.f32 %v4755_v20, %v4643_v11  ;;  %11837 = vmatmul.msk.f32.gmra.mxu0 %vm65_vm2, %v15040_v6 }
 0x438   : > { %11856 = vmatmul.msk.f32.gmra.mxu1 %vm65_vm2, %v15125_v16  ;;  %11875 = vmatmul.msk.f32.gmra.mxu2 %vm65_vm2, %v15374_v30  ;;  %v4829_v14 = vsel %vm33_vm0, %v4807_v2, -inf }
 0x439   : > { %11895 = vmatmul.msk.f32.gmra.mxu3 %vm33_vm0, %v5679_v27  ;;  %v4809_v17 = vmax.f32 %v4793_v8, 0.0 }
 0x43b   : > { %v4824_v19 = vsel %vm33_vm0, %v4809_v17, -inf  ;;  %v4973_v35 = vpop.f32.mrf.mxu2 }
 0x43c   : > { %v15391_v24 = vpop.f32.mrf.mxu3  ;;  %v4825_v6 = vmax.f32 %v4823_v58, %v4824_v19  ;;  %v4974_v18 = vadd.f32 %v15279_v3, %v4973_v35  ;;  %v4608_v23 = vpop.f32.mrf.mxu0  ;;  %v15442_v35 = vld [vmem:[%s12844_s21 + $0x3c0] sm:$0xff] }
 0x43d   : > { %v4758_v26 = vpop.f32.mrf.mxu1  ;;  %v4644_v32 = vadd.f32 %v4608_v23, %v15089_v63  ;;  %v5680_v63 = vld [vmem:[#allocation3 + $0x50] sm:$0xff] }
 0x43e   : > { %4845 = vst.msk [vmem:[#allocation2 + $0x8] sm:$0xff] %vm33_vm0, %v4825_v6  ;;  %v15400_v31 = vadd.f32 %v15304_v1, %v4974_v18  ;;  %v5682_v18 = vld [vmem:[#allocation3 + $0x60] sm:$0xff] }
 0x43f   : > { %v4794_v13 = vadd.f32 %v4758_v26, %v4644_v32  ;;  %11838 = vmatmul.msk.f32.gmra.mxu0 %vm65_vm2, %v15063_v0 }
 0x440   : > { %11857 = vmatmul.msk.f32.gmra.mxu1 %vm65_vm2, %v15145_v53  ;;  %11876 = vmatmul.msk.f32.gmra.mxu2 %vm65_vm2, %v15396_v10 }
 0x441   : > { %11896 = vmatmul.msk.f32.gmra.mxu3 %vm33_vm0, %v5680_v63  ;;  %v4810_v1 = vmax.f32 %v4794_v13, 0.0  ;;  %v11930_v13 = vld [vmem:[%s18241_s3 + $0x40] sm:$0xff]  ;;  %v15470_v63 = vld [vmem:[%s12844_s21 + $0x3c8] sm:$0xff] }
 0x442   : > { %6117 = vmatpush.msra.mxu1 %v11930_v13 }
 0x443   : > { %v4827_v45 = vsel %vm33_vm0, %v4810_v1, -inf  ;;  %v4976_v12 = vpop.f32.mrf.mxu2 }
 0x444   : > { %v15414_v61 = vpop.f32.mrf.mxu3  ;;  %v4828_v0 = vmax.f32 %v4826_v56, %v4827_v45  ;;  %v4977_v21 = vadd.f32 %v15279_v3, %v4976_v12  ;;  %v4611_v15 = vpop.f32.mrf.mxu0  ;;  %v5683_v12 = vld [vmem:[#allocation3 + $0x68] sm:$0xff] }
 0x445   : > { %v4761_v62 = vpop.f32.mrf.mxu1  ;;  %v4645_v36 = vadd.f32 %v4611_v15, %v15108_v42  ;;  %v4852_v7 = vld [vmem:[#allocation2] ss:$2 sm:$0xff]  ;;  %v4856_v49 = vld [vmem:[#allocation2 + $0x1] ss:$2 sm:$0xff]  ;;  %v5681_v42 = vld [vmem:[#allocation3 + $0x58] sm:$0xff] }
 0x446   : > { %4846 = vst.msk [vmem:[#allocation2 + $0x10] sm:$0xff] %vm33_vm0, %v4828_v0  ;;  %v15423_v50 = vadd.f32 %v15319_v40, %v4977_v21  ;;  %v4860_v20 = vmax.f32 %v4852_v7, %v4856_v49  ;;  %v5684_v7 = vld [vmem:[#allocation3 + $0x70] sm:$0xff] }
 0x447   : > { %v4795_v11 = vadd.f32 %v4761_v62, %v4645_v36  ;;  %11839 = vmatmul.msk.f32.gmra.mxu0 %vm65_vm2, %v15086_v55  ;;  %v11978_v55 = vld [vmem:[%s18241_s3 + $0x80] sm:$0xff] }
 0x448   : > { %11858 = vmatmul.msk.f32.gmra.mxu1 %vm65_vm2, %v15164_v38  ;;  %11877 = vmatmul.msk.f32.gmra.mxu2 %vm65_vm2, %v15419_v9  ;;  %4864 = vst.msk [vmem:[#allocation3 + $0xa0] sm:$0xff] %vm33_vm0, %v4860_v20 }
 0x449   : > { %11897 = vmatmul.msk.f32.gmra.mxu3 %vm33_vm0, %v5681_v42  ;;  %v4811_v40 = vmax.f32 %v4795_v11, 0.0 }
 0x44a   : > { %6481 = vmatpush.msrb.mxu3 %v11978_v55 }
 0x44b   : > { %v4830_v51 = vsel %vm33_vm0, %v4811_v40, -inf  ;;  %v4979_v8 = vpop.f32.mrf.mxu2 }
 0x44c   : > { %v15435_v27 = vpop.f32.mrf.mxu3  ;;  %v4831_v17 = vmax.f32 %v4829_v14, %v4830_v51  ;;  %v4980_v58 = vadd.f32 %v15279_v3, %v4979_v8  ;;  %v4614_v39 = vpop.f32.mrf.mxu0  ;;  %v5685_v14 = vld [vmem:[#allocation3 + $0x78] sm:$0xff] }
 0x44d   : > { %v4764_v19 = vpop.f32.mrf.mxu1  ;;  %v4646_v40 = vadd.f32 %v4614_v39, %v15128_v37 }
 0x44e   : > { %4847 = vst.msk [vmem:[#allocation2 + $0x18] sm:$0xff] %vm33_vm0, %v4831_v17  ;;  %v15446_v6 = vadd.f32 %v15340_v34, %v4980_v58 }
 0x44f   : > { %11840 = vmatmul.msk.f32.gmra.mxu0 %vm65_vm2, %v15105_v25  ;;  %v11954_v25 = vld [vmem:[%s18241_s3 + $0x60] sm:$0xff]  ;;  %v4796_v51 = vadd.f32 %v4764_v19, %v4646_v40  ;;  %v5687_v40 = vld [vmem:[#allocation3 + $0x88] sm:$0xff] }
 0x450   : > { %11859 = vmatmul.msk.f32.gmra.mxu1 %vm65_vm2, %v15345_v5  ;;  %11878 = vmatmul.msk.f32.gmra.mxu2 %vm65_vm2, %v15442_v35  ;;  %v5686_v19 = vld [vmem:[#allocation3 + $0x80] sm:$0xff] }
 0x451   : > { %11898 = vmatmul.msk.f32.gmra.mxu3 %vm33_vm0, %v5682_v18  ;;  %6299 = vmatpush.msra.mxu2 %v11954_v25  ;;  %v4812_v18 = vmax.f32 %v4796_v51, 0.0 }
 0x453   : > { %v4982_v23 = vpop.f32.mrf.mxu2 }
 0x454   : > { %v15455_v26 = vpop.f32.mrf.mxu3  ;;  %v4983_v32 = vadd.f32 %v15279_v3, %v4982_v23  ;;  %v4617_v46 = vpop.f32.mrf.mxu0 }
 0x455   : > { %v15458_v34 = vpop.f32.mrf.mxu1  ;;  %v4853_v1 = vld [vmem:[#allocation2 + $0x10] ss:$2 sm:$0xff]  ;;  %v4857_v56 = vld [vmem:[#allocation2 + $0x11] ss:$2 sm:$0xff]  ;;  %v4647_v23 = vadd.f32 %v4617_v46, %v15148_v54 }
 0x456   : > { %v15473_v44 = vadd.f32 %v15360_v60, %v4983_v32  ;;  %v4861_v45 = vmax.f32 %v4853_v1, %v4857_v56  ;;  %v12005_v54 = vld [vmem:[%s18241_s3 + $0xb8] sm:$0xff] }
 0x457   : > { %11841 = vmatmul.msk.f32.gmra.mxu0 %vm65_vm2, %v15125_v16  ;;  %v15489_v16 = vld [vmem:[%s12844_s21 + $0x3d0] sm:$0xff]  ;;  %v4797_v46 = vadd.f32 %v15458_v34, %v4647_v23 }
 0x458   : > { %11860 = vmatmul.msk.f32.gmra.mxu1 %vm65_vm2, %v15374_v30  ;;  %11879 = vmatmul.msk.f32.gmra.mxu2 %vm65_vm2, %v15470_v63  ;;  %4865 = vst.msk [vmem:[#allocation3 + $0xa8] sm:$0xff] %vm33_vm0, %v4861_v45 }
 0x459   : > { %11899 = vmatmul.msk.f32.gmra.mxu3 %vm33_vm0, %v5683_v12  ;;  %6660 = vmatpush.msrb.mxu0 %v12005_v54 }
 0x45b   : > { %v4985_v0 = vpop.f32.mrf.mxu2 }
 0x45c   : > { %v15483_v21 = vpop.f32.mrf.mxu3  ;;  %v4986_v60 = vadd.f32 %v15279_v3, %v4985_v0  ;;  %v4620_v15 = vpop.f32.mrf.mxu0 }
 0x45d   : > { %v15486_v62 = vpop.f32.mrf.mxu1  ;;  %v4648_v34 = vadd.f32 %v4620_v15, %v15167_v48 }
 0x45e   : > { %v15492_v36 = vadd.f32 %v15391_v24, %v4986_v60  ;;  %v5469_v60 = vld [vmem:[%s12844_s21 + $0x3e8] sm:$0xff] }
 0x45f   : > { %11842 = vmatmul.msk.f32.gmra.mxu0 %vm65_vm2, %v15145_v53  ;;  %v15509_v53 = vld [vmem:[%s12844_s21 + $0x3d8] sm:$0xff]  ;;  %v4798_v15 = vadd.f32 %v15486_v62, %v4648_v34 }
 0x460   : > { %11861 = vmatmul.msk.f32.gmra.mxu1 %vm65_vm2, %v15396_v10  ;;  %11880 = vmatmul.msk.f32.gmra.mxu2 %vm65_vm2, %v15489_v16 }
 0x461   : > { %11900 = vmatmul.msk.f32.gmra.mxu3 %vm33_vm0, %v5684_v7 }
 0x463   : > { %v4988_v49 = vpop.f32.mrf.mxu2 }
 0x464   : > { %v15501_v20 = vpop.f32.mrf.mxu3  ;;  %v4989_v2 = vadd.f32 %v15279_v3, %v4988_v49  ;;  %v15504_v11 = vpop.f32.mrf.mxu0  ;;  %v4813_v49 = vmax.f32 %v4797_v46, 0.0 }
 0x465   : > { %v15506_v24 = vpop.f32.mrf.mxu1  ;;  %v4649_v62 = vadd.f32 %v15504_v11, %v15182_v29 }
 0x466   : > { %v15512_v42 = vadd.f32 %v15414_v61, %v4989_v2  ;;  %v4835_v48 = vsel %vm33_vm0, %v4813_v49, -inf }
 0x467   : > { %11843 = vmatmul.msk.f32.gmra.mxu0 %vm65_vm2, %v15164_v38  ;;  %v5468_v38 = vld [vmem:[%s12844_s21 + $0x3e0] sm:$0xff] }
 0x468   : > { %11862 = vmatmul.msk.f32.gmra.mxu1 %vm65_vm2, %v15419_v9  ;;  %11881 = vmatmul.msk.f32.gmra.mxu2 %vm65_vm2, %v15509_v53 }
 0x469   : > { %11901 = vmatmul.msk.f32.gmra.mxu3 %vm33_vm0, %v5685_v14 }
 0x46b   : > { %v4991_v8 = vpop.f32.mrf.mxu2 }
 0x46c   : > { %v15522_v55 = vpop.f32.mrf.mxu3  ;;  %v4992_v61 = vadd.f32 %v15279_v3, %v4991_v8  ;;  %v4626_v17 = vpop.f32.mrf.mxu0 }
 0x46d   : > { %v4776_v37 = vpop.f32.mrf.mxu1  ;;  %v4650_v58 = vadd.f32 %v4626_v17, %v15209_v28  ;;  %v12053_v28 = vld [vmem:[%s18241_s3 + $0xf8] sm:$0xff] }
 0x46e   : > { %v15528_v39 = vadd.f32 %v15435_v27, %v4992_v61  ;;  %7024 = vmatpush.msrb.mxu2 %v12053_v28 }
 0x46f   : > { %v4800_v32 = vadd.f32 %v4776_v37, %v4650_v58  ;;  %11844 = vmatmul.msk.f32.gmra.mxu0 %vm65_vm2, %v15345_v5  ;;  %v12077_v5 = vld [vmem:[%s18241_s3 + $0x118] sm:$0xff]  ;;  %v5470_v58 = vld [vmem:[%s12844_s21 + $0x3f0] sm:$0xff] }
 0x470   : > { %11863 = vmatmul.msk.f32.gmra.mxu1 %vm65_vm2, %v15442_v35  ;;  %11882 = vmatmul.msk.f32.gmra.mxu2 %vm65_vm2, %v5468_v38  ;;  %v4832_v35 = vsel %vm33_vm0, %v4812_v18, -inf  ;;  %v4814_v18 = vmax.f32 %v4798_v15, 0.0 }
 0x471   : > { %11902 = vmatmul.msk.f32.gmra.mxu3 %vm33_vm0, %v5686_v19  ;;  %v4816_v27 = vmax.f32 %v4800_v32, 0.0  ;;  %v5688_v32 = vld [vmem:[#allocation3 + $0x90] sm:$0xff]  ;;  %v4799_v19 = vadd.f32 %v15506_v24, %v4649_v62 }
 0x472   : > { %7206 = vmatpush.msra.mxu3 %v12077_v5  ;;  %v12004_v62 = vld [vmem:[%s18241_s3 + $0xb0] sm:$0xff] }
 0x473   : > { %v4833_v25 = vsel %vm33_vm0, %v4816_v27, -inf  ;;  %v4994_v43 = vpop.f32.mrf.mxu2  ;;  %6661 = vmatpush.msrb.mxu0 %v12004_v62  ;;  %v15710_v62 = vld [vmem:[#allocation3 + $0x2a] sm:$0xff] }
 0x474   : > { %v15549_v13 = vpop.f32.mrf.mxu3  ;;  %v4834_v1 = vmax.f32 %v4832_v35, %v4833_v25  ;;  %v4995_v56 = vadd.f32 %v15279_v3, %v4994_v43  ;;  %v4629_v45 = vpop.f32.mrf.mxu0  ;;  %v5471_v35 = vld [vmem:[%s12844_s21 + $0x3f8] sm:$0xff] }
 0x475   : > { %v4779_v12 = vpop.f32.mrf.mxu1  ;;  %v4651_v0 = vadd.f32 %v4629_v45, %v15231_v57  ;;  %v12029_v57 = vld [vmem:[%s18241_s3 + $0xd8] sm:$0xff] }
 0x476   : > { %4848 = vst.msk [vmem:[#allocation2 + $0x20] sm:$0xff] %vm33_vm0, %v4834_v1  ;;  %v15556_v7 = vadd.f32 %v15455_v26, %v4995_v56  ;;  %6842 = vmatpush.msrb.mxu1 %v12029_v57  ;;  %v4815_v1 = vmax.f32 %v4799_v19, 0.0  ;;  %v5689_v45 = vld [vmem:[#allocation3 + $0x98] sm:$0xff] }
 0x477   : > { %v4801_v2 = vadd.f32 %v4779_v12, %v4651_v0  ;;  %11845 = vmatmul.msk.f32.gmra.mxu0 %vm65_vm2, %v15374_v30 }
 0x478   : > { %11864 = vmatmul.msk.f32.gmra.mxu1 %vm65_vm2, %v15470_v63  ;;  %11883 = vmatmul.msk.f32.gmra.mxu2 %vm65_vm2, %v5469_v60 }
 0x479   : > { %11903 = vmatmul.msk.f32.gmra.mxu3 %vm33_vm0, %v5687_v40  ;;  %v4817_v26 = vmax.f32 %v4801_v2, 0.0  ;;  %v5835_v2 = vld [vmem:[#allocation3 + $0x1] sm:$0xff] }
 0x47a   : > { %v6017_v40 = vld [vmem:[#allocation3 + $0x2] sm:$0xff] }
 0x47b   : > { %v4836_v30 = vsel %vm33_vm0, %v4817_v26, -inf  ;;  %v4997_v14 = vpop.f32.mrf.mxu2  ;;  %v6199_v26 = vld [vmem:[#allocation3 + $0x3] sm:$0xff] }
 0x47c   : > { %v15571_v63 = vpop.f32.mrf.mxu3  ;;  %v4837_v51 = vmax.f32 %v4835_v48, %v4836_v30  ;;  %v4998_v8 = vadd.f32 %v15279_v3, %v4997_v14  ;;  %v4632_v61 = vpop.f32.mrf.mxu0  ;;  %v6381_v48 = vld [vmem:[#allocation3 + $0x4] sm:$0xff] }
 0x47d   : > { %v4782_v17 = vpop.f32.mrf.mxu1  ;;  %v4652_v37 = vadd.f32 %v4632_v61, %v15250_v59  ;;  %v6018_v61 = vld [vmem:[#allocation3 + $0xa] sm:$0xff] }
 0x47e   : > { %4849 = vst.msk [vmem:[#allocation2 + $0x28] sm:$0xff] %vm33_vm0, %v4837_v51  ;;  %v15578_v38 = vadd.f32 %v15483_v21, %v4998_v8  ;;  %v4838_v21 = vsel %vm33_vm0, %v4814_v18, -inf  ;;  %v12052_v18 = vld [vmem:[%s18241_s3 + $0xf0] sm:$0xff] }
 0x47f   : > { %v4802_v23 = vadd.f32 %v4782_v17, %v4652_v37  ;;  %11846 = vmatmul.msk.f32.gmra.mxu0 %vm65_vm2, %v15396_v10  ;;  %v6200_v37 = vld [vmem:[#allocation3 + $0xb] sm:$0xff]  ;;  %7025 = vmatpush.msrb.mxu2 %v12052_v18 }
 0x480   : > { %11865 = vmatmul.msk.f32.gmra.mxu1 %vm65_vm2, %v15489_v16  ;;  %11884 = vmatmul.msk.f32.gmra.mxu2 %vm65_vm2, %v5470_v58  ;;  %v6382_v58 = vld [vmem:[#allocation3 + $0xc] sm:$0xff] }
 0x481   : > { %11904 = vmatmul.msk.f32.gmra.mxu3 %vm33_vm0, %v5688_v32  ;;  %v4818_v59 = vmax.f32 %v4802_v23, 0.0  ;;  %v12076_v23 = vld [vmem:[%s18241_s3 + $0x110] sm:$0xff] }
 0x482   : > { %7207 = vmatpush.msra.mxu3 %v12076_v23  ;;  %v15708_v18 = vld [vmem:[#allocation3 + $0x29] sm:$0xff] }
 0x483   : > { %v4839_v29 = vsel %vm33_vm0, %v4818_v59, -inf  ;;  %v5000_v11 = vpop.f32.mrf.mxu2 }
 0x484   : > { %v15591_v28 = vpop.f32.mrf.mxu3  ;;  %v4840_v10 = vmax.f32 %v4838_v21, %v4839_v29  ;;  %v5001_v54 = vadd.f32 %v15279_v3, %v5000_v11  ;;  %v4635_v5 = vpop.f32.mrf.mxu0  ;;  %v15646_v29 = vld [vmem:[#allocation3 + $0x11] sm:$0xff] }
 0x485   : > { %v4785_v16 = vpop.f32.mrf.mxu1  ;;  %v4653_v27 = vadd.f32 %v4635_v5, %v15267_v52  ;;  %v4854_v46 = vld [vmem:[#allocation2 + $0x20] ss:$2 sm:$0xff]  ;;  %v4858_v25 = vld [vmem:[#allocation2 + $0x21] ss:$2 sm:$0xff]  ;;  %v15648_v11 = vld [vmem:[#allocation3 + $0x12] sm:$0xff] }
 0x486   : > { %4850 = vst.msk [vmem:[#allocation2 + $0x30] sm:$0xff] %vm33_vm0, %v4840_v10  ;;  %v15598_v43 = vadd.f32 %v15501_v20, %v5001_v54  ;;  %v4862_v24 = vmax.f32 %v4854_v46, %v4858_v25  ;;  %v4841_v20 = vsel %vm33_vm0, %v4815_v1, -inf  ;;  %v15654_v10 = vld [vmem:[#allocation3 + $0x13] sm:$0xff]  ;;  %v15678_v1 = vld [vmem:[#allocation3 + $0x1b] sm:$0xff] }
 0x487   : > { %v4803_v56 = vadd.f32 %v4785_v16, %v4653_v27  ;;  %11847 = vmatmul.msk.f32.gmra.mxu0 %vm65_vm2, %v15419_v9  ;;  %v6383_v54 = vld [vmem:[#allocation3 + $0x14] sm:$0xff] }
 0x488   : > { %11866 = vmatmul.msk.f32.gmra.mxu1 %vm65_vm2, %v15509_v53  ;;  %11885 = vmatmul.msk.f32.gmra.mxu2 %vm65_vm2, %v5471_v35  ;;  %4866 = vst.msk [vmem:[#allocation3 + $0xb0] sm:$0xff] %vm33_vm0, %v4862_v24  ;;  %v12028_v5 = vld [vmem:[%s18241_s3 + $0xd0] sm:$0xff]  ;;  %v15670_v25 = vld [vmem:[#allocation3 + $0x19] sm:$0xff] }
 0x489   : > { %11905 = vmatmul.msk.f32.gmra.mxu3 %vm33_vm0, %v5689_v45  ;;  %v4819_v52 = vmax.f32 %v4803_v56, 0.0  ;;  %6843 = vmatpush.msrb.mxu1 %v12028_v5  ;;  %v15672_v24 = vld [vmem:[#allocation3 + $0x1a] sm:$0xff] }
 0x48a   : > { %v6384_v56 = vld [vmem:[#allocation3 + $0x1c] sm:$0xff] }
 0x48b   : > { %v4842_v12 = vsel %vm33_vm0, %v4819_v52, -inf  ;;  %v5003_v0 = vpop.f32.mrf.mxu2 }
 0x48c   : > { %v15609_v60 = vpop.f32.mrf.mxu3  ;;  %v4843_v49 = vmax.f32 %v4841_v20, %v4842_v12  ;;  %v5004_v9 = vadd.f32 %v15279_v3, %v5003_v0  ;;  %v5242_v34 = vpop.f32.mrf.mxu0 }
 0x48d   : > { %v15612_v53 = vpop.f32.mrf.mxu1  ;;  %v5290_v45 = vadd.f32 %v5242_v34, %v15295_v4  ;;  %v15698_v4 = vld [vmem:[#allocation3 + $0x23] sm:$0xff] }
 0x48e   : > { %4851 = vst.msk [vmem:[#allocation2 + $0x38] sm:$0xff] %vm33_vm0, %v4843_v49  ;;  %v15616_v57 = vadd.f32 %v15522_v55, %v5004_v9  ;;  %v5836_v55 = vld [vmem:[#allocation3 + $0x9] sm:$0xff] }
 0x48f   : > { %11910 = vmatmul.msk.f32.vlgmr.msra.gmra.mxu0 %vm33_vm0, %v5835_v2  ;;  %v5440_v49 = vadd.f32 %v15612_v53, %v5290_v45  ;;  %v15690_v2 = vld [vmem:[#allocation3 + $0x21] sm:$0xff] }
 0x490   : > { %11934 = vmatmul.msk.f32.vlgmr.msra.gmra.mxu1 %vm33_vm0, %v6017_v40  ;;  %11958 = vmatmul.msk.f32.vlgmr.msra.gmra.mxu2 %vm33_vm0, %v6199_v26  ;;  %v15692_v40 = vld [vmem:[#allocation3 + $0x22] sm:$0xff] }
 0x491   : > { %11982 = vmatmul.msk.f32.vlgmr.msrb.gmra.mxu3 %vm33_vm0, %v6381_v48  ;;  %v6385_v34 = vld [vmem:[#allocation3 + $0x24] sm:$0xff] }
 0x493   : > { %v5542_v3 = vpop.f32.mrf.mxu2 }
 0x494   : > { %v15622_v15 = vpop.f32.mrf.mxu3  ;;  %v5245_v30 = vpop.f32.mrf.mxu0  ;;  %v5590_v26 = vadd.f32 %v5542_v3, %v5440_v49 }
 0x495   : > { %v15624_v14 = vpop.f32.mrf.mxu1  ;;  %v4855_v51 = vld [vmem:[#allocation2 + $0x30] ss:$2 sm:$0xff]  ;;  %v4859_v8 = vld [vmem:[#allocation2 + $0x31] ss:$2 sm:$0xff] }
 0x496   : > { %v4863_v17 = vmax.f32 %v4855_v51, %v4859_v8  ;;  %v5606_v8 = vmax.f32 %v5590_v26, 0.0 }
 0x497   : > { %11911 = vmatmul.msk.f32.gmra.mxu0 %vm33_vm0, %v5836_v55 }
 0x498   : > { %11935 = vmatmul.msk.f32.gmra.mxu1 %vm33_vm0, %v6018_v61  ;;  %11959 = vmatmul.msk.f32.gmra.mxu2 %vm33_vm0, %v6200_v37  ;;  %4867 = vst.msk [vmem:[#allocation3 + $0xb8] sm:$0xff] %vm33_vm0, %v4863_v17  ;;  %v5622_v23 = vsel %vm33_vm0, %v5606_v8, -inf }
 0x499   : > { %11983 = vmatmul.msk.f32.gmra.mxu3 %vm33_vm0, %v6382_v58 }
 0x49b   : > { %v5545_v32 = vpop.f32.mrf.mxu2 }
 0x49c   : > { %v15640_v59 = vpop.f32.mrf.mxu3  ;;  %v15642_v21 = vpop.f32.mrf.mxu0 }
 0x49d   : > { %v15644_v19 = vpop.f32.mrf.mxu1  ;;  %v5292_v5 = vadd.f32 %v15642_v21, %v15330_v22  ;;  %v15738_v22 = vld [vmem:[#allocation3 + $0x33] sm:$0xff] }
 0x49e   : > { %v6387_v21 = vld [vmem:[#allocation3 + $0x34] sm:$0xff] }
 0x49f   : > { %11912 = vmatmul.msk.f32.gmra.mxu0 %vm33_vm0, %v15646_v29 }
 0x4a0   : > { %11936 = vmatmul.msk.f32.gmra.mxu1 %vm33_vm0, %v15648_v11  ;;  %11960 = vmatmul.msk.f32.gmra.mxu2 %vm33_vm0, %v15654_v10 }
 0x4a1   : > { %11984 = vmatmul.msk.f32.gmra.mxu3 %vm33_vm0, %v6383_v54 }
 0x4a3   : > { %v15662_v16 = vpop.f32.mrf.mxu2 }
 0x4a4   : > { %v15664_v27 = vpop.f32.mrf.mxu3  ;;  %v15666_v35 = vpop.f32.mrf.mxu0 }
 0x4a5   : > { %v15668_v46 = vpop.f32.mrf.mxu1 }
 0x4a7   : > { %11913 = vmatmul.msk.f32.gmra.mxu0 %vm33_vm0, %v15670_v25 }
 0x4a8   : > { %11937 = vmatmul.msk.f32.gmra.mxu1 %vm33_vm0, %v15672_v24  ;;  %11961 = vmatmul.msk.f32.gmra.mxu2 %vm33_vm0, %v15678_v1 }
 0x4a9   : > { %11985 = vmatmul.msk.f32.gmra.mxu3 %vm33_vm0, %v6384_v56 }
 0x4ab   : > { %v15684_v52 = vpop.f32.mrf.mxu2 }
 0x4ac   : > { %v15686_v20 = vpop.f32.mrf.mxu3  ;;  %v5254_v12 = vpop.f32.mrf.mxu0 }
 0x4ad   : > { %v5404_v0 = vpop.f32.mrf.mxu1  ;;  %v5294_v9 = vadd.f32 %v5254_v12, %v15378_v33  ;;  %v5291_v33 = vadd.f32 %v5245_v30, %v15310_v47  ;;  %v15716_v47 = vld [vmem:[#allocation3 + $0x2b] sm:$0xff] }
 0x4ae   : > { %v6386_v30 = vld [vmem:[#allocation3 + $0x2c] sm:$0xff] }
 0x4af   : > { %11914 = vmatmul.msk.f32.gmra.mxu0 %vm33_vm0, %v15690_v2  ;;  %v5444_v53 = vadd.f32 %v5404_v0, %v5294_v9  ;;  %v5441_v37 = vadd.f32 %v15624_v14, %v5291_v33 }
 0x4b0   : > { %11938 = vmatmul.msk.f32.gmra.mxu1 %vm33_vm0, %v15692_v40  ;;  %11962 = vmatmul.msk.f32.gmra.mxu2 %vm33_vm0, %v15698_v4 }
 0x4b1   : > { %11986 = vmatmul.msk.f32.gmra.mxu3 %vm33_vm0, %v6385_v34  ;;  %v5591_v54 = vadd.f32 %v5545_v32, %v5441_v37  ;;  %v5442_v34 = vadd.f32 %v15644_v19, %v5292_v5  ;;  %v5293_v37 = vadd.f32 %v15666_v35, %v15348_v41  ;;  %v15770_v41 = vld [vmem:[#allocation3 + $0x3b] sm:$0xff] }
 0x4b2   : > { %v6388_v35 = vld [vmem:[#allocation3 + $0x3c] sm:$0xff] }
 0x4b3   : > { %v5554_v48 = vpop.f32.mrf.mxu2  ;;  %v5607_v0 = vmax.f32 %v5591_v54, 0.0  ;;  %v5592_v19 = vadd.f32 %v15662_v16, %v5442_v34  ;;  %v5443_v5 = vadd.f32 %v15668_v46, %v5293_v37  ;;  %v15787_v37 = vld [vmem:[#allocation3 + $0x41] sm:$0xff] }
 0x4b4   : > { %v15704_v51 = vpop.f32.mrf.mxu3  ;;  %v5594_v55 = vadd.f32 %v5554_v48, %v5444_v53  ;;  %v5257_v61 = vpop.f32.mrf.mxu0  ;;  %v15730_v53 = vld [vmem:[#allocation3 + $0x31] sm:$0xff] }
 0x4b5   : > { %v5407_v17 = vpop.f32.mrf.mxu1  ;;  %v5295_v3 = vadd.f32 %v5257_v61, %v15400_v31  ;;  %v15732_v48 = vld [vmem:[#allocation3 + $0x32] sm:$0xff]  ;;  %v5625_v8 = vsel %vm33_vm0, %v5607_v0, -inf  ;;  %v12003_v61 = vld [vmem:[%s18241_s3 + $0xa8] sm:$0xff]  ;;  %v5593_v46 = vadd.f32 %v15684_v52, %v5443_v5 }
 0x4b6   : > { %v5610_v58 = vmax.f32 %v5594_v55, 0.0  ;;  %6662 = vmatpush.msrb.mxu0 %v12003_v61  ;;  %v15762_v0 = vld [vmem:[#allocation3 + $0x39] sm:$0xff] }
 0x4b7   : > { %11915 = vmatmul.msk.f32.gmra.mxu0 %vm33_vm0, %v15708_v18  ;;  %v5445_v56 = vadd.f32 %v5407_v17, %v5295_v3  ;;  %v12075_v17 = vld [vmem:[%s18241_s3 + $0x108] sm:$0xff] }
 0x4b8   : > { %11939 = vmatmul.msk.f32.gmra.mxu1 %vm33_vm0, %v15710_v62  ;;  %v5623_v14 = vsel %vm33_vm0, %v5610_v58, -inf  ;;  %11963 = vmatmul.msk.f32.gmra.mxu2 %vm33_vm0, %v15716_v47 }
 0x4b9   : > { %11987 = vmatmul.msk.f32.gmra.mxu3 %vm33_vm0, %v6386_v30  ;;  %v5624_v31 = vmax.f32 %v5622_v23, %v5623_v14  ;;  %v5608_v23 = vmax.f32 %v5592_v19, 0.0 }
 0x4ba   : > { %7208 = vmatpush.msra.mxu3 %v12075_v17 }
 0x4bb   : > { %v5557_v45 = vpop.f32.mrf.mxu2  ;;  %5646 = vst.msk [vmem:[#allocation2] sm:$0xff] %vm33_vm0, %v5624_v31 }
 0x4bc   : > { %v15725_v12 = vpop.f32.mrf.mxu3  ;;  %v5595_v49 = vadd.f32 %v5557_v45, %v5445_v56  ;;  %v5260_v32 = vpop.f32.mrf.mxu0 }
 0x4bd   : > { %v5410_v9 = vpop.f32.mrf.mxu1  ;;  %v5296_v33 = vadd.f32 %v5260_v32, %v15423_v50  ;;  %v12051_v50 = vld [vmem:[%s18241_s3 + $0xe8] sm:$0xff]  ;;  %v5628_v32 = vsel %vm33_vm0, %v5608_v23, -inf }
 0x4be   : > { %v5611_v26 = vmax.f32 %v5595_v49, 0.0  ;;  %7026 = vmatpush.msrb.mxu2 %v12051_v50  ;;  %v15764_v49 = vld [vmem:[#allocation3 + $0x3a] sm:$0xff]  ;;  %v6389_v23 = vld [vmem:[#allocation3 + $0x44] sm:$0xff] }
 0x4bf   : > { %11916 = vmatmul.msk.f32.gmra.mxu0 %vm33_vm0, %v15730_v53  ;;  %v5446_v58 = vadd.f32 %v5410_v9, %v5296_v33 }
 0x4c0   : > { %11940 = vmatmul.msk.f32.gmra.mxu1 %vm33_vm0, %v15732_v48  ;;  %v5626_v55 = vsel %vm33_vm0, %v5611_v26, -inf  ;;  %11964 = vmatmul.msk.f32.gmra.mxu2 %vm33_vm0, %v15738_v22 }
 0x4c1   : > { %11988 = vmatmul.msk.f32.gmra.mxu3 %vm33_vm0, %v6387_v21  ;;  %v5627_v16 = vmax.f32 %v5625_v8, %v5626_v55  ;;  %v5609_v55 = vmax.f32 %v5593_v46, 0.0  ;;  %v15809_v46 = vld [vmem:[#allocation3 + $0x4a] sm:$0xff] }
 0x4c2   : > { %18271 = vst [vmem:[#allocation12_spill] sm:$0xff] %v15809_v46 }
 0x4c3   : > { %v5560_v3 = vpop.f32.mrf.mxu2  ;;  %5647 = vst.msk [vmem:[#allocation2 + $0x8] sm:$0xff] %vm33_vm0, %v5627_v16 }
 0x4c4   : > { %v15757_v30 = vpop.f32.mrf.mxu3  ;;  %v5596_v54 = vadd.f32 %v5560_v3, %v5446_v58  ;;  %v5263_v14 = vpop.f32.mrf.mxu0  ;;  %v15789_v58 = vld [vmem:[#allocation3 + $0x42] sm:$0xff] }
 0x4c5   : > { %v5413_v31 = vpop.f32.mrf.mxu1  ;;  %v5297_v45 = vadd.f32 %v5263_v14, %v15446_v6  ;;  %v12027_v6 = vld [vmem:[%s18241_s3 + $0xc8] sm:$0xff] }
 0x4c6   : > { %v5612_v56 = vmax.f32 %v5596_v54, 0.0  ;;  %6844 = vmatpush.msrb.mxu1 %v12027_v6  ;;  %v15795_v3 = vld [vmem:[#allocation3 + $0x43] sm:$0xff]  ;;  %v5631_v54 = vsel %vm33_vm0, %v5609_v55, -inf  ;;  %v6390_v6 = vld [vmem:[#allocation3 + $0x4c] sm:$0xff] }
 0x4c7   : > { %11917 = vmatmul.msk.f32.gmra.mxu0 %vm33_vm0, %v15762_v0  ;;  %v5447_v26 = vadd.f32 %v5413_v31, %v5297_v45 }
 0x4c8   : > { %11941 = vmatmul.msk.f32.gmra.mxu1 %vm33_vm0, %v15764_v49  ;;  %v5629_v9 = vsel %vm33_vm0, %v5612_v56, -inf  ;;  %11965 = vmatmul.msk.f32.gmra.mxu2 %vm33_vm0, %v15770_v41 }
 0x4c9   : > { %11989 = vmatmul.msk.f32.gmra.mxu3 %vm33_vm0, %v6388_v35  ;;  %v5630_v34 = vmax.f32 %v5628_v32, %v5629_v9  ;;  %v15807_v32 = vld [vmem:[#allocation3 + $0x49] sm:$0xff] }
 0x4ca   : > { %v5654_v33 = vld [vmem:[#allocation2] ss:$2 sm:$0xff]  ;;  %v5658_v21 = vld [vmem:[#allocation2 + $0x1] ss:$2 sm:$0xff]  ;;  %18270 = vst [vmem:[#allocation11_spill] sm:$0xff] %v15807_v32 }
 0x4cb   : > { %v5563_v8 = vpop.f32.mrf.mxu2  ;;  %5648 = vst.msk [vmem:[#allocation2 + $0x10] sm:$0xff] %vm33_vm0, %v5630_v34  ;;  %v5662_v52 = vmax.f32 %v5654_v33, %v5658_v21  ;;  %v15815_v9 = vld [vmem:[#allocation3 + $0x4b] sm:$0xff] }
 0x4cc   : > { %v15781_v19 = vpop.f32.mrf.mxu3  ;;  %v5597_v50 = vadd.f32 %v5563_v8, %v5447_v26  ;;  %v5266_v61 = vpop.f32.mrf.mxu0  ;;  %18272 = vst [vmem:[#allocation13_spill] sm:$0xff] %v15815_v9 }
 0x4cd   : > { %18268 = vst [vmem:[#allocation9_spill] sm:$0xff] %v15781_v19  ;;  %v15784_v17 = vpop.f32.mrf.mxu1  ;;  %v15902_v19 = vld [vmem:[#allocation3 + $0x6a] sm:$0xff] }
 0x4ce   : > { %5666 = vst.msk [vmem:[#allocation3 + $0xc0] sm:$0xff] %vm33_vm0, %v5662_v52  ;;  %v5613_v16 = vmax.f32 %v5597_v50, 0.0  ;;  %v15829_v50 = vld [vmem:[#allocation3 + $0x51] sm:$0xff] }
 0x4cf   : > { %11918 = vmatmul.msk.f32.gmra.mxu0 %vm33_vm0, %v15787_v37  ;;  %18274 = vst [vmem:[#allocation15_spill] sm:$0xff] %v15829_v50 }
 0x4d0   : > { %11942 = vmatmul.msk.f32.gmra.mxu1 %vm33_vm0, %v15789_v58  ;;  %v5632_v14 = vsel %vm33_vm0, %v5613_v16, -inf  ;;  %11966 = vmatmul.msk.f32.gmra.mxu2 %vm33_vm0, %v15795_v3  ;;  %v15831_v16 = vld [vmem:[#allocation3 + $0x52] sm:$0xff] }
 0x4d1   : > { %11990 = vmatmul.msk.f32.gmra.mxu3 %vm33_vm0, %v6389_v23  ;;  %v5633_v31 = vmax.f32 %v5631_v54, %v5632_v14  ;;  %18275 = vst [vmem:[#allocation16_spill] sm:$0xff] %v15831_v16  ;;  %v15837_v23 = vld [vmem:[#allocation3 + $0x53] sm:$0xff] }
 0x4d2   : > { %18276 = vst [vmem:[#allocation17_spill] sm:$0xff] %v15837_v23  ;;  %v6391_v54 = vld [vmem:[#allocation3 + $0x54] sm:$0xff] }
 0x4d3   : > { %v5566_v5 = vpop.f32.mrf.mxu2  ;;  %5649 = vst.msk [vmem:[#allocation2 + $0x18] sm:$0xff] %vm33_vm0, %v5633_v31 }
 0x4d4   : > { %v15802_v56 = vpop.f32.mrf.mxu3  ;;  %v5269_v45 = vpop.f32.mrf.mxu0 }
 0x4d5   : > { %18269 = vst [vmem:[#allocation10_spill] sm:$0xff] %v15802_v56  ;;  %v15805_v35 = vpop.f32.mrf.mxu1 }
 0x4d7   : > { %11919 = vmatmul.msk.f32.gmra.mxu0 %vm33_vm0, %v15807_v32  ;;  %v15881_v32 = vld [vmem:[#allocation3 + $0x62] sm:$0xff] }
 0x4d8   : > { %11943 = vmatmul.msk.f32.gmra.mxu1 %vm33_vm0, %v15809_v46  ;;  %11967 = vmatmul.msk.f32.gmra.mxu2 %vm33_vm0, %v15815_v9  ;;  %v15879_v46 = vld [vmem:[#allocation3 + $0x61] sm:$0xff]  ;;  %18283 = vst [vmem:[#allocation24_spill] sm:$0xff] %v15881_v32 }
 0x4d9   : > { %11991 = vmatmul.msk.f32.gmra.mxu3 %vm33_vm0, %v6390_v6  ;;  %18282 = vst [vmem:[#allocation23_spill] sm:$0xff] %v15879_v46 }
 0x4da   : > { %v5655_v34 = vld [vmem:[#allocation2 + $0x10] ss:$2 sm:$0xff]  ;;  %v5659_v26 = vld [vmem:[#allocation2 + $0x11] ss:$2 sm:$0xff] }
 0x4db   : > { %v15820_v33 = vpop.f32.mrf.mxu2  ;;  %v5663_v8 = vmax.f32 %v5655_v34, %v5659_v26  ;;  %v15850_v26 = vld [vmem:[#allocation3 + $0x59] sm:$0xff] }
 0x4dc   : > { %v15822_v21 = vpop.f32.mrf.mxu3  ;;  %v15824_v52 = vpop.f32.mrf.mxu0  ;;  %18278 = vst [vmem:[#allocation19_spill] sm:$0xff] %v15850_v26 }
 0x4dd   : > { %18273 = vst [vmem:[#allocation14_spill] sm:$0xff] %v15822_v21  ;;  %v15826_v55 = vpop.f32.mrf.mxu1  ;;  %v15858_v21 = vld [vmem:[#allocation3 + $0x5b] sm:$0xff] }
 0x4de   : > { %5667 = vst.msk [vmem:[#allocation3 + $0xc8] sm:$0xff] %vm33_vm0, %v5663_v8  ;;  %v15852_v8 = vld [vmem:[#allocation3 + $0x5a] sm:$0xff] }
 0x4df   : > { %11920 = vmatmul.msk.f32.gmra.mxu0 %vm33_vm0, %v15829_v50  ;;  %18279 = vst [vmem:[#allocation20_spill] sm:$0xff] %v15852_v8 }
 0x4e0   : > { %11944 = vmatmul.msk.f32.gmra.mxu1 %vm33_vm0, %v15831_v16  ;;  %11968 = vmatmul.msk.f32.gmra.mxu2 %vm33_vm0, %v15837_v23  ;;  %18280 = vst [vmem:[#allocation21_spill] sm:$0xff] %v15858_v21  ;;  %v12002_v23 = vld [vmem:[%s18241_s3 + $0xa0] sm:$0xff] }
 0x4e1   : > { %11992 = vmatmul.msk.f32.gmra.mxu3 %vm33_vm0, %v6391_v54  ;;  %v6392_v54 = vld [vmem:[#allocation3 + $0x5c] sm:$0xff]  ;;  %6663 = vmatpush.msrb.mxu0 %v12002_v23 }
 0x4e3   : > { %v15842_v14 = vpop.f32.mrf.mxu2 }
 0x4e4   : > { %v15844_v31 = vpop.f32.mrf.mxu3  ;;  %v15846_v6 = vpop.f32.mrf.mxu0 }
 0x4e5   : > { %18277 = vst [vmem:[#allocation18_spill] sm:$0xff] %v15844_v31  ;;  %v15848_v34 = vpop.f32.mrf.mxu1  ;;  %v12050_v31 = vld [vmem:[%s18241_s3 + $0xe0] sm:$0xff] }
 0x4e6   : > { %7027 = vmatpush.msrb.mxu2 %v12050_v31 }
 0x4e7   : > { %11921 = vmatmul.msk.f32.gmra.mxu0 %vm33_vm0, %v15850_v26  ;;  %v5298_v26 = vadd.f32 %v5266_v61, %v15473_v44  ;;  %v15887_v44 = vld [vmem:[#allocation3 + $0x63] sm:$0xff] }
 0x4e8   : > { %11945 = vmatmul.msk.f32.gmra.mxu1 %vm33_vm0, %v15852_v8  ;;  %11969 = vmatmul.msk.f32.gmra.mxu2 %vm33_vm0, %v15858_v21  ;;  %v12074_v8 = vld [vmem:[%s18241_s3 + $0x100] sm:$0xff]  ;;  %18284 = vst [vmem:[#allocation25_spill] sm:$0xff] %v15887_v44 }
 0x4e9   : > { %11993 = vmatmul.msk.f32.gmra.mxu3 %vm33_vm0, %v6392_v54  ;;  %v5448_v56 = vadd.f32 %v15784_v17, %v5298_v26  ;;  %v6393_v61 = vld [vmem:[#allocation3 + $0x64] sm:$0xff]  ;;  %v5299_v17 = vadd.f32 %v5269_v45, %v15492_v36  ;;  %v6394_v45 = vld [vmem:[#allocation3 + $0x6c] sm:$0xff] }
 0x4ea   : > { %7209 = vmatpush.msra.mxu3 %v12074_v8  ;;  %v15908_v36 = vld [vmem:[#allocation3 + $0x6b] sm:$0xff] }
 0x4eb   : > { %v15873_v16 = vpop.f32.mrf.mxu2  ;;  %v5598_v23 = vadd.f32 %v5566_v5, %v5448_v56  ;;  %v5449_v56 = vadd.f32 %v15805_v35, %v5299_v17 }
 0x4ec   : > { %v15875_v21 = vpop.f32.mrf.mxu3  ;;  %v5278_v54 = vpop.f32.mrf.mxu0 }
 0x4ed   : > { %18281 = vst [vmem:[#allocation22_spill] sm:$0xff] %v15875_v21  ;;  %v5428_v50 = vpop.f32.mrf.mxu1  ;;  %v5302_v9 = vadd.f32 %v5278_v54, %v15556_v7  ;;  %v12026_v7 = vld [vmem:[%s18241_s3 + $0xc0] sm:$0xff]  ;;  %v5614_v54 = vmax.f32 %v5598_v23, 0.0  ;;  %v5599_v35 = vadd.f32 %v15820_v33, %v5449_v56 }
 0x4ee   : > { %6845 = vmatpush.msrb.mxu1 %v12026_v7 }
 0x4ef   : > { %11922 = vmatmul.msk.f32.gmra.mxu0 %vm33_vm0, %v15879_v46  ;;  %v5452_v31 = vadd.f32 %v5428_v50, %v5302_v9  ;;  %v15900_v46 = vld [vmem:[#allocation3 + $0x69] sm:$0xff]  ;;  %v5634_v9 = vsel %vm33_vm0, %v5614_v54, -inf  ;;  %v5615_v17 = vmax.f32 %v5599_v35, 0.0  ;;  %v5301_v35 = vadd.f32 %v15846_v6, %v15528_v39  ;;  %v15953_v39 = vld [vmem:[%s18242_s4] ss:$0 sm:$0xff] }
 0x4f0   : > { %11946 = vmatmul.msk.f32.gmra.mxu1 %vm33_vm0, %v15881_v32  ;;  %11970 = vmatmul.msk.f32.gmra.mxu2 %vm33_vm0, %v15887_v44  ;;  %v15959_v6 = vld [vmem:[#allocation3 + $0x7b] sm:$0xff] }
 0x4f1   : > { %11994 = vmatmul.msk.f32.gmra.mxu3 %vm33_vm0, %v6393_v61 }
 0x4f3   : > { %v5578_v26 = vpop.f32.mrf.mxu2 }
 0x4f4   : > { %v15896_v8 = vpop.f32.mrf.mxu3  ;;  %v5602_v21 = vadd.f32 %v5578_v26, %v5452_v31  ;;  %v5281_v32 = vpop.f32.mrf.mxu0 }
 0x4f5   : > { %v5431_v5 = vpop.f32.mrf.mxu1  ;;  %v5303_v61 = vadd.f32 %v5281_v32, %v15578_v38  ;;  %v5300_v32 = vadd.f32 %v15824_v52, %v15512_v42  ;;  %v15931_v42 = vld [vmem:[#allocation3 + $0x73] sm:$0xff] }
 0x4f6   : > { %v5618_v44 = vmax.f32 %v5602_v21, 0.0  ;;  %v6395_v52 = vld [vmem:[#allocation3 + $0x74] sm:$0xff] }
 0x4f7   : > { %11923 = vmatmul.msk.f32.gmra.mxu0 %vm33_vm0, %v15900_v46  ;;  %v5453_v50 = vadd.f32 %v5431_v5, %v5303_v61  ;;  %v5637_v5 = vsel %vm33_vm0, %v5615_v17, -inf }
 0x4f8   : > { %11947 = vmatmul.msk.f32.gmra.mxu1 %vm33_vm0, %v15902_v19  ;;  %v5635_v21 = vsel %vm33_vm0, %v5618_v44, -inf  ;;  %11971 = vmatmul.msk.f32.gmra.mxu2 %vm33_vm0, %v15908_v36  ;;  %v5450_v44 = vadd.f32 %v15826_v55, %v5300_v32 }
 0x4f9   : > { %11995 = vmatmul.msk.f32.gmra.mxu3 %vm33_vm0, %v6394_v45  ;;  %v5636_v38 = vmax.f32 %v5634_v9, %v5635_v21  ;;  %v15923_v45 = vld [vmem:[#allocation3 + $0x71] sm:$0xff] }
 0x4fa   : > { %v15925_v9 = vld [vmem:[#allocation3 + $0x72] sm:$0xff]  ;;  %v5600_v55 = vadd.f32 %v15842_v14, %v5450_v44 }
 0x4fb   : > { %v5581_v23 = vpop.f32.mrf.mxu2  ;;  %5650 = vst.msk [vmem:[#allocation2 + $0x20] sm:$0xff] %vm33_vm0, %v5636_v38 }
 0x4fc   : > { %v15918_v7 = vpop.f32.mrf.mxu3  ;;  %v5603_v31 = vadd.f32 %v5581_v23, %v5453_v50  ;;  %v5284_v33 = vpop.f32.mrf.mxu0  ;;  %v5616_v50 = vmax.f32 %v5600_v55, 0.0 }
 0x4fd   : > { %v5434_v26 = vpop.f32.mrf.mxu1  ;;  %v5304_v56 = vadd.f32 %v5284_v33, %v15598_v43 }
 0x4fe   : > { %v5619_v54 = vmax.f32 %v5603_v31, 0.0  ;;  %v5451_v31 = vadd.f32 %v15848_v34, %v5301_v35  ;;  %v6396_v34 = vld [vmem:[#allocation3 + $0x7c] sm:$0xff]  ;;  %v5776_v35 = vadd.f32 %v15953_v39, %v15549_v13 }
 0x4ff   : > { %11924 = vmatmul.msk.f32.gmra.mxu0 %vm33_vm0, %v15923_v45  ;;  %v5454_v21 = vadd.f32 %v5434_v26, %v5304_v56  ;;  %v15981_v13 = vld [vmem:[#allocation3 + $0x83] sm:$0xff] }
 0x500   : > { %11948 = vmatmul.msk.f32.gmra.mxu1 %vm33_vm0, %v15925_v9  ;;  %v5638_v61 = vsel %vm33_vm0, %v5619_v54, -inf  ;;  %11972 = vmatmul.msk.f32.gmra.mxu2 %vm33_vm0, %v15931_v42  ;;  %v15946_v54 = vld [vmem:[#allocation3 + $0x79] sm:$0xff]  ;;  %v5601_v26 = vadd.f32 %v15873_v16, %v5451_v31 }
 0x501   : > { %11996 = vmatmul.msk.f32.gmra.mxu3 %vm33_vm0, %v6395_v52  ;;  %v5639_v43 = vmax.f32 %v5637_v5, %v5638_v61  ;;  %v15948_v52 = vld [vmem:[#allocation3 + $0x7a] sm:$0xff] }
 0x503   : > { %v5584_v38 = vpop.f32.mrf.mxu2  ;;  %5651 = vst.msk [vmem:[#allocation2 + $0x28] sm:$0xff] %vm33_vm0, %v5639_v43 }
 0x504   : > { %v15941_v32 = vpop.f32.mrf.mxu3  ;;  %v5604_v23 = vadd.f32 %v5584_v38, %v5454_v21  ;;  %v5287_v14 = vpop.f32.mrf.mxu0 }
 0x505   : > { %v5437_v17 = vpop.f32.mrf.mxu1  ;;  %v5305_v44 = vadd.f32 %v5287_v14, %v15616_v57  ;;  %v5640_v57 = vsel %vm33_vm0, %v5616_v50, -inf  ;;  %v5617_v50 = vmax.f32 %v5601_v26, 0.0  ;;  %v6397_v26 = vld [vmem:[#allocation3 + $0x84] sm:$0xff] }
 0x506   : > { %v5620_v33 = vmax.f32 %v5604_v23, 0.0 }
 0x507   : > { %11925 = vmatmul.msk.f32.gmra.mxu0 %vm33_vm0, %v15946_v54  ;;  %v5455_v55 = vadd.f32 %v5437_v17, %v5305_v44  ;;  %v15973_v17 = vld [vmem:[#allocation3 + $0x81] sm:$0xff] }
 0x508   : > { %11949 = vmatmul.msk.f32.gmra.mxu1 %vm33_vm0, %v15948_v52  ;;  %v5641_v56 = vsel %vm33_vm0, %v5620_v33, -inf  ;;  %11973 = vmatmul.msk.f32.gmra.mxu2 %vm33_vm0, %v15959_v6  ;;  %v15975_v44 = vld [vmem:[#allocation3 + $0x82] sm:$0xff] }
 0x509   : > { %11997 = vmatmul.msk.f32.gmra.mxu3 %vm33_vm0, %v6396_v34  ;;  %v5642_v5 = vmax.f32 %v5640_v57, %v5641_v56  ;;  %v5643_v56 = vsel %vm33_vm0, %v5617_v50, -inf }
 0x50a   : > { %v5656_v61 = vld [vmem:[#allocation2 + $0x20] ss:$2 sm:$0xff]  ;;  %v5660_v43 = vld [vmem:[#allocation2 + $0x21] ss:$2 sm:$0xff] }
 0x50b   : > { %v5587_v21 = vpop.f32.mrf.mxu2  ;;  %5652 = vst.msk [vmem:[#allocation2 + $0x30] sm:$0xff] %vm33_vm0, %v5642_v5  ;;  %v5664_v16 = vmax.f32 %v5656_v61, %v5660_v43  ;;  %v12101_v61 = vld [vmem:[%s18241_s3 + $0x138] sm:$0xff] }
 0x50c   : > { %v15969_v38 = vpop.f32.mrf.mxu3  ;;  %v5605_v23 = vadd.f32 %v5587_v21, %v5455_v55  ;;  %v5937_v14 = vpop.f32.mrf.mxu0  ;;  %v12149_v55 = vld [vmem:[%s18241_s3 + $0x178] sm:$0xff]  ;;  %7388 = vmatpush.msra.mxu0 %v12101_v61  ;;  %v5779_v21 = vadd.f32 %v15953_v39, %v15571_v63  ;;  %v16013_v63 = vld [vmem:[#allocation3 + $0x8b] sm:$0xff] }
 0x50d   : > { %18285 = vst [vmem:[#allocation26_spill] sm:$0xff] %v15969_v38  ;;  %v6119_v31 = vpop.f32.mrf.mxu1  ;;  %v5997_v33 = vadd.f32 %v5937_v14, %v5776_v35  ;;  %v12173_v43 = vld [vmem:[%s18241_s3 + $0x198] sm:$0xff]  ;;  %7752 = vmatpush.msra.mxu2 %v12149_v55  ;;  %v16004_v38 = vld [vmem:[#allocation3 + $0x8a] sm:$0xff] }
 0x50e   : > { %5668 = vst.msk [vmem:[#allocation3 + $0xd0] sm:$0xff] %vm33_vm0, %v5664_v16  ;;  %v5621_v34 = vmax.f32 %v5605_v23, 0.0  ;;  %7934 = vmatpush.msrb.mxu3 %v12173_v43  ;;  %v5782_v43 = vadd.f32 %v15953_v39, %v15591_v28  ;;  %v16031_v28 = vld [vmem:[#allocation3 + $0x93] sm:$0xff] }
 0x50f   : > { %v6179_v57 = vadd.f32 %v6119_v31, %v5997_v33  ;;  %11926 = vmatmul.msk.f32.gmra.mxu0 %vm33_vm0, %v15973_v17 }
 0x510   : > { %11950 = vmatmul.msk.f32.gmra.mxu1 %vm33_vm0, %v15975_v44  ;;  %v5644_v5 = vsel %vm33_vm0, %v5621_v34, -inf  ;;  %11974 = vmatmul.msk.f32.gmra.mxu2 %vm33_vm0, %v15981_v13 }
 0x511   : > { %11998 = vmatmul.msk.f32.gmra.mxu3 %vm33_vm0, %v6397_v26  ;;  %v5645_v35 = vmax.f32 %v5643_v56, %v5644_v5  ;;  %v16002_v26 = vld [vmem:[#allocation3 + $0x89] sm:$0xff]  ;;  %v12125_v56 = vld [vmem:[%s18241_s3 + $0x158] sm:$0xff] }
 0x512   : > { %7570 = vmatpush.msra.mxu1 %v12125_v56 }
 0x513   : > { %v6301_v16 = vpop.f32.mrf.mxu2  ;;  %5653 = vst.msk [vmem:[#allocation2 + $0x38] sm:$0xff] %vm33_vm0, %v5645_v35 }
 0x514   : > { %v6483_v50 = vpop.f32.mrf.mxu3  ;;  %v6361_v23 = vadd.f32 %v6301_v16, %v6179_v57  ;;  %v5940_v14 = vpop.f32.mrf.mxu0  ;;  %v6398_v57 = vld [vmem:[#allocation3 + $0x8c] sm:$0xff] }
 0x515   : > { %v6122_v31 = vpop.f32.mrf.mxu1  ;;  %v5998_v33 = vadd.f32 %v5940_v14, %v5779_v21 }
 0x516   : > { %v16000_v34 = vadd.f32 %v6483_v50, %v6361_v23 }
 0x517   : > { %v6180_v5 = vadd.f32 %v6122_v31, %v5998_v33  ;;  %11927 = vmatmul.msk.f32.gmra.mxu0 %vm33_vm0, %v16002_v26 }
 0x518   : > { %18286 = vst [vmem:[#allocation27_spill] sm:$0xff] %v16000_v34  ;;  %11951 = vmatmul.msk.f32.gmra.mxu1 %vm33_vm0, %v16004_v38  ;;  %11975 = vmatmul.msk.f32.gmra.mxu2 %vm33_vm0, %v16013_v63  ;;  %v16023_v34 = vld [vmem:[#allocation3 + $0x91] sm:$0xff] }
 0x519   : > { %11999 = vmatmul.msk.f32.gmra.mxu3 %vm33_vm0, %v6398_v57  ;;  %v16025_v57 = vld [vmem:[#allocation3 + $0x92] sm:$0xff] }
 0x51a   : > { %v5657_v55 = vld [vmem:[#allocation2 + $0x30] ss:$2 sm:$0xff]  ;;  %v5661_v61 = vld [vmem:[#allocation2 + $0x31] ss:$2 sm:$0xff] }
 0x51b   : > { %v6304_v35 = vpop.f32.mrf.mxu2  ;;  %v5665_v16 = vmax.f32 %v5657_v55, %v5661_v61  ;;  %v5785_v55 = vadd.f32 %v15953_v39, %v15609_v60  ;;  %v16048_v60 = vld [vmem:[#allocation3 + $0x9b] sm:$0xff] }
 0x51c   : > { %v6486_v21 = vpop.f32.mrf.mxu3  ;;  %v6362_v50 = vadd.f32 %v6304_v35, %v6180_v5  ;;  %v5943_v23 = vpop.f32.mrf.mxu0  ;;  %v6399_v5 = vld [vmem:[#allocation3 + $0x94] sm:$0xff] }
 0x51d   : > { %v6125_v14 = vpop.f32.mrf.mxu1  ;;  %v5999_v31 = vadd.f32 %v5943_v23, %v5782_v43  ;;  %5669 = vst.msk [vmem:[#allocation3 + $0xd8] sm:$0xff] %vm33_vm0, %v5665_v16 }
 0x51e   : > { %v16021_v33 = vadd.f32 %v6486_v21, %v6362_v50 }
 0x51f   : > { %v6181_v56 = vadd.f32 %v6125_v14, %v5999_v31  ;;  %11928 = vmatmul.msk.f32.gmra.mxu0 %vm33_vm0, %v16023_v34  ;;  %v16040_v14 = vld [vmem:[#allocation3 + $0x99] sm:$0xff] }
 0x520   : > { %18287 = vst [vmem:[#allocation28_spill] sm:$0xff] %v16021_v33  ;;  %11952 = vmatmul.msk.f32.gmra.mxu1 %vm33_vm0, %v16025_v57  ;;  %11976 = vmatmul.msk.f32.gmra.mxu2 %vm33_vm0, %v16031_v28  ;;  %v16042_v31 = vld [vmem:[#allocation3 + $0x9a] sm:$0xff] }
 0x521   : > { %12000 = vmatmul.msk.f32.gmra.mxu3 %vm33_vm0, %v6399_v5  ;;  %18289 = vst [vmem:[#allocation30_spill] sm:$0xff] %v16042_v31  ;;  %v6400_v5 = vld [vmem:[#allocation3 + $0x9c] sm:$0xff] }
 0x523   : > { %v6307_v61 = vpop.f32.mrf.mxu2 }
 0x524   : > { %v6489_v43 = vpop.f32.mrf.mxu3  ;;  %v6363_v35 = vadd.f32 %v6307_v61, %v6181_v56  ;;  %v5946_v21 = vpop.f32.mrf.mxu0  ;;  %v5788_v56 = vadd.f32 %v15953_v39, %v15622_v15  ;;  %v5791_v15 = vadd.f32 %v15953_v39, %v15640_v59  ;;  %v12148_v59 = vld [vmem:[%s18241_s3 + $0x170] sm:$0xff] }
 0x525   : > { %v6128_v16 = vpop.f32.mrf.mxu1  ;;  %v6000_v50 = vadd.f32 %v5946_v21, %v5785_v55  ;;  %7753 = vmatpush.msra.mxu2 %v12148_v59 }
 0x526   : > { %v16038_v23 = vadd.f32 %v6489_v43, %v6363_v35 }
 0x527   : > { %v6182_v33 = vadd.f32 %v6128_v16, %v6000_v50  ;;  %11929 = vmatmul.msk.f32.gmra.mxu0 %vm33_vm0, %v16040_v14 }
 0x528   : > { %18288 = vst [vmem:[#allocation29_spill] sm:$0xff] %v16038_v23  ;;  %11953 = vmatmul.msk.f32.gmra.mxu1 %vm33_vm0, %v16042_v31  ;;  %11977 = vmatmul.msk.f32.gmra.mxu2 %vm33_vm0, %v16048_v60  ;;  %v6563_v23 = vld [vmem:[#allocation3 + $0x10] sm:$0xff] }
 0x529   : > { %12001 = vmatmul.msk.f32.gmra.mxu3 %vm33_vm0, %v6400_v5 }
 0x52b   : > { %v6310_v55 = vpop.f32.mrf.mxu2 }
 0x52c   : > { %v6492_v61 = vpop.f32.mrf.mxu3  ;;  %v6364_v43 = vadd.f32 %v6310_v55, %v6182_v33  ;;  %v5949_v35 = vpop.f32.mrf.mxu0 }
 0x52d   : > { %v6131_v21 = vpop.f32.mrf.mxu1  ;;  %v6001_v16 = vadd.f32 %v5949_v35, %v5788_v56 }
 0x52e   : > { %v16055_v50 = vadd.f32 %v6492_v61, %v6364_v43 }
 0x52f   : > { %v6183_v31 = vadd.f32 %v6131_v21, %v6001_v16  ;;  %12006 = vmatmul.msk.f32.vlgmr.msrb.gmra.mxu0 %vm33_vm0, %v6563_v23  ;;  %v6564_v23 = vld [vmem:[#allocation3 + $0x18] sm:$0xff] }
 0x530   : > { %12030 = vmatmul.msk.f32.vlgmr.msrb.gmra.mxu1 %vm33_vm0, %v15646_v29  ;;  %12054 = vmatmul.msk.f32.vlgmr.msrb.gmra.mxu2 %vm33_vm0, %v15648_v11  ;;  %v12100_v29 = vld [vmem:[%s18241_s3 + $0x130] sm:$0xff] }
 0x531   : > { %12078 = vmatmul.msk.f32.vlgmr.msra.gmra.mxu3 %vm33_vm0, %v15654_v10  ;;  %v12172_v11 = vld [vmem:[%s18241_s3 + $0x190] sm:$0xff]  ;;  %7389 = vmatpush.msra.mxu0 %v12100_v29  ;;  %v5794_v10 = vadd.f32 %v15953_v39, %v15664_v27  ;;  %v5797_v27 = vadd.f32 %v15953_v39, %v15686_v20  ;;  %v5800_v20 = vadd.f32 %v15953_v39, %v15704_v51 }
 0x532   : > { %7935 = vmatpush.msrb.mxu3 %v12172_v11  ;;  %v5803_v51 = vadd.f32 %v15953_v39, %v15725_v12  ;;  %v5806_v12 = vadd.f32 %v15953_v39, %v15757_v30  ;;  %v12147_v30 = vld [vmem:[%s18241_s3 + $0x168] sm:$0xff] }
 0x533   : > { %v6313_v33 = vpop.f32.mrf.mxu2  ;;  %7754 = vmatpush.msra.mxu2 %v12147_v30 }
 0x534   : > { %v6495_v5 = vpop.f32.mrf.mxu3  ;;  %v6365_v56 = vadd.f32 %v6313_v33, %v6183_v31  ;;  %v5952_v55 = vpop.f32.mrf.mxu0 }
 0x535   : > { %v6134_v61 = vpop.f32.mrf.mxu1  ;;  %v6002_v43 = vadd.f32 %v5952_v55, %v5791_v15 }
 0x536   : > { %v16066_v35 = vadd.f32 %v6495_v5, %v6365_v56  ;;  %v16088_v5 = vld [vmem:[#allocation3 + $0x20] sm:$0xff]  ;;  %v12124_v56 = vld [vmem:[%s18241_s3 + $0x150] sm:$0xff] }
 0x537   : > { %v6184_v21 = vadd.f32 %v6134_v61, %v6002_v43  ;;  %12007 = vmatmul.msk.f32.gmra.mxu0 %vm33_vm0, %v6564_v23  ;;  %7571 = vmatpush.msra.mxu1 %v12124_v56 }
 0x538   : > { %12031 = vmatmul.msk.f32.gmra.mxu1 %vm33_vm0, %v15670_v25  ;;  %12055 = vmatmul.msk.f32.gmra.mxu2 %vm33_vm0, %v15672_v24 }
 0x539   : > { %12079 = vmatmul.msk.f32.gmra.mxu3 %vm33_vm0, %v15678_v1 }
 0x53b   : > { %v6316_v25 = vpop.f32.mrf.mxu2 }
 0x53c   : > { %v6498_v24 = vpop.f32.mrf.mxu3  ;;  %v6366_v1 = vadd.f32 %v6316_v25, %v6184_v21  ;;  %v5955_v31 = vpop.f32.mrf.mxu0 }
 0x53d   : > { %v6137_v16 = vpop.f32.mrf.mxu1  ;;  %v6003_v15 = vadd.f32 %v5955_v31, %v5794_v10  ;;  %v16105_v10 = vld [vmem:[#allocation3 + $0x28] sm:$0xff] }
 0x53e   : > { %v16086_v33 = vadd.f32 %v6498_v24, %v6366_v1 }
 0x53f   : > { %v6185_v55 = vadd.f32 %v6137_v16, %v6003_v15  ;;  %12008 = vmatmul.msk.f32.gmra.mxu0 %vm33_vm0, %v16088_v5  ;;  %v16119_v15 = vld [vmem:[#allocation3 + $0x30] sm:$0xff] }
 0x540   : > { %12032 = vmatmul.msk.f32.gmra.mxu1 %vm33_vm0, %v15690_v2  ;;  %12056 = vmatmul.msk.f32.gmra.mxu2 %vm33_vm0, %v15692_v40 }
 0x541   : > { %12080 = vmatmul.msk.f32.gmra.mxu3 %vm33_vm0, %v15698_v4 }
 0x543   : > { %v6319_v61 = vpop.f32.mrf.mxu2 }
 0x544   : > { %v6501_v43 = vpop.f32.mrf.mxu3  ;;  %v6367_v23 = vadd.f32 %v6319_v61, %v6185_v55  ;;  %v5958_v21 = vpop.f32.mrf.mxu0 }
 0x545   : > { %v6140_v59 = vpop.f32.mrf.mxu1  ;;  %v6004_v29 = vadd.f32 %v5958_v21, %v5797_v27 }
 0x546   : > { %v16103_v11 = vadd.f32 %v6501_v43, %v6367_v23  ;;  %v16133_v23 = vld [vmem:[#allocation3 + $0x38] sm:$0xff] }
 0x547   : > { %v6186_v2 = vadd.f32 %v6140_v59, %v6004_v29  ;;  %12009 = vmatmul.msk.f32.gmra.mxu0 %vm33_vm0, %v16105_v10 }
 0x548   : > { %12033 = vmatmul.msk.f32.gmra.mxu1 %vm33_vm0, %v15708_v18  ;;  %12057 = vmatmul.msk.f32.gmra.mxu2 %vm33_vm0, %v15710_v62 }
 0x549   : > { %12081 = vmatmul.msk.f32.gmra.mxu3 %vm33_vm0, %v15716_v47 }
 0x54b   : > { %v6322_v40 = vpop.f32.mrf.mxu2 }
 0x54c   : > { %v6504_v4 = vpop.f32.mrf.mxu3  ;;  %v6368_v25 = vadd.f32 %v6322_v40, %v6186_v2  ;;  %v5961_v24 = vpop.f32.mrf.mxu0  ;;  %v16147_v40 = vld [vmem:[#allocation3 + $0x40] sm:$0xff] }
 0x54d   : > { %v6143_v1 = vpop.f32.mrf.mxu1  ;;  %v6005_v31 = vadd.f32 %v5961_v24, %v5800_v20 }
 0x54e   : > { %v16117_v16 = vadd.f32 %v6504_v4, %v6368_v25 }
 0x54f   : > { %v6187_v18 = vadd.f32 %v6143_v1, %v6005_v31  ;;  %12010 = vmatmul.msk.f32.gmra.mxu0 %vm33_vm0, %v16119_v15 }
 0x550   : > { %12034 = vmatmul.msk.f32.gmra.mxu1 %vm33_vm0, %v15730_v53  ;;  %12058 = vmatmul.msk.f32.gmra.mxu2 %vm33_vm0, %v15732_v48 }
 0x551   : > { %12082 = vmatmul.msk.f32.gmra.mxu3 %vm33_vm0, %v15738_v22 }
 0x553   : > { %v6325_v62 = vpop.f32.mrf.mxu2 }
 0x554   : > { %v6507_v47 = vpop.f32.mrf.mxu3  ;;  %v6369_v56 = vadd.f32 %v6325_v62, %v6187_v18  ;;  %v5964_v55 = vpop.f32.mrf.mxu0  ;;  %v12123_v62 = vld [vmem:[%s18241_s3 + $0x148] sm:$0xff] }
 0x555   : > { %v6146_v27 = vpop.f32.mrf.mxu1  ;;  %v6006_v61 = vadd.f32 %v5964_v55, %v5803_v51  ;;  %v16170_v51 = vld [vmem:[#allocation3 + $0x48] sm:$0xff]  ;;  %7572 = vmatpush.msra.mxu1 %v12123_v62 }
 0x556   : > { %v16131_v43 = vadd.f32 %v6507_v47, %v6369_v56  ;;  %v18291_v56 = vld [vmem:[#allocation11_spill] sm:$0xff]  ;;  %v18292_v55 = vld [vmem:[#allocation12_spill] sm:$0xff] }
 0x557   : > { %v6188_v53 = vadd.f32 %v6146_v27, %v6006_v61  ;;  %12011 = vmatmul.msk.f32.gmra.mxu0 %vm33_vm0, %v16133_v23  ;;  %v18293_v27 = vld [vmem:[#allocation13_spill] sm:$0xff]  ;;  %v18294_v61 = vld [vmem:[#allocation10_spill] sm:$0xff] }
 0x558   : > { %12035 = vmatmul.msk.f32.gmra.mxu1 %vm33_vm0, %v15762_v0  ;;  %12059 = vmatmul.msk.f32.gmra.mxu2 %vm33_vm0, %v15764_v49  ;;  %v12099_v49 = vld [vmem:[%s18241_s3 + $0x128] sm:$0xff] }
 0x559   : > { %12083 = vmatmul.msk.f32.gmra.mxu3 %vm33_vm0, %v15770_v41  ;;  %v12171_v41 = vld [vmem:[%s18241_s3 + $0x188] sm:$0xff]  ;;  %7390 = vmatpush.msra.mxu0 %v12099_v49  ;;  %v18295_v49 = vld [vmem:[#allocation15_spill] sm:$0xff] }
 0x55a   : > { %7936 = vmatpush.msrb.mxu3 %v12171_v41  ;;  %v18296_v41 = vld [vmem:[#allocation16_spill] sm:$0xff] }
 0x55b   : > { %v6328_v48 = vpop.f32.mrf.mxu2 }
 0x55c   : > { %v6510_v22 = vpop.f32.mrf.mxu3  ;;  %v6370_v21 = vadd.f32 %v6328_v48, %v6188_v53  ;;  %v5967_v59 = vpop.f32.mrf.mxu0  ;;  %v5812_v53 = vadd.f32 %v15953_v39, %v18294_v61  ;;  %v18300_v61 = vld [vmem:[#allocation20_spill] sm:$0xff] }
 0x55d   : > { %v6149_v29 = vpop.f32.mrf.mxu1  ;;  %v6007_v2 = vadd.f32 %v5967_v59, %v5806_v12 }
 0x55e   : > { %v16145_v20 = vadd.f32 %v6510_v22, %v6370_v21 }
 0x55f   : > { %v6189_v0 = vadd.f32 %v6149_v29, %v6007_v2  ;;  %12012 = vmatmul.msk.f32.gmra.mxu0 %vm33_vm0, %v16147_v40 }
 0x560   : > { %12036 = vmatmul.msk.f32.gmra.mxu1 %vm33_vm0, %v15787_v37  ;;  %12060 = vmatmul.msk.f32.gmra.mxu2 %vm33_vm0, %v15789_v58  ;;  %v18290_v37 = vld [vmem:[#allocation9_spill] sm:$0xff] }
 0x561   : > { %12084 = vmatmul.msk.f32.gmra.mxu3 %vm33_vm0, %v15795_v3  ;;  %v5809_v58 = vadd.f32 %v15953_v39, %v18290_v37  ;;  %v18297_v37 = vld [vmem:[#allocation17_spill] sm:$0xff] }
 0x563   : > { %v6331_v4 = vpop.f32.mrf.mxu2 }
 0x564   : > { %v6513_v3 = vpop.f32.mrf.mxu3  ;;  %v6371_v25 = vadd.f32 %v6331_v4, %v6189_v0  ;;  %v5970_v24 = vpop.f32.mrf.mxu0  ;;  %v16187_v0 = vld [vmem:[#allocation3 + $0x50] sm:$0xff] }
 0x565   : > { %v6152_v1 = vpop.f32.mrf.mxu1  ;;  %v6008_v31 = vadd.f32 %v5970_v24, %v5809_v58  ;;  %v18298_v58 = vld [vmem:[#allocation14_spill] sm:$0xff] }
 0x566   : > { %v16168_v18 = vadd.f32 %v6513_v3, %v6371_v25  ;;  %v5815_v4 = vadd.f32 %v15953_v39, %v18298_v58 }
 0x567   : > { %v6190_v47 = vadd.f32 %v6152_v1, %v6008_v31  ;;  %12013 = vmatmul.msk.f32.gmra.mxu0 %vm33_vm0, %v16170_v51 }
 0x568   : > { %12037 = vmatmul.msk.f32.gmra.mxu1 %vm33_vm0, %v18291_v56  ;;  %12061 = vmatmul.msk.f32.gmra.mxu2 %vm33_vm0, %v18292_v55  ;;  %v16201_v56 = vld [vmem:[#allocation3 + $0x58] sm:$0xff] }
 0x569   : > { %12085 = vmatmul.msk.f32.gmra.mxu3 %vm33_vm0, %v18293_v27  ;;  %v18299_v27 = vld [vmem:[#allocation19_spill] sm:$0xff] }
 0x56b   : > { %v6334_v12 = vpop.f32.mrf.mxu2 }
 0x56c   : > { %v6516_v48 = vpop.f32.mrf.mxu3  ;;  %v6372_v22 = vadd.f32 %v6334_v12, %v6190_v47  ;;  %v5973_v21 = vpop.f32.mrf.mxu0  ;;  %v18302_v12 = vld [vmem:[#allocation18_spill] sm:$0xff] }
 0x56d   : > { %v6155_v59 = vpop.f32.mrf.mxu1  ;;  %v6009_v29 = vadd.f32 %v5973_v21, %v5812_v53  ;;  %v18301_v53 = vld [vmem:[#allocation21_spill] sm:$0xff] }
 0x56e   : > { %v16185_v2 = vadd.f32 %v6516_v48, %v6372_v22  ;;  %v5818_v48 = vadd.f32 %v15953_v39, %v18302_v12 }
 0x56f   : > { %v6191_v30 = vadd.f32 %v6155_v59, %v6009_v29  ;;  %12014 = vmatmul.msk.f32.gmra.mxu0 %vm33_vm0, %v16187_v0 }
 0x570   : > { %12038 = vmatmul.msk.f32.gmra.mxu1 %vm33_vm0, %v18295_v49  ;;  %12062 = vmatmul.msk.f32.gmra.mxu2 %vm33_vm0, %v18296_v41 }
 0x571   : > { %12086 = vmatmul.msk.f32.gmra.mxu3 %vm33_vm0, %v18297_v37  ;;  %v16215_v37 = vld [vmem:[#allocation3 + $0x60] sm:$0xff] }
 0x573   : > { %v6337_v3 = vpop.f32.mrf.mxu2 }
 0x574   : > { %v6519_v25 = vpop.f32.mrf.mxu3  ;;  %v6373_v24 = vadd.f32 %v6337_v3, %v6191_v30  ;;  %v5976_v1 = vpop.f32.mrf.mxu0  ;;  %v18304_v3 = vld [vmem:[#allocation24_spill] sm:$0xff] }
 0x575   : > { %v6158_v31 = vpop.f32.mrf.mxu1  ;;  %v6010_v62 = vadd.f32 %v5976_v1, %v5815_v4  ;;  %v18303_v4 = vld [vmem:[#allocation23_spill] sm:$0xff] }
 0x576   : > { %v16199_v47 = vadd.f32 %v6519_v25, %v6373_v24  ;;  %v18305_v25 = vld [vmem:[#allocation25_spill] sm:$0xff]  ;;  %v18306_v24 = vld [vmem:[#allocation22_spill] sm:$0xff] }
 0x577   : > { %v6192_v55 = vadd.f32 %v6158_v31, %v6010_v62  ;;  %12015 = vmatmul.msk.f32.gmra.mxu0 %vm33_vm0, %v16201_v56  ;;  %v5821_v1 = vadd.f32 %v15953_v39, %v18306_v24  ;;  %v12122_v24 = vld [vmem:[%s18241_s3 + $0x140] sm:$0xff] }
 0x578   : > { %12039 = vmatmul.msk.f32.gmra.mxu1 %vm33_vm0, %v18299_v27  ;;  %12063 = vmatmul.msk.f32.gmra.mxu2 %vm33_vm0, %v18300_v61 }
 0x579   : > { %12087 = vmatmul.msk.f32.gmra.mxu3 %vm33_vm0, %v18301_v53  ;;  %7573 = vmatpush.msra.mxu1 %v12122_v24 }
 0x57b   : > { %v6340_v22 = vpop.f32.mrf.mxu2 }
 0x57c   : > { %v6522_v21 = vpop.f32.mrf.mxu3  ;;  %v6374_v59 = vadd.f32 %v6340_v22, %v6192_v55  ;;  %v5979_v29 = vpop.f32.mrf.mxu0 }
 0x57d   : > { %v6161_v30 = vpop.f32.mrf.mxu1  ;;  %v6011_v49 = vadd.f32 %v5979_v29, %v5818_v48  ;;  %v16229_v48 = vld [vmem:[#allocation3 + $0x68] sm:$0xff]  ;;  %v12170_v29 = vld [vmem:[%s18241_s3 + $0x180] sm:$0xff] }
 0x57e   : > { %v16213_v41 = vadd.f32 %v6522_v21, %v6374_v59  ;;  %v12146_v21 = vld [vmem:[%s18241_s3 + $0x160] sm:$0xff]  ;;  %7937 = vmatpush.msrb.mxu3 %v12170_v29 }
 0x57f   : > { %v6193_v58 = vadd.f32 %v6161_v30, %v6011_v49  ;;  %12016 = vmatmul.msk.f32.gmra.mxu0 %vm33_vm0, %v16215_v37  ;;  %v12098_v59 = vld [vmem:[%s18241_s3 + $0x120] sm:$0xff]  ;;  %7755 = vmatpush.msra.mxu2 %v12146_v21  ;;  %v16269_v21 = vld [vmem:[#allocation3 + $0x78] sm:$0xff] }
 0x580   : > { %12040 = vmatmul.msk.f32.gmra.mxu1 %vm33_vm0, %v18303_v4  ;;  %12064 = vmatmul.msk.f32.gmra.mxu2 %vm33_vm0, %v18304_v3 }
 0x581   : > { %12088 = vmatmul.msk.f32.gmra.mxu3 %vm33_vm0, %v18305_v25  ;;  %7391 = vmatpush.msra.mxu0 %v12098_v59  ;;  %v16252_v25 = vld [vmem:[#allocation3 + $0x70] sm:$0xff] }
 0x583   : > { %v6343_v31 = vpop.f32.mrf.mxu2 }
 0x584   : > { %v6525_v62 = vpop.f32.mrf.mxu3  ;;  %v6375_v55 = vadd.f32 %v6343_v31, %v6193_v58  ;;  %v5982_v27 = vpop.f32.mrf.mxu0 }
 0x585   : > { %v6164_v61 = vpop.f32.mrf.mxu1  ;;  %v6012_v53 = vadd.f32 %v5982_v27, %v5821_v1 }
 0x586   : > { %v16227_v12 = vadd.f32 %v6525_v62, %v6375_v55 }
 0x587   : > { %v6194_v22 = vadd.f32 %v6164_v61, %v6012_v53  ;;  %12017 = vmatmul.msk.f32.gmra.mxu0 %vm33_vm0, %v16229_v48 }
 0x588   : > { %12041 = vmatmul.msk.f32.gmra.mxu1 %vm33_vm0, %v15900_v46  ;;  %12065 = vmatmul.msk.f32.gmra.mxu2 %vm33_vm0, %v15902_v19  ;;  %v5824_v19 = vadd.f32 %v15953_v39, %v15896_v8  ;;  %v5827_v8 = vadd.f32 %v15953_v39, %v15918_v7  ;;  %v5830_v7 = vadd.f32 %v15953_v39, %v15941_v32  ;;  %v18307_v32 = vld [vmem:[#allocation26_spill] sm:$0xff] }
 0x589   : > { %12089 = vmatmul.msk.f32.gmra.mxu3 %vm33_vm0, %v15908_v36 }
 0x58b   : > { %v6346_v46 = vpop.f32.mrf.mxu2 }
 0x58c   : > { %v6528_v36 = vpop.f32.mrf.mxu3  ;;  %v6376_v30 = vadd.f32 %v6346_v46, %v6194_v22  ;;  %v5985_v49 = vpop.f32.mrf.mxu0 }
 0x58d   : > { %v6167_v58 = vpop.f32.mrf.mxu1  ;;  %v6013_v4 = vadd.f32 %v5985_v49, %v5824_v19 }
 0x58e   : > { %v16250_v3 = vadd.f32 %v6528_v36, %v6376_v30  ;;  %v16283_v30 = vld [vmem:[#allocation3 + $0x80] sm:$0xff] }
 0x58f   : > { %v6195_v1 = vadd.f32 %v6167_v58, %v6013_v4  ;;  %12018 = vmatmul.msk.f32.gmra.mxu0 %vm33_vm0, %v16252_v25 }
 0x590   : > { %12042 = vmatmul.msk.f32.gmra.mxu1 %vm33_vm0, %v15923_v45  ;;  %12066 = vmatmul.msk.f32.gmra.mxu2 %vm33_vm0, %v15925_v9 }
 0x591   : > { %12090 = vmatmul.msk.f32.gmra.mxu3 %vm33_vm0, %v15931_v42 }
 0x593   : > { %v6349_v31 = vpop.f32.mrf.mxu2 }
 0x594   : > { %v6531_v62 = vpop.f32.mrf.mxu3  ;;  %v6377_v55 = vadd.f32 %v6349_v31, %v6195_v1  ;;  %v5988_v27 = vpop.f32.mrf.mxu0  ;;  %v16297_v31 = vld [vmem:[#allocation3 + $0x88] sm:$0xff] }
 0x595   : > { %v6170_v61 = vpop.f32.mrf.mxu1  ;;  %v6014_v53 = vadd.f32 %v5988_v27, %v5827_v8  ;;  %v18308_v27 = vld [vmem:[#allocation27_spill] sm:$0xff] }
 0x596   : > { %v16267_v22 = vadd.f32 %v6531_v62, %v6377_v55 }
 0x597   : > { %v6196_v45 = vadd.f32 %v6170_v61, %v6014_v53  ;;  %12019 = vmatmul.msk.f32.gmra.mxu0 %vm33_vm0, %v16269_v21 }
 0x598   : > { %12043 = vmatmul.msk.f32.gmra.mxu1 %vm33_vm0, %v15946_v54  ;;  %12067 = vmatmul.msk.f32.gmra.mxu2 %vm33_vm0, %v15948_v52  ;;  %v5833_v52 = vadd.f32 %v15953_v39, %v18307_v32 }
 0x599   : > { %12091 = vmatmul.msk.f32.gmra.mxu3 %vm33_vm0, %v15959_v6 }
 0x59b   : > { %v6352_v9 = vpop.f32.mrf.mxu2 }
 0x59c   : > { %v6534_v42 = vpop.f32.mrf.mxu3  ;;  %v6378_v59 = vadd.f32 %v6352_v9, %v6196_v45  ;;  %v5991_v29 = vpop.f32.mrf.mxu0  ;;  %v16310_v45 = vld [vmem:[#allocation3 + $0x90] sm:$0xff] }
 0x59d   : > { %v6173_v19 = vpop.f32.mrf.mxu1  ;;  %v6015_v46 = vadd.f32 %v5991_v29, %v5830_v7 }
 0x59e   : > { %v16281_v36 = vadd.f32 %v6534_v42, %v6378_v59  ;;  %v18309_v59 = vld [vmem:[#allocation28_spill] sm:$0xff] }
 0x59f   : > { %v6197_v54 = vadd.f32 %v6173_v19, %v6015_v46  ;;  %12020 = vmatmul.msk.f32.gmra.mxu0 %vm33_vm0, %v16283_v30  ;;  %v16332_v46 = vld [vmem:[#allocation3 + $0x98] sm:$0xff] }
 0x5a0   : > { %12044 = vmatmul.msk.f32.gmra.mxu1 %vm33_vm0, %v15973_v17  ;;  %12068 = vmatmul.msk.f32.gmra.mxu2 %vm33_vm0, %v15975_v44 }
 0x5a1   : > { %12092 = vmatmul.msk.f32.gmra.mxu3 %vm33_vm0, %v15981_v13 }
 0x5a3   : > { %v6355_v6 = vpop.f32.mrf.mxu2 }
 0x5a4   : > { %v6537_v49 = vpop.f32.mrf.mxu3  ;;  %v6379_v58 = vadd.f32 %v6355_v6, %v6197_v54  ;;  %v5994_v4 = vpop.f32.mrf.mxu0  ;;  %v12221_v54 = vld [vmem:[%s18241_s3 + $0x1d8] sm:$0xff] }
 0x5a5   : > { %v6176_v24 = vpop.f32.mrf.mxu1  ;;  %v6016_v1 = vadd.f32 %v5994_v4, %v5833_v52  ;;  %v18310_v52 = vld [vmem:[#allocation30_spill] sm:$0xff]  ;;  %8298 = vmatpush.msrb.mxu1 %v12221_v54 }
 0x5a6   : > { %v16295_v8 = vadd.f32 %v6537_v49, %v6379_v58 }
 0x5a7   : > { %v6198_v17 = vadd.f32 %v6176_v24, %v6016_v1  ;;  %12021 = vmatmul.msk.f32.gmra.mxu0 %vm33_vm0, %v16297_v31  ;;  %v18311_v1 = vld [vmem:[#allocation29_spill] sm:$0xff] }
 0x5a8   : > { %12045 = vmatmul.msk.f32.gmra.mxu1 %vm33_vm0, %v16002_v26  ;;  %12069 = vmatmul.msk.f32.gmra.mxu2 %vm33_vm0, %v16004_v38  ;;  %v12245_v38 = vld [vmem:[%s18241_s3 + $0x1f8] sm:$0xff] }
 0x5a9   : > { %12093 = vmatmul.msk.f32.gmra.mxu3 %vm33_vm0, %v16013_v63  ;;  %v12197_v26 = vld [vmem:[%s18241_s3 + $0x1b8] sm:$0xff]  ;;  %8480 = vmatpush.msrb.mxu2 %v12245_v38 }
 0x5aa   : > { %v12269_v63 = vld [vmem:[%s18241_s3 + $0x218] sm:$0xff]  ;;  %8116 = vmatpush.msrb.mxu0 %v12197_v26 }
 0x5ab   : > { %v6358_v39 = vpop.f32.mrf.mxu2  ;;  %8662 = vmatpush.msra.mxu3 %v12269_v63 }
 0x5ac   : > { %v6540_v44 = vpop.f32.mrf.mxu3  ;;  %v6380_v13 = vadd.f32 %v6358_v39, %v6198_v17  ;;  %v6665_v62 = vpop.f32.mrf.mxu0 }
 0x5ad   : > { %v6847_v55 = vpop.f32.mrf.mxu1  ;;  %v6725_v61 = vadd.f32 %v6665_v62, %v18308_v27  ;;  %v7127_v62 = vld [vmem:[#allocation3 + $0xa3] sm:$0xff] }
 0x5ae   : > { %v16308_v53 = vadd.f32 %v6540_v44, %v6380_v13  ;;  %v16348_v44 = vld [vmem:[#allocation3 + $0xa0] sm:$0xff] }
 0x5af   : > { %v6907_v7 = vadd.f32 %v6847_v55, %v6725_v61  ;;  %12022 = vmatmul.msk.f32.gmra.mxu0 %vm33_vm0, %v16310_v45  ;;  %v16350_v13 = vld [vmem:[#allocation3 + $0xa1] sm:$0xff] }
 0x5b0   : > { %12046 = vmatmul.msk.f32.gmra.mxu1 %vm33_vm0, %v16023_v34  ;;  %12070 = vmatmul.msk.f32.gmra.mxu2 %vm33_vm0, %v16025_v57 }
 0x5b1   : > { %12094 = vmatmul.msk.f32.gmra.mxu3 %vm33_vm0, %v16031_v28 }
 0x5b3   : > { %v7029_v34 = vpop.f32.mrf.mxu2 }
 0x5b4   : > { %v7211_v57 = vpop.f32.mrf.mxu3  ;;  %v7089_v9 = vadd.f32 %v7029_v34, %v6907_v7  ;;  %v6668_v42 = vpop.f32.mrf.mxu0  ;;  %v16364_v34 = vld [vmem:[#allocation3 + $0xa8] sm:$0xff] }
 0x5b5   : > { %v6850_v28 = vpop.f32.mrf.mxu1  ;;  %v6726_v29 = vadd.f32 %v6668_v42, %v18309_v59  ;;  %v16372_v42 = vld [vmem:[#allocation3 + $0xaa] sm:$0xff] }
 0x5b6   : > { %v16330_v19 = vadd.f32 %v7211_v57, %v7089_v9  ;;  %v16366_v57 = vld [vmem:[#allocation3 + $0xa9] sm:$0xff] }
 0x5b7   : > { %v6908_v32 = vadd.f32 %v6850_v28, %v6726_v29  ;;  %12023 = vmatmul.msk.f32.gmra.mxu0 %vm33_vm0, %v16332_v46  ;;  %v7128_v28 = vld [vmem:[#allocation3 + $0xab] sm:$0xff] }
 0x5b8   : > { %12047 = vmatmul.msk.f32.gmra.mxu1 %vm33_vm0, %v16040_v14  ;;  %12071 = vmatmul.msk.f32.gmra.mxu2 %vm33_vm0, %v18310_v52 }
 0x5b9   : > { %12095 = vmatmul.msk.f32.gmra.mxu3 %vm33_vm0, %v16048_v60  ;;  %v16356_v60 = vld [vmem:[#allocation3 + $0xa2] sm:$0xff] }
 0x5bb   : > { %v7032_v6 = vpop.f32.mrf.mxu2 }
 0x5bc   : > { %v7214_v49 = vpop.f32.mrf.mxu3  ;;  %v7090_v58 = vadd.f32 %v7032_v6, %v6908_v32  ;;  %v6671_v4 = vpop.f32.mrf.mxu0 }
 0x5bd   : > { %v6853_v24 = vpop.f32.mrf.mxu1  ;;  %v6727_v17 = vadd.f32 %v6671_v4, %v18311_v1  ;;  %v7655_v4 = vld [vmem:[#allocation3 + $0x21] sm:$0xff] }
 0x5be   : > { %v16346_v39 = vadd.f32 %v7214_v49, %v7090_v58  ;;  %v7291_v49 = vld [vmem:[#allocation3 + $0x14] sm:$0xff] }
 0x5bf   : > { %v6909_v14 = vadd.f32 %v6853_v24, %v6727_v17  ;;  %12024 = vmatmul.msk.f32.gmra.mxu0 %vm33_vm0, %v16348_v44  ;;  %v7837_v24 = vld [vmem:[#allocation3 + $0x22] sm:$0xff] }
 0x5c0   : > { %12048 = vmatmul.msk.f32.gmra.mxu1 %vm33_vm0, %v16350_v13  ;;  %12072 = vmatmul.msk.f32.gmra.mxu2 %vm33_vm0, %v16356_v60 }
 0x5c1   : > { %12096 = vmatmul.msk.f32.gmra.mxu3 %vm33_vm0, %v7127_v62 }
 0x5c3   : > { %v7035_v55 = vpop.f32.mrf.mxu2 }
 0x5c4   : > { %v7217_v27 = vpop.f32.mrf.mxu3  ;;  %v7091_v61 = vadd.f32 %v7035_v55, %v6909_v14  ;;  %v6674_v7 = vpop.f32.mrf.mxu0 }
 0x5c5   : > { %v6856_v38 = vpop.f32.mrf.mxu1  ;;  %v6728_v26 = vadd.f32 %v6674_v7, %v16055_v50 }
 0x5c6   : > { %v16362_v63 = vadd.f32 %v7217_v27, %v7091_v61  ;;  %v7292_v61 = vld [vmem:[#allocation3 + $0x1c] sm:$0xff] }
 0x5c7   : > { %v6910_v9 = vadd.f32 %v6856_v38, %v6728_v26  ;;  %12025 = vmatmul.msk.f32.gmra.mxu0 %vm33_vm0, %v16364_v34  ;;  %v7838_v38 = vld [vmem:[#allocation3 + $0x2a] sm:$0xff] }
 0x5c8   : > { %12049 = vmatmul.msk.f32.gmra.mxu1 %vm33_vm0, %v16366_v57  ;;  %12073 = vmatmul.msk.f32.gmra.mxu2 %vm33_vm0, %v16372_v42  ;;  %v12244_v26 = vld [vmem:[%s18241_s3 + $0x1f0] sm:$0xff] }
 0x5c9   : > { %12097 = vmatmul.msk.f32.gmra.mxu3 %vm33_vm0, %v7128_v28  ;;  %8481 = vmatpush.msrb.mxu2 %v12244_v26 }
 0x5cb   : > { %v7038_v50 = vpop.f32.mrf.mxu2 }
 0x5cc   : > { %v7220_v59 = vpop.f32.mrf.mxu3  ;;  %v7092_v29 = vadd.f32 %v7038_v50, %v6910_v9  ;;  %v6677_v54 = vpop.f32.mrf.mxu0  ;;  %v12268_v9 = vld [vmem:[%s18241_s3 + $0x210] sm:$0xff] }
 0x5cd   : > { %v6859_v32 = vpop.f32.mrf.mxu1  ;;  %v6729_v52 = vadd.f32 %v6677_v54, %v16066_v35  ;;  %8663 = vmatpush.msra.mxu3 %v12268_v9 }
 0x5ce   : > { %v16378_v6 = vadd.f32 %v7220_v59, %v7092_v29 }
 0x5cf   : > { %v6911_v58 = vadd.f32 %v6859_v32, %v6729_v52  ;;  %12102 = vmatmul.msk.f32.vlgmr.msra.gmra.mxu0 %vm33_vm0, %v7291_v49  ;;  %v16405_v52 = vld [vmem:[#allocation3 + $0x24] sm:$0xff]  ;;  %v12220_v49 = vld [vmem:[%s18241_s3 + $0x1d0] sm:$0xff] }
 0x5d0   : > { %12126 = vmatmul.msk.f32.vlgmr.msra.gmra.mxu1 %vm33_vm0, %v16088_v5  ;;  %12150 = vmatmul.msk.f32.vlgmr.msra.gmra.mxu2 %vm33_vm0, %v7655_v4  ;;  %v7656_v5 = vld [vmem:[#allocation3 + $0x29] sm:$0xff]  ;;  %v16414_v4 = vld [vmem:[#allocation3 + $0x31] sm:$0xff] }
 0x5d1   : > { %12174 = vmatmul.msk.f32.vlgmr.msrb.gmra.mxu3 %vm33_vm0, %v7837_v24  ;;  %v7839_v24 = vld [vmem:[#allocation3 + $0x32] sm:$0xff]  ;;  %8299 = vmatpush.msrb.mxu1 %v12220_v49 }
 0x5d3   : > { %v7041_v1 = vpop.f32.mrf.mxu2 }
 0x5d4   : > { %v7223_v17 = vpop.f32.mrf.mxu3  ;;  %v7093_v14 = vadd.f32 %v7041_v1, %v6911_v58  ;;  %v6680_v62 = vpop.f32.mrf.mxu0 }
 0x5d5   : > { %v6862_v35 = vpop.f32.mrf.mxu1  ;;  %v6730_v55 = vadd.f32 %v6680_v62, %v16086_v33  ;;  %v12196_v33 = vld [vmem:[%s18241_s3 + $0x1b0] sm:$0xff] }
 0x5d6   : > { %v16386_v27 = vadd.f32 %v7223_v17, %v7093_v14  ;;  %8117 = vmatpush.msrb.mxu0 %v12196_v33 }
 0x5d7   : > { %v6912_v7 = vadd.f32 %v6862_v35, %v6730_v55  ;;  %12103 = vmatmul.msk.f32.gmra.mxu0 %vm33_vm0, %v7292_v61  ;;  %v16422_v61 = vld [vmem:[#allocation3 + $0x2c] sm:$0xff] }
 0x5d8   : > { %12127 = vmatmul.msk.f32.gmra.mxu1 %vm33_vm0, %v16105_v10  ;;  %12151 = vmatmul.msk.f32.gmra.mxu2 %vm33_vm0, %v7656_v5  ;;  %v7840_v5 = vld [vmem:[#allocation3 + $0x3a] sm:$0xff] }
 0x5d9   : > { %12175 = vmatmul.msk.f32.gmra.mxu3 %vm33_vm0, %v7838_v38 }
 0x5db   : > { %v7044_v10 = vpop.f32.mrf.mxu2 }
 0x5dc   : > { %v7226_v28 = vpop.f32.mrf.mxu3  ;;  %v7094_v50 = vadd.f32 %v7044_v10, %v6912_v7  ;;  %v6683_v59 = vpop.f32.mrf.mxu0  ;;  %v16428_v7 = vld [vmem:[#allocation3 + $0x39] sm:$0xff] }
 0x5dd   : > { %v6865_v29 = vpop.f32.mrf.mxu1  ;;  %v6731_v54 = vadd.f32 %v6683_v59, %v16103_v11  ;;  %v16442_v59 = vld [vmem:[#allocation3 + $0x41] sm:$0xff] }
 0x5de   : > { %v16403_v32 = vadd.f32 %v7226_v28, %v7094_v50  ;;  %v16436_v50 = vld [vmem:[#allocation3 + $0x34] sm:$0xff] }
 0x5df   : > { %v6913_v58 = vadd.f32 %v6865_v29, %v6731_v54  ;;  %12104 = vmatmul.msk.f32.gmra.mxu0 %vm33_vm0, %v16405_v52  ;;  %v7841_v29 = vld [vmem:[#allocation3 + $0x42] sm:$0xff] }
 0x5e0   : > { %12128 = vmatmul.msk.f32.gmra.mxu1 %vm33_vm0, %v16119_v15  ;;  %12152 = vmatmul.msk.f32.gmra.mxu2 %vm33_vm0, %v16414_v4 }
 0x5e1   : > { %12176 = vmatmul.msk.f32.gmra.mxu3 %vm33_vm0, %v7839_v24 }
 0x5e3   : > { %v7047_v11 = vpop.f32.mrf.mxu2 }
 0x5e4   : > { %v7229_v1 = vpop.f32.mrf.mxu3  ;;  %v7095_v17 = vadd.f32 %v7047_v11, %v6913_v58  ;;  %v6686_v14 = vpop.f32.mrf.mxu0 }
 0x5e5   : > { %v6868_v62 = vpop.f32.mrf.mxu1  ;;  %v6732_v35 = vadd.f32 %v6686_v14, %v16117_v16  ;;  %v16456_v14 = vld [vmem:[#allocation3 + $0x49] sm:$0xff] }
 0x5e6   : > { %v16420_v55 = vadd.f32 %v7229_v1, %v7095_v17  ;;  %v16450_v17 = vld [vmem:[#allocation3 + $0x3c] sm:$0xff] }
 0x5e7   : > { %v6914_v15 = vadd.f32 %v6868_v62, %v6732_v35  ;;  %12105 = vmatmul.msk.f32.gmra.mxu0 %vm33_vm0, %v16422_v61  ;;  %v7842_v62 = vld [vmem:[#allocation3 + $0x4a] sm:$0xff] }
 0x5e8   : > { %12129 = vmatmul.msk.f32.gmra.mxu1 %vm33_vm0, %v16133_v23  ;;  %12153 = vmatmul.msk.f32.gmra.mxu2 %vm33_vm0, %v16428_v7 }
 0x5e9   : > { %12177 = vmatmul.msk.f32.gmra.mxu3 %vm33_vm0, %v7840_v5 }
 0x5eb   : > { %v7050_v16 = vpop.f32.mrf.mxu2 }
 0x5ec   : > { %v7232_v38 = vpop.f32.mrf.mxu3  ;;  %v7096_v26 = vadd.f32 %v7050_v16, %v6914_v15  ;;  %v6689_v33 = vpop.f32.mrf.mxu0 }
 0x5ed   : > { %v6871_v9 = vpop.f32.mrf.mxu1  ;;  %v6733_v10 = vadd.f32 %v6689_v33, %v16131_v43  ;;  %v16464_v33 = vld [vmem:[#allocation3 + $0x44] sm:$0xff] }
 0x5ee   : > { %v16434_v28 = vadd.f32 %v7232_v38, %v7096_v26 }
 0x5ef   : > { %v6915_v23 = vadd.f32 %v6871_v9, %v6733_v10  ;;  %12106 = vmatmul.msk.f32.gmra.mxu0 %vm33_vm0, %v16436_v50  ;;  %v16470_v9 = vld [vmem:[#allocation3 + $0x51] sm:$0xff] }
 0x5f0   : > { %12130 = vmatmul.msk.f32.gmra.mxu1 %vm33_vm0, %v16147_v40  ;;  %12154 = vmatmul.msk.f32.gmra.mxu2 %vm33_vm0, %v16442_v59  ;;  %v7843_v10 = vld [vmem:[#allocation3 + $0x52] sm:$0xff] }
 0x5f1   : > { %12178 = vmatmul.msk.f32.gmra.mxu3 %vm33_vm0, %v7841_v29 }
 0x5f3   : > { %v7053_v43 = vpop.f32.mrf.mxu2 }
 0x5f4   : > { %v7235_v54 = vpop.f32.mrf.mxu3  ;;  %v7097_v49 = vadd.f32 %v7053_v43, %v6915_v23  ;;  %v6692_v58 = vpop.f32.mrf.mxu0  ;;  %v12195_v23 = vld [vmem:[%s18241_s3 + $0x1a8] sm:$0xff] }
 0x5f5   : > { %v6874_v24 = vpop.f32.mrf.mxu1  ;;  %v6734_v11 = vadd.f32 %v6692_v58, %v16145_v20  ;;  %8118 = vmatpush.msrb.mxu0 %v12195_v23  ;;  %v16504_v23 = vld [vmem:[#allocation3 + $0x54] sm:$0xff] }
 0x5f6   : > { %v16448_v1 = vadd.f32 %v7235_v54, %v7097_v49 }
 0x5f7   : > { %v6916_v40 = vadd.f32 %v6874_v24, %v6734_v11  ;;  %12107 = vmatmul.msk.f32.gmra.mxu0 %vm33_vm0, %v16450_v17 }
 0x5f8   : > { %12131 = vmatmul.msk.f32.gmra.mxu1 %vm33_vm0, %v16170_v51  ;;  %12155 = vmatmul.msk.f32.gmra.mxu2 %vm33_vm0, %v16456_v14 }
 0x5f9   : > { %12179 = vmatmul.msk.f32.gmra.mxu3 %vm33_vm0, %v7842_v62  ;;  %v12219_v62 = vld [vmem:[%s18241_s3 + $0x1c8] sm:$0xff] }
 0x5fa   : > { %8300 = vmatpush.msrb.mxu1 %v12219_v62 }
 0x5fb   : > { %v7056_v20 = vpop.f32.mrf.mxu2 }
 0x5fc   : > { %v7238_v35 = vpop.f32.mrf.mxu3  ;;  %v7098_v15 = vadd.f32 %v7056_v20, %v6916_v40  ;;  %v6695_v5 = vpop.f32.mrf.mxu0  ;;  %v16487_v40 = vld [vmem:[#allocation3 + $0x4c] sm:$0xff] }
 0x5fd   : > { %v6877_v16 = vpop.f32.mrf.mxu1  ;;  %v6735_v38 = vadd.f32 %v6695_v5, %v16168_v18  ;;  %v12243_v18 = vld [vmem:[%s18241_s3 + $0x1e8] sm:$0xff] }
 0x5fe   : > { %v16462_v26 = vadd.f32 %v7238_v35, %v7098_v15  ;;  %8482 = vmatpush.msrb.mxu2 %v12243_v18  ;;  %v16496_v35 = vld [vmem:[#allocation3 + $0x59] sm:$0xff] }
 0x5ff   : > { %v6917_v51 = vadd.f32 %v6877_v16, %v6735_v38  ;;  %12108 = vmatmul.msk.f32.gmra.mxu0 %vm33_vm0, %v16464_v33  ;;  %v7844_v15 = vld [vmem:[#allocation3 + $0x5a] sm:$0xff] }
 0x600   : > { %12132 = vmatmul.msk.f32.gmra.mxu1 %vm33_vm0, %v16187_v0  ;;  %12156 = vmatmul.msk.f32.gmra.mxu2 %vm33_vm0, %v16470_v9  ;;  %v12267_v0 = vld [vmem:[%s18241_s3 + $0x208] sm:$0xff] }
 0x601   : > { %12180 = vmatmul.msk.f32.gmra.mxu3 %vm33_vm0, %v7843_v10 }
 0x602   : > { %8664 = vmatpush.msra.mxu3 %v12267_v0  ;;  %v16510_v0 = vld [vmem:[#allocation3 + $0x61] sm:$0xff] }
 0x603   : > { %v7059_v29 = vpop.f32.mrf.mxu2 }
 0x604   : > { %v7241_v43 = vpop.f32.mrf.mxu3  ;;  %v7099_v54 = vadd.f32 %v7059_v29, %v6917_v51  ;;  %v6698_v49 = vpop.f32.mrf.mxu0  ;;  %v7845_v29 = vld [vmem:[#allocation3 + $0x62] sm:$0xff] }
 0x605   : > { %v6880_v58 = vpop.f32.mrf.mxu1  ;;  %v6736_v24 = vadd.f32 %v6698_v49, %v16185_v2 }
 0x606   : > { %v16485_v11 = vadd.f32 %v7241_v43, %v7099_v54 }
 0x607   : > { %v6918_v20 = vadd.f32 %v6880_v58, %v6736_v24  ;;  %12109 = vmatmul.msk.f32.gmra.mxu0 %vm33_vm0, %v16487_v40 }
 0x608   : > { %12133 = vmatmul.msk.f32.gmra.mxu1 %vm33_vm0, %v16201_v56  ;;  %12157 = vmatmul.msk.f32.gmra.mxu2 %vm33_vm0, %v16496_v35 }
 0x609   : > { %12181 = vmatmul.msk.f32.gmra.mxu3 %vm33_vm0, %v7844_v15  ;;  %v16524_v15 = vld [vmem:[#allocation3 + $0x69] sm:$0xff] }
 0x60b   : > { %v7062_v2 = vpop.f32.mrf.mxu2 }
 0x60c   : > { %v7244_v5 = vpop.f32.mrf.mxu3  ;;  %v7100_v16 = vadd.f32 %v7062_v2, %v6918_v20  ;;  %v6701_v38 = vpop.f32.mrf.mxu0  ;;  %v16518_v20 = vld [vmem:[#allocation3 + $0x5c] sm:$0xff]  ;;  %v7846_v2 = vld [vmem:[#allocation3 + $0x6a] sm:$0xff] }
 0x60d   : > { %v6883_v51 = vpop.f32.mrf.mxu1  ;;  %v6737_v10 = vadd.f32 %v6701_v38, %v16199_v47 }
 0x60e   : > { %v16502_v18 = vadd.f32 %v7244_v5, %v7100_v16 }
 0x60f   : > { %v6919_v56 = vadd.f32 %v6883_v51, %v6737_v10  ;;  %12110 = vmatmul.msk.f32.gmra.mxu0 %vm33_vm0, %v16504_v23 }
 0x610   : > { %12134 = vmatmul.msk.f32.gmra.mxu1 %vm33_vm0, %v16215_v37  ;;  %12158 = vmatmul.msk.f32.gmra.mxu2 %vm33_vm0, %v16510_v0 }
 0x611   : > { %12182 = vmatmul.msk.f32.gmra.mxu3 %vm33_vm0, %v7845_v29  ;;  %v16532_v29 = vld [vmem:[#allocation3 + $0x64] sm:$0xff] }
 0x613   : > { %v7065_v47 = vpop.f32.mrf.mxu2 }
 0x614   : > { %v7247_v43 = vpop.f32.mrf.mxu3  ;;  %v7101_v54 = vadd.f32 %v7065_v47, %v6919_v56  ;;  %v6704_v49 = vpop.f32.mrf.mxu0  ;;  %v16538_v47 = vld [vmem:[#allocation3 + $0x71] sm:$0xff] }
 0x615   : > { %v6886_v58 = vpop.f32.mrf.mxu1  ;;  %v6738_v24 = vadd.f32 %v6704_v49, %v16213_v41 }
 0x616   : > { %v16516_v62 = vadd.f32 %v7247_v43, %v7101_v54  ;;  %v7847_v43 = vld [vmem:[#allocation3 + $0x72] sm:$0xff] }
 0x617   : > { %v6920_v37 = vadd.f32 %v6886_v58, %v6738_v24  ;;  %12111 = vmatmul.msk.f32.gmra.mxu0 %vm33_vm0, %v16518_v20 }
 0x618   : > { %12135 = vmatmul.msk.f32.gmra.mxu1 %vm33_vm0, %v16229_v48  ;;  %12159 = vmatmul.msk.f32.gmra.mxu2 %vm33_vm0, %v16524_v15 }
 0x619   : > { %12183 = vmatmul.msk.f32.gmra.mxu3 %vm33_vm0, %v7846_v2 }
 0x61b   : > { %v7068_v41 = vpop.f32.mrf.mxu2 }
 0x61c   : > { %v7250_v5 = vpop.f32.mrf.mxu3  ;;  %v7102_v16 = vadd.f32 %v7068_v41, %v6920_v37  ;;  %v6707_v38 = vpop.f32.mrf.mxu0  ;;  %v16546_v41 = vld [vmem:[#allocation3 + $0x6c] sm:$0xff] }
 0x61d   : > { %v6889_v51 = vpop.f32.mrf.mxu1  ;;  %v6739_v10 = vadd.f32 %v6707_v38, %v16227_v12  ;;  %v12194_v38 = vld [vmem:[%s18241_s3 + $0x1a0] sm:$0xff] }
 0x61e   : > { %v16530_v56 = vadd.f32 %v7250_v5, %v7102_v16  ;;  %v16552_v5 = vld [vmem:[#allocation3 + $0x79] sm:$0xff]  ;;  %8119 = vmatpush.msrb.mxu0 %v12194_v38 }
 0x61f   : > { %v6921_v48 = vadd.f32 %v6889_v51, %v6739_v10  ;;  %12112 = vmatmul.msk.f32.gmra.mxu0 %vm33_vm0, %v16532_v29  ;;  %v7848_v16 = vld [vmem:[#allocation3 + $0x7a] sm:$0xff] }
 0x620   : > { %12136 = vmatmul.msk.f32.gmra.mxu1 %vm33_vm0, %v16252_v25  ;;  %12160 = vmatmul.msk.f32.gmra.mxu2 %vm33_vm0, %v16538_v47 }
 0x621   : > { %12184 = vmatmul.msk.f32.gmra.mxu3 %vm33_vm0, %v7847_v43 }
 0x623   : > { %v7071_v12 = vpop.f32.mrf.mxu2 }
 0x624   : > { %v7253_v54 = vpop.f32.mrf.mxu3  ;;  %v7103_v49 = vadd.f32 %v7071_v12, %v6921_v48  ;;  %v6710_v58 = vpop.f32.mrf.mxu0 }
 0x625   : > { %v6892_v24 = vpop.f32.mrf.mxu1  ;;  %v6740_v37 = vadd.f32 %v6710_v58, %v16250_v3  ;;  %v12242_v3 = vld [vmem:[%s18241_s3 + $0x1e0] sm:$0xff]  ;;  %v16569_v58 = vld [vmem:[#allocation3 + $0x74] sm:$0xff] }
 0x626   : > { %v16544_v2 = vadd.f32 %v7253_v54, %v7103_v49  ;;  %8483 = vmatpush.msrb.mxu2 %v12242_v3 }
 0x627   : > { %v6922_v25 = vadd.f32 %v6892_v24, %v6740_v37  ;;  %12113 = vmatmul.msk.f32.gmra.mxu0 %vm33_vm0, %v16546_v41  ;;  %v12218_v24 = vld [vmem:[%s18241_s3 + $0x1c0] sm:$0xff] }
 0x628   : > { %12137 = vmatmul.msk.f32.gmra.mxu1 %vm33_vm0, %v16269_v21  ;;  %12161 = vmatmul.msk.f32.gmra.mxu2 %vm33_vm0, %v16552_v5  ;;  %v12266_v21 = vld [vmem:[%s18241_s3 + $0x200] sm:$0xff] }
 0x629   : > { %12185 = vmatmul.msk.f32.gmra.mxu3 %vm33_vm0, %v7848_v16  ;;  %v7849_v16 = vld [vmem:[#allocation3 + $0x82] sm:$0xff]  ;;  %8301 = vmatpush.msrb.mxu1 %v12218_v24 }
 0x62a   : > { %8665 = vmatpush.msra.mxu3 %v12266_v21 }
 0x62b   : > { %v7074_v51 = vpop.f32.mrf.mxu2 }
 0x62c   : > { %v7256_v10 = vpop.f32.mrf.mxu3  ;;  %v7104_v48 = vadd.f32 %v7074_v51, %v6922_v25  ;;  %v6713_v43 = vpop.f32.mrf.mxu0  ;;  %v16578_v25 = vld [vmem:[#allocation3 + $0x81] sm:$0xff] }
 0x62d   : > { %v6895_v12 = vpop.f32.mrf.mxu1  ;;  %v6741_v54 = vadd.f32 %v6713_v43, %v16267_v22  ;;  %v16586_v43 = vld [vmem:[#allocation3 + $0x7c] sm:$0xff] }
 0x62e   : > { %v16567_v49 = vadd.f32 %v7256_v10, %v7104_v48 }
 0x62f   : > { %v6923_v37 = vadd.f32 %v6895_v12, %v6741_v54  ;;  %12114 = vmatmul.msk.f32.gmra.mxu0 %vm33_vm0, %v16569_v58  ;;  %v16592_v12 = vld [vmem:[#allocation3 + $0x89] sm:$0xff] }
 0x630   : > { %12138 = vmatmul.msk.f32.gmra.mxu1 %vm33_vm0, %v16283_v30  ;;  %12162 = vmatmul.msk.f32.gmra.mxu2 %vm33_vm0, %v16578_v25  ;;  %v7850_v54 = vld [vmem:[#allocation3 + $0x8a] sm:$0xff] }
 0x631   : > { %12186 = vmatmul.msk.f32.gmra.mxu3 %vm33_vm0, %v7849_v16 }
 0x633   : > { %v7077_v22 = vpop.f32.mrf.mxu2 }
 0x634   : > { %v7259_v3 = vpop.f32.mrf.mxu3  ;;  %v7105_v38 = vadd.f32 %v7077_v22, %v6923_v37  ;;  %v6716_v21 = vpop.f32.mrf.mxu0 }
 0x635   : > { %v6898_v51 = vpop.f32.mrf.mxu1  ;;  %v6742_v10 = vadd.f32 %v6716_v21, %v16281_v36  ;;  %v16600_v21 = vld [vmem:[#allocation3 + $0x84] sm:$0xff] }
 0x636   : > { %v16584_v48 = vadd.f32 %v7259_v3, %v7105_v38 }
 0x637   : > { %v6924_v30 = vadd.f32 %v6898_v51, %v6742_v10  ;;  %12115 = vmatmul.msk.f32.gmra.mxu0 %vm33_vm0, %v16586_v43  ;;  %v16606_v51 = vld [vmem:[#allocation3 + $0x91] sm:$0xff] }
 0x638   : > { %12139 = vmatmul.msk.f32.gmra.mxu1 %vm33_vm0, %v16297_v31  ;;  %12163 = vmatmul.msk.f32.gmra.mxu2 %vm33_vm0, %v16592_v12  ;;  %v7851_v10 = vld [vmem:[#allocation3 + $0x92] sm:$0xff] }
 0x639   : > { %12187 = vmatmul.msk.f32.gmra.mxu3 %vm33_vm0, %v7850_v54 }
 0x63b   : > { %v7080_v36 = vpop.f32.mrf.mxu2 }
 0x63c   : > { %v7262_v24 = vpop.f32.mrf.mxu3  ;;  %v7106_v37 = vadd.f32 %v7080_v36, %v6924_v30  ;;  %v6719_v16 = vpop.f32.mrf.mxu0 }
 0x63d   : > { %v6901_v22 = vpop.f32.mrf.mxu1  ;;  %v6743_v3 = vadd.f32 %v6719_v16, %v16295_v8 }
 0x63e   : > { %v16598_v38 = vadd.f32 %v7262_v24, %v7106_v37 }
 0x63f   : > { %v6925_v31 = vadd.f32 %v6901_v22, %v6743_v3  ;;  %12116 = vmatmul.msk.f32.gmra.mxu0 %vm33_vm0, %v16600_v21  ;;  %v16614_v22 = vld [vmem:[#allocation3 + $0x8c] sm:$0xff]  ;;  %v16620_v3 = vld [vmem:[#allocation3 + $0x99] sm:$0xff] }
 0x640   : > { %12140 = vmatmul.msk.f32.gmra.mxu1 %vm33_vm0, %v16310_v45  ;;  %12164 = vmatmul.msk.f32.gmra.mxu2 %vm33_vm0, %v16606_v51 }
 0x641   : > { %12188 = vmatmul.msk.f32.gmra.mxu3 %vm33_vm0, %v7851_v10  ;;  %v7852_v10 = vld [vmem:[#allocation3 + $0x9a] sm:$0xff] }
 0x643   : > { %v7083_v8 = vpop.f32.mrf.mxu2 }
 0x644   : > { %v7265_v30 = vpop.f32.mrf.mxu3  ;;  %v7107_v54 = vadd.f32 %v7083_v8, %v6925_v31  ;;  %v6722_v36 = vpop.f32.mrf.mxu0 }
 0x645   : > { %v6904_v24 = vpop.f32.mrf.mxu1  ;;  %v6744_v37 = vadd.f32 %v6722_v36, %v16308_v53 }
 0x646   : > { %v16612_v16 = vadd.f32 %v7265_v30, %v7107_v54 }
 0x647   : > { %v6926_v45 = vadd.f32 %v6904_v24, %v6744_v37  ;;  %12117 = vmatmul.msk.f32.gmra.mxu0 %vm33_vm0, %v16614_v22  ;;  %v16628_v37 = vld [vmem:[#allocation3 + $0x94] sm:$0xff] }
 0x648   : > { %12141 = vmatmul.msk.f32.gmra.mxu1 %vm33_vm0, %v16332_v46  ;;  %12165 = vmatmul.msk.f32.gmra.mxu2 %vm33_vm0, %v16620_v3 }
 0x649   : > { %12189 = vmatmul.msk.f32.gmra.mxu3 %vm33_vm0, %v7852_v10  ;;  %v12365_v10 = vld [vmem:[%s18241_s3 + $0x298] sm:$0xff] }
 0x64a   : > { %9390 = vmatpush.msrb.mxu3 %v12365_v10 }
 0x64b   : > { %v7086_v53 = vpop.f32.mrf.mxu2 }
 0x64c   : > { %v7268_v31 = vpop.f32.mrf.mxu3  ;;  %v7108_v8 = vadd.f32 %v7086_v53, %v6926_v45  ;;  %v7393_v30 = vpop.f32.mrf.mxu0  ;;  %v12293_v45 = vld [vmem:[%s18241_s3 + $0x238] sm:$0xff] }
 0x64d   : > { %v7575_v54 = vpop.f32.mrf.mxu1  ;;  %v7453_v36 = vadd.f32 %v7393_v30, %v16330_v19  ;;  %v12341_v19 = vld [vmem:[%s18241_s3 + $0x278] sm:$0xff]  ;;  %8844 = vmatpush.msra.mxu0 %v12293_v45 }
 0x64e   : > { %v16626_v24 = vadd.f32 %v7268_v31, %v7108_v8  ;;  %9208 = vmatpush.msra.mxu2 %v12341_v19 }
 0x64f   : > { %v7635_v46 = vadd.f32 %v7575_v54, %v7453_v36  ;;  %12118 = vmatmul.msk.f32.gmra.mxu0 %vm33_vm0, %v16628_v37  ;;  %v16650_v54 = vld [vmem:[#allocation3 + $0x9c] sm:$0xff] }
 0x650   : > { %18312 = vst [vmem:[#allocation9_spill] sm:$0xff] %v16626_v24  ;;  %12142 = vmatmul.msk.f32.gmra.mxu1 %vm33_vm0, %v16348_v44  ;;  %12166 = vmatmul.msk.f32.gmra.mxu2 %vm33_vm0, %v16350_v13  ;;  %v12317_v36 = vld [vmem:[%s18241_s3 + $0x258] sm:$0xff] }
 0x651   : > { %12190 = vmatmul.msk.f32.gmra.mxu3 %vm33_vm0, %v16356_v60  ;;  %9026 = vmatpush.msra.mxu1 %v12317_v36 }
 0x653   : > { %v7757_v44 = vpop.f32.mrf.mxu2 }
 0x654   : > { %v7939_v13 = vpop.f32.mrf.mxu3  ;;  %v7817_v53 = vadd.f32 %v7757_v44, %v7635_v46  ;;  %v7396_v31 = vpop.f32.mrf.mxu0 }
 0x655   : > { %v7578_v60 = vpop.f32.mrf.mxu1  ;;  %v7454_v8 = vadd.f32 %v7396_v31, %v16346_v39  ;;  %v16668_v31 = vld [vmem:[#allocation3 + $0xb0] sm:$0xff] }
 0x656   : > { %v16648_v30 = vadd.f32 %v7939_v13, %v7817_v53  ;;  %v16666_v53 = vld [vmem:[#allocation3 + $0xa4] sm:$0xff] }
 0x657   : > { %v7636_v24 = vadd.f32 %v7578_v60, %v7454_v8  ;;  %12119 = vmatmul.msk.f32.gmra.mxu0 %vm33_vm0, %v16650_v54 }
 0x658   : > { %12143 = vmatmul.msk.f32.gmra.mxu1 %vm33_vm0, %v16364_v34  ;;  %12167 = vmatmul.msk.f32.gmra.mxu2 %vm33_vm0, %v16366_v57  ;;  %v16674_v57 = vld [vmem:[#allocation3 + $0xb1] sm:$0xff] }
 0x659   : > { %12191 = vmatmul.msk.f32.gmra.mxu3 %vm33_vm0, %v16372_v42  ;;  %v7855_v42 = vld [vmem:[#allocation3 + $0xb2] sm:$0xff] }
 0x65b   : > { %v7760_v39 = vpop.f32.mrf.mxu2 }
 0x65c   : > { %v7942_v46 = vpop.f32.mrf.mxu3  ;;  %v7818_v19 = vadd.f32 %v7760_v39, %v7636_v24  ;;  %v7399_v45 = vpop.f32.mrf.mxu0 }
 0x65d   : > { %v7581_v10 = vpop.f32.mrf.mxu1  ;;  %v7455_v44 = vadd.f32 %v7399_v45, %v16362_v63  ;;  %v16684_v45 = vld [vmem:[#allocation3 + $0xb8] sm:$0xff] }
 0x65e   : > { %v16664_v13 = vadd.f32 %v7942_v46, %v7818_v19  ;;  %v16682_v19 = vld [vmem:[#allocation3 + $0xac] sm:$0xff]  ;;  %18314 = vst [vmem:[#allocation12_spill] sm:$0xff] %v16684_v45 }
 0x65f   : > { %v7637_v34 = vadd.f32 %v7581_v10, %v7455_v44  ;;  %12120 = vmatmul.msk.f32.gmra.mxu0 %vm33_vm0, %v16666_v53  ;;  %v16690_v44 = vld [vmem:[#allocation3 + $0xb9] sm:$0xff] }
 0x660   : > { %12144 = vmatmul.msk.f32.gmra.mxu1 %vm33_vm0, %v16668_v31  ;;  %12168 = vmatmul.msk.f32.gmra.mxu2 %vm33_vm0, %v16674_v57  ;;  %18315 = vst [vmem:[#allocation13_spill] sm:$0xff] %v16690_v44 }
 0x661   : > { %12192 = vmatmul.msk.f32.gmra.mxu3 %vm33_vm0, %v7855_v42 }
 0x663   : > { %v7763_v63 = vpop.f32.mrf.mxu2 }
 0x664   : > { %v7945_v24 = vpop.f32.mrf.mxu3  ;;  %v7819_v60 = vadd.f32 %v7763_v63, %v7637_v34  ;;  %v7402_v8 = vpop.f32.mrf.mxu0  ;;  %v7856_v34 = vld [vmem:[#allocation3 + $0xba] sm:$0xff] }
 0x665   : > { %v7584_v36 = vpop.f32.mrf.mxu1  ;;  %v7456_v39 = vadd.f32 %v7402_v8, %v16378_v6 }
 0x666   : > { %v16680_v46 = vadd.f32 %v7945_v24, %v7819_v60 }
 0x667   : > { %v7638_v10 = vadd.f32 %v7584_v36, %v7456_v39  ;;  %12121 = vmatmul.msk.f32.gmra.mxu0 %vm33_vm0, %v16682_v19  ;;  %v8019_v39 = vld [vmem:[#allocation3 + $0x23] sm:$0xff] }
 0x668   : > { %18313 = vst [vmem:[#allocation11_spill] sm:$0xff] %v16680_v46  ;;  %12145 = vmatmul.msk.f32.gmra.mxu1 %vm33_vm0, %v16684_v45  ;;  %12169 = vmatmul.msk.f32.gmra.mxu2 %vm33_vm0, %v16690_v44  ;;  %v8383_v45 = vld [vmem:[#allocation3 + $0x30] sm:$0xff] }
 0x669   : > { %12193 = vmatmul.msk.f32.gmra.mxu3 %vm33_vm0, %v7856_v34 }
 0x66b   : > { %v7766_v6 = vpop.f32.mrf.mxu2 }
 0x66c   : > { %v7948_v42 = vpop.f32.mrf.mxu3  ;;  %v7820_v63 = vadd.f32 %v7766_v6, %v7638_v10  ;;  %v7405_v24 = vpop.f32.mrf.mxu0 }
 0x66d   : > { %v7587_v60 = vpop.f32.mrf.mxu1  ;;  %v7457_v8 = vadd.f32 %v7405_v24, %v16386_v27  ;;  %v8020_v24 = vld [vmem:[#allocation3 + $0x2b] sm:$0xff] }
 0x66e   : > { %v16696_v36 = vadd.f32 %v7948_v42, %v7820_v63 }
 0x66f   : > { %v7639_v46 = vadd.f32 %v7587_v60, %v7457_v8  ;;  %12198 = vmatmul.msk.f32.vlgmr.msrb.gmra.mxu0 %vm33_vm0, %v8019_v39 }
 0x670   : > { %12222 = vmatmul.msk.f32.vlgmr.msrb.gmra.mxu1 %vm33_vm0, %v16405_v52  ;;  %12246 = vmatmul.msk.f32.vlgmr.msrb.gmra.mxu2 %vm33_vm0, %v8383_v45  ;;  %v8384_v52 = vld [vmem:[#allocation3 + $0x38] sm:$0xff] }
 0x671   : > { %12270 = vmatmul.msk.f32.vlgmr.msra.gmra.mxu3 %vm33_vm0, %v16414_v4  ;;  %v12340_v4 = vld [vmem:[%s18241_s3 + $0x270] sm:$0xff] }
 0x672   : > { %9209 = vmatpush.msra.mxu2 %v12340_v4 }
 0x673   : > { %v7769_v10 = vpop.f32.mrf.mxu2 }
 0x674   : > { %v7951_v34 = vpop.f32.mrf.mxu3  ;;  %v7821_v6 = vadd.f32 %v7769_v10, %v7639_v46  ;;  %v7408_v44 = vpop.f32.mrf.mxu0  ;;  %v12364_v46 = vld [vmem:[%s18241_s3 + $0x290] sm:$0xff] }
 0x675   : > { %v7590_v27 = vpop.f32.mrf.mxu1  ;;  %v7458_v42 = vadd.f32 %v7408_v44, %v16403_v32  ;;  %v12292_v32 = vld [vmem:[%s18241_s3 + $0x230] sm:$0xff]  ;;  %9391 = vmatpush.msrb.mxu3 %v12364_v46 }
 0x676   : > { %v16705_v63 = vadd.f32 %v7951_v34, %v7821_v6  ;;  %8845 = vmatpush.msra.mxu0 %v12292_v32  ;;  %v16725_v34 = vld [vmem:[#allocation3 + $0x33] sm:$0xff] }
 0x677   : > { %v7640_v60 = vadd.f32 %v7590_v27, %v7458_v42  ;;  %12199 = vmatmul.msk.f32.gmra.mxu0 %vm33_vm0, %v8020_v24  ;;  %v12316_v6 = vld [vmem:[%s18241_s3 + $0x250] sm:$0xff]  ;;  %v16734_v42 = vld [vmem:[#allocation3 + $0x40] sm:$0xff] }
 0x678   : > { %12223 = vmatmul.msk.f32.gmra.mxu1 %vm33_vm0, %v16422_v61  ;;  %12247 = vmatmul.msk.f32.gmra.mxu2 %vm33_vm0, %v8384_v52 }
 0x679   : > { %12271 = vmatmul.msk.f32.gmra.mxu3 %vm33_vm0, %v16428_v7  ;;  %9027 = vmatpush.msra.mxu1 %v12316_v6 }
 0x67b   : > { %v7772_v61 = vpop.f32.mrf.mxu2 }
 0x67c   : > { %v7954_v45 = vpop.f32.mrf.mxu3  ;;  %v7822_v44 = vadd.f32 %v7772_v61, %v7640_v60  ;;  %v7411_v8 = vpop.f32.mrf.mxu0  ;;  %v16743_v61 = vld [vmem:[#allocation3 + $0x3b] sm:$0xff] }
 0x67d   : > { %v7593_v7 = vpop.f32.mrf.mxu1  ;;  %v7459_v39 = vadd.f32 %v7411_v8, %v16420_v55 }
 0x67e   : > { %v16723_v10 = vadd.f32 %v7954_v45, %v7822_v44 }
 0x67f   : > { %v7641_v27 = vadd.f32 %v7593_v7, %v7459_v39  ;;  %12200 = vmatmul.msk.f32.gmra.mxu0 %vm33_vm0, %v16725_v34 }
 0x680   : > { %12224 = vmatmul.msk.f32.gmra.mxu1 %vm33_vm0, %v16436_v50  ;;  %12248 = vmatmul.msk.f32.gmra.mxu2 %vm33_vm0, %v16734_v42 }
 0x681   : > { %12272 = vmatmul.msk.f32.gmra.mxu3 %vm33_vm0, %v16442_v59  ;;  %v16749_v59 = vld [vmem:[#allocation3 + $0x48] sm:$0xff] }
 0x683   : > { %v7775_v55 = vpop.f32.mrf.mxu2 }
 0x684   : > { %v7957_v24 = vpop.f32.mrf.mxu3  ;;  %v7823_v60 = vadd.f32 %v7775_v55, %v7641_v27  ;;  %v7414_v52 = vpop.f32.mrf.mxu0  ;;  %v16758_v27 = vld [vmem:[#allocation3 + $0x43] sm:$0xff]  ;;  %v16764_v55 = vld [vmem:[#allocation3 + $0x50] sm:$0xff] }
 0x685   : > { %v7596_v4 = vpop.f32.mrf.mxu1  ;;  %v7460_v32 = vadd.f32 %v7414_v52, %v16434_v28 }
 0x686   : > { %v16741_v46 = vadd.f32 %v7957_v24, %v7823_v60 }
 0x687   : > { %v7642_v50 = vadd.f32 %v7596_v4, %v7460_v32  ;;  %12201 = vmatmul.msk.f32.gmra.mxu0 %vm33_vm0, %v16743_v61 }
 0x688   : > { %12225 = vmatmul.msk.f32.gmra.mxu1 %vm33_vm0, %v16450_v17  ;;  %12249 = vmatmul.msk.f32.gmra.mxu2 %vm33_vm0, %v16749_v59 }
 0x689   : > { %12273 = vmatmul.msk.f32.gmra.mxu3 %vm33_vm0, %v16456_v14 }
 0x68b   : > { %v7778_v28 = vpop.f32.mrf.mxu2 }
 0x68c   : > { %v7960_v45 = vpop.f32.mrf.mxu3  ;;  %v7824_v44 = vadd.f32 %v7778_v28, %v7642_v50  ;;  %v7417_v8 = vpop.f32.mrf.mxu0  ;;  %v16773_v50 = vld [vmem:[#allocation3 + $0x4b] sm:$0xff]  ;;  %v16779_v28 = vld [vmem:[#allocation3 + $0x58] sm:$0xff] }
 0x68d   : > { %v7599_v7 = vpop.f32.mrf.mxu1  ;;  %v7461_v39 = vadd.f32 %v7417_v8, %v16448_v1 }
 0x68e   : > { %v16756_v6 = vadd.f32 %v7960_v45, %v7824_v44 }
 0x68f   : > { %v7643_v17 = vadd.f32 %v7599_v7, %v7461_v39  ;;  %12202 = vmatmul.msk.f32.gmra.mxu0 %vm33_vm0, %v16758_v27 }
 0x690   : > { %12226 = vmatmul.msk.f32.gmra.mxu1 %vm33_vm0, %v16464_v33  ;;  %12250 = vmatmul.msk.f32.gmra.mxu2 %vm33_vm0, %v16764_v55 }
 0x691   : > { %12274 = vmatmul.msk.f32.gmra.mxu3 %vm33_vm0, %v16470_v9 }
 0x693   : > { %v7781_v1 = vpop.f32.mrf.mxu2 }
 0x694   : > { %v7963_v14 = vpop.f32.mrf.mxu3  ;;  %v7825_v24 = vadd.f32 %v7781_v1, %v7643_v17  ;;  %v7420_v60 = vpop.f32.mrf.mxu0  ;;  %v16788_v17 = vld [vmem:[#allocation3 + $0x53] sm:$0xff]  ;;  %v16794_v1 = vld [vmem:[#allocation3 + $0x60] sm:$0xff] }
 0x695   : > { %v7602_v52 = vpop.f32.mrf.mxu1  ;;  %v7462_v4 = vadd.f32 %v7420_v60, %v16462_v26 }
 0x696   : > { %v16771_v32 = vadd.f32 %v7963_v14, %v7825_v24 }
 0x697   : > { %v7644_v33 = vadd.f32 %v7602_v52, %v7462_v4  ;;  %12203 = vmatmul.msk.f32.gmra.mxu0 %vm33_vm0, %v16773_v50 }
 0x698   : > { %12227 = vmatmul.msk.f32.gmra.mxu1 %vm33_vm0, %v16487_v40  ;;  %12251 = vmatmul.msk.f32.gmra.mxu2 %vm33_vm0, %v16779_v28 }
 0x699   : > { %12275 = vmatmul.msk.f32.gmra.mxu3 %vm33_vm0, %v16496_v35  ;;  %v12291_v35 = vld [vmem:[%s18241_s3 + $0x228] sm:$0xff] }
 0x69a   : > { %8846 = vmatpush.msra.mxu0 %v12291_v35 }
 0x69b   : > { %v7784_v26 = vpop.f32.mrf.mxu2 }
 0x69c   : > { %v7966_v9 = vpop.f32.mrf.mxu3  ;;  %v7826_v45 = vadd.f32 %v7784_v26, %v7644_v33  ;;  %v7423_v44 = vpop.f32.mrf.mxu0  ;;  %v16812_v26 = vld [vmem:[#allocation3 + $0x5b] sm:$0xff] }
 0x69d   : > { %v7605_v8 = vpop.f32.mrf.mxu1  ;;  %v7463_v7 = vadd.f32 %v7423_v44, %v16485_v11  ;;  %v12339_v11 = vld [vmem:[%s18241_s3 + $0x268] sm:$0xff] }
 0x69e   : > { %v16786_v39 = vadd.f32 %v7966_v9, %v7826_v45  ;;  %9210 = vmatpush.msra.mxu2 %v12339_v11  ;;  %v12315_v9 = vld [vmem:[%s18241_s3 + $0x248] sm:$0xff] }
 0x69f   : > { %v7645_v40 = vadd.f32 %v7605_v8, %v7463_v7  ;;  %12204 = vmatmul.msk.f32.gmra.mxu0 %vm33_vm0, %v16788_v17  ;;  %v16821_v44 = vld [vmem:[#allocation3 + $0x68] sm:$0xff]  ;;  %9028 = vmatpush.msra.mxu1 %v12315_v9 }
 0x6a0   : > { %12228 = vmatmul.msk.f32.gmra.mxu1 %vm33_vm0, %v16504_v23  ;;  %12252 = vmatmul.msk.f32.gmra.mxu2 %vm33_vm0, %v16794_v1  ;;  %v12363_v23 = vld [vmem:[%s18241_s3 + $0x288] sm:$0xff] }
 0x6a1   : > { %12276 = vmatmul.msk.f32.gmra.mxu3 %vm33_vm0, %v16510_v0 }
 0x6a2   : > { %9392 = vmatpush.msrb.mxu3 %v12363_v23 }
 0x6a3   : > { %v7787_v14 = vpop.f32.mrf.mxu2 }
 0x6a4   : > { %v7969_v24 = vpop.f32.mrf.mxu3  ;;  %v7827_v60 = vadd.f32 %v7787_v14, %v7645_v40  ;;  %v7426_v52 = vpop.f32.mrf.mxu0  ;;  %v16830_v14 = vld [vmem:[#allocation3 + $0x63] sm:$0xff] }
 0x6a5   : > { %v7608_v0 = vpop.f32.mrf.mxu1  ;;  %v7464_v4 = vadd.f32 %v7426_v52, %v16502_v18 }
 0x6a6   : > { %v16810_v33 = vadd.f32 %v7969_v24, %v7827_v60 }
 0x6a7   : > { %v7646_v45 = vadd.f32 %v7608_v0, %v7464_v4  ;;  %12205 = vmatmul.msk.f32.gmra.mxu0 %vm33_vm0, %v16812_v26 }
 0x6a8   : > { %12229 = vmatmul.msk.f32.gmra.mxu1 %vm33_vm0, %v16518_v20  ;;  %12253 = vmatmul.msk.f32.gmra.mxu2 %vm33_vm0, %v16821_v44 }
 0x6a9   : > { %12277 = vmatmul.msk.f32.gmra.mxu3 %vm33_vm0, %v16524_v15  ;;  %v16836_v15 = vld [vmem:[#allocation3 + $0x70] sm:$0xff] }
 0x6ab   : > { %v7790_v18 = vpop.f32.mrf.mxu2 }
 0x6ac   : > { %v7972_v8 = vpop.f32.mrf.mxu3  ;;  %v7828_v7 = vadd.f32 %v7790_v18, %v7646_v45  ;;  %v7429_v40 = vpop.f32.mrf.mxu0  ;;  %v16845_v45 = vld [vmem:[#allocation3 + $0x6b] sm:$0xff]  ;;  %v16851_v18 = vld [vmem:[#allocation3 + $0x78] sm:$0xff] }
 0x6ad   : > { %v7611_v11 = vpop.f32.mrf.mxu1  ;;  %v7465_v35 = vadd.f32 %v7429_v40, %v16516_v62 }
 0x6ae   : > { %v16828_v23 = vadd.f32 %v7972_v8, %v7828_v7 }
 0x6af   : > { %v7647_v20 = vadd.f32 %v7611_v11, %v7465_v35  ;;  %12206 = vmatmul.msk.f32.gmra.mxu0 %vm33_vm0, %v16830_v14 }
 0x6b0   : > { %12230 = vmatmul.msk.f32.gmra.mxu1 %vm33_vm0, %v16532_v29  ;;  %12254 = vmatmul.msk.f32.gmra.mxu2 %vm33_vm0, %v16836_v15 }
 0x6b1   : > { %12278 = vmatmul.msk.f32.gmra.mxu3 %vm33_vm0, %v16538_v47 }
 0x6b3   : > { %v7793_v62 = vpop.f32.mrf.mxu2 }
 0x6b4   : > { %v7975_v24 = vpop.f32.mrf.mxu3  ;;  %v7829_v60 = vadd.f32 %v7793_v62, %v7647_v20  ;;  %v7432_v52 = vpop.f32.mrf.mxu0  ;;  %v16860_v20 = vld [vmem:[#allocation3 + $0x73] sm:$0xff]  ;;  %v16866_v62 = vld [vmem:[#allocation3 + $0x80] sm:$0xff] }
 0x6b5   : > { %v7614_v0 = vpop.f32.mrf.mxu1  ;;  %v7466_v4 = vadd.f32 %v7432_v52, %v16530_v56 }
 0x6b6   : > { %v16843_v9 = vadd.f32 %v7975_v24, %v7829_v60 }
 0x6b7   : > { %v7648_v29 = vadd.f32 %v7614_v0, %v7466_v4  ;;  %12207 = vmatmul.msk.f32.gmra.mxu0 %vm33_vm0, %v16845_v45 }
 0x6b8   : > { %12231 = vmatmul.msk.f32.gmra.mxu1 %vm33_vm0, %v16546_v41  ;;  %12255 = vmatmul.msk.f32.gmra.mxu2 %vm33_vm0, %v16851_v18 }
 0x6b9   : > { %12279 = vmatmul.msk.f32.gmra.mxu3 %vm33_vm0, %v16552_v5 }
 0x6bb   : > { %v7796_v56 = vpop.f32.mrf.mxu2 }
 0x6bc   : > { %v7978_v47 = vpop.f32.mrf.mxu3  ;;  %v7830_v8 = vadd.f32 %v7796_v56, %v7648_v29  ;;  %v7435_v7 = vpop.f32.mrf.mxu0  ;;  %v16875_v29 = vld [vmem:[#allocation3 + $0x7b] sm:$0xff]  ;;  %v16881_v56 = vld [vmem:[#allocation3 + $0x88] sm:$0xff] }
 0x6bd   : > { %v7617_v40 = vpop.f32.mrf.mxu1  ;;  %v7467_v11 = vadd.f32 %v7435_v7, %v16544_v2 }
 0x6be   : > { %v16858_v35 = vadd.f32 %v7978_v47, %v7830_v8 }
 0x6bf   : > { %v7649_v41 = vadd.f32 %v7617_v40, %v7467_v11  ;;  %12208 = vmatmul.msk.f32.gmra.mxu0 %vm33_vm0, %v16860_v20 }
 0x6c0   : > { %12232 = vmatmul.msk.f32.gmra.mxu1 %vm33_vm0, %v16569_v58  ;;  %12256 = vmatmul.msk.f32.gmra.mxu2 %vm33_vm0, %v16866_v62 }
 0x6c1   : > { %12280 = vmatmul.msk.f32.gmra.mxu3 %vm33_vm0, %v16578_v25  ;;  %v12290_v25 = vld [vmem:[%s18241_s3 + $0x220] sm:$0xff] }
 0x6c2   : > { %8847 = vmatpush.msra.mxu0 %v12290_v25 }
 0x6c3   : > { %v7799_v2 = vpop.f32.mrf.mxu2 }
 0x6c4   : > { %v7981_v5 = vpop.f32.mrf.mxu3  ;;  %v7831_v24 = vadd.f32 %v7799_v2, %v7649_v41  ;;  %v7438_v60 = vpop.f32.mrf.mxu0  ;;  %v16899_v2 = vld [vmem:[#allocation3 + $0x83] sm:$0xff] }
 0x6c5   : > { %v7620_v52 = vpop.f32.mrf.mxu1  ;;  %v7468_v0 = vadd.f32 %v7438_v60, %v16567_v49  ;;  %v12338_v49 = vld [vmem:[%s18241_s3 + $0x260] sm:$0xff]  ;;  %v16908_v60 = vld [vmem:[#allocation3 + $0x90] sm:$0xff] }
 0x6c6   : > { %v16873_v4 = vadd.f32 %v7981_v5, %v7831_v24  ;;  %9211 = vmatpush.msra.mxu2 %v12338_v49  ;;  %v12314_v5 = vld [vmem:[%s18241_s3 + $0x240] sm:$0xff] }
 0x6c7   : > { %v7650_v58 = vadd.f32 %v7620_v52, %v7468_v0  ;;  %12209 = vmatmul.msk.f32.gmra.mxu0 %vm33_vm0, %v16875_v29  ;;  %9029 = vmatpush.msra.mxu1 %v12314_v5 }
 0x6c8   : > { %12233 = vmatmul.msk.f32.gmra.mxu1 %vm33_vm0, %v16586_v43  ;;  %12257 = vmatmul.msk.f32.gmra.mxu2 %vm33_vm0, %v16881_v56  ;;  %v12362_v43 = vld [vmem:[%s18241_s3 + $0x280] sm:$0xff] }
 0x6c9   : > { %12281 = vmatmul.msk.f32.gmra.mxu3 %vm33_vm0, %v16592_v12 }
 0x6ca   : > { %9393 = vmatpush.msrb.mxu3 %v12362_v43 }
 0x6cb   : > { %v7802_v47 = vpop.f32.mrf.mxu2 }
 0x6cc   : > { %v7984_v8 = vpop.f32.mrf.mxu3  ;;  %v7832_v7 = vadd.f32 %v7802_v47, %v7650_v58  ;;  %v7441_v40 = vpop.f32.mrf.mxu0  ;;  %v16917_v47 = vld [vmem:[#allocation3 + $0x8b] sm:$0xff] }
 0x6cd   : > { %v7623_v12 = vpop.f32.mrf.mxu1  ;;  %v7469_v11 = vadd.f32 %v7441_v40, %v16584_v48 }
 0x6ce   : > { %v16897_v41 = vadd.f32 %v7984_v8, %v7832_v7 }
 0x6cf   : > { %v7651_v24 = vadd.f32 %v7623_v12, %v7469_v11  ;;  %12210 = vmatmul.msk.f32.gmra.mxu0 %vm33_vm0, %v16899_v2 }
 0x6d0   : > { %12234 = vmatmul.msk.f32.gmra.mxu1 %vm33_vm0, %v16600_v21  ;;  %12258 = vmatmul.msk.f32.gmra.mxu2 %vm33_vm0, %v16908_v60 }
 0x6d1   : > { %12282 = vmatmul.msk.f32.gmra.mxu3 %vm33_vm0, %v16606_v51  ;;  %v16923_v51 = vld [vmem:[#allocation3 + $0x98] sm:$0xff] }
 0x6d3   : > { %v7805_v48 = vpop.f32.mrf.mxu2 }
 0x6d4   : > { %v7987_v52 = vpop.f32.mrf.mxu3  ;;  %v7833_v0 = vadd.f32 %v7805_v48, %v7651_v24  ;;  %v7444_v58 = vpop.f32.mrf.mxu0  ;;  %v16932_v24 = vld [vmem:[#allocation3 + $0x93] sm:$0xff]  ;;  %v16938_v48 = vld [vmem:[#allocation3 + $0xa0] sm:$0xff] }
 0x6d5   : > { %v7626_v49 = vpop.f32.mrf.mxu1  ;;  %v7470_v25 = vadd.f32 %v7444_v58, %v16598_v38 }
 0x6d6   : > { %v16915_v43 = vadd.f32 %v7987_v52, %v7833_v0 }
 0x6d7   : > { %v7652_v21 = vadd.f32 %v7626_v49, %v7470_v25  ;;  %12211 = vmatmul.msk.f32.gmra.mxu0 %vm33_vm0, %v16917_v47  ;;  %v18316_v25 = vld [vmem:[#allocation9_spill] sm:$0xff] }
 0x6d8   : > { %12235 = vmatmul.msk.f32.gmra.mxu1 %vm33_vm0, %v16614_v22  ;;  %12259 = vmatmul.msk.f32.gmra.mxu2 %vm33_vm0, %v16923_v51 }
 0x6d9   : > { %12283 = vmatmul.msk.f32.gmra.mxu3 %vm33_vm0, %v16620_v3  ;;  %v8579_v3 = vld [vmem:[#allocation3 + $0xa1] sm:$0xff] }
 0x6db   : > { %v7808_v38 = vpop.f32.mrf.mxu2 }
 0x6dc   : > { %v7990_v8 = vpop.f32.mrf.mxu3  ;;  %v7834_v7 = vadd.f32 %v7808_v38, %v7652_v21  ;;  %v7447_v40 = vpop.f32.mrf.mxu0 }
 0x6dd   : > { %v7629_v12 = vpop.f32.mrf.mxu1  ;;  %v7471_v11 = vadd.f32 %v7447_v40, %v16612_v16  ;;  %v8580_v40 = vld [vmem:[#allocation3 + $0xa9] sm:$0xff] }
 0x6de   : > { %v16930_v5 = vadd.f32 %v7990_v8, %v7834_v7  ;;  %v16946_v8 = vld [vmem:[#allocation3 + $0x9b] sm:$0xff]  ;;  %v16952_v7 = vld [vmem:[#allocation3 + $0xa8] sm:$0xff] }
 0x6df   : > { %v7653_v22 = vadd.f32 %v7629_v12, %v7471_v11  ;;  %12212 = vmatmul.msk.f32.gmra.mxu0 %vm33_vm0, %v16932_v24 }
 0x6e0   : > { %12236 = vmatmul.msk.f32.gmra.mxu1 %vm33_vm0, %v16628_v37  ;;  %12260 = vmatmul.msk.f32.gmra.mxu2 %vm33_vm0, %v16938_v48 }
 0x6e1   : > { %12284 = vmatmul.msk.f32.gmra.mxu3 %vm33_vm0, %v8579_v3 }
 0x6e3   : > { %v7811_v16 = vpop.f32.mrf.mxu2 }
 0x6e4   : > { %v7993_v52 = vpop.f32.mrf.mxu3  ;;  %v7835_v0 = vadd.f32 %v7811_v16, %v7653_v22  ;;  %v7450_v58 = vpop.f32.mrf.mxu0 }
 0x6e5   : > { %v7632_v49 = vpop.f32.mrf.mxu1  ;;  %v7472_v21 = vadd.f32 %v7450_v58, %v18316_v25  ;;  %v16960_v58 = vld [vmem:[#allocation3 + $0xa3] sm:$0xff]  ;;  %v12461_v25 = vld [vmem:[%s18241_s3 + $0x318] sm:$0xff] }
 0x6e6   : > { %v16944_v38 = vadd.f32 %v7993_v52, %v7835_v0  ;;  %10118 = vmatpush.msra.mxu3 %v12461_v25 }
 0x6e7   : > { %v7654_v37 = vadd.f32 %v7632_v49, %v7472_v21  ;;  %12213 = vmatmul.msk.f32.gmra.mxu0 %vm33_vm0, %v16946_v8  ;;  %v12389_v49 = vld [vmem:[%s18241_s3 + $0x2b8] sm:$0xff] }
 0x6e8   : > { %12237 = vmatmul.msk.f32.gmra.mxu1 %vm33_vm0, %v16650_v54  ;;  %12261 = vmatmul.msk.f32.gmra.mxu2 %vm33_vm0, %v16952_v7 }
 0x6e9   : > { %12285 = vmatmul.msk.f32.gmra.mxu3 %vm33_vm0, %v8580_v40  ;;  %9572 = vmatpush.msrb.mxu0 %v12389_v49 }
 0x6eb   : > { %v7814_v12 = vpop.f32.mrf.mxu2 }
 0x6ec   : > { %v7996_v11 = vpop.f32.mrf.mxu3  ;;  %v7836_v22 = vadd.f32 %v7814_v12, %v7654_v37  ;;  %v8121_v3 = vpop.f32.mrf.mxu0 }
 0x6ed   : > { %v8303_v16 = vpop.f32.mrf.mxu1  ;;  %v8181_v52 = vadd.f32 %v8121_v3, %v16648_v30  ;;  %v12437_v30 = vld [vmem:[%s18241_s3 + $0x2f8] sm:$0xff] }
 0x6ee   : > { %v16958_v0 = vadd.f32 %v7996_v11, %v7836_v22  ;;  %9936 = vmatpush.msrb.mxu2 %v12437_v30  ;;  %v16982_v11 = vld [vmem:[#allocation3 + $0xab] sm:$0xff]  ;;  %v12413_v22 = vld [vmem:[%s18241_s3 + $0x2d8] sm:$0xff] }
 0x6ef   : > { %v8363_v54 = vadd.f32 %v8303_v16, %v8181_v52  ;;  %12214 = vmatmul.msk.f32.gmra.mxu0 %vm33_vm0, %v16960_v58  ;;  %v18317_v16 = vld [vmem:[#allocation12_spill] sm:$0xff]  ;;  %v18318_v52 = vld [vmem:[#allocation13_spill] sm:$0xff]  ;;  %9754 = vmatpush.msrb.mxu1 %v12413_v22 }
 0x6f0   : > { %12238 = vmatmul.msk.f32.gmra.mxu1 %vm33_vm0, %v16666_v53  ;;  %12262 = vmatmul.msk.f32.gmra.mxu2 %vm33_vm0, %v16668_v31  ;;  %v8583_v22 = vld [vmem:[#allocation3 + $0xc1] sm:$0xff] }
 0x6f1   : > { %12286 = vmatmul.msk.f32.gmra.mxu3 %vm33_vm0, %v16674_v57 }
 0x6f3   : > { %v8485_v53 = vpop.f32.mrf.mxu2 }
 0x6f4   : > { %v8667_v31 = vpop.f32.mrf.mxu3  ;;  %v8545_v21 = vadd.f32 %v8485_v53, %v8363_v54  ;;  %v8124_v37 = vpop.f32.mrf.mxu0  ;;  %v18319_v53 = vld [vmem:[#allocation11_spill] sm:$0xff] }
 0x6f5   : > { %v8306_v57 = vpop.f32.mrf.mxu1  ;;  %v8182_v40 = vadd.f32 %v8124_v37, %v16664_v13  ;;  %v16998_v37 = vld [vmem:[#allocation3 + $0xb3] sm:$0xff] }
 0x6f6   : > { %v16980_v12 = vadd.f32 %v8667_v31, %v8545_v21 }
 0x6f7   : > { %v8364_v3 = vadd.f32 %v8306_v57, %v8182_v40  ;;  %12215 = vmatmul.msk.f32.gmra.mxu0 %vm33_vm0, %v16982_v11  ;;  %v17000_v57 = vld [vmem:[#allocation3 + $0xb4] sm:$0xff]  ;;  %v17006_v40 = vld [vmem:[#allocation3 + $0xc0] sm:$0xff] }
 0x6f8   : > { %12239 = vmatmul.msk.f32.gmra.mxu1 %vm33_vm0, %v16682_v19  ;;  %12263 = vmatmul.msk.f32.gmra.mxu2 %vm33_vm0, %v18317_v16 }
 0x6f9   : > { %12287 = vmatmul.msk.f32.gmra.mxu3 %vm33_vm0, %v18318_v52 }
 0x6fb   : > { %v8488_v13 = vpop.f32.mrf.mxu2 }
 0x6fc   : > { %v8670_v54 = vpop.f32.mrf.mxu3  ;;  %v8546_v30 = vadd.f32 %v8488_v13, %v8364_v3  ;;  %v8127_v49 = vpop.f32.mrf.mxu0 }
 0x6fd   : > { %v8309_v25 = vpop.f32.mrf.mxu1  ;;  %v8183_v31 = vadd.f32 %v8127_v49, %v18319_v53  ;;  %v17016_v53 = vld [vmem:[#allocation3 + $0xbc] sm:$0xff] }
 0x6fe   : > { %v16996_v21 = vadd.f32 %v8670_v54, %v8546_v30  ;;  %18322 = vst [vmem:[#allocation16_spill] sm:$0xff] %v17016_v53 }
 0x6ff   : > { %v8365_v19 = vadd.f32 %v8309_v25, %v8183_v31  ;;  %12216 = vmatmul.msk.f32.gmra.mxu0 %vm33_vm0, %v16998_v37  ;;  %v17014_v25 = vld [vmem:[#allocation3 + $0xbb] sm:$0xff] }
 0x700   : > { %12240 = vmatmul.msk.f32.gmra.mxu1 %vm33_vm0, %v17000_v57  ;;  %12264 = vmatmul.msk.f32.gmra.mxu2 %vm33_vm0, %v17006_v40  ;;  %18321 = vst [vmem:[#allocation15_spill] sm:$0xff] %v17014_v25 }
 0x701   : > { %12288 = vmatmul.msk.f32.gmra.mxu3 %vm33_vm0, %v8583_v22  ;;  %v17022_v22 = vld [vmem:[#allocation3 + $0xc8] sm:$0xff] }
 0x702   : > { %18323 = vst [vmem:[#allocation17_spill] sm:$0xff] %v17022_v22 }
 0x703   : > { %v8491_v3 = vpop.f32.mrf.mxu2 }
 0x704   : > { %v8673_v16 = vpop.f32.mrf.mxu3  ;;  %v8547_v52 = vadd.f32 %v8491_v3, %v8365_v19  ;;  %v8130_v13 = vpop.f32.mrf.mxu0  ;;  %v8584_v19 = vld [vmem:[#allocation3 + $0xc9] sm:$0xff] }
 0x705   : > { %v8312_v54 = vpop.f32.mrf.mxu1  ;;  %v8184_v30 = vadd.f32 %v8130_v13, %v16696_v36 }
 0x706   : > { %v17012_v49 = vadd.f32 %v8673_v16, %v8547_v52 }
 0x707   : > { %v8366_v31 = vadd.f32 %v8312_v54, %v8184_v30  ;;  %12217 = vmatmul.msk.f32.gmra.mxu0 %vm33_vm0, %v17014_v25 }
 0x708   : > { %18320 = vst [vmem:[#allocation10_spill] sm:$0xff] %v17012_v49  ;;  %12241 = vmatmul.msk.f32.gmra.mxu1 %vm33_vm0, %v17016_v53  ;;  %12265 = vmatmul.msk.f32.gmra.mxu2 %vm33_vm0, %v17022_v22  ;;  %v8747_v49 = vld [vmem:[#allocation3 + $0x32] sm:$0xff] }
 0x709   : > { %12289 = vmatmul.msk.f32.gmra.mxu3 %vm33_vm0, %v8584_v19  ;;  %v9111_v53 = vld [vmem:[#allocation3 + $0x34] sm:$0xff] }
 0x70b   : > { %v8494_v36 = vpop.f32.mrf.mxu2 }
 0x70c   : > { %v8676_v3 = vpop.f32.mrf.mxu3  ;;  %v8548_v16 = vadd.f32 %v8494_v36, %v8366_v31  ;;  %v8133_v52 = vpop.f32.mrf.mxu0 }
 0x70d   : > { %v8315_v13 = vpop.f32.mrf.mxu1  ;;  %v8185_v54 = vadd.f32 %v8133_v52, %v16705_v63  ;;  %v8748_v52 = vld [vmem:[#allocation3 + $0x3a] sm:$0xff] }
 0x70e   : > { %v17028_v30 = vadd.f32 %v8676_v3, %v8548_v16 }
 0x70f   : > { %v8367_v25 = vadd.f32 %v8315_v13, %v8185_v54  ;;  %12294 = vmatmul.msk.f32.vlgmr.msra.gmra.mxu0 %vm33_vm0, %v8747_v49 }
 0x710   : > { %12318 = vmatmul.msk.f32.vlgmr.msra.gmra.mxu1 %vm33_vm0, %v16725_v34  ;;  %12342 = vmatmul.msk.f32.vlgmr.msra.gmra.mxu2 %vm33_vm0, %v9111_v53  ;;  %v9112_v34 = vld [vmem:[#allocation3 + $0x3c] sm:$0xff] }
 0x711   : > { %12366 = vmatmul.msk.f32.vlgmr.msrb.gmra.mxu3 %vm33_vm0, %v16734_v42  ;;  %v12436_v42 = vld [vmem:[%s18241_s3 + $0x2f0] sm:$0xff] }
 0x712   : > { %9937 = vmatpush.msrb.mxu2 %v12436_v42 }
 0x713   : > { %v8497_v31 = vpop.f32.mrf.mxu2 }
 0x714   : > { %v8679_v19 = vpop.f32.mrf.mxu3  ;;  %v8549_v36 = vadd.f32 %v8497_v31, %v8367_v25  ;;  %v8136_v22 = vpop.f32.mrf.mxu0  ;;  %v12460_v25 = vld [vmem:[%s18241_s3 + $0x310] sm:$0xff] }
 0x715   : > { %v8318_v63 = vpop.f32.mrf.mxu1  ;;  %v8186_v3 = vadd.f32 %v8136_v22, %v16723_v10  ;;  %v12388_v10 = vld [vmem:[%s18241_s3 + $0x2b0] sm:$0xff]  ;;  %10119 = vmatpush.msra.mxu3 %v12460_v25 }
 0x716   : > { %v17037_v16 = vadd.f32 %v8679_v19, %v8549_v36  ;;  %9573 = vmatpush.msrb.mxu0 %v12388_v10  ;;  %v17057_v19 = vld [vmem:[#allocation3 + $0x42] sm:$0xff]  ;;  %v12412_v36 = vld [vmem:[%s18241_s3 + $0x2d0] sm:$0xff] }
 0x717   : > { %v8368_v49 = vadd.f32 %v8318_v63, %v8186_v3  ;;  %12295 = vmatmul.msk.f32.gmra.mxu0 %vm33_vm0, %v8748_v52  ;;  %v17066_v3 = vld [vmem:[#allocation3 + $0x44] sm:$0xff]  ;;  %9755 = vmatpush.msrb.mxu1 %v12412_v36 }
 0x718   : > { %12319 = vmatmul.msk.f32.gmra.mxu1 %vm33_vm0, %v16743_v61  ;;  %12343 = vmatmul.msk.f32.gmra.mxu2 %vm33_vm0, %v9112_v34 }
 0x719   : > { %12367 = vmatmul.msk.f32.gmra.mxu3 %vm33_vm0, %v16749_v59 }
 0x71b   : > { %v8500_v61 = vpop.f32.mrf.mxu2 }
 0x71c   : > { %v8682_v53 = vpop.f32.mrf.mxu3  ;;  %v8550_v22 = vadd.f32 %v8500_v61, %v8368_v49  ;;  %v8139_v13 = vpop.f32.mrf.mxu0  ;;  %v17075_v61 = vld [vmem:[#allocation3 + $0x4a] sm:$0xff] }
 0x71d   : > { %v8321_v59 = vpop.f32.mrf.mxu1  ;;  %v8187_v54 = vadd.f32 %v8139_v13, %v16741_v46 }
 0x71e   : > { %v17055_v31 = vadd.f32 %v8682_v53, %v8550_v22 }
 0x71f   : > { %v8369_v63 = vadd.f32 %v8321_v59, %v8187_v54  ;;  %12296 = vmatmul.msk.f32.gmra.mxu0 %vm33_vm0, %v17057_v19 }
 0x720   : > { %12320 = vmatmul.msk.f32.gmra.mxu1 %vm33_vm0, %v16758_v27  ;;  %12344 = vmatmul.msk.f32.gmra.mxu2 %vm33_vm0, %v17066_v3 }
 0x721   : > { %12368 = vmatmul.msk.f32.gmra.mxu3 %vm33_vm0, %v16764_v55  ;;  %v17081_v55 = vld [vmem:[#allocation3 + $0x4c] sm:$0xff] }
 0x723   : > { %v8503_v46 = vpop.f32.mrf.mxu2 }
 0x724   : > { %v8685_v52 = vpop.f32.mrf.mxu3  ;;  %v8551_v49 = vadd.f32 %v8503_v46, %v8369_v63  ;;  %v8142_v34 = vpop.f32.mrf.mxu0  ;;  %v17090_v63 = vld [vmem:[#allocation3 + $0x52] sm:$0xff] }
 0x725   : > { %v8324_v42 = vpop.f32.mrf.mxu1  ;;  %v8188_v10 = vadd.f32 %v8142_v34, %v16756_v6  ;;  %v17096_v46 = vld [vmem:[#allocation3 + $0x54] sm:$0xff] }
 0x726   : > { %v17073_v25 = vadd.f32 %v8685_v52, %v8551_v49 }
 0x727   : > { %v8370_v27 = vadd.f32 %v8324_v42, %v8188_v10  ;;  %12297 = vmatmul.msk.f32.gmra.mxu0 %vm33_vm0, %v17075_v61 }
 0x728   : > { %12321 = vmatmul.msk.f32.gmra.mxu1 %vm33_vm0, %v16773_v50  ;;  %12345 = vmatmul.msk.f32.gmra.mxu2 %vm33_vm0, %v17081_v55 }
 0x729   : > { %12369 = vmatmul.msk.f32.gmra.mxu3 %vm33_vm0, %v16779_v28 }
 0x72b   : > { %v8506_v6 = vpop.f32.mrf.mxu2 }
 0x72c   : > { %v8688_v53 = vpop.f32.mrf.mxu3  ;;  %v8552_v22 = vadd.f32 %v8506_v6, %v8370_v27  ;;  %v8145_v13 = vpop.f32.mrf.mxu0  ;;  %v17105_v27 = vld [vmem:[#allocation3 + $0x5a] sm:$0xff] }
 0x72d   : > { %v8327_v59 = vpop.f32.mrf.mxu1  ;;  %v8189_v54 = vadd.f32 %v8145_v13, %v16771_v32  ;;  %v17111_v6 = vld [vmem:[#allocation3 + $0x5c] sm:$0xff] }
 0x72e   : > { %v17088_v36 = vadd.f32 %v8688_v53, %v8552_v22 }
 0x72f   : > { %v8371_v50 = vadd.f32 %v8327_v59, %v8189_v54  ;;  %12298 = vmatmul.msk.f32.gmra.mxu0 %vm33_vm0, %v17090_v63 }
 0x730   : > { %12322 = vmatmul.msk.f32.gmra.mxu1 %vm33_vm0, %v16788_v17  ;;  %12346 = vmatmul.msk.f32.gmra.mxu2 %vm33_vm0, %v17096_v46 }
 0x731   : > { %12370 = vmatmul.msk.f32.gmra.mxu3 %vm33_vm0, %v16794_v1 }
 0x733   : > { %v8509_v32 = vpop.f32.mrf.mxu2 }
 0x734   : > { %v8691_v28 = vpop.f32.mrf.mxu3  ;;  %v8553_v52 = vadd.f32 %v8509_v32, %v8371_v50  ;;  %v8148_v49 = vpop.f32.mrf.mxu0  ;;  %v17120_v50 = vld [vmem:[#allocation3 + $0x62] sm:$0xff] }
 0x735   : > { %v8330_v34 = vpop.f32.mrf.mxu1  ;;  %v8190_v42 = vadd.f32 %v8148_v49, %v16786_v39  ;;  %v17126_v32 = vld [vmem:[#allocation3 + $0x64] sm:$0xff] }
 0x736   : > { %v17103_v10 = vadd.f32 %v8691_v28, %v8553_v52 }
 0x737   : > { %v8372_v17 = vadd.f32 %v8330_v34, %v8190_v42  ;;  %12299 = vmatmul.msk.f32.gmra.mxu0 %vm33_vm0, %v17105_v27 }
 0x738   : > { %12323 = vmatmul.msk.f32.gmra.mxu1 %vm33_vm0, %v16812_v26  ;;  %12347 = vmatmul.msk.f32.gmra.mxu2 %vm33_vm0, %v17111_v6 }
 0x739   : > { %12371 = vmatmul.msk.f32.gmra.mxu3 %vm33_vm0, %v16821_v44  ;;  %v12387_v44 = vld [vmem:[%s18241_s3 + $0x2a8] sm:$0xff] }
 0x73a   : > { %9574 = vmatpush.msrb.mxu0 %v12387_v44 }
 0x73b   : > { %v8512_v39 = vpop.f32.mrf.mxu2 }
 0x73c   : > { %v8694_v1 = vpop.f32.mrf.mxu3  ;;  %v8554_v53 = vadd.f32 %v8512_v39, %v8372_v17  ;;  %v8151_v22 = vpop.f32.mrf.mxu0  ;;  %v17144_v39 = vld [vmem:[#allocation3 + $0x6a] sm:$0xff] }
 0x73d   : > { %v8333_v13 = vpop.f32.mrf.mxu1  ;;  %v8191_v59 = vadd.f32 %v8151_v22, %v16810_v33  ;;  %v12435_v33 = vld [vmem:[%s18241_s3 + $0x2e8] sm:$0xff] }
 0x73e   : > { %v17118_v54 = vadd.f32 %v8694_v1, %v8554_v53  ;;  %9938 = vmatpush.msrb.mxu2 %v12435_v33  ;;  %v12411_v1 = vld [vmem:[%s18241_s3 + $0x2c8] sm:$0xff] }
 0x73f   : > { %v8373_v26 = vadd.f32 %v8333_v13, %v8191_v59  ;;  %12300 = vmatmul.msk.f32.gmra.mxu0 %vm33_vm0, %v17120_v50  ;;  %v17153_v22 = vld [vmem:[#allocation3 + $0x6c] sm:$0xff]  ;;  %9756 = vmatpush.msrb.mxu1 %v12411_v1 }
 0x740   : > { %12324 = vmatmul.msk.f32.gmra.mxu1 %vm33_vm0, %v16830_v14  ;;  %12348 = vmatmul.msk.f32.gmra.mxu2 %vm33_vm0, %v17126_v32  ;;  %v12459_v14 = vld [vmem:[%s18241_s3 + $0x308] sm:$0xff] }
 0x741   : > { %12372 = vmatmul.msk.f32.gmra.mxu3 %vm33_vm0, %v16836_v15 }
 0x742   : > { %10120 = vmatpush.msra.mxu3 %v12459_v14 }
 0x743   : > { %v8515_v28 = vpop.f32.mrf.mxu2 }
 0x744   : > { %v8697_v52 = vpop.f32.mrf.mxu3  ;;  %v8555_v49 = vadd.f32 %v8515_v28, %v8373_v26  ;;  %v8154_v34 = vpop.f32.mrf.mxu0  ;;  %v17162_v28 = vld [vmem:[#allocation3 + $0x72] sm:$0xff] }
 0x745   : > { %v8336_v15 = vpop.f32.mrf.mxu1  ;;  %v8192_v42 = vadd.f32 %v8154_v34, %v16828_v23 }
 0x746   : > { %v17142_v17 = vadd.f32 %v8697_v52, %v8555_v49 }
 0x747   : > { %v8374_v53 = vadd.f32 %v8336_v15, %v8192_v42  ;;  %12301 = vmatmul.msk.f32.gmra.mxu0 %vm33_vm0, %v17144_v39 }
 0x748   : > { %12325 = vmatmul.msk.f32.gmra.mxu1 %vm33_vm0, %v16845_v45  ;;  %12349 = vmatmul.msk.f32.gmra.mxu2 %vm33_vm0, %v17153_v22 }
 0x749   : > { %12373 = vmatmul.msk.f32.gmra.mxu3 %vm33_vm0, %v16851_v18  ;;  %v17168_v18 = vld [vmem:[#allocation3 + $0x74] sm:$0xff] }
 0x74b   : > { %v8518_v23 = vpop.f32.mrf.mxu2 }
 0x74c   : > { %v8700_v13 = vpop.f32.mrf.mxu3  ;;  %v8556_v59 = vadd.f32 %v8518_v23, %v8374_v53  ;;  %v8157_v26 = vpop.f32.mrf.mxu0  ;;  %v17177_v53 = vld [vmem:[#allocation3 + $0x7a] sm:$0xff] }
 0x74d   : > { %v8339_v33 = vpop.f32.mrf.mxu1  ;;  %v8193_v44 = vadd.f32 %v8157_v26, %v16843_v9  ;;  %v17183_v23 = vld [vmem:[#allocation3 + $0x7c] sm:$0xff] }
 0x74e   : > { %v17160_v14 = vadd.f32 %v8700_v13, %v8556_v59 }
 0x74f   : > { %v8375_v45 = vadd.f32 %v8339_v33, %v8193_v44  ;;  %12302 = vmatmul.msk.f32.gmra.mxu0 %vm33_vm0, %v17162_v28 }
 0x750   : > { %12326 = vmatmul.msk.f32.gmra.mxu1 %vm33_vm0, %v16860_v20  ;;  %12350 = vmatmul.msk.f32.gmra.mxu2 %vm33_vm0, %v17168_v18 }
 0x751   : > { %12374 = vmatmul.msk.f32.gmra.mxu3 %vm33_vm0, %v16866_v62 }
 0x753   : > { %v8521_v9 = vpop.f32.mrf.mxu2 }
 0x754   : > { %v8703_v52 = vpop.f32.mrf.mxu3  ;;  %v8557_v49 = vadd.f32 %v8521_v9, %v8375_v45  ;;  %v8160_v34 = vpop.f32.mrf.mxu0  ;;  %v17192_v45 = vld [vmem:[#allocation3 + $0x82] sm:$0xff] }
 0x755   : > { %v8342_v15 = vpop.f32.mrf.mxu1  ;;  %v8194_v42 = vadd.f32 %v8160_v34, %v16858_v35  ;;  %v17198_v9 = vld [vmem:[#allocation3 + $0x84] sm:$0xff] }
 0x756   : > { %v17175_v1 = vadd.f32 %v8703_v52, %v8557_v49 }
 0x757   : > { %v8376_v20 = vadd.f32 %v8342_v15, %v8194_v42  ;;  %12303 = vmatmul.msk.f32.gmra.mxu0 %vm33_vm0, %v17177_v53 }
 0x758   : > { %12327 = vmatmul.msk.f32.gmra.mxu1 %vm33_vm0, %v16875_v29  ;;  %12351 = vmatmul.msk.f32.gmra.mxu2 %vm33_vm0, %v17183_v23 }
 0x759   : > { %12375 = vmatmul.msk.f32.gmra.mxu3 %vm33_vm0, %v16881_v56 }
 0x75b   : > { %v8524_v35 = vpop.f32.mrf.mxu2 }
 0x75c   : > { %v8706_v62 = vpop.f32.mrf.mxu3  ;;  %v8558_v13 = vadd.f32 %v8524_v35, %v8376_v20  ;;  %v8163_v59 = vpop.f32.mrf.mxu0  ;;  %v17207_v20 = vld [vmem:[#allocation3 + $0x8a] sm:$0xff] }
 0x75d   : > { %v8345_v26 = vpop.f32.mrf.mxu1  ;;  %v8195_v33 = vadd.f32 %v8163_v59, %v16873_v4  ;;  %v17213_v35 = vld [vmem:[#allocation3 + $0x8c] sm:$0xff] }
 0x75e   : > { %v17190_v44 = vadd.f32 %v8706_v62, %v8558_v13 }
 0x75f   : > { %v8377_v29 = vadd.f32 %v8345_v26, %v8195_v33  ;;  %12304 = vmatmul.msk.f32.gmra.mxu0 %vm33_vm0, %v17192_v45 }
 0x760   : > { %12328 = vmatmul.msk.f32.gmra.mxu1 %vm33_vm0, %v16899_v2  ;;  %12352 = vmatmul.msk.f32.gmra.mxu2 %vm33_vm0, %v17198_v9 }
 0x761   : > { %12376 = vmatmul.msk.f32.gmra.mxu3 %vm33_vm0, %v16908_v60  ;;  %v12386_v60 = vld [vmem:[%s18241_s3 + $0x2a0] sm:$0xff] }
 0x762   : > { %9575 = vmatpush.msrb.mxu0 %v12386_v60 }
 0x763   : > { %v8527_v4 = vpop.f32.mrf.mxu2 }
 0x764   : > { %v8709_v56 = vpop.f32.mrf.mxu3  ;;  %v8559_v52 = vadd.f32 %v8527_v4, %v8377_v29  ;;  %v8166_v49 = vpop.f32.mrf.mxu0  ;;  %v17231_v4 = vld [vmem:[#allocation3 + $0x92] sm:$0xff] }
 0x765   : > { %v8348_v34 = vpop.f32.mrf.mxu1  ;;  %v8196_v15 = vadd.f32 %v8166_v49, %v16897_v41  ;;  %v12434_v41 = vld [vmem:[%s18241_s3 + $0x2e0] sm:$0xff]  ;;  %v17240_v49 = vld [vmem:[#allocation3 + $0x94] sm:$0xff] }
 0x766   : > { %v17205_v42 = vadd.f32 %v8709_v56, %v8559_v52  ;;  %9939 = vmatpush.msrb.mxu2 %v12434_v41  ;;  %v12410_v56 = vld [vmem:[%s18241_s3 + $0x2c0] sm:$0xff] }
 0x767   : > { %v8378_v2 = vadd.f32 %v8348_v34, %v8196_v15  ;;  %12305 = vmatmul.msk.f32.gmra.mxu0 %vm33_vm0, %v17207_v20  ;;  %9757 = vmatpush.msrb.mxu1 %v12410_v56 }
 0x768   : > { %12329 = vmatmul.msk.f32.gmra.mxu1 %vm33_vm0, %v16917_v47  ;;  %12353 = vmatmul.msk.f32.gmra.mxu2 %vm33_vm0, %v17213_v35  ;;  %v12458_v47 = vld [vmem:[%s18241_s3 + $0x300] sm:$0xff] }
 0x769   : > { %12377 = vmatmul.msk.f32.gmra.mxu3 %vm33_vm0, %v16923_v51 }
 0x76a   : > { %10121 = vmatpush.msra.mxu3 %v12458_v47 }
 0x76b   : > { %v8530_v62 = vpop.f32.mrf.mxu2 }
 0x76c   : > { %v8712_v13 = vpop.f32.mrf.mxu3  ;;  %v8560_v59 = vadd.f32 %v8530_v62, %v8378_v2  ;;  %v8169_v26 = vpop.f32.mrf.mxu0  ;;  %v17249_v62 = vld [vmem:[#allocation3 + $0x9a] sm:$0xff] }
 0x76d   : > { %v8351_v51 = vpop.f32.mrf.mxu1  ;;  %v8197_v33 = vadd.f32 %v8169_v26, %v16915_v43 }
 0x76e   : > { %v17229_v29 = vadd.f32 %v8712_v13, %v8560_v59 }
 0x76f   : > { %v8379_v52 = vadd.f32 %v8351_v51, %v8197_v33  ;;  %12306 = vmatmul.msk.f32.gmra.mxu0 %vm33_vm0, %v17231_v4 }
 0x770   : > { %12330 = vmatmul.msk.f32.gmra.mxu1 %vm33_vm0, %v16932_v24  ;;  %12354 = vmatmul.msk.f32.gmra.mxu2 %vm33_vm0, %v17240_v49 }
 0x771   : > { %12378 = vmatmul.msk.f32.gmra.mxu3 %vm33_vm0, %v16938_v48  ;;  %v17255_v48 = vld [vmem:[#allocation3 + $0x9c] sm:$0xff] }
 0x773   : > { %v8533_v43 = vpop.f32.mrf.mxu2 }
 0x774   : > { %v8715_v34 = vpop.f32.mrf.mxu3  ;;  %v8561_v15 = vadd.f32 %v8533_v43, %v8379_v52  ;;  %v8172_v2 = vpop.f32.mrf.mxu0  ;;  %v17264_v52 = vld [vmem:[#allocation3 + $0xa2] sm:$0xff] }
 0x775   : > { %v8354_v41 = vpop.f32.mrf.mxu1  ;;  %v8198_v60 = vadd.f32 %v8172_v2, %v16930_v5  ;;  %v17270_v43 = vld [vmem:[#allocation3 + $0xa4] sm:$0xff] }
 0x776   : > { %v17247_v47 = vadd.f32 %v8715_v34, %v8561_v15 }
 0x777   : > { %v8380_v24 = vadd.f32 %v8354_v41, %v8198_v60  ;;  %12307 = vmatmul.msk.f32.gmra.mxu0 %vm33_vm0, %v17249_v62 }
 0x778   : > { %12331 = vmatmul.msk.f32.gmra.mxu1 %vm33_vm0, %v16946_v8  ;;  %12355 = vmatmul.msk.f32.gmra.mxu2 %vm33_vm0, %v17255_v48 }
 0x779   : > { %12379 = vmatmul.msk.f32.gmra.mxu3 %vm33_vm0, %v16952_v7  ;;  %v9307_v7 = vld [vmem:[#allocation3 + $0xb0] sm:$0xff] }
 0x77b   : > { %v8536_v5 = vpop.f32.mrf.mxu2 }
 0x77c   : > { %v8718_v13 = vpop.f32.mrf.mxu3  ;;  %v8562_v59 = vadd.f32 %v8536_v5, %v8380_v24  ;;  %v8175_v26 = vpop.f32.mrf.mxu0  ;;  %v17278_v5 = vld [vmem:[#allocation3 + $0xaa] sm:$0xff] }
 0x77d   : > { %v8357_v51 = vpop.f32.mrf.mxu1  ;;  %v8199_v33 = vadd.f32 %v8175_v26, %v16944_v38 }
 0x77e   : > { %v17262_v56 = vadd.f32 %v8718_v13, %v8562_v59  ;;  %v17284_v13 = vld [vmem:[#allocation3 + $0xac] sm:$0xff]  ;;  %v9308_v59 = vld [vmem:[#allocation3 + $0xb8] sm:$0xff] }
 0x77f   : > { %v8381_v8 = vadd.f32 %v8357_v51, %v8199_v33  ;;  %12308 = vmatmul.msk.f32.gmra.mxu0 %vm33_vm0, %v17264_v52 }
 0x780   : > { %12332 = vmatmul.msk.f32.gmra.mxu1 %vm33_vm0, %v16960_v58  ;;  %12356 = vmatmul.msk.f32.gmra.mxu2 %vm33_vm0, %v17270_v43 }
 0x781   : > { %12380 = vmatmul.msk.f32.gmra.mxu3 %vm33_vm0, %v9307_v7 }
 0x783   : > { %v8539_v38 = vpop.f32.mrf.mxu2 }
 0x784   : > { %v8721_v34 = vpop.f32.mrf.mxu3  ;;  %v8563_v15 = vadd.f32 %v8539_v38, %v8381_v8  ;;  %v8178_v2 = vpop.f32.mrf.mxu0 }
 0x785   : > { %v8360_v41 = vpop.f32.mrf.mxu1  ;;  %v8200_v60 = vadd.f32 %v8178_v2, %v16958_v0 }
 0x786   : > { %v17276_v24 = vadd.f32 %v8721_v34, %v8563_v15  ;;  %v17292_v34 = vld [vmem:[#allocation3 + $0xb2] sm:$0xff] }
 0x787   : > { %v8382_v58 = vadd.f32 %v8360_v41, %v8200_v60  ;;  %12309 = vmatmul.msk.f32.gmra.mxu0 %vm33_vm0, %v17278_v5 }
 0x788   : > { %12333 = vmatmul.msk.f32.gmra.mxu1 %vm33_vm0, %v16982_v11  ;;  %12357 = vmatmul.msk.f32.gmra.mxu2 %vm33_vm0, %v17284_v13 }
 0x789   : > { %12381 = vmatmul.msk.f32.gmra.mxu3 %vm33_vm0, %v9308_v59 }
 0x78b   : > { %v8542_v0 = vpop.f32.mrf.mxu2 }
 0x78c   : > { %v8724_v26 = vpop.f32.mrf.mxu3  ;;  %v8564_v51 = vadd.f32 %v8542_v0, %v8382_v58  ;;  %v8849_v33 = vpop.f32.mrf.mxu0  ;;  %v17305_v0 = vld [vmem:[#allocation3 + $0xba] sm:$0xff] }
 0x78d   : > { %v9031_v8 = vpop.f32.mrf.mxu1  ;;  %v8909_v7 = vadd.f32 %v8849_v33, %v16980_v12 }
 0x78e   : > { %v17290_v38 = vadd.f32 %v8724_v26, %v8564_v51 }
 0x78f   : > { %v9091_v11 = vadd.f32 %v9031_v8, %v8909_v7  ;;  %12310 = vmatmul.msk.f32.gmra.mxu0 %vm33_vm0, %v17292_v34 }
 0x790   : > { %12334 = vmatmul.msk.f32.gmra.mxu1 %vm33_vm0, %v16998_v37  ;;  %12358 = vmatmul.msk.f32.gmra.mxu2 %vm33_vm0, %v17000_v57  ;;  %v18324_v37 = vld [vmem:[#allocation15_spill] sm:$0xff]  ;;  %v18325_v57 = vld [vmem:[#allocation16_spill] sm:$0xff] }
 0x791   : > { %12382 = vmatmul.msk.f32.gmra.mxu3 %vm33_vm0, %v17006_v40  ;;  %v18326_v40 = vld [vmem:[#allocation17_spill] sm:$0xff] }
 0x793   : > { %v9213_v15 = vpop.f32.mrf.mxu2 }
 0x794   : > { %v9395_v2 = vpop.f32.mrf.mxu3  ;;  %v9273_v12 = vadd.f32 %v9213_v15, %v9091_v11  ;;  %v8852_v41 = vpop.f32.mrf.mxu0  ;;  %v18327_v11 = vld [vmem:[#allocation10_spill] sm:$0xff] }
 0x795   : > { %v9034_v60 = vpop.f32.mrf.mxu1  ;;  %v8910_v58 = vadd.f32 %v8852_v41, %v16996_v21  ;;  %v17320_v41 = vld [vmem:[#allocation3 + $0xc3] sm:$0xff] }
 0x796   : > { %v17303_v59 = vadd.f32 %v9395_v2, %v9273_v12  ;;  %v17318_v12 = vld [vmem:[#allocation3 + $0xc2] sm:$0xff] }
 0x797   : > { %v9092_v26 = vadd.f32 %v9034_v60, %v8910_v58  ;;  %12311 = vmatmul.msk.f32.gmra.mxu0 %vm33_vm0, %v17305_v0  ;;  %v17326_v58 = vld [vmem:[#allocation3 + $0xc4] sm:$0xff] }
 0x798   : > { %12335 = vmatmul.msk.f32.gmra.mxu1 %vm33_vm0, %v18324_v37  ;;  %12359 = vmatmul.msk.f32.gmra.mxu2 %vm33_vm0, %v18325_v57 }
 0x799   : > { %12383 = vmatmul.msk.f32.gmra.mxu3 %vm33_vm0, %v18326_v40 }
 0x79b   : > { %v9216_v51 = vpop.f32.mrf.mxu2 }
 0x79c   : > { %v9398_v33 = vpop.f32.mrf.mxu3  ;;  %v9274_v21 = vadd.f32 %v9216_v51, %v9092_v26  ;;  %v8855_v8 = vpop.f32.mrf.mxu0  ;;  %v9311_v26 = vld [vmem:[#allocation3 + $0xd0] sm:$0xff] }
 0x79d   : > { %v9037_v7 = vpop.f32.mrf.mxu1  ;;  %v8911_v15 = vadd.f32 %v8855_v8, %v18327_v11  ;;  %v17336_v11 = vld [vmem:[#allocation3 + $0xcb] sm:$0xff] }
 0x79e   : > { %v17316_v2 = vadd.f32 %v9398_v33, %v9274_v21  ;;  %18330 = vst [vmem:[#allocation20_spill] sm:$0xff] %v17336_v11 }
 0x79f   : > { %v9093_v60 = vadd.f32 %v9037_v7, %v8911_v15  ;;  %12312 = vmatmul.msk.f32.gmra.mxu0 %vm33_vm0, %v17318_v12  ;;  %v17334_v7 = vld [vmem:[#allocation3 + $0xca] sm:$0xff] }
 0x7a0   : > { %18328 = vst [vmem:[#allocation14_spill] sm:$0xff] %v17316_v2  ;;  %12336 = vmatmul.msk.f32.gmra.mxu1 %vm33_vm0, %v17320_v41  ;;  %12360 = vmatmul.msk.f32.gmra.mxu2 %vm33_vm0, %v17326_v58  ;;  %v9475_v2 = vld [vmem:[#allocation3 + $0x41] sm:$0xff] }
 0x7a1   : > { %12384 = vmatmul.msk.f32.gmra.mxu3 %vm33_vm0, %v9311_v26  ;;  %v17342_v26 = vld [vmem:[#allocation3 + $0xcc] sm:$0xff] }
 0x7a2   : > { %18331 = vst [vmem:[#allocation21_spill] sm:$0xff] %v17342_v26 }
 0x7a3   : > { %v9219_v37 = vpop.f32.mrf.mxu2 }
 0x7a4   : > { %v9401_v57 = vpop.f32.mrf.mxu3  ;;  %v9275_v40 = vadd.f32 %v9219_v37, %v9093_v60  ;;  %v8858_v51 = vpop.f32.mrf.mxu0  ;;  %v9312_v60 = vld [vmem:[#allocation3 + $0xd8] sm:$0xff] }
 0x7a5   : > { %v9040_v33 = vpop.f32.mrf.mxu1  ;;  %v8912_v21 = vadd.f32 %v8858_v51, %v17028_v30 }
 0x7a6   : > { %v17332_v8 = vadd.f32 %v9401_v57, %v9275_v40 }
 0x7a7   : > { %v9094_v15 = vadd.f32 %v9040_v33, %v8912_v21  ;;  %12313 = vmatmul.msk.f32.gmra.mxu0 %vm33_vm0, %v17334_v7 }
 0x7a8   : > { %18329 = vst [vmem:[#allocation19_spill] sm:$0xff] %v17332_v8  ;;  %12337 = vmatmul.msk.f32.gmra.mxu1 %vm33_vm0, %v17336_v11  ;;  %12361 = vmatmul.msk.f32.gmra.mxu2 %vm33_vm0, %v17342_v26  ;;  %v9839_v11 = vld [vmem:[#allocation3 + $0x43] sm:$0xff] }
 0x7a9   : > { %12385 = vmatmul.msk.f32.gmra.mxu3 %vm33_vm0, %v9312_v60 }
 0x7ab   : > { %v9222_v30 = vpop.f32.mrf.mxu2 }
 0x7ac   : > { %v9404_v37 = vpop.f32.mrf.mxu3  ;;  %v9276_v57 = vadd.f32 %v9222_v30, %v9094_v15  ;;  %v8861_v40 = vpop.f32.mrf.mxu0 }
 0x7ad   : > { %v9043_v51 = vpop.f32.mrf.mxu1  ;;  %v8913_v33 = vadd.f32 %v8861_v40, %v17037_v16  ;;  %v9476_v40 = vld [vmem:[#allocation3 + $0x49] sm:$0xff] }
 0x7ae   : > { %v17348_v21 = vadd.f32 %v9404_v37, %v9276_v57 }
 0x7af   : > { %v9095_v8 = vadd.f32 %v9043_v51, %v8913_v33  ;;  %12390 = vmatmul.msk.f32.vlgmr.msrb.gmra.mxu0 %vm33_vm0, %v9475_v2 }
 0x7b0   : > { %12414 = vmatmul.msk.f32.vlgmr.msrb.gmra.mxu1 %vm33_vm0, %v17057_v19  ;;  %12438 = vmatmul.msk.f32.vlgmr.msrb.gmra.mxu2 %vm33_vm0, %v9839_v11  ;;  %v9840_v19 = vld [vmem:[#allocation3 + $0x4b] sm:$0xff] }
 0x7b1   : > { %12462 = vmatmul.msk.f32.vlgmr.msra.gmra.mxu3 %vm33_vm0, %v17066_v3 }
 0x7b3   : > { %v9225_v15 = vpop.f32.mrf.mxu2 }
 0x7b4   : > { %v9407_v60 = vpop.f32.mrf.mxu3  ;;  %v9277_v30 = vadd.f32 %v9225_v15, %v9095_v8  ;;  %v8864_v26 = vpop.f32.mrf.mxu0  ;;  %v9477_v15 = vld [vmem:[#allocation3 + $0x51] sm:$0xff] }
 0x7b5   : > { %v9046_v16 = vpop.f32.mrf.mxu1  ;;  %v8914_v37 = vadd.f32 %v8864_v26, %v17055_v31 }
 0x7b6   : > { %v17357_v57 = vadd.f32 %v9407_v60, %v9277_v30 }
 0x7b7   : > { %v9096_v2 = vadd.f32 %v9046_v16, %v8914_v37  ;;  %12391 = vmatmul.msk.f32.gmra.mxu0 %vm33_vm0, %v9476_v40 }
 0x7b8   : > { %12415 = vmatmul.msk.f32.gmra.mxu1 %vm33_vm0, %v17075_v61  ;;  %12439 = vmatmul.msk.f32.gmra.mxu2 %vm33_vm0, %v9840_v19  ;;  %v9841_v61 = vld [vmem:[#allocation3 + $0x53] sm:$0xff] }
 0x7b9   : > { %12463 = vmatmul.msk.f32.gmra.mxu3 %vm33_vm0, %v17081_v55  ;;  %v9478_v19 = vld [vmem:[#allocation3 + $0x59] sm:$0xff] }
 0x7bb   : > { %v9228_v3 = vpop.f32.mrf.mxu2 }
 0x7bc   : > { %v9410_v8 = vpop.f32.mrf.mxu3  ;;  %v9278_v11 = vadd.f32 %v9228_v3, %v9096_v2  ;;  %v8867_v51 = vpop.f32.mrf.mxu0 }
 0x7bd   : > { %v9049_v31 = vpop.f32.mrf.mxu1  ;;  %v8915_v26 = vadd.f32 %v8867_v51, %v17073_v25 }
 0x7be   : > { %v17366_v33 = vadd.f32 %v9410_v8, %v9278_v11 }
 0x7bf   : > { %v9097_v60 = vadd.f32 %v9049_v31, %v8915_v26  ;;  %12392 = vmatmul.msk.f32.gmra.mxu0 %vm33_vm0, %v9477_v15  ;;  %v9479_v15 = vld [vmem:[#allocation3 + $0x61] sm:$0xff] }
 0x7c0   : > { %12416 = vmatmul.msk.f32.gmra.mxu1 %vm33_vm0, %v17090_v63  ;;  %12440 = vmatmul.msk.f32.gmra.mxu2 %vm33_vm0, %v9841_v61  ;;  %v9842_v63 = vld [vmem:[#allocation3 + $0x5b] sm:$0xff] }
 0x7c1   : > { %12464 = vmatmul.msk.f32.gmra.mxu3 %vm33_vm0, %v17096_v46 }
 0x7c3   : > { %v9231_v55 = vpop.f32.mrf.mxu2 }
 0x7c4   : > { %v9413_v30 = vpop.f32.mrf.mxu3  ;;  %v9279_v16 = vadd.f32 %v9231_v55, %v9097_v60  ;;  %v8870_v37 = vpop.f32.mrf.mxu0 }
 0x7c5   : > { %v9052_v25 = vpop.f32.mrf.mxu1  ;;  %v8916_v40 = vadd.f32 %v8870_v37, %v17088_v36 }
 0x7c6   : > { %v17375_v2 = vadd.f32 %v9413_v30, %v9279_v16 }
 0x7c7   : > { %v9098_v3 = vadd.f32 %v9052_v25, %v8916_v40  ;;  %12393 = vmatmul.msk.f32.gmra.mxu0 %vm33_vm0, %v9478_v19  ;;  %v9480_v25 = vld [vmem:[#allocation3 + $0x69] sm:$0xff] }
 0x7c8   : > { %12417 = vmatmul.msk.f32.gmra.mxu1 %vm33_vm0, %v17105_v27  ;;  %12441 = vmatmul.msk.f32.gmra.mxu2 %vm33_vm0, %v9842_v63  ;;  %v9843_v27 = vld [vmem:[#allocation3 + $0x63] sm:$0xff] }
 0x7c9   : > { %12465 = vmatmul.msk.f32.gmra.mxu3 %vm33_vm0, %v17111_v6 }
 0x7cb   : > { %v9234_v46 = vpop.f32.mrf.mxu2 }
 0x7cc   : > { %v9416_v8 = vpop.f32.mrf.mxu3  ;;  %v9280_v11 = vadd.f32 %v9234_v46, %v9098_v3  ;;  %v8873_v51 = vpop.f32.mrf.mxu0 }
 0x7cd   : > { %v9055_v36 = vpop.f32.mrf.mxu1  ;;  %v8917_v31 = vadd.f32 %v8873_v51, %v17103_v10 }
 0x7ce   : > { %v17384_v26 = vadd.f32 %v9416_v8, %v9280_v11  ;;  %v9481_v11 = vld [vmem:[#allocation3 + $0x71] sm:$0xff] }
 0x7cf   : > { %v9099_v60 = vadd.f32 %v9055_v36, %v8917_v31  ;;  %12394 = vmatmul.msk.f32.gmra.mxu0 %vm33_vm0, %v9479_v15 }
 0x7d0   : > { %12418 = vmatmul.msk.f32.gmra.mxu1 %vm33_vm0, %v17120_v50  ;;  %12442 = vmatmul.msk.f32.gmra.mxu2 %vm33_vm0, %v9843_v27  ;;  %v9844_v50 = vld [vmem:[#allocation3 + $0x6b] sm:$0xff] }
 0x7d1   : > { %12466 = vmatmul.msk.f32.gmra.mxu3 %vm33_vm0, %v17126_v32 }
 0x7d3   : > { %v9237_v6 = vpop.f32.mrf.mxu2 }
 0x7d4   : > { %v9419_v61 = vpop.f32.mrf.mxu3  ;;  %v9281_v55 = vadd.f32 %v9237_v6, %v9099_v60  ;;  %v8876_v30 = vpop.f32.mrf.mxu0  ;;  %v9482_v6 = vld [vmem:[#allocation3 + $0x79] sm:$0xff] }
 0x7d5   : > { %v9058_v10 = vpop.f32.mrf.mxu1  ;;  %v8918_v16 = vadd.f32 %v8876_v30, %v17118_v54 }
 0x7d6   : > { %v17393_v37 = vadd.f32 %v9419_v61, %v9281_v55 }
 0x7d7   : > { %v9100_v40 = vadd.f32 %v9058_v10, %v8918_v16  ;;  %12395 = vmatmul.msk.f32.gmra.mxu0 %vm33_vm0, %v9480_v25 }
 0x7d8   : > { %12419 = vmatmul.msk.f32.gmra.mxu1 %vm33_vm0, %v17144_v39  ;;  %12443 = vmatmul.msk.f32.gmra.mxu2 %vm33_vm0, %v9844_v50  ;;  %v9845_v39 = vld [vmem:[#allocation3 + $0x73] sm:$0xff] }
 0x7d9   : > { %12467 = vmatmul.msk.f32.gmra.mxu3 %vm33_vm0, %v17153_v22 }
 0x7db   : > { %v9240_v32 = vpop.f32.mrf.mxu2 }
 0x7dc   : > { %v9422_v19 = vpop.f32.mrf.mxu3  ;;  %v9282_v3 = vadd.f32 %v9240_v32, %v9100_v40  ;;  %v8879_v63 = vpop.f32.mrf.mxu0  ;;  %v9483_v40 = vld [vmem:[#allocation3 + $0x81] sm:$0xff] }
 0x7dd   : > { %v9061_v54 = vpop.f32.mrf.mxu1  ;;  %v8919_v46 = vadd.f32 %v8879_v63, %v17142_v17 }
 0x7de   : > { %v17402_v8 = vadd.f32 %v9422_v19, %v9282_v3 }
 0x7df   : > { %v9101_v51 = vadd.f32 %v9061_v54, %v8919_v46  ;;  %12396 = vmatmul.msk.f32.gmra.mxu0 %vm33_vm0, %v9481_v11  ;;  %v9484_v46 = vld [vmem:[#allocation3 + $0x89] sm:$0xff] }
 0x7e0   : > { %12420 = vmatmul.msk.f32.gmra.mxu1 %vm33_vm0, %v17162_v28  ;;  %12444 = vmatmul.msk.f32.gmra.mxu2 %vm33_vm0, %v9845_v39  ;;  %v9846_v28 = vld [vmem:[#allocation3 + $0x7b] sm:$0xff] }
 0x7e1   : > { %12468 = vmatmul.msk.f32.gmra.mxu3 %vm33_vm0, %v17168_v18 }
 0x7e3   : > { %v9243_v22 = vpop.f32.mrf.mxu2 }
 0x7e4   : > { %v9425_v36 = vpop.f32.mrf.mxu3  ;;  %v9283_v31 = vadd.f32 %v9243_v22, %v9101_v51  ;;  %v8882_v15 = vpop.f32.mrf.mxu0 }
 0x7e5   : > { %v9064_v17 = vpop.f32.mrf.mxu1  ;;  %v8920_v60 = vadd.f32 %v8882_v15, %v17160_v14  ;;  %v9485_v15 = vld [vmem:[#allocation3 + $0x91] sm:$0xff] }
 0x7e6   : > { %v17411_v27 = vadd.f32 %v9425_v36, %v9283_v31 }
 0x7e7   : > { %v9102_v61 = vadd.f32 %v9064_v17, %v8920_v60  ;;  %12397 = vmatmul.msk.f32.gmra.mxu0 %vm33_vm0, %v9482_v6 }
 0x7e8   : > { %12421 = vmatmul.msk.f32.gmra.mxu1 %vm33_vm0, %v17177_v53  ;;  %12445 = vmatmul.msk.f32.gmra.mxu2 %vm33_vm0, %v9846_v28  ;;  %v9847_v53 = vld [vmem:[#allocation3 + $0x83] sm:$0xff] }
 0x7e9   : > { %12469 = vmatmul.msk.f32.gmra.mxu3 %vm33_vm0, %v17183_v23 }
 0x7eb   : > { %v9246_v18 = vpop.f32.mrf.mxu2 }
 0x7ec   : > { %v9428_v55 = vpop.f32.mrf.mxu3  ;;  %v9284_v30 = vadd.f32 %v9246_v18, %v9102_v61  ;;  %v8885_v10 = vpop.f32.mrf.mxu0 }
 0x7ed   : > { %v9067_v14 = vpop.f32.mrf.mxu1  ;;  %v8921_v16 = vadd.f32 %v8885_v10, %v17175_v1 }
 0x7ee   : > { %v17420_v25 = vadd.f32 %v9428_v55, %v9284_v30  ;;  %v9486_v55 = vld [vmem:[#allocation3 + $0x99] sm:$0xff] }
 0x7ef   : > { %v9103_v50 = vadd.f32 %v9067_v14, %v8921_v16  ;;  %12398 = vmatmul.msk.f32.gmra.mxu0 %vm33_vm0, %v9483_v40 }
 0x7f0   : > { %12422 = vmatmul.msk.f32.gmra.mxu1 %vm33_vm0, %v17192_v45  ;;  %12446 = vmatmul.msk.f32.gmra.mxu2 %vm33_vm0, %v9847_v53  ;;  %v9848_v45 = vld [vmem:[#allocation3 + $0x8b] sm:$0xff]  ;;  %v9487_v53 = vld [vmem:[#allocation3 + $0xa1] sm:$0xff] }
 0x7f1   : > { %12470 = vmatmul.msk.f32.gmra.mxu3 %vm33_vm0, %v17198_v9 }
 0x7f3   : > { %v9249_v23 = vpop.f32.mrf.mxu2 }
 0x7f4   : > { %v9431_v32 = vpop.f32.mrf.mxu3  ;;  %v9285_v19 = vadd.f32 %v9249_v23, %v9103_v50  ;;  %v8888_v3 = vpop.f32.mrf.mxu0 }
 0x7f5   : > { %v9070_v1 = vpop.f32.mrf.mxu1  ;;  %v8922_v63 = vadd.f32 %v8888_v3, %v17190_v44 }
 0x7f6   : > { %v17429_v54 = vadd.f32 %v9431_v32, %v9285_v19 }
 0x7f7   : > { %v9104_v11 = vadd.f32 %v9070_v1, %v8922_v63  ;;  %12399 = vmatmul.msk.f32.gmra.mxu0 %vm33_vm0, %v9484_v46  ;;  %v9488_v46 = vld [vmem:[#allocation3 + $0xa9] sm:$0xff] }
 0x7f8   : > { %12423 = vmatmul.msk.f32.gmra.mxu1 %vm33_vm0, %v17207_v20  ;;  %12447 = vmatmul.msk.f32.gmra.mxu2 %vm33_vm0, %v9848_v45  ;;  %v9849_v20 = vld [vmem:[#allocation3 + $0x93] sm:$0xff] }
 0x7f9   : > { %12471 = vmatmul.msk.f32.gmra.mxu3 %vm33_vm0, %v17213_v35 }
 0x7fb   : > { %v9252_v9 = vpop.f32.mrf.mxu2 }
 0x7fc   : > { %v9434_v51 = vpop.f32.mrf.mxu3  ;;  %v9286_v39 = vadd.f32 %v9252_v9, %v9104_v11  ;;  %v8891_v22 = vpop.f32.mrf.mxu0 }
 0x7fd   : > { %v9073_v44 = vpop.f32.mrf.mxu1  ;;  %v8923_v36 = vadd.f32 %v8891_v22, %v17205_v42 }
 0x7fe   : > { %v17438_v31 = vadd.f32 %v9434_v51, %v9286_v39 }
 0x7ff   : > { %v9105_v17 = vadd.f32 %v9073_v44, %v8923_v36  ;;  %12400 = vmatmul.msk.f32.gmra.mxu0 %vm33_vm0, %v9485_v15  ;;  %v9489_v44 = vld [vmem:[#allocation3 + $0xb1] sm:$0xff] }
 0x800   : > { %12424 = vmatmul.msk.f32.gmra.mxu1 %vm33_vm0, %v17231_v4  ;;  %12448 = vmatmul.msk.f32.gmra.mxu2 %vm33_vm0, %v9849_v20  ;;  %v9850_v4 = vld [vmem:[#allocation3 + $0x9b] sm:$0xff] }
 0x801   : > { %12472 = vmatmul.msk.f32.gmra.mxu3 %vm33_vm0, %v17240_v49  ;;  %v10035_v15 = vld [vmem:[#allocation3 + $0xb4] sm:$0xff] }
 0x803   : > { %v9255_v35 = vpop.f32.mrf.mxu2 }
 0x804   : > { %v9437_v60 = vpop.f32.mrf.mxu3  ;;  %v9287_v6 = vadd.f32 %v9255_v35, %v9105_v17  ;;  %v8894_v61 = vpop.f32.mrf.mxu0 }
 0x805   : > { %v9076_v42 = vpop.f32.mrf.mxu1  ;;  %v8924_v28 = vadd.f32 %v8894_v61, %v17229_v29  ;;  %v9490_v61 = vld [vmem:[#allocation3 + $0xb9] sm:$0xff] }
 0x806   : > { %v17447_v18 = vadd.f32 %v9437_v60, %v9287_v6 }
 0x807   : > { %v9106_v30 = vadd.f32 %v9076_v42, %v8924_v28  ;;  %12401 = vmatmul.msk.f32.gmra.mxu0 %vm33_vm0, %v9486_v55  ;;  %v10036_v28 = vld [vmem:[#allocation3 + $0xbc] sm:$0xff] }
 0x808   : > { %12425 = vmatmul.msk.f32.gmra.mxu1 %vm33_vm0, %v17249_v62  ;;  %12449 = vmatmul.msk.f32.gmra.mxu2 %vm33_vm0, %v9850_v4  ;;  %v9851_v62 = vld [vmem:[#allocation3 + $0xa3] sm:$0xff] }
 0x809   : > { %12473 = vmatmul.msk.f32.gmra.mxu3 %vm33_vm0, %v17255_v48 }
 0x80b   : > { %v9258_v49 = vpop.f32.mrf.mxu2 }
 0x80c   : > { %v9440_v10 = vpop.f32.mrf.mxu3  ;;  %v9288_v14 = vadd.f32 %v9258_v49, %v9106_v30  ;;  %v8897_v16 = vpop.f32.mrf.mxu0 }
 0x80d   : > { %v9079_v29 = vpop.f32.mrf.mxu1  ;;  %v8925_v40 = vadd.f32 %v8897_v16, %v17247_v47 }
 0x80e   : > { %v17456_v50 = vadd.f32 %v9440_v10, %v9288_v14  ;;  %v9491_v14 = vld [vmem:[#allocation3 + $0xc1] sm:$0xff] }
 0x80f   : > { %v9107_v23 = vadd.f32 %v9079_v29, %v8925_v40  ;;  %12402 = vmatmul.msk.f32.gmra.mxu0 %vm33_vm0, %v9487_v53  ;;  %v9492_v53 = vld [vmem:[#allocation3 + $0xc9] sm:$0xff] }
 0x810   : > { %12426 = vmatmul.msk.f32.gmra.mxu1 %vm33_vm0, %v17264_v52  ;;  %12450 = vmatmul.msk.f32.gmra.mxu2 %vm33_vm0, %v9851_v62  ;;  %v9852_v52 = vld [vmem:[#allocation3 + $0xab] sm:$0xff]  ;;  %v18332_v62 = vld [vmem:[#allocation20_spill] sm:$0xff] }
 0x811   : > { %12474 = vmatmul.msk.f32.gmra.mxu3 %vm33_vm0, %v17270_v43 }
 0x813   : > { %v9261_v48 = vpop.f32.mrf.mxu2 }
 0x814   : > { %v9443_v32 = vpop.f32.mrf.mxu3  ;;  %v9289_v19 = vadd.f32 %v9261_v48, %v9107_v23  ;;  %v8900_v3 = vpop.f32.mrf.mxu0 }
 0x815   : > { %v9082_v47 = vpop.f32.mrf.mxu1  ;;  %v8926_v1 = vadd.f32 %v8900_v3, %v17262_v56 }
 0x816   : > { %v17465_v63 = vadd.f32 %v9443_v32, %v9289_v19 }
 0x817   : > { %v9108_v11 = vadd.f32 %v9082_v47, %v8926_v1  ;;  %12403 = vmatmul.msk.f32.gmra.mxu0 %vm33_vm0, %v9488_v46  ;;  %v18334_v47 = vld [vmem:[#allocation19_spill] sm:$0xff]  ;;  %v9493_v46 = vld [vmem:[#allocation3 + $0xd1] sm:$0xff] }
 0x818   : > { %12427 = vmatmul.msk.f32.gmra.mxu1 %vm33_vm0, %v17278_v5  ;;  %12451 = vmatmul.msk.f32.gmra.mxu2 %vm33_vm0, %v9852_v52  ;;  %v9853_v5 = vld [vmem:[#allocation3 + $0xb3] sm:$0xff] }
 0x819   : > { %12475 = vmatmul.msk.f32.gmra.mxu3 %vm33_vm0, %v17284_v13  ;;  %v18335_v52 = vld [vmem:[#allocation14_spill] sm:$0xff] }
 0x81b   : > { %v9264_v43 = vpop.f32.mrf.mxu2 }
 0x81c   : > { %v9446_v45 = vpop.f32.mrf.mxu3  ;;  %v9290_v9 = vadd.f32 %v9264_v43, %v9108_v11  ;;  %v8903_v51 = vpop.f32.mrf.mxu0  ;;  %v9675_v11 = vld [vmem:[#allocation3 + $0xd2] sm:$0xff] }
 0x81d   : > { %v9085_v56 = vpop.f32.mrf.mxu1  ;;  %v8927_v39 = vadd.f32 %v8903_v51, %v17276_v24 }
 0x81e   : > { %v17474_v22 = vadd.f32 %v9446_v45, %v9290_v9 }
 0x81f   : > { %v9109_v36 = vadd.f32 %v9085_v56, %v8927_v39  ;;  %12404 = vmatmul.msk.f32.gmra.mxu0 %vm33_vm0, %v9489_v44 }
 0x820   : > { %12428 = vmatmul.msk.f32.gmra.mxu1 %vm33_vm0, %v17292_v34  ;;  %12452 = vmatmul.msk.f32.gmra.mxu2 %vm33_vm0, %v9853_v5  ;;  %v9854_v34 = vld [vmem:[#allocation3 + $0xbb] sm:$0xff] }
 0x821   : > { %12476 = vmatmul.msk.f32.gmra.mxu3 %vm33_vm0, %v10035_v15 }
 0x823   : > { %v9267_v13 = vpop.f32.mrf.mxu2 }
 0x824   : > { %v9449_v17 = vpop.f32.mrf.mxu3  ;;  %v9291_v20 = vadd.f32 %v9267_v13, %v9109_v36  ;;  %v8906_v35 = vpop.f32.mrf.mxu0 }
 0x825   : > { %v9088_v24 = vpop.f32.mrf.mxu1  ;;  %v8928_v60 = vadd.f32 %v8906_v35, %v17290_v38  ;;  %v9494_v35 = vld [vmem:[#allocation3 + $0xd9] sm:$0xff] }
 0x826   : > { %v17482_v6 = vadd.f32 %v9449_v17, %v9291_v20 }
 0x827   : > { %v9110_v42 = vadd.f32 %v9088_v24, %v8928_v60  ;;  %12405 = vmatmul.msk.f32.gmra.mxu0 %vm33_vm0, %v9490_v61  ;;  %v9676_v24 = vld [vmem:[#allocation3 + $0xda] sm:$0xff] }
 0x828   : > { %12429 = vmatmul.msk.f32.gmra.mxu1 %vm33_vm0, %v17305_v0  ;;  %12453 = vmatmul.msk.f32.gmra.mxu2 %vm33_vm0, %v9854_v34  ;;  %v9858_v60 = vld [vmem:[#allocation3 + $0xdb] sm:$0xff] }
 0x829   : > { %12477 = vmatmul.msk.f32.gmra.mxu3 %vm33_vm0, %v10036_v28  ;;  %v10040_v61 = vld [vmem:[#allocation3 + $0xdc] sm:$0xff] }
 0x82b   : > { %v9270_v55 = vpop.f32.mrf.mxu2 }
 0x82c   : > { %v9452_v30 = vpop.f32.mrf.mxu3  ;;  %v9292_v4 = vadd.f32 %v9270_v55, %v9110_v42  ;;  %v9577_v49 = vpop.f32.mrf.mxu0 }
 0x82d   : > { %v9759_v38 = vpop.f32.mrf.mxu1  ;;  %v9637_v23 = vadd.f32 %v9577_v49, %v17303_v59  ;;  %v9857_v59 = vld [vmem:[#allocation3 + $0xd3] sm:$0xff] }
 0x82e   : > { %v17489_v10 = vadd.f32 %v9452_v30, %v9292_v4 }
 0x82f   : > { %12406 = vmatmul.msk.f32.gmra.mxu0 %vm33_vm0, %v9491_v14  ;;  %v9819_v48 = vadd.f32 %v9759_v38, %v9637_v23 }
 0x830   : > { %12430 = vmatmul.msk.f32.gmra.mxu1 %vm33_vm0, %v17318_v12  ;;  %12454 = vmatmul.msk.f32.gmra.mxu2 %vm33_vm0, %v17320_v41  ;;  %v18333_v12 = vld [vmem:[#allocation21_spill] sm:$0xff] }
 0x831   : > { %12478 = vmatmul.msk.f32.gmra.mxu3 %vm33_vm0, %v17326_v58 }
 0x833   : > { %v9941_v0 = vpop.f32.mrf.mxu2 }
 0x834   : > { %v10123_v16 = vpop.f32.mrf.mxu3  ;;  %v9580_v29 = vpop.f32.mrf.mxu0  ;;  %v10001_v3 = vadd.f32 %v9941_v0, %v9819_v48 }
 0x835   : > { %v9762_v40 = vpop.f32.mrf.mxu1  ;;  %v9638_v43 = vadd.f32 %v9580_v29, %v18335_v52 }
 0x836   : > { %v10183_v45 = vadd.f32 %v10123_v16, %v10001_v3 }
 0x837   : > { %12407 = vmatmul.msk.f32.gmra.mxu0 %vm33_vm0, %v9492_v53  ;;  %v9820_v39 = vadd.f32 %v9762_v40, %v9638_v43 }
 0x838   : > { %12431 = vmatmul.msk.f32.gmra.mxu1 %vm33_vm0, %v17334_v7  ;;  %12455 = vmatmul.msk.f32.gmra.mxu2 %vm33_vm0, %v18332_v62  ;;  %v10039_v7 = vld [vmem:[#allocation3 + $0xd4] sm:$0xff]  ;;  %v10203_v15 = vmax.f32 %v10183_v45, 0.0 }
 0x839   : > { %12479 = vmatmul.msk.f32.gmra.mxu3 %vm33_vm0, %v18333_v12 }
 0x83a   : > { %v10224_v34 = vsel %vm10223_vm3, %v10203_v15, -inf }
 0x83b   : > { %v9944_v41 = vpop.f32.mrf.mxu2 }
 0x83c   : > { %v10126_v58 = vpop.f32.mrf.mxu3  ;;  %v9583_v32 = vpop.f32.mrf.mxu0  ;;  %v10002_v13 = vadd.f32 %v9944_v41, %v9820_v39 }
 0x83d   : > { %v9765_v19 = vpop.f32.mrf.mxu1  ;;  %v9639_v1 = vadd.f32 %v9583_v32, %v18334_v47 }
 0x83e   : > { %v10184_v28 = vadd.f32 %v10126_v58, %v10002_v13 }
 0x83f   : > { %12408 = vmatmul.msk.f32.gmra.mxu0 %vm33_vm0, %v9493_v46  ;;  %v9821_v9 = vadd.f32 %v9765_v19, %v9639_v1 }
 0x840   : > { %12432 = vmatmul.msk.f32.gmra.mxu1 %vm33_vm0, %v9675_v11  ;;  %12456 = vmatmul.msk.f32.gmra.mxu2 %vm33_vm0, %v9857_v59  ;;  %v10204_v16 = vmax.f32 %v10184_v28, 0.0 }
 0x841   : > { %12480 = vmatmul.msk.f32.gmra.mxu3 %vm33_vm0, %v10039_v7 }
 0x842   : > { %v10227_v53 = vsel %vm10223_vm3, %v10204_v16, -inf }
 0x843   : > { %v9947_v51 = vpop.f32.mrf.mxu2 }
 0x844   : > { %v10129_v56 = vpop.f32.mrf.mxu3  ;;  %v10003_v44 = vadd.f32 %v9947_v51, %v9821_v9  ;;  %v9586_v36 = vpop.f32.mrf.mxu0 }
 0x845   : > { %v9768_v5 = vpop.f32.mrf.mxu1  ;;  %v9640_v20 = vadd.f32 %v9586_v36, %v17348_v21 }
 0x846   : > { %v10185_v17 = vadd.f32 %v10129_v56, %v10003_v44 }
 0x847   : > { %12409 = vmatmul.msk.f32.gmra.mxu0 %vm33_vm0, %v9494_v35  ;;  %v9822_v21 = vadd.f32 %v9768_v5, %v9640_v20 }
 0x848   : > { %12433 = vmatmul.msk.f32.gmra.mxu1 %vm33_vm0, %v9676_v24  ;;  %v10205_v42 = vmax.f32 %v10185_v17, 0.0  ;;  %12457 = vmatmul.msk.f32.gmra.mxu2 %vm33_vm0, %v9858_v60 }
 0x849   : > { %12481 = vmatmul.msk.f32.gmra.mxu3 %vm33_vm0, %v10040_v61 }
 0x84a   : > { %v10225_v55 = vsel %vm10223_vm3, %v10205_v42, -inf }
 0x84b   : > { %v10226_v30 = vmax.f32 %v10224_v34, %v10225_v55  ;;  %v9950_v4 = vpop.f32.mrf.mxu2 }
 0x84c   : > { %v10132_v49 = vpop.f32.mrf.mxu3  ;;  %v10004_v38 = vadd.f32 %v9950_v4, %v9822_v21  ;;  %v9589_v14 = vpop.f32.mrf.mxu0 }
 0x84d   : > { %v9771_v0 = vpop.f32.mrf.mxu1  ;;  %10254 = vst.msk [vmem:[#allocation4] sm:$0xff] %vm10223_vm3, %v10226_v30  ;;  %v9641_v32 = vadd.f32 %v9589_v14, %v17357_v57 }
 0x84e   : > { %v10186_v29 = vadd.f32 %v10132_v49, %v10004_v38 }
 0x84f   : > { %v9823_v46 = vadd.f32 %v9771_v0, %v9641_v32 }
 0x850   : > { %v10206_v40 = vmax.f32 %v10186_v29, 0.0 }
 0x852   : > { %v10228_v23 = vsel %vm10223_vm3, %v10206_v40, -inf }
 0x853   : > { %v10229_v62 = vmax.f32 %v10227_v53, %v10228_v23  ;;  %v9953_v12 = vpop.f32.mrf.mxu2 }
 0x854   : > { %v10135_v41 = vpop.f32.mrf.mxu3  ;;  %v9592_v58 = vpop.f32.mrf.mxu0  ;;  %v10005_v52 = vadd.f32 %v9953_v12, %v9823_v46 }
 0x855   : > { %v9774_v48 = vpop.f32.mrf.mxu1  ;;  %10255 = vst.msk [vmem:[#allocation4 + $0x8] sm:$0xff] %vm10223_vm3, %v10229_v62  ;;  %v9642_v45 = vadd.f32 %v9592_v58, %v17366_v33 }
 0x856   : > { %v10187_v9 = vadd.f32 %v10135_v41, %v10005_v52 }
 0x857   : > { %v9824_v39 = vadd.f32 %v9774_v48, %v9642_v45 }
 0x858   : > { %v10207_v15 = vmax.f32 %v10187_v9, 0.0 }
 0x85a   : > { %v10230_v35 = vsel %vm10223_vm3, %v10207_v15, -inf }
 0x85b   : > { %v9956_v19 = vpop.f32.mrf.mxu2 }
 0x85c   : > { %v10138_v3 = vpop.f32.mrf.mxu3  ;;  %v10264_v47 = vld [vmem:[#allocation4] ss:$2 sm:$0xff]  ;;  %v10274_v1 = vld [vmem:[#allocation4 + $0x1] ss:$2 sm:$0xff]  ;;  %v9595_v11 = vpop.f32.mrf.mxu0  ;;  %v10006_v13 = vadd.f32 %v9956_v19, %v9824_v39 }
 0x85d   : > { %v9777_v59 = vpop.f32.mrf.mxu1  ;;  %v10283_v7 = vmax.f32 %v10264_v47, %v10274_v1  ;;  %v9643_v43 = vadd.f32 %v9595_v11, %v17375_v2 }
 0x85e   : > { %v10188_v24 = vadd.f32 %v10138_v3, %v10006_v13 }
 0x85f   : > { %10290 = vst.msk [vmem:[%s17526_s27] sm:$0xff] %vm10223_vm3, %v10283_v7  ;;  %v9825_v57 = vadd.f32 %v9777_v59, %v9643_v43 }
 0x860   : > { %v10208_v30 = vmax.f32 %v10188_v24, 0.0 }
 0x863   : > { %v9959_v51 = vpop.f32.mrf.mxu2 }
 0x864   : > { %v10141_v56 = vpop.f32.mrf.mxu3  ;;  %v10007_v44 = vadd.f32 %v9959_v51, %v9825_v57  ;;  %v9598_v36 = vpop.f32.mrf.mxu0 }
 0x865   : > { %v9780_v5 = vpop.f32.mrf.mxu1  ;;  %v9644_v2 = vadd.f32 %v9598_v36, %v17384_v26  ;;  %v10233_v26 = vsel %vm10223_vm3, %v10208_v30, -inf }
 0x866   : > { %v10189_v17 = vadd.f32 %v10141_v56, %v10007_v44 }
 0x867   : > { %v9826_v33 = vadd.f32 %v9780_v5, %v9644_v2 }
 0x868   : > { %v10209_v20 = vmax.f32 %v10189_v17, 0.0 }
 0x86a   : > { %v10231_v60 = vsel %vm10223_vm3, %v10209_v20, -inf }
 0x86b   : > { %v10232_v61 = vmax.f32 %v10230_v35, %v10231_v60  ;;  %v9962_v42 = vpop.f32.mrf.mxu2 }
 0x86c   : > { %v10144_v34 = vpop.f32.mrf.mxu3  ;;  %v10008_v28 = vadd.f32 %v9962_v42, %v9826_v33  ;;  %v9601_v55 = vpop.f32.mrf.mxu0 }
 0x86d   : > { %v9783_v21 = vpop.f32.mrf.mxu1  ;;  %10256 = vst.msk [vmem:[#allocation4 + $0x10] sm:$0xff] %vm10223_vm3, %v10232_v61  ;;  %v9645_v53 = vadd.f32 %v9601_v55, %v17393_v37 }
 0x86e   : > { %v10190_v4 = vadd.f32 %v10144_v34, %v10008_v28 }
 0x86f   : > { %v9827_v58 = vadd.f32 %v9783_v21, %v9645_v53 }
 0x870   : > { %v10210_v49 = vmax.f32 %v10190_v4, 0.0 }
 0x872   : > { %v10234_v38 = vsel %vm10223_vm3, %v10210_v49, -inf }
 0x873   : > { %v10235_v14 = vmax.f32 %v10233_v26, %v10234_v38  ;;  %v9965_v0 = vpop.f32.mrf.mxu2 }
 0x874   : > { %v10147_v16 = vpop.f32.mrf.mxu3  ;;  %v9604_v29 = vpop.f32.mrf.mxu0  ;;  %v10009_v3 = vadd.f32 %v9965_v0, %v9827_v58 }
 0x875   : > { %v9786_v40 = vpop.f32.mrf.mxu1  ;;  %10257 = vst.msk [vmem:[#allocation4 + $0x18] sm:$0xff] %vm10223_vm3, %v10235_v14  ;;  %v9646_v1 = vadd.f32 %v9604_v29, %v17402_v8 }
 0x876   : > { %v10191_v46 = vadd.f32 %v10147_v16, %v10009_v3 }
 0x877   : > { %v9828_v37 = vadd.f32 %v9786_v40, %v9646_v1 }
 0x878   : > { %v10211_v9 = vmax.f32 %v10191_v46, 0.0 }
 0x87b   : > { %v9968_v23 = vpop.f32.mrf.mxu2 }
 0x87c   : > { %v10150_v62 = vpop.f32.mrf.mxu3  ;;  %v10266_v12 = vld [vmem:[#allocation4 + $0x10] ss:$2 sm:$0xff]  ;;  %v10276_v41 = vld [vmem:[#allocation4 + $0x11] ss:$2 sm:$0xff]  ;;  %v9607_v48 = vpop.f32.mrf.mxu0  ;;  %v10010_v57 = vadd.f32 %v9968_v23, %v9828_v37 }
 0x87d   : > { %v9789_v32 = vpop.f32.mrf.mxu1  ;;  %v10284_v19 = vmax.f32 %v10266_v12, %v10276_v41  ;;  %v9647_v47 = vadd.f32 %v9607_v48, %v17411_v27  ;;  %v10236_v27 = vsel %vm10223_vm3, %v10211_v9, -inf }
 0x87e   : > { %v10192_v44 = vadd.f32 %v10150_v62, %v10010_v57 }
 0x87f   : > { %10291 = vst.msk [vmem:[%s17526_s27 + $0x8] sm:$0xff] %vm10223_vm3, %v10284_v19  ;;  %v9829_v11 = vadd.f32 %v9789_v32, %v9647_v47 }
 0x880   : > { %v10212_v35 = vmax.f32 %v10192_v44, 0.0 }
 0x883   : > { %v9971_v59 = vpop.f32.mrf.mxu2 }
 0x884   : > { %v10153_v7 = vpop.f32.mrf.mxu3  ;;  %v10011_v52 = vadd.f32 %v9971_v59, %v9829_v11  ;;  %v9610_v43 = vpop.f32.mrf.mxu0 }
 0x885   : > { %v9792_v45 = vpop.f32.mrf.mxu1  ;;  %v9648_v56 = vadd.f32 %v9610_v43, %v17420_v25  ;;  %v10239_v25 = vsel %vm10223_vm3, %v10212_v35, -inf }
 0x886   : > { %v10193_v51 = vadd.f32 %v10153_v7, %v10011_v52 }
 0x887   : > { %v9830_v8 = vadd.f32 %v9792_v45, %v9648_v56 }
 0x888   : > { %v10213_v39 = vmax.f32 %v10193_v51, 0.0 }
 0x88a   : > { %v10237_v36 = vsel %vm10223_vm3, %v10213_v39, -inf }
 0x88b   : > { %v10238_v5 = vmax.f32 %v10236_v27, %v10237_v36  ;;  %v9974_v15 = vpop.f32.mrf.mxu2 }
 0x88c   : > { %v10156_v13 = vpop.f32.mrf.mxu3  ;;  %v10012_v17 = vadd.f32 %v9974_v15, %v9830_v8  ;;  %v9613_v2 = vpop.f32.mrf.mxu0 }
 0x88d   : > { %v9795_v20 = vpop.f32.mrf.mxu1  ;;  %10258 = vst.msk [vmem:[#allocation4 + $0x20] sm:$0xff] %vm10223_vm3, %v10238_v5  ;;  %v9649_v21 = vadd.f32 %v9613_v2, %v17429_v54 }
 0x88e   : > { %v10194_v24 = vadd.f32 %v10156_v13, %v10012_v17 }
 0x88f   : > { %v9831_v38 = vadd.f32 %v9795_v20, %v9649_v21 }
 0x890   : > { %v10214_v60 = vmax.f32 %v10194_v24, 0.0 }
 0x892   : > { %v10240_v33 = vsel %vm10223_vm3, %v10214_v60, -inf }
 0x893   : > { %v10241_v61 = vmax.f32 %v10239_v25, %v10240_v33  ;;  %v9977_v42 = vpop.f32.mrf.mxu2 }
 0x894   : > { %v10159_v34 = vpop.f32.mrf.mxu3  ;;  %v9616_v28 = vpop.f32.mrf.mxu0  ;;  %v10013_v29 = vadd.f32 %v9977_v42, %v9831_v38 }
 0x895   : > { %v9798_v55 = vpop.f32.mrf.mxu1  ;;  %10259 = vst.msk [vmem:[#allocation4 + $0x28] sm:$0xff] %vm10223_vm3, %v10241_v61  ;;  %v9650_v53 = vadd.f32 %v9616_v28, %v17438_v31 }
 0x896   : > { %v10195_v23 = vadd.f32 %v10159_v34, %v10013_v29 }
 0x897   : > { %v9832_v54 = vadd.f32 %v9798_v55, %v9650_v53 }
 0x898   : > { %v10215_v19 = vmax.f32 %v10195_v23, 0.0 }
 0x89b   : > { %v9980_v30 = vpop.f32.mrf.mxu2 }
 0x89c   : > { %v10162_v4 = vpop.f32.mrf.mxu3  ;;  %v10268_v49 = vld [vmem:[#allocation4 + $0x20] ss:$2 sm:$0xff]  ;;  %v10278_v26 = vld [vmem:[#allocation4 + $0x21] ss:$2 sm:$0xff]  ;;  %v9619_v14 = vpop.f32.mrf.mxu0  ;;  %v10014_v3 = vadd.f32 %v9980_v30, %v9832_v54 }
 0x89d   : > { %v9801_v0 = vpop.f32.mrf.mxu1  ;;  %v10285_v16 = vmax.f32 %v10268_v49, %v10278_v26  ;;  %v9651_v40 = vadd.f32 %v9619_v14, %v17447_v18  ;;  %v10242_v18 = vsel %vm10223_vm3, %v10215_v19, -inf }
 0x89e   : > { %v10196_v11 = vadd.f32 %v10162_v4, %v10014_v3 }
 0x89f   : > { %10292 = vst.msk [vmem:[%s17526_s27 + $0x10] sm:$0xff] %vm10223_vm3, %v10285_v16  ;;  %v9833_v62 = vadd.f32 %v9801_v0, %v9651_v40 }
 0x8a0   : > { %v10216_v57 = vmax.f32 %v10196_v11, 0.0  ;;  %v12490_v11 = vld [vmem:[%s18243_s5 + $0x78] sm:$0xff] (%p37_p0) }
 0x8a1   :  { %10354 = vmatpush.msra.mxu1 (%p37_p0), %v12490_v11  ;;  %v12519_v11 = vld [vmem:[%s18243_s5 + $0x140] sm:$0xff] (%p37_p0) }
 0x8a3   : > { %v9983_v12 = vpop.f32.mrf.mxu2 }
 0x8a4   : > { %v10165_v41 = vpop.f32.mrf.mxu3  ;;  %v10015_v58 = vadd.f32 %v9983_v12, %v9833_v62  ;;  %v9622_v48 = vpop.f32.mrf.mxu0 }
 0x8a5   : > { %v9804_v32 = vpop.f32.mrf.mxu1  ;;  %v9652_v1 = vadd.f32 %v9622_v48, %v17456_v50  ;;  %v10245_v50 = vsel %vm10223_vm3, %v10216_v57, -inf  ;;  %v12496_v57 = vld [vmem:[%s18243_s5 + $0xa0] sm:$0xff] (%p37_p0) }
 0x8a6   : > { %v10197_v47 = vadd.f32 %v10165_v41, %v10015_v58 }
 0x8a7   : > { %v9834_v31 = vadd.f32 %v9804_v32, %v9652_v1  ;;  %v10303_v1 = vld [vmem:[%s18243_s5 + $0x38] sm:$0xff] (%p37_p0) }
 0x8a8   : > { %v10217_v46 = vmax.f32 %v10197_v47, 0.0  ;;  %10320 = vmatpush.msra.mxu0 (%p37_p0), %v10303_v1 }
 0x8aa   : > { %v10243_v59 = vsel %vm10223_vm3, %v10217_v46, -inf  ;;  %v12499_v46 = vld [vmem:[%s18243_s5 + $0xb8] sm:$0xff] (%p37_p0) }
 0x8ab   : > { %v10244_v7 = vmax.f32 %v10242_v18, %v10243_v59  ;;  %v9986_v37 = vpop.f32.mrf.mxu2  ;;  %v10302_v18 = vld [vmem:[%s18243_s5 + $0x30] sm:$0xff] (%p37_p0)  ;;  %10389 = vmatpush.msra.mxu2 (%p37_p0), %v12499_v46  ;;  %v12553_v46 = vld [vmem:[%s18243_s5 + $0x238] sm:$0xff] (%p37_p0) }
 0x8ac   : > { %v10168_v52 = vpop.f32.mrf.mxu3  ;;  %v10016_v43 = vadd.f32 %v9986_v37, %v9834_v31  ;;  %v9625_v45 = vpop.f32.mrf.mxu0  ;;  %v12498_v59 = vld [vmem:[%s18243_s5 + $0xb0] sm:$0xff] (%p37_p0)  ;;  %v12508_v31 = vld [vmem:[%s18243_s5 + $0xf8] sm:$0xff] (%p37_p0)  ;;  %10321 = vmatpush.msra.mxu0 (%p37_p0), %v10302_v18 }
 0x8ad   : > { %v9807_v9 = vpop.f32.mrf.mxu1  ;;  %10260 = vst.msk [vmem:[#allocation4 + $0x30] sm:$0xff] %vm10223_vm3, %v10244_v7  ;;  %v9653_v15 = vadd.f32 %v9625_v45, %v17465_v63  ;;  %10424 = vmatpush.msra.mxu3 (%p37_p0), %v12508_v31  ;;  %v10301_v7 = vld [vmem:[%s18243_s5 + $0x28] sm:$0xff] (%p37_p0)  ;;  %v12489_v37 = vld [vmem:[%s18243_s5 + $0x70] sm:$0xff] (%p37_p0)  ;;  %10390 = vmatpush.msra.mxu2 (%p37_p0), %v12498_v59  ;;  %v12571_v18 = vld [vmem:[%s18243_s5 + $0x2b8] sm:$0xff] (%p37_p0) }
 0x8ae   : > { %v10198_v51 = vadd.f32 %v10168_v52, %v10016_v43  ;;  %v12497_v52 = vld [vmem:[%s18243_s5 + $0xa8] sm:$0xff] (%p37_p0)  ;;  %v12507_v43 = vld [vmem:[%s18243_s5 + $0xf0] sm:$0xff] (%p37_p0)  ;;  %10355 = vmatpush.msra.mxu1 (%p37_p0), %v12489_v37  ;;  %10322 = vmatpush.msra.mxu0 (%p37_p0), %v10301_v7  ;;  %v12537_v59 = vld [vmem:[%s18243_s5 + $0x1c0] sm:$0xff] (%p37_p0) }
 0x8af   : > { %v9835_v35 = vadd.f32 %v9807_v9, %v9653_v15  ;;  %v12488_v45 = vld [vmem:[%s18243_s5 + $0x68] sm:$0xff] (%p37_p0)  ;;  %10425 = vmatpush.msra.mxu3 (%p37_p0), %v12507_v43  ;;  %v10300_v9 = vld [vmem:[%s18243_s5 + $0x20] sm:$0xff] (%p37_p0)  ;;  %10391 = vmatpush.msra.mxu2 (%p37_p0), %v12497_v52  ;;  %v12485_v15 = vld [vmem:[%s18243_s5 + $0x50] sm:$0xff] (%p37_p0) }
 0x8b0   : > { %v10218_v56 = vmax.f32 %v10198_v51, 0.0  ;;  %v12506_v51 = vld [vmem:[%s18243_s5 + $0xe8] sm:$0xff] (%p37_p0)  ;;  %10356 = vmatpush.msra.mxu1 (%p37_p0), %v12488_v45  ;;  %10323 = vmatpush.msra.mxu0 (%p37_p0), %v10300_v9  ;;  %v12552_v7 = vld [vmem:[%s18243_s5 + $0x230] sm:$0xff] (%p37_p0)  ;;  %v12562_v37 = vld [vmem:[%s18243_s5 + $0x278] sm:$0xff] (%p37_p0) }
 0x8b1   :  { %10426 = vmatpush.msra.mxu3 (%p37_p0), %v12506_v51  ;;  %10392 = vmatpush.msra.mxu2 (%p37_p0), %v12496_v57  ;;  %v12570_v52 = vld [vmem:[%s18243_s5 + $0x2b0] sm:$0xff] (%p37_p0)  ;;  %v12580_v43 = vld [vmem:[%s18243_s5 + $0x2f8] sm:$0xff] (%p37_p0)  ;;  %v12551_v45 = vld [vmem:[%s18243_s5 + $0x228] sm:$0xff] (%p37_p0) }
 0x8b2   : > { %v10246_v39 = vsel %vm10223_vm3, %v10218_v56, -inf  ;;  %v12487_v56 = vld [vmem:[%s18243_s5 + $0x60] sm:$0xff] (%p37_p0)  ;;  %v12561_v9 = vld [vmem:[%s18243_s5 + $0x270] sm:$0xff] (%p37_p0)  ;;  %v12569_v57 = vld [vmem:[%s18243_s5 + $0x2a8] sm:$0xff] (%p37_p0) }
 0x8b3   : > { %v10247_v27 = vmax.f32 %v10245_v50, %v10246_v39  ;;  %v9989_v44 = vpop.f32.mrf.mxu2  ;;  %v12505_v50 = vld [vmem:[%s18243_s5 + $0xe0] sm:$0xff] (%p37_p0)  ;;  %v10299_v39 = vld [vmem:[%s18243_s5 + $0x18] sm:$0xff] (%p37_p0)  ;;  %10357 = vmatpush.msra.mxu1 (%p37_p0), %v12487_v56  ;;  %v12579_v51 = vld [vmem:[%s18243_s5 + $0x2f0] sm:$0xff] (%p37_p0) }
 0x8b4   : > { %v10171_v36 = vpop.f32.mrf.mxu3  ;;  %v9628_v8 = vpop.f32.mrf.mxu0  ;;  %v10017_v25 = vadd.f32 %v9989_v44, %v9835_v35  ;;  %v12486_v44 = vld [vmem:[%s18243_s5 + $0x58] sm:$0xff] (%p37_p0)  ;;  %10427 = vmatpush.msra.mxu3 (%p37_p0), %v12505_v50  ;;  %10324 = vmatpush.msra.mxu0 (%p37_p0), %v10299_v39  ;;  %v12502_v35 = vld [vmem:[%s18243_s5 + $0xc8] sm:$0xff] (%p37_p0)  ;;  %v12550_v50 = vld [vmem:[%s18243_s5 + $0x220] sm:$0xff] (%p37_p0) }
 0x8b5   : > { %10261 = vst.msk [vmem:[#allocation4 + $0x38] sm:$0xff] %vm10223_vm3, %v10247_v27  ;;  %v9810_v5 = vpop.f32.mrf.mxu1  ;;  %v9654_v42 = vadd.f32 %v9628_v8, %v17474_v22  ;;  %v12495_v27 = vld [vmem:[%s18243_s5 + $0x98] sm:$0xff] (%p37_p0)  ;;  %v10298_v8 = vld [vmem:[%s18243_s5 + $0x10] sm:$0xff] (%p37_p0)  ;;  %10358 = vmatpush.msra.mxu1 (%p37_p0), %v12486_v44  ;;  %v12560_v39 = vld [vmem:[%s18243_s5 + $0x268] sm:$0xff] (%p37_p0) }
 0x8b6   : > { %v10199_v34 = vadd.f32 %v10171_v36, %v10017_v25  ;;  %v12504_v36 = vld [vmem:[%s18243_s5 + $0xd8] sm:$0xff] (%p37_p0)  ;;  %10393 = vmatpush.msra.mxu2 (%p37_p0), %v12495_v27  ;;  %10325 = vmatpush.msra.mxu0 (%p37_p0), %v10298_v8  ;;  %v12568_v27 = vld [vmem:[%s18243_s5 + $0x2a0] sm:$0xff] (%p37_p0)  ;;  %v12578_v44 = vld [vmem:[%s18243_s5 + $0x2e8] sm:$0xff] (%p37_p0) }
 0x8b7   : > { %v9836_v63 = vadd.f32 %v9810_v5, %v9654_v42  ;;  %v12494_v5 = vld [vmem:[%s18243_s5 + $0x90] sm:$0xff] (%p37_p0)  ;;  %10428 = vmatpush.msra.mxu3 (%p37_p0), %v12504_v36  ;;  %10359 = vmatpush.msra.mxu1 (%p37_p0), %v12485_v15  ;;  %v12517_v25 = vld [vmem:[%s18243_s5 + $0x138] sm:$0xff] (%p37_p0)  ;;  %v12501_v42 = vld [vmem:[%s18243_s5 + $0xc0] sm:$0xff] (%p37_p0) }
 0x8b8   : > { %v10219_v49 = vmax.f32 %v10199_v34, 0.0  ;;  %10394 = vmatpush.msra.mxu2 (%p37_p0), %v12494_v5  ;;  %v12516_v34 = vld [vmem:[%s18243_s5 + $0x130] sm:$0xff] (%p37_p0)  ;;  %v12549_v5 = vld [vmem:[%s18243_s5 + $0x218] sm:$0xff] (%p37_p0)  ;;  %v12559_v15 = vld [vmem:[%s18243_s5 + $0x260] sm:$0xff] (%p37_p0) }
 0x8bb   : > { %v9992_v13 = vpop.f32.mrf.mxu2 }
 0x8bc   : > { %v10174_v17 = vpop.f32.mrf.mxu3  ;;  %v10270_v2 = vld [vmem:[#allocation4 + $0x30] ss:$2 sm:$0xff]  ;;  %v10280_v20 = vld [vmem:[#allocation4 + $0x31] ss:$2 sm:$0xff]  ;;  %v9631_v24 = vpop.f32.mrf.mxu0  ;;  %v10018_v26 = vadd.f32 %v9992_v13, %v9836_v63  ;;  %v12503_v13 = vld [vmem:[%s18243_s5 + $0xd0] sm:$0xff] (%p37_p0) }
 0x8bd   : > { %v10286_v60 = vmax.f32 %v10270_v2, %v10280_v20  ;;  %v9655_v33 = vadd.f32 %v9631_v24, %v17482_v6  ;;  %v9813_v61 = vpop.f32.mrf.mxu1  ;;  %v10248_v6 = vsel %vm10223_vm3, %v10219_v49, -inf  ;;  %v12493_v2 = vld [vmem:[%s18243_s5 + $0x88] sm:$0xff] (%p37_p0)  ;;  %10429 = vmatpush.msra.mxu3 (%p37_p0), %v12503_v13  ;;  %v10296_v24 = vld [vmem:[%s18243_s5] sm:$0xff] (%p37_p0)  ;;  %v12543_v49 = vld [vmem:[%s18243_s5 + $0x1f0] sm:$0xff] (%p37_p0) }
 0x8be   : > { %v10200_v29 = vadd.f32 %v10174_v17, %v10018_v26  ;;  %v10297_v17 = vld [vmem:[%s18243_s5 + $0x8] sm:$0xff] (%p37_p0)  ;;  %10395 = vmatpush.msra.mxu2 (%p37_p0), %v12493_v2  ;;  %v12514_v26 = vld [vmem:[%s18243_s5 + $0x120] sm:$0xff] (%p37_p0)  ;;  %v12567_v13 = vld [vmem:[%s18243_s5 + $0x298] sm:$0xff] (%p37_p0) }
 0x8bf   : > { %10293 = vst.msk [vmem:[%s17526_s27 + $0x18] sm:$0xff] %vm10223_vm3, %v10286_v60  ;;  %v9837_v28 = vadd.f32 %v9813_v61, %v9655_v33  ;;  %v12484_v20 = vld [vmem:[%s18243_s5 + $0x48] sm:$0xff] (%p37_p0)  ;;  %v12492_v60 = vld [vmem:[%s18243_s5 + $0x80] sm:$0xff] (%p37_p0)  ;;  %10326 = vmatpush.msra.mxu0 (%p37_p0), %v10297_v17  ;;  %v12535_v33 = vld [vmem:[%s18243_s5 + $0x1b8] sm:$0xff] (%p37_p0)  ;;  %10430 = vmatpush.msra.mxu3 (%p37_p0), %v12502_v35 }
 0x8c0   : > { %v10220_v41 = vmax.f32 %v10200_v29, 0.0  ;;  %10360 = vmatpush.msra.mxu1 (%p37_p0), %v12484_v20  ;;  %v12483_v61 = vld [vmem:[%s18243_s5 + $0x40] sm:$0xff] (%p37_p0)  ;;  %10396 = vmatpush.msra.mxu2 (%p37_p0), %v12492_v60  ;;  %v12515_v63 = vld [vmem:[%s18243_s5 + $0x128] sm:$0xff] (%p37_p0)  ;;  %v12531_v29 = vld [vmem:[%s18243_s5 + $0x198] sm:$0xff] (%p37_p0) }
 0x8c1   :  { %10327 = vmatpush.msra.mxu0 (%p37_p0), %v10296_v24  ;;  %10431 = vmatpush.msra.mxu3 (%p37_p0), %v12501_v42  ;;  %v12577_v17 = vld [vmem:[%s18243_s5 + $0x2e0] sm:$0xff] (%p37_p0)  ;;  %v12548_v20 = vld [vmem:[%s18243_s5 + $0x210] sm:$0xff] (%p37_p0)  ;;  %v12558_v35 = vld [vmem:[%s18243_s5 + $0x258] sm:$0xff] (%p37_p0) }
 0x8c2   :  { %10529 = vmatpush.msrb.mxu2 (%p37_p0), %v12535_v33  ;;  %10361 = vmatpush.msra.mxu1 (%p37_p0), %v12483_v61  ;;  %v12566_v24 = vld [vmem:[%s18243_s5 + $0x290] sm:$0xff] (%p37_p0)  ;;  %v12576_v60 = vld [vmem:[%s18243_s5 + $0x2d8] sm:$0xff] (%p37_p0)  ;;  %v12565_v61 = vld [vmem:[%s18243_s5 + $0x288] sm:$0xff] (%p37_p0) }
 0x8c3   : > { %v9995_v55 = vpop.f32.mrf.mxu2  ;;  %10459 = vmatpush.msrb.mxu0 (%p37_p0), %v12517_v25  ;;  %v12547_v25 = vld [vmem:[%s18243_s5 + $0x208] sm:$0xff] (%p37_p0)  ;;  %v12557_v33 = vld [vmem:[%s18243_s5 + $0x250] sm:$0xff] (%p37_p0) }
 0x8c4   : > { %v10177_v21 = vpop.f32.mrf.mxu3  ;;  %v10019_v30 = vadd.f32 %v9995_v55, %v9837_v28  ;;  %v9634_v4 = vpop.f32.mrf.mxu0  ;;  %v12526_v28 = vld [vmem:[%s18243_s5 + $0x178] sm:$0xff] (%p37_p0)  ;;  %v12534_v55 = vld [vmem:[%s18243_s5 + $0x1b0] sm:$0xff] (%p37_p0) }
 0x8c5   : > { %v9656_v14 = vadd.f32 %v9634_v4, %v17489_v10  ;;  %v9816_v16 = vpop.f32.mrf.mxu1  ;;  %v10251_v10 = vsel %vm10223_vm3, %v10220_v41, -inf  ;;  %10460 = vmatpush.msrb.mxu0 (%p37_p0), %v12516_v34  ;;  %10494 = vmatpush.msrb.mxu1 (%p37_p0), %v12526_v28  ;;  %v12533_v4 = vld [vmem:[%s18243_s5 + $0x1a8] sm:$0xff] (%p37_p0)  ;;  %v12521_v41 = vld [vmem:[%s18243_s5 + $0x150] sm:$0xff] (%p37_p0)  ;;  %v12546_v34 = vld [vmem:[%s18243_s5 + $0x200] sm:$0xff] (%p37_p0) }
 0x8c6   : > { %v10201_v38 = vadd.f32 %v10177_v21, %v10019_v30  ;;  %v12544_v21 = vld [vmem:[%s18243_s5 + $0x1f8] sm:$0xff] (%p37_p0)  ;;  %v12525_v30 = vld [vmem:[%s18243_s5 + $0x170] sm:$0xff] (%p37_p0)  ;;  %10530 = vmatpush.msrb.mxu2 (%p37_p0), %v12534_v55  ;;  %v12556_v28 = vld [vmem:[%s18243_s5 + $0x248] sm:$0xff] (%p37_p0) }
 0x8c7   : > { %v9838_v22 = vadd.f32 %v9816_v16, %v9656_v14  ;;  %10564 = vmatpush.msrb.mxu3 (%p37_p0), %v12544_v21  ;;  %10461 = vmatpush.msrb.mxu0 (%p37_p0), %v12515_v63  ;;  %v12532_v14 = vld [vmem:[%s18243_s5 + $0x1a0] sm:$0xff] (%p37_p0)  ;;  %v12513_v16 = vld [vmem:[%s18243_s5 + $0x118] sm:$0xff] (%p37_p0)  ;;  %v12575_v42 = vld [vmem:[%s18243_s5 + $0x2d0] sm:$0xff] (%p37_p0) }
 0x8c8   : > { %v10221_v0 = vmax.f32 %v10201_v38, 0.0  ;;  %v12524_v38 = vld [vmem:[%s18243_s5 + $0x168] sm:$0xff] (%p37_p0)  ;;  %10495 = vmatpush.msrb.mxu1 (%p37_p0), %v12525_v30  ;;  %10531 = vmatpush.msrb.mxu2 (%p37_p0), %v12533_v4  ;;  %v12564_v55 = vld [vmem:[%s18243_s5 + $0x280] sm:$0xff] (%p37_p0)  ;;  %v12589_v30 = vld [vmem:[%s18243_s5 + $0x338] sm:$0xff] (%p37_p0) }
 0x8c9   :  { %10565 = vmatpush.msrb.mxu3 (%p37_p0), %v12543_v49  ;;  %10462 = vmatpush.msrb.mxu0 (%p37_p0), %v12514_v26  ;;  %v12574_v21 = vld [vmem:[%s18243_s5 + $0x2c8] sm:$0xff] (%p37_p0)  ;;  %v12607_v4 = vld [vmem:[%s18243_s5 + $0x3b8] sm:$0xff] (%p37_p0)  ;;  %v12555_v26 = vld [vmem:[%s18243_s5 + $0x240] sm:$0xff] (%p37_p0) }
 0x8ca   : > { %v10249_v40 = vsel %vm10223_vm3, %v10221_v0, -inf  ;;  %v12542_v0 = vld [vmem:[%s18243_s5 + $0x1e8] sm:$0xff] (%p37_p0)  ;;  %10496 = vmatpush.msrb.mxu1 (%p37_p0), %v12524_v38  ;;  %10532 = vmatpush.msrb.mxu2 (%p37_p0), %v12532_v14  ;;  %v12573_v38 = vld [vmem:[%s18243_s5 + $0x2c0] sm:$0xff] (%p37_p0) }
 0x8cb   : > { %v10250_v53 = vmax.f32 %v10248_v6, %v10249_v40  ;;  %v9998_v23 = vpop.f32.mrf.mxu2  ;;  %v12523_v6 = vld [vmem:[%s18243_s5 + $0x160] sm:$0xff] (%p37_p0)  ;;  %10566 = vmatpush.msrb.mxu3 (%p37_p0), %v12542_v0  ;;  %10463 = vmatpush.msrb.mxu0 (%p37_p0), %v12513_v16  ;;  %v12588_v0 = vld [vmem:[%s18243_s5 + $0x330] sm:$0xff] (%p37_p0)  ;;  %v12598_v16 = vld [vmem:[%s18243_s5 + $0x378] sm:$0xff] (%p37_p0) }
 0x8cc   : > { %v10020_v62 = vadd.f32 %v9998_v23, %v9838_v22  ;;  %v10180_v12 = vpop.f32.mrf.mxu3  ;;  %v12541_v40 = vld [vmem:[%s18243_s5 + $0x1e0] sm:$0xff] (%p37_p0)  ;;  %v12512_v22 = vld [vmem:[%s18243_s5 + $0x110] sm:$0xff] (%p37_p0)  ;;  %10497 = vmatpush.msrb.mxu1 (%p37_p0), %v12523_v6  ;;  %10533 = vmatpush.msrb.mxu2 (%p37_p0), %v12531_v29  ;;  %v12616_v29 = vld [vmem:[%s18243_s5 + $0x3f8] sm:$0xff] (%p37_p0) }
 0x8cd   : > { %10262 = vst.msk [vmem:[#allocation4 + $0x40] sm:$0xff] %vm10223_vm3, %v10250_v53  ;;  %v12522_v53 = vld [vmem:[%s18243_s5 + $0x158] sm:$0xff] (%p37_p0)  ;;  %v12530_v23 = vld [vmem:[%s18243_s5 + $0x190] sm:$0xff] (%p37_p0)  ;;  %10567 = vmatpush.msrb.mxu3 (%p37_p0), %v12541_v40  ;;  %10464 = vmatpush.msrb.mxu0 (%p37_p0), %v12512_v22  ;;  %v12587_v22 = vld [vmem:[%s18243_s5 + $0x328] sm:$0xff] (%p37_p0) }
 0x8ce   : > { %v10202_v54 = vadd.f32 %v10180_v12, %v10020_v62  ;;  %v12540_v62 = vld [vmem:[%s18243_s5 + $0x1d8] sm:$0xff] (%p37_p0)  ;;  %v12511_v12 = vld [vmem:[%s18243_s5 + $0x108] sm:$0xff] (%p37_p0)  ;;  %10498 = vmatpush.msrb.mxu1 (%p37_p0), %v12522_v53  ;;  %10534 = vmatpush.msrb.mxu2 (%p37_p0), %v12530_v23  ;;  %v12606_v6 = vld [vmem:[%s18243_s5 + $0x3b0] sm:$0xff] (%p37_p0) }
 0x8cf   :  { %10568 = vmatpush.msrb.mxu3 (%p37_p0), %v12540_v62  ;;  %10465 = vmatpush.msrb.mxu0 (%p37_p0), %v12511_v12  ;;  %v12597_v53 = vld [vmem:[%s18243_s5 + $0x370] sm:$0xff] (%p37_p0)  ;;  %v12605_v23 = vld [vmem:[%s18243_s5 + $0x3a8] sm:$0xff] (%p37_p0)  ;;  %v12586_v12 = vld [vmem:[%s18243_s5 + $0x320] sm:$0xff] (%p37_p0) }
 0x8d0   : > { %v10222_v58 = vmax.f32 %v10202_v54, 0.0  ;;  %v12529_v54 = vld [vmem:[%s18243_s5 + $0x188] sm:$0xff] (%p37_p0)  ;;  %10499 = vmatpush.msrb.mxu1 (%p37_p0), %v12521_v41  ;;  %v12615_v62 = vld [vmem:[%s18243_s5 + $0x3f0] sm:$0xff] (%p37_p0) }
 0x8d1   :  { %10535 = vmatpush.msrb.mxu2 (%p37_p0), %v12529_v54  ;;  %v12596_v41 = vld [vmem:[%s18243_s5 + $0x368] sm:$0xff] (%p37_p0)  ;;  %v12604_v54 = vld [vmem:[%s18243_s5 + $0x3a0] sm:$0xff] (%p37_p0) }
 0x8d2   : > { %v10252_v48 = vsel %vm10223_vm3, %v10222_v58, -inf  ;;  %v12539_v58 = vld [vmem:[%s18243_s5 + $0x1d0] sm:$0xff] (%p37_p0) }
 0x8d3   : > { %v10253_v32 = vmax.f32 %v10251_v10, %v10252_v48  ;;  %v12510_v48 = vld [vmem:[%s18243_s5 + $0x100] sm:$0xff] (%p37_p0)  ;;  %10569 = vmatpush.msrb.mxu3 (%p37_p0), %v12539_v58  ;;  %v12614_v58 = vld [vmem:[%s18243_s5 + $0x3e8] sm:$0xff] (%p37_p0) }
 0x8d4   :  { %10466 = vmatpush.msrb.mxu0 (%p37_p0), %v12510_v48  ;;  %v12595_v48 = vld [vmem:[%s18243_s5 + $0x360] sm:$0xff] (%p37_p0) }
 0x8d5   : > { %10263 = vst.msk [vmem:[#allocation4 + $0x48] sm:$0xff] %vm10223_vm3, %v10253_v32  ;;  %v12520_v32 = vld [vmem:[%s18243_s5 + $0x148] sm:$0xff] (%p37_p0) }
 0x8d6   :  { %10500 = vmatpush.msrb.mxu1 (%p37_p0), %v12520_v32  ;;  %v12603_v32 = vld [vmem:[%s18243_s5 + $0x398] sm:$0xff] (%p37_p0) }
 0x8d8   :  { %10501 = vmatpush.msrb.mxu1 (%p37_p0), %v12519_v11  ;;  %v12593_v11 = vld [vmem:[%s18243_s5 + $0x350] sm:$0xff] (%p37_p0) }
 0x8db   :  { %39 = sbr.rel (!%p37_p0) target bundleno = 2 (0x2), region = 157 }
 0x8dc   : > { %v10272_v19 = vld [vmem:[#allocation4 + $0x40] ss:$2 sm:$0xff]  ;;  %v10282_v3 = vld [vmem:[#allocation4 + $0x41] ss:$2 sm:$0xff] }
 0x8dd   : > { %v10287_v47 = vmax.f32 %v10272_v19, %v10282_v3  ;;  %v12528_v19 = vld [vmem:[%s18243_s5 + $0x180] sm:$0xff] (%p37_p0)  ;;  %v12538_v3 = vld [vmem:[%s18243_s5 + $0x1c8] sm:$0xff] (%p37_p0) }
 0x8de   :  { %10536 = vmatpush.msrb.mxu2 (%p37_p0), %v12528_v19  ;;  %10570 = vmatpush.msrb.mxu3 (%p37_p0), %v12538_v3  ;;  %v12613_v19 = vld [vmem:[%s18243_s5 + $0x3e0] sm:$0xff] (%p37_p0)  ;;  %v12584_v3 = vld [vmem:[%s18243_s5 + $0x310] sm:$0xff] (%p37_p0) }
 0x8df   : > { %10294 = vst.msk [vmem:[%s17526_s27 + $0x20] sm:$0xff] %vm10223_vm3, %v10287_v47 }
 0x8e0   :  { %10571 = vmatpush.msrb.mxu3 %v12537_v59  ;;  %v12601_v59 = vld [vmem:[%s18243_s5 + $0x388] sm:$0xff] }
 0x8e6   :  { %v10368_v10 = vld [vmem:[#allocation5 + $0x2] ss:$40 sm:$0x3]  ;;  %v10295_v47 = vld [vmem:[#allocation5] ss:$40 sm:$0x3] }
 0x8e7   :  { %12500 = vmatmul.msk.f32.vlgmr.msra.gmra.mxu2 %vm10223_vm3, %v10368_v10  ;;  %v10403_v1 = vld [vmem:[#allocation5 + $0x3] ss:$40 sm:$0x3]  ;;  %12482 = vmatmul.msk.f32.vlgmr.msra.gmra.mxu0 %vm10223_vm3, %v10295_v47  ;;  %v10333_v31 = vld [vmem:[#allocation5 + $0x1] ss:$40 sm:$0x3] }
 0x8e8   :  { %12509 = vmatmul.msk.f32.vlgmr.msra.gmra.mxu3 %vm10223_vm3, %v10403_v1  ;;  %10599 = vmatpush.msra.mxu0 %v12553_v46  ;;  %v10508_v56 = vld [vmem:[#allocation5 + $0x9] ss:$40 sm:$0x3]  ;;  %v10438_v36 = vld [vmem:[#allocation5 + $0x4] ss:$40 sm:$0x3] }
 0x8e9   :  { %10669 = vmatpush.msra.mxu2 %v12571_v18  ;;  %12491 = vmatmul.msk.f32.vlgmr.msra.gmra.mxu1 %vm10223_vm3, %v10333_v31  ;;  %v10543_v8 = vld [vmem:[#allocation5 + $0xa] ss:$40 sm:$0x3]  ;;  %v10473_v2 = vld [vmem:[#allocation5 + $0x8] ss:$40 sm:$0x3] }
 0x8ea   :  { %10600 = vmatpush.msra.mxu0 %v12552_v7  ;;  %10634 = vmatpush.msra.mxu1 %v12562_v37  ;;  %v10648_v63 = vld [vmem:[#allocation5 + $0x10] ss:$40 sm:$0x3]  ;;  %v10578_v49 = vld [vmem:[#allocation5 + $0xb] ss:$40 sm:$0x3] }
 0x8eb   :  { %10670 = vmatpush.msra.mxu2 %v12570_v52  ;;  %10704 = vmatpush.msra.mxu3 %v12580_v43  ;;  %v10683_v14 = vld [vmem:[#allocation5 + $0x11] ss:$40 sm:$0x3]  ;;  %v10613_v40 = vld [vmem:[#allocation5 + $0xc] ss:$40 sm:$0x3] }
 0x8ec   :  { %10601 = vmatpush.msra.mxu0 %v12551_v45  ;;  %10635 = vmatpush.msra.mxu1 %v12561_v9  ;;  %v12585_v10 = vld [vmem:[%s18243_s5 + $0x318] sm:$0xff]  ;;  %v12602_v1 = vld [vmem:[%s18243_s5 + $0x390] sm:$0xff]  ;;  %v12583_v18 = vld [vmem:[%s18243_s5 + $0x308] sm:$0xff] }
 0x8ed   :  { %10671 = vmatpush.msra.mxu2 %v12569_v57  ;;  %10705 = vmatpush.msra.mxu3 %v12579_v51  ;;  %v12594_v47 = vld [vmem:[%s18243_s5 + $0x358] sm:$0xff]  ;;  %v12611_v31 = vld [vmem:[%s18243_s5 + $0x3d0] sm:$0xff]  ;;  %v12582_v7 = vld [vmem:[%s18243_s5 + $0x300] sm:$0xff] }
 0x8ee   :  { %10602 = vmatpush.msra.mxu0 %v12550_v50  ;;  %10636 = vmatpush.msra.mxu1 %v12560_v39  ;;  %v12612_v46 = vld [vmem:[%s18243_s5 + $0x3d8] sm:$0xff]  ;;  %v12592_v37 = vld [vmem:[%s18243_s5 + $0x348] sm:$0xff]  ;;  %v12600_v52 = vld [vmem:[%s18243_s5 + $0x380] sm:$0xff] }
 0x8ef   :  { %12536 = vmatmul.msk.f32.vlgmr.msrb.gmra.mxu2 %vm10223_vm3, %v10508_v56  ;;  %10706 = vmatpush.msra.mxu3 %v12578_v44  ;;  %v12610_v43 = vld [vmem:[%s18243_s5 + $0x3c8] sm:$0xff]  ;;  %v12625_v57 = vld [vmem:[%s18243_s5 + $0x438] sm:$0xff]  ;;  %v12591_v56 = vld [vmem:[%s18243_s5 + $0x340] sm:$0xff] }
 0x8f0   :  { %10672 = vmatpush.msra.mxu2 %v12568_v27  ;;  %12518 = vmatmul.msk.f32.vlgmr.msrb.gmra.mxu0 %vm10223_vm3, %v10438_v36  ;;  %v10718_v45 = vld [vmem:[#allocation5 + $0x12] ss:$40 sm:$0x3]  ;;  %v10788_v9 = vld [vmem:[#allocation5 + $0x14] ss:$40 sm:$0x3] }
 0x8f1   :  { %12545 = vmatmul.msk.f32.vlgmr.msrb.gmra.mxu3 %vm10223_vm3, %v10543_v8  ;;  %10603 = vmatpush.msra.mxu0 %v12549_v5  ;;  %v12643_v51 = vld [vmem:[%s18243_s5 + $0x4b8] sm:$0xff]  ;;  %v12609_v50 = vld [vmem:[%s18243_s5 + $0x3c0] sm:$0xff]  ;;  %v10753_v39 = vld [vmem:[#allocation5 + $0x13] ss:$40 sm:$0x3] }
 0x8f2   :  { %10637 = vmatpush.msra.mxu1 %v12559_v15  ;;  %10673 = vmatpush.msra.mxu2 %v12567_v13  ;;  %v10823_v27 = vld [vmem:[#allocation5 + $0x18] ss:$40 sm:$0x3]  ;;  %v12623_v15 = vld [vmem:[%s18243_s5 + $0x428] sm:$0xff] }
 0x8f3   :  { %10707 = vmatpush.msra.mxu3 %v12577_v17  ;;  %12527 = vmatmul.msk.f32.vlgmr.msrb.gmra.mxu1 %vm10223_vm3, %v10473_v2  ;;  %v12624_v44 = vld [vmem:[%s18243_s5 + $0x430] sm:$0xff]  ;;  %v12634_v36 = vld [vmem:[%s18243_s5 + $0x478] sm:$0xff]  ;;  %v12641_v17 = vld [vmem:[%s18243_s5 + $0x4a8] sm:$0xff] }
 0x8f4   :  { %10604 = vmatpush.msra.mxu0 %v12548_v20  ;;  %10638 = vmatpush.msra.mxu1 %v12558_v35  ;;  %v12642_v8 = vld [vmem:[%s18243_s5 + $0x4b0] sm:$0xff]  ;;  %v12652_v5 = vld [vmem:[%s18243_s5 + $0x4f8] sm:$0xff]  ;;  %v12622_v20 = vld [vmem:[%s18243_s5 + $0x420] sm:$0xff] }
 0x8f5   :  { %10674 = vmatpush.msra.mxu2 %v12566_v24  ;;  %10708 = vmatpush.msra.mxu3 %v12576_v60  ;;  %v12633_v13 = vld [vmem:[%s18243_s5 + $0x470] sm:$0xff]  ;;  %v12632_v35 = vld [vmem:[%s18243_s5 + $0x468] sm:$0xff]  ;;  %v12640_v24 = vld [vmem:[%s18243_s5 + $0x4a0] sm:$0xff] }
 0x8f6   :  { %10605 = vmatpush.msra.mxu0 %v12547_v25  ;;  %10639 = vmatpush.msra.mxu1 %v12557_v33  ;;  %v12651_v2 = vld [vmem:[%s18243_s5 + $0x4f0] sm:$0xff]  ;;  %v12650_v60 = vld [vmem:[%s18243_s5 + $0x4e8] sm:$0xff]  ;;  %v12621_v25 = vld [vmem:[%s18243_s5 + $0x418] sm:$0xff] }
 0x8f7   :  { %10675 = vmatpush.msra.mxu2 %v12565_v61  ;;  %10709 = vmatpush.msra.mxu3 %v12575_v42  ;;  %v12631_v33 = vld [vmem:[%s18243_s5 + $0x460] sm:$0xff]  ;;  %v12639_v61 = vld [vmem:[%s18243_s5 + $0x498] sm:$0xff] }
 0x8f8   :  { %10606 = vmatpush.msra.mxu0 %v12546_v34  ;;  %10640 = vmatpush.msra.mxu1 %v12556_v28  ;;  %v12649_v42 = vld [vmem:[%s18243_s5 + $0x4e0] sm:$0xff]  ;;  %v12620_v34 = vld [vmem:[%s18243_s5 + $0x410] sm:$0xff]  ;;  %v12630_v28 = vld [vmem:[%s18243_s5 + $0x458] sm:$0xff] }
 0x8f9   :  { %10676 = vmatpush.msra.mxu2 %v12564_v55  ;;  %10710 = vmatpush.msra.mxu3 %v12574_v21  ;;  %v12638_v55 = vld [vmem:[%s18243_s5 + $0x490] sm:$0xff]  ;;  %v12648_v21 = vld [vmem:[%s18243_s5 + $0x4d8] sm:$0xff] }
 0x8fa   :  { %12572 = vmatmul.msk.f32.vlgmr.msra.gmra.mxu2 %vm10223_vm3, %v10648_v63  ;;  %10739 = vmatpush.msrb.mxu0 %v12589_v30  ;;  %v12619_v63 = vld [vmem:[%s18243_s5 + $0x408] sm:$0xff]  ;;  %v12629_v30 = vld [vmem:[%s18243_s5 + $0x450] sm:$0xff] }
 0x8fb   :  { %10809 = vmatpush.msrb.mxu2 %v12607_v4  ;;  %12554 = vmatmul.msk.f32.vlgmr.msra.gmra.mxu0 %vm10223_vm3, %v10578_v49  ;;  %v12637_v4 = vld [vmem:[%s18243_s5 + $0x488] sm:$0xff]  ;;  %v12647_v49 = vld [vmem:[%s18243_s5 + $0x4d0] sm:$0xff] }
 0x8fc   :  { %10641 = vmatpush.msra.mxu1 %v12555_v26  ;;  %10711 = vmatpush.msra.mxu3 %v12573_v38  ;;  %v12618_v26 = vld [vmem:[%s18243_s5 + $0x400] sm:$0xff]  ;;  %v12628_v38 = vld [vmem:[%s18243_s5 + $0x448] sm:$0xff] }
 0x8fd   :  { %12581 = vmatmul.msk.f32.vlgmr.msra.gmra.mxu3 %vm10223_vm3, %v10683_v14  ;;  %10740 = vmatpush.msrb.mxu0 %v12588_v0  ;;  %v12636_v14 = vld [vmem:[%s18243_s5 + $0x480] sm:$0xff]  ;;  %v12646_v0 = vld [vmem:[%s18243_s5 + $0x4c8] sm:$0xff] }
 0x8fe   :  { %10774 = vmatpush.msrb.mxu1 %v12598_v16  ;;  %10810 = vmatpush.msrb.mxu2 %v12606_v6  ;;  %v10858_v16 = vld [vmem:[#allocation5 + $0x19] ss:$40 sm:$0x3]  ;;  %v10928_v6 = vld [vmem:[#allocation5 + $0x1b] ss:$40 sm:$0x3] }
 0x8ff   :  { %10844 = vmatpush.msrb.mxu3 %v12616_v29  ;;  %12563 = vmatmul.msk.f32.vlgmr.msra.gmra.mxu1 %vm10223_vm3, %v10613_v40  ;;  %v12661_v29 = vld [vmem:[%s18243_s5 + $0x538] sm:$0xff] }
 0x900   :  { %10741 = vmatpush.msrb.mxu0 %v12587_v22  ;;  %10775 = vmatpush.msrb.mxu1 %v12597_v53  ;;  %v12679_v40 = vld [vmem:[%s18243_s5 + $0x5b8] sm:$0xff]  ;;  %v12627_v22 = vld [vmem:[%s18243_s5 + $0x440] sm:$0xff] }
 0x901   :  { %10811 = vmatpush.msrb.mxu2 %v12605_v23  ;;  %10845 = vmatpush.msrb.mxu3 %v12615_v62  ;;  %v12645_v53 = vld [vmem:[%s18243_s5 + $0x4c0] sm:$0xff]  ;;  %v10893_v23 = vld [vmem:[#allocation5 + $0x1a] ss:$40 sm:$0x3] }
 0x902   :  { %10742 = vmatpush.msrb.mxu0 %v12586_v12  ;;  %10776 = vmatpush.msrb.mxu1 %v12596_v41  ;;  %v10963_v62 = vld [vmem:[#allocation5 + $0x1c] ss:$40 sm:$0x3] }
 0x903   :  { %10812 = vmatpush.msrb.mxu2 %v12604_v54  ;;  %10846 = vmatpush.msrb.mxu3 %v12614_v58  ;;  %v12660_v12 = vld [vmem:[%s18243_s5 + $0x530] sm:$0xff]  ;;  %v12670_v41 = vld [vmem:[%s18243_s5 + $0x578] sm:$0xff] }
 0x904   :  { %10743 = vmatpush.msrb.mxu0 %v12585_v10  ;;  %10777 = vmatpush.msrb.mxu1 %v12595_v48  ;;  %v12678_v54 = vld [vmem:[%s18243_s5 + $0x5b0] sm:$0xff]  ;;  %v12688_v58 = vld [vmem:[%s18243_s5 + $0x5f8] sm:$0xff]  ;;  %v12659_v10 = vld [vmem:[%s18243_s5 + $0x528] sm:$0xff] }
 0x905   :  { %10813 = vmatpush.msrb.mxu2 %v12603_v32  ;;  %10847 = vmatpush.msrb.mxu3 %v12613_v19  ;;  %v12669_v48 = vld [vmem:[%s18243_s5 + $0x570] sm:$0xff]  ;;  %v12677_v32 = vld [vmem:[%s18243_s5 + $0x5a8] sm:$0xff] }
 0x906   :  { %10744 = vmatpush.msrb.mxu0 %v12584_v3  ;;  %10778 = vmatpush.msrb.mxu1 %v12594_v47  ;;  %v12687_v19 = vld [vmem:[%s18243_s5 + $0x5f0] sm:$0xff]  ;;  %v12658_v3 = vld [vmem:[%s18243_s5 + $0x520] sm:$0xff]  ;;  %v12668_v47 = vld [vmem:[%s18243_s5 + $0x568] sm:$0xff] }
 0x907   :  { %10814 = vmatpush.msrb.mxu2 %v12602_v1  ;;  %10848 = vmatpush.msrb.mxu3 %v12612_v46  ;;  %v12676_v1 = vld [vmem:[%s18243_s5 + $0x5a0] sm:$0xff]  ;;  %v12686_v46 = vld [vmem:[%s18243_s5 + $0x5e8] sm:$0xff] }
 0x908   :  { %10745 = vmatpush.msrb.mxu0 %v12583_v18  ;;  %10779 = vmatpush.msrb.mxu1 %v12593_v11  ;;  %v12657_v18 = vld [vmem:[%s18243_s5 + $0x518] sm:$0xff]  ;;  %v12667_v11 = vld [vmem:[%s18243_s5 + $0x560] sm:$0xff] }
 0x909   :  { %10815 = vmatpush.msrb.mxu2 %v12601_v59  ;;  %10849 = vmatpush.msrb.mxu3 %v12611_v31  ;;  %v12675_v59 = vld [vmem:[%s18243_s5 + $0x598] sm:$0xff]  ;;  %v12685_v31 = vld [vmem:[%s18243_s5 + $0x5e0] sm:$0xff] }
 0x90a   :  { %10746 = vmatpush.msrb.mxu0 %v12582_v7  ;;  %10780 = vmatpush.msrb.mxu1 %v12592_v37  ;;  %v12656_v7 = vld [vmem:[%s18243_s5 + $0x510] sm:$0xff]  ;;  %v12666_v37 = vld [vmem:[%s18243_s5 + $0x558] sm:$0xff] }
 0x90b   :  { %10816 = vmatpush.msrb.mxu2 %v12600_v52  ;;  %10850 = vmatpush.msrb.mxu3 %v12610_v43  ;;  %v12674_v52 = vld [vmem:[%s18243_s5 + $0x590] sm:$0xff]  ;;  %v12684_v43 = vld [vmem:[%s18243_s5 + $0x5d8] sm:$0xff] }
 0x90c   :  { %12590 = vmatmul.msk.f32.vlgmr.msrb.gmra.mxu0 %vm10223_vm3, %v10718_v45  ;;  %12608 = vmatmul.msk.f32.vlgmr.msrb.gmra.mxu2 %vm10223_vm3, %v10788_v9  ;;  %v12655_v45 = vld [vmem:[%s18243_s5 + $0x508] sm:$0xff]  ;;  %v12665_v9 = vld [vmem:[%s18243_s5 + $0x550] sm:$0xff] }
 0x90d   :  { %10879 = vmatpush.msra.mxu0 %v12625_v57  ;;  %10949 = vmatpush.msra.mxu2 %v12643_v51  ;;  %v12673_v57 = vld [vmem:[%s18243_s5 + $0x588] sm:$0xff]  ;;  %v12683_v51 = vld [vmem:[%s18243_s5 + $0x5d0] sm:$0xff] }
 0x90e   :  { %10781 = vmatpush.msrb.mxu1 %v12591_v56  ;;  %10851 = vmatpush.msrb.mxu3 %v12609_v50  ;;  %v12654_v56 = vld [vmem:[%s18243_s5 + $0x500] sm:$0xff]  ;;  %v12664_v50 = vld [vmem:[%s18243_s5 + $0x548] sm:$0xff] }
 0x90f   :  { %12599 = vmatmul.msk.f32.vlgmr.msrb.gmra.mxu1 %vm10223_vm3, %v10753_v39  ;;  %12617 = vmatmul.msk.f32.vlgmr.msrb.gmra.mxu3 %vm10223_vm3, %v10823_v27  ;;  %v12672_v39 = vld [vmem:[%s18243_s5 + $0x580] sm:$0xff]  ;;  %v12682_v27 = vld [vmem:[%s18243_s5 + $0x5c8] sm:$0xff] }
 0x910   :  { %10880 = vmatpush.msra.mxu0 %v12624_v44  ;;  %10914 = vmatpush.msra.mxu1 %v12634_v36  ;;  %v10998_v44 = vld [vmem:[#allocation5 + $0x20] ss:$40 sm:$0x3]  ;;  %v11068_v36 = vld [vmem:[#allocation5 + $0x22] ss:$40 sm:$0x3] }
 0x911   :  { %10950 = vmatpush.msra.mxu2 %v12642_v8  ;;  %10984 = vmatpush.msra.mxu3 %v12652_v5  ;;  %v12697_v8 = vld [vmem:[%s18243_s5 + $0x638] sm:$0xff]  ;;  %v12663_v5 = vld [vmem:[%s18243_s5 + $0x540] sm:$0xff] }
 0x912   :  { %10881 = vmatpush.msra.mxu0 %v12623_v15  ;;  %10915 = vmatpush.msra.mxu1 %v12633_v13  ;;  %v12681_v15 = vld [vmem:[%s18243_s5 + $0x5c0] sm:$0xff] }
 0x913   :  { %10951 = vmatpush.msra.mxu2 %v12641_v17  ;;  %10985 = vmatpush.msra.mxu3 %v12651_v2  ;;  %v11033_v13 = vld [vmem:[#allocation5 + $0x21] ss:$40 sm:$0x3]  ;;  %v11103_v17 = vld [vmem:[#allocation5 + $0x23] ss:$40 sm:$0x3] }
 0x914   :  { %10882 = vmatpush.msra.mxu0 %v12622_v20  ;;  %10916 = vmatpush.msra.mxu1 %v12632_v35  ;;  %v12696_v2 = vld [vmem:[%s18243_s5 + $0x630] sm:$0xff]  ;;  %v12695_v20 = vld [vmem:[%s18243_s5 + $0x628] sm:$0xff]  ;;  %v12694_v35 = vld [vmem:[%s18243_s5 + $0x620] sm:$0xff] }
 0x915   :  { %10952 = vmatpush.msra.mxu2 %v12640_v24  ;;  %10986 = vmatpush.msra.mxu3 %v12650_v60  ;;  %v12693_v24 = vld [vmem:[%s18243_s5 + $0x618] sm:$0xff]  ;;  %v12692_v60 = vld [vmem:[%s18243_s5 + $0x610] sm:$0xff] }
 0x916   :  { %10883 = vmatpush.msra.mxu0 %v12621_v25  ;;  %10917 = vmatpush.msra.mxu1 %v12631_v33  ;;  %v12691_v25 = vld [vmem:[%s18243_s5 + $0x608] sm:$0xff]  ;;  %v12690_v33 = vld [vmem:[%s18243_s5 + $0x600] sm:$0xff] }
 0x917   :  { %10953 = vmatpush.msra.mxu2 %v12639_v61  ;;  %10987 = vmatpush.msra.mxu3 %v12649_v42  ;;  %v11138_v61 = vld [vmem:[#allocation5 + $0x24] ss:$40 sm:$0x3]  ;;  %v12724_v42 = vld [vmem:[%s18244_s6] ss:$0 sm:$0xff] }
 0x918   :  { %10884 = vmatpush.msra.mxu0 %v12620_v34  ;;  %10918 = vmatpush.msra.mxu1 %v12630_v28 }
 0x919   :  { %10954 = vmatpush.msra.mxu2 %v12638_v55  ;;  %10988 = vmatpush.msra.mxu3 %v12648_v21 }
 0x91a   :  { %10885 = vmatpush.msra.mxu0 %v12619_v63  ;;  %10919 = vmatpush.msra.mxu1 %v12629_v30 }
 0x91b   :  { %10955 = vmatpush.msra.mxu2 %v12637_v4  ;;  %10989 = vmatpush.msra.mxu3 %v12647_v49 }
 0x91c   :  { %10886 = vmatpush.msra.mxu0 %v12618_v26  ;;  %10920 = vmatpush.msra.mxu1 %v12628_v38 }
 0x91d   :  { %10956 = vmatpush.msra.mxu2 %v12636_v14  ;;  %10990 = vmatpush.msra.mxu3 %v12646_v0 }
 0x91e   :  { %12626 = vmatmul.msk.f32.vlgmr.msra.gmra.mxu0 %vm10223_vm3, %v10858_v16  ;;  %12644 = vmatmul.msk.f32.vlgmr.msra.gmra.mxu2 %vm10223_vm3, %v10928_v6 }
 0x91f   :  { %11019 = vmatpush.msrb.mxu0 %v12661_v29  ;;  %11089 = vmatpush.msrb.mxu2 %v12679_v40 }
 0x920   :  { %10921 = vmatpush.msra.mxu1 %v12627_v22  ;;  %10991 = vmatpush.msra.mxu3 %v12645_v53 }
 0x921   :  { %12635 = vmatmul.msk.f32.vlgmr.msra.gmra.mxu1 %vm10223_vm3, %v10893_v23  ;;  %12653 = vmatmul.msk.f32.vlgmr.msra.gmra.mxu3 %vm10223_vm3, %v10963_v62 }
 0x922   :  { %11020 = vmatpush.msrb.mxu0 %v12660_v12  ;;  %11054 = vmatpush.msrb.mxu1 %v12670_v41  ;;  %v11180_v12 = vld [vmem:[%s18245_s7 + $0x38] sm:$0xff] }
 0x923   :  { %11090 = vmatpush.msrb.mxu2 %v12678_v54  ;;  %11124 = vmatpush.msrb.mxu3 %v12688_v58  ;;  %v11179_v58 = vld [vmem:[%s18245_s7 + $0x30] sm:$0xff] }
 0x924   :  { %11021 = vmatpush.msrb.mxu0 %v12659_v10  ;;  %11055 = vmatpush.msrb.mxu1 %v12669_v48  ;;  %v11178_v48 = vld [vmem:[%s18245_s7 + $0x28] sm:$0xff] }
 0x925   :  { %11091 = vmatpush.msrb.mxu2 %v12677_v32  ;;  %11125 = vmatpush.msrb.mxu3 %v12687_v19  ;;  %v11177_v19 = vld [vmem:[%s18245_s7 + $0x20] sm:$0xff] }
 0x926   :  { %11022 = vmatpush.msrb.mxu0 %v12658_v3  ;;  %11056 = vmatpush.msrb.mxu1 %v12668_v47  ;;  %v11176_v47 = vld [vmem:[%s18245_s7 + $0x18] sm:$0xff] }
 0x927   :  { %11092 = vmatpush.msrb.mxu2 %v12676_v1  ;;  %11126 = vmatpush.msrb.mxu3 %v12686_v46 }
 0x928   :  { %11023 = vmatpush.msrb.mxu0 %v12657_v18  ;;  %11057 = vmatpush.msrb.mxu1 %v12667_v11  ;;  %v11175_v18 = vld [vmem:[%s18245_s7 + $0x10] sm:$0xff] }
 0x929   :  { %11093 = vmatpush.msrb.mxu2 %v12675_v59  ;;  %11127 = vmatpush.msrb.mxu3 %v12685_v31  ;;  %v11174_v31 = vld [vmem:[%s18245_s7 + $0x8] sm:$0xff] }
 0x92a   :  { %11024 = vmatpush.msrb.mxu0 %v12656_v7  ;;  %11058 = vmatpush.msrb.mxu1 %v12666_v37  ;;  %v11173_v37 = vld [vmem:[%s18245_s7] sm:$0xff] }
 0x92b   :  { %11094 = vmatpush.msrb.mxu2 %v12674_v52  ;;  %11128 = vmatpush.msrb.mxu3 %v12684_v43 }
 0x92c   :  { %11025 = vmatpush.msrb.mxu0 %v12655_v45  ;;  %11059 = vmatpush.msrb.mxu1 %v12665_v9 }
 0x92d   :  { %11095 = vmatpush.msrb.mxu2 %v12673_v57  ;;  %11129 = vmatpush.msrb.mxu3 %v12683_v51 }
 0x92e   :  { %11026 = vmatpush.msrb.mxu0 %v12654_v56  ;;  %11060 = vmatpush.msrb.mxu1 %v12664_v50 }
 0x92f   :  { %11096 = vmatpush.msrb.mxu2 %v12672_v39  ;;  %11130 = vmatpush.msrb.mxu3 %v12682_v27 }
 0x930   :  { %12662 = vmatmul.msk.f32.vlgmr.msrb.gmra.mxu0 %vm10223_vm3, %v10998_v44  ;;  %12680 = vmatmul.msk.f32.vlgmr.msrb.gmra.mxu2 %vm10223_vm3, %v11068_v36 }
 0x931   :  { %11159 = vmatpush.msra.mxu0 %v12697_v8  ;;  %11061 = vmatpush.msrb.mxu1 %v12663_v5 }
 0x932   :  { %11131 = vmatpush.msrb.mxu3 %v12681_v15  ;;  %12671 = vmatmul.msk.f32.vlgmr.msrb.gmra.mxu1 %vm10223_vm3, %v11033_v13 }
 0x933   :  { %12689 = vmatmul.msk.f32.vlgmr.msrb.gmra.mxu3 %vm10223_vm3, %v11103_v17  ;;  %11160 = vmatpush.msra.mxu0 %v12696_v2 }
 0x934   :  { %11196 = vmatpush.msra.mxu1 %v11180_v12 }
 0x935   :  { %11161 = vmatpush.msra.mxu0 %v12695_v20 }
 0x936   :  { %11197 = vmatpush.msra.mxu1 %v11179_v58 }
 0x937   :  { %11162 = vmatpush.msra.mxu0 %v12694_v35 }
 0x938   :  { %11198 = vmatpush.msra.mxu1 %v11178_v48 }
 0x939   :  { %11163 = vmatpush.msra.mxu0 %v12693_v24 }
 0x93a   :  { %11199 = vmatpush.msra.mxu1 %v11177_v19 }
 0x93b   :  { %11164 = vmatpush.msra.mxu0 %v12692_v60  ;;  %v12725_v60 = vld [vmem:[%s18246_s8] ss:$0 sm:$0xff] }
 0x93c   :  { %11200 = vmatpush.msra.mxu1 %v11176_v47 }
 0x93d   :  { %11165 = vmatpush.msra.mxu0 %v12691_v25 }
 0x93e   :  { %11201 = vmatpush.msra.mxu1 %v11175_v18 }
 0x93f   :  { %11166 = vmatpush.msra.mxu0 %v12690_v33 }
 0x940   :  { %12698 = vmatmul.msk.f32.vlgmr.msra.gmra.mxu0 %vm10223_vm3, %v11138_v61  ;;  %11202 = vmatpush.msra.mxu1 %v11174_v31 }
 0x942   :  { %11203 = vmatpush.msra.mxu1 %v11173_v37 }
 0x964   :  { %v10329_v34 = vpop.f32.mrf.mxu0 }
 0x965   :  { %v10330_v28 = vadd.f32 %v12724_v42, %v10329_v34 }
 0x966   :  { %v10363_v55 = vpop.f32.mrf.mxu1 }
 0x967   :  { %v10366_v21 = vadd.f32 %v10363_v55, %v10330_v28 }
 0x96a   :  { %v10398_v63 = vpop.f32.mrf.mxu2 }
 0x96b   :  { %v10401_v30 = vadd.f32 %v10398_v63, %v10366_v21  ;;  %v10433_v4 = vpop.f32.mrf.mxu3 }
 0x96d   :  { %v10436_v49 = vadd.f32 %v10433_v4, %v10401_v30  ;;  %v10468_v26 = vpop.f32.mrf.mxu0 }
 0x96f   :  { %v10471_v38 = vadd.f32 %v10468_v26, %v10436_v49 }
 0x970   :  { %v10503_v14 = vpop.f32.mrf.mxu1 }
 0x971   :  { %v10506_v0 = vadd.f32 %v10503_v14, %v10471_v38 }
 0x972   :  { %v10538_v16 = vpop.f32.mrf.mxu2 }
 0x973   :  { %v10541_v6 = vadd.f32 %v10538_v16, %v10506_v0 }
 0x974   :  { %v10573_v29 = vpop.f32.mrf.mxu3 }
 0x975   :  { %v10576_v40 = vadd.f32 %v10573_v29, %v10541_v6 }
 0x978   :  { %v10608_v22 = vpop.f32.mrf.mxu0 }
 0x979   :  { %v10611_v53 = vadd.f32 %v10608_v22, %v10576_v40 }
 0x97c   :  { %v10643_v23 = vpop.f32.mrf.mxu1 }
 0x97d   :  { %v10646_v62 = vadd.f32 %v10643_v23, %v10611_v53  ;;  %v10678_v41 = vpop.f32.mrf.mxu2 }
 0x97f   :  { %v10681_v54 = vadd.f32 %v10678_v41, %v10646_v62 }
 0x980   :  { %v10713_v10 = vpop.f32.mrf.mxu3 }
 0x981   :  { %v10716_v3 = vadd.f32 %v10713_v10, %v10681_v54 }
 0x989   :  { %v10748_v32 = vpop.f32.mrf.mxu0 }
 0x98a   :  { %v10751_v1 = vadd.f32 %v10748_v32, %v10716_v3 }
 0x98c   :  { %v10783_v46 = vpop.f32.mrf.mxu1 }
 0x98d   :  { %v10786_v59 = vadd.f32 %v10783_v46, %v10751_v1 }
 0x98f   :  { %v10818_v11 = vpop.f32.mrf.mxu2 }
 0x990   :  { %v10821_v7 = vadd.f32 %v10818_v11, %v10786_v59 }
 0x992   :  { %v10853_v52 = vpop.f32.mrf.mxu3 }
 0x993   :  { %v10856_v45 = vadd.f32 %v10853_v52, %v10821_v7 }
 0x99b   :  { %v10888_v43 = vpop.f32.mrf.mxu0 }
 0x99c   :  { %v10891_v9 = vadd.f32 %v10888_v43, %v10856_v45 }
 0x99e   :  { %v10923_v57 = vpop.f32.mrf.mxu1 }
 0x99f   :  { %v10926_v56 = vadd.f32 %v10923_v57, %v10891_v9 }
 0x9a1   :  { %v10958_v51 = vpop.f32.mrf.mxu2 }
 0x9a2   :  { %v10961_v50 = vadd.f32 %v10958_v51, %v10926_v56 }
 0x9a4   :  { %v10993_v39 = vpop.f32.mrf.mxu3 }
 0x9a5   :  { %v10996_v44 = vadd.f32 %v10993_v39, %v10961_v50 }
 0x9ad   :  { %v11028_v27 = vpop.f32.mrf.mxu0 }
 0x9ae   :  { %v11031_v36 = vadd.f32 %v11028_v27, %v10996_v44 }
 0x9af   :  { %v11063_v8 = vpop.f32.mrf.mxu1 }
 0x9b0   :  { %v11066_v15 = vadd.f32 %v11063_v8, %v11031_v36 }
 0x9b3   :  { %v11098_v5 = vpop.f32.mrf.mxu2 }
 0x9b4   :  { %v11101_v13 = vadd.f32 %v11098_v5, %v11066_v15 }
 0x9b6   :  { %v11133_v17 = vpop.f32.mrf.mxu3 }
 0x9b7   :  { %v11136_v2 = vadd.f32 %v11133_v17, %v11101_v13 }
 0x9bd   :  { %v11168_v20 = vpop.f32.mrf.mxu0 }
 0x9be   :  { %v11171_v35 = vadd.f32 %v11168_v20, %v11136_v2 }
 0x9c0   :  { %v11172_v24 = vmax.f32 %v11171_v35, 0.0 }
 0x9c2   :  { %12699 = vmatmul.msk.f32.vlgmr.msra.gmra.mxu1 %vm10223_vm3, %v11172_v24 }
 0xa3f   :  { %v11205_v25 = vpop.f32.mrf.mxu1 }
 0xa40   :  { %v11206_v33 = vadd.f32 %v12725_v60, %v11205_v25 }
 0xa42   :  { %11208 = vst [vmem:[#allocation6] sm:$0x3] %v11206_v33 }
 0xa43   :  { %11219 = dma.vmem_to_hbm [thread:$0]  %s11215_s10, 32, %s11217_s12, [#allocation7]  }
 0xa44   :  { %12754 = dma.done.wait [#allocation7], 32  }
 0xa45   :  { %12755 = vsyncadd [#allocation7], 4294967264 }
 0xa46   :  { %11224 = vsyncpa [#allocation7], 1 }

</bundles_post_ra>
